<compile_context>
chip_gen: v6e
topology: v6e:2x2x1
jax: 0.10.0
libtpu: 0.0.40
codegen_flags: <defaults>
</compile_context>

<pallas_src>
import math

import jax
import jax.numpy as jnp
from jax.experimental import pallas as pl
from jax.experimental.pallas import tpu as pltpu

# ---------------- model sizes (small but TPU-lane friendly) ----------------
B = 4          # user-facing batch
BP = 8         # batch padded to one full sublane tile inside the LSTM / head
S = 8          # sequence length
H = 128        # hidden_size
NH = 4         # attention heads
HD = H // NH   # head dim
FFN = 256      # BERT intermediate size
MID = 128      # mid_size of the fc head
VOCAB = 128
MAX_POS = 64
N_CLASSES = 2
NCP = 128      # class dim lane-padded to a full vreg lane width
N_DROPOUTS = 5 # multi-sample dropout count (eval mode -> identity average)

_VMEM = pl.BlockSpec(memory_space=pltpu.MemorySpace.VMEM)


def _layer_norm(x, g, b, eps=1e-12):
    mu = jnp.mean(x, axis=-1, keepdims=True)
    var = jnp.mean((x - mu) ** 2, axis=-1, keepdims=True)
    return (x - mu) * jax.lax.rsqrt(var + eps) * g + b


# ============================ fused Pallas kernel ===========================

def bert_lstm_mdp_kernel(
        emb_ref, mask_ref,
        eln_g_ref, eln_b_ref, wqkv_ref, bqkv_ref, wo_ref, bo_ref,
        ln1_g_ref, ln1_b_ref, wf1_ref, bf1_ref, wf2_ref, bf2_ref,
        ln2_g_ref, ln2_b_ref,
        perm_ref, wih_ref, bih_ref, whh_ref,
        fc1_w_ref, fc1_b_ref, bng_ref, bnb_ref, bnm_ref, bnv_ref,
        fc2_w_ref, fc2_b_ref,
        logits_ref, probs_ref, gates_ref):
    bf16 = jnp.bfloat16
    f32 = jnp.float32

    # ------------------ synthetic 1-layer BERT encoder ---------------------
    # Embedding LayerNorm + fused QKV projection.
    xn = _layer_norm(emb_ref[...], eln_g_ref[...], eln_b_ref[...])       # (B*S, H)
    qkv = (jnp.dot(xn.astype(bf16), wqkv_ref[...],
                   preferred_element_type=f32) + bqkv_ref[...])          # (B*S, 3H)

    # Multi-head self-attention, fully in-kernel (static loop over NH heads).
    mask_b = mask_ref[...][:, None, :]                                   # (B, 1, S)
    scale = 1.0 / math.sqrt(HD)
    ctx_heads = []
    for h in range(NH):
        qh = qkv[:, h * HD:(h + 1) * HD].reshape(B, S, HD)
        kh = qkv[:, H + h * HD:H + (h + 1) * HD].reshape(B, S, HD)
        vh = qkv[:, 2 * H + h * HD:2 * H + (h + 1) * HD].reshape(B, S, HD)
        s = (jnp.einsum("bqd,bkd->bqk", qh.astype(bf16), kh.astype(bf16),
                        preferred_element_type=f32) * scale + mask_b)
        m = jnp.max(s, axis=-1, keepdims=True)
        p = jnp.exp(s - m)
        p = p / jnp.sum(p, axis=-1, keepdims=True)
        ctx_heads.append(
            jnp.einsum("bqk,bkd->bqd", p.astype(bf16), vh.astype(bf16),
                       preferred_element_type=f32))
    ctx = jnp.concatenate(ctx_heads, axis=-1).reshape(B * S, H)

    # Attention output projection + residual LN1 + FFN(gelu) + residual LN2.
    attn_out = (jnp.dot(ctx.astype(bf16), wo_ref[...],
                        preferred_element_type=f32) + bo_ref[...])
    x1 = _layer_norm(xn + attn_out, ln1_g_ref[...], ln1_b_ref[...])
    f = (jnp.dot(x1.astype(bf16), wf1_ref[...],
                 preferred_element_type=f32) + bf1_ref[...])
    f = jax.nn.gelu(f)   # TODO(synk): tanh-approx GELU (HF BERT uses exact erf GELU)
    f = (jnp.dot(f.astype(bf16), wf2_ref[...],
                 preferred_element_type=f32) + bf2_ref[...])
    seq = _layer_norm(x1 + f, ln2_g_ref[...], ln2_b_ref[...])            # (B*S, H)

    # ----------------------------- BiLSTM ----------------------------------
    # Batch-major -> time-major padded (S*BP, H) via a constant 0/1 permutation
    # matmul (exact: the following matmul would cast x to bf16 anyway).
    x_tm = jnp.dot(perm_ref[...], seq.astype(bf16), preferred_element_type=f32)

    # Hoisted input projection for both directions and all timesteps at once;
    # biases b_ih + b_hh pre-summed.  Gate order: PyTorch i, f, g, o.
    gates_ref[...] = (jnp.dot(x_tm.astype(bf16), wih_ref[...],
                              preferred_element_type=f32) + bih_ref[...])

    h4 = 4 * H
    h_f = jnp.zeros((BP, H), f32)
    c_f = jnp.zeros((BP, H), f32)
    h_b = jnp.zeros((BP, H), f32)
    c_b = jnp.zeros((BP, H), f32)
    sum_f = jnp.zeros((BP, H), f32)
    sum_b = jnp.zeros((BP, H), f32)

    def cell(gates, c):
        i = jax.nn.sigmoid(gates[:, 0 * H:1 * H])
        fg = jax.nn.sigmoid(gates[:, 1 * H:2 * H])
        g = jnp.tanh(gates[:, 2 * H:3 * H])
        o = jax.nn.sigmoid(gates[:, 3 * H:4 * H])
        c_new = fg * c + i * g
        h_new = o * jnp.tanh(c_new)
        return h_new, c_new

    # Static unroll (S=8).  Both direction chains share ONE per-step matmul
    # against the block-diagonal W_hh (constant RHS -> weight stays latched in
    # the MXU across all steps; K=256 fills the 256-deep array on v6e/v7x).
    for t in range(S):
        tb = S - 1 - t
        gi_f = gates_ref[t * BP:(t + 1) * BP, 0:h4]
        gi_b = gates_ref[tb * BP:(tb + 1) * BP, h4:2 * h4]
        hh = jnp.dot(jnp.concatenate([h_f, h_b], axis=-1).astype(bf16),
                     whh_ref[...], preferred_element_type=f32)           # (BP, 8H)
        h_f, c_f = cell(gi_f + hh[:, 0:h4], c_f)
        h_b, c_b = cell(gi_b + hh[:, h4:2 * h4], c_b)
        sum_f = sum_f + h_f
        sum_b = sum_b + h_b

    # ----------------------------- head -------------------------------------
    # Mean over seq -> Linear(2H, MID) -> BN(eval) -> ReLU -> Linear(MID, 2).
    mean_cat = jnp.concatenate([sum_f, sum_b], axis=-1) * (1.0 / S)      # (BP, 2H)
    z = (jnp.dot(mean_cat.astype(bf16), fc1_w_ref[...],
                 preferred_element_type=f32) + fc1_b_ref[...])
    z = ((z - bnm_ref[...]) * jax.lax.rsqrt(bnv_ref[...] + 1e-5)
         * bng_ref[...] + bnb_ref[...])
    z = jnp.maximum(z, 0.0)
    logits = (jnp.dot(z.astype(bf16), fc2_w_ref[...],
                      preferred_element_type=f32) + fc2_b_ref[...])
    # Multi-sample dropout (eval): average of N_DROPOUTS identical passes == identity.
    logits_ref[...] = logits

    # Softmax over the first N_CLASSES lanes only (remaining lanes are padding).
    col = jax.lax.broadcasted_iota(jnp.int32, logits.shape, 1)
    masked = jnp.where(col < N_CLASSES, logits, -1e30)
    m = jnp.max(masked, axis=-1, keepdims=True)
    e = jnp.exp(masked - m)
    probs_ref[...] = e / jnp.sum(e, axis=-1, keepdims=True)


# ============================ JAX glue ======================================

def forward(params, input_ids, input_types):
    p = params
    # Attention mask bias from torch.ne(input_ids, 0).
    mask_bias = jnp.where(input_ids != 0, 0.0, -1e9).astype(jnp.float32)  # (B, S)
    # Embedding lookups stay in XLA (a single small fusion before the kernel).
    emb = (p["word_emb"][input_ids]
           + p["type_emb"][input_types]
           + p["pos_emb"][None, :S, :]).reshape(B * S, H)

    operands = (
        emb, mask_bias,
        p["emb_ln_g"], p["emb_ln_b"], p["wqkv"], p["bqkv"], p["wo"], p["bo"],
        p["ln1_g"], p["ln1_b"], p["wf1"], p["bf1"], p["wf2"], p["bf2"],
        p["ln2_g"], p["ln2_b"],
        p["perm"], p["w_ih"], p["b_ih"], p["w_hh"],
        p["fc1_w"], p["fc1_b"], p["bn_g"], p["bn_b"], p["bn_rm"], p["bn_rv"],
        p["fc2_w"], p["fc2_b"],
    )

    logits_p, probs_p = pl.pallas_call(
        bert_lstm_mdp_kernel,
        out_shape=(jax.ShapeDtypeStruct((BP, NCP), jnp.float32),
                   jax.ShapeDtypeStruct((BP, NCP), jnp.float32)),
        in_specs=[_VMEM] * len(operands),
        out_specs=(_VMEM, _VMEM),
        scratch_shapes=[pltpu.VMEM((S * BP, 8 * H), jnp.float32)],
    )(*operands)

    return logits_p[:B, :N_CLASSES], probs_p[:B, :N_CLASSES]


# ============================ parameter init ================================

def init_params(key):
    ks = iter(jax.random.split(key, 40))

    def rn(shape, scale=0.02):
        return (scale * jax.random.normal(next(ks), shape)).astype(jnp.float32)

    u = 1.0 / math.sqrt(H)

    def ru(shape):
        return jax.random.uniform(next(ks), shape, jnp.float32, -u, u)

    bf16 = jnp.bfloat16
    p = {}
    # embeddings
    p["word_emb"] = rn((VOCAB, H))
    p["type_emb"] = rn((2, H))
    p["pos_emb"] = rn((MAX_POS, H))
    p["emb_ln_g"] = jnp.ones((1, H), jnp.float32)
    p["emb_ln_b"] = jnp.zeros((1, H), jnp.float32)
    # 1 transformer layer: fused QKV, output proj, FFN (weights bf16)
    p["wqkv"] = rn((H, 3 * H)).astype(bf16)
    p["bqkv"] = jnp.zeros((1, 3 * H), jnp.float32)
    p["wo"] = rn((H, H)).astype(bf16)
    p["bo"] = jnp.zeros((1, H), jnp.float32)
    p["ln1_g"] = jnp.ones((1, H), jnp.float32)
    p["ln1_b"] = jnp.zeros((1, H), jnp.float32)
    p["wf1"] = rn((H, FFN)).astype(bf16)
    p["bf1"] = jnp.zeros((1, FFN), jnp.float32)
    p["wf2"] = rn((FFN, H)).astype(bf16)
    p["bf2"] = jnp.zeros((1, H), jnp.float32)
    p["ln2_g"] = jnp.ones((1, H), jnp.float32)
    p["ln2_b"] = jnp.zeros((1, H), jnp.float32)

    # Constant batch-major -> time-major (padded to BP) permutation matrix:
    # row t*BP + b  selects  source row b*S + t  (exact 0/1 values in bf16).
    t_idx = jnp.arange(S)
    b_idx = jnp.arange(B)
    rows = (t_idx[:, None] * BP + b_idx[None, :]).reshape(-1)
    cols = (b_idx[None, :] * S + t_idx[:, None]).reshape(-1)
    perm = jnp.zeros((S * BP, B * S), jnp.float32).at[rows, cols].set(1.0)
    p["perm"] = perm.astype(bf16)

    # Bidirectional LSTM: W_ih pre-transposed & concatenated (H, 8H) = [fwd|bwd];
    # biases b_ih + b_hh pre-summed to (1, 8H); W_hh stored block-diagonal
    # (2H, 8H) = diag(W_hh_f, W_hh_b) so the recurrence is a single constant-RHS
    # matmul per step.
    w_ih_f, w_ih_b = ru((H, 4 * H)), ru((H, 4 * H))
    p["w_ih"] = jnp.concatenate([w_ih_f, w_ih_b], axis=1).astype(bf16)
    b_f = ru((1, 4 * H)) + ru((1, 4 * H))
    b_b = ru((1, 4 * H)) + ru((1, 4 * H))
    p["b_ih"] = jnp.concatenate([b_f, b_b], axis=1)
    w_hh_f, w_hh_b = ru((H, 4 * H)), ru((H, 4 * H))
    w_hh_blk = (jnp.zeros((2 * H, 8 * H), jnp.float32)
                .at[0:H, 0:4 * H].set(w_hh_f)
                .at[H:2 * H, 4 * H:8 * H].set(w_hh_b))
    p["w_hh"] = w_hh_blk.astype(bf16)

    # fc head
    p["fc1_w"] = rn((2 * H, MID), scale=1.0 / math.sqrt(2 * H)).astype(bf16)
    p["fc1_b"] = jnp.zeros((1, MID), jnp.float32)
    p["bn_g"] = jnp.ones((1, MID), jnp.float32)
    p["bn_b"] = jnp.zeros((1, MID), jnp.float32)
    p["bn_rm"] = jnp.zeros((1, MID), jnp.float32)
    p["bn_rv"] = jnp.ones((1, MID), jnp.float32)
    w2 = rn((MID, N_CLASSES), scale=1.0 / math.sqrt(MID))
    p["fc2_w"] = (jnp.zeros((MID, NCP), jnp.float32)
                  .at[:, :N_CLASSES].set(w2).astype(bf16))   # lane-padded, zeros
    p["fc2_b"] = jnp.zeros((1, NCP), jnp.float32)
    return p


# ================================ main ======================================

if __name__ == "__main__":
    key = jax.random.PRNGKey(0)
    k_param, k_ids = jax.random.split(key)
    params = init_params(k_param)

    input_ids = jax.random.randint(k_ids, (B, S), 1, VOCAB, dtype=jnp.int32)
    input_ids = input_ids.at[0, -2:].set(0)          # some padding to exercise mask
    input_types = jnp.zeros((B, S), dtype=jnp.int32).at[:, S // 2:].set(1)

    fwd = jax.jit(forward)
    logits, probs = fwd(params, input_ids, input_types)
    jax.block_until_ready((logits, probs))

    assert logits.shape == (B, N_CLASSES) and probs.shape == (B, N_CLASSES)
    assert bool(jnp.all(jnp.isfinite(logits))) and bool(jnp.all(jnp.isfinite(probs)))
    assert bool(jnp.allclose(jnp.sum(probs, axis=-1), 1.0, atol=1e-5))
    print("KERNEL_OK")
</pallas_src>

<mosaic_0001>
module attributes {stable_mosaic.version = 11 : i64} {
  func.func @bert_lstm_mdp_kernel(%arg0: memref<32x128xf32, #tpu.memory_space<vmem>>, %arg1: memref<4x8xf32, #tpu.memory_space<vmem>>, %arg2: memref<1x128xf32, #tpu.memory_space<vmem>>, %arg3: memref<1x128xf32, #tpu.memory_space<vmem>>, %arg4: memref<128x384xbf16, #tpu.memory_space<vmem>>, %arg5: memref<1x384xf32, #tpu.memory_space<vmem>>, %arg6: memref<128x128xbf16, #tpu.memory_space<vmem>>, %arg7: memref<1x128xf32, #tpu.memory_space<vmem>>, %arg8: memref<1x128xf32, #tpu.memory_space<vmem>>, %arg9: memref<1x128xf32, #tpu.memory_space<vmem>>, %arg10: memref<128x256xbf16, #tpu.memory_space<vmem>>, %arg11: memref<1x256xf32, #tpu.memory_space<vmem>>, %arg12: memref<256x128xbf16, #tpu.memory_space<vmem>>, %arg13: memref<1x128xf32, #tpu.memory_space<vmem>>, %arg14: memref<1x128xf32, #tpu.memory_space<vmem>>, %arg15: memref<1x128xf32, #tpu.memory_space<vmem>>, %arg16: memref<64x32xbf16, #tpu.memory_space<vmem>>, %arg17: memref<128x1024xbf16, #tpu.memory_space<vmem>>, %arg18: memref<1x1024xf32, #tpu.memory_space<vmem>>, %arg19: memref<256x1024xbf16, #tpu.memory_space<vmem>>, %arg20: memref<256x128xbf16, #tpu.memory_space<vmem>>, %arg21: memref<1x128xf32, #tpu.memory_space<vmem>>, %arg22: memref<1x128xf32, #tpu.memory_space<vmem>>, %arg23: memref<1x128xf32, #tpu.memory_space<vmem>>, %arg24: memref<1x128xf32, #tpu.memory_space<vmem>>, %arg25: memref<1x128xf32, #tpu.memory_space<vmem>>, %arg26: memref<128x128xbf16, #tpu.memory_space<vmem>>, %arg27: memref<1x128xf32, #tpu.memory_space<vmem>>, %arg28: memref<8x128xf32, #tpu.memory_space<vmem>>, %arg29: memref<8x128xf32, #tpu.memory_space<vmem>>, %arg30: memref<64x1024xf32, #tpu.memory_space<vmem>>) attributes {dimension_semantics = [], scalar_prefetch = 0 : i64, scratch_operands = 1 : i64, tpu.core_type = #tpu.core_type<tc>} {
    %c0 = arith.constant 0 : index
    %c0_0 = arith.constant 0 : index
    %0 = vector.load %arg0[%c0, %c0_0] : memref<32x128xf32, #tpu.memory_space<vmem>>, vector<32x128xf32>
    %c0_1 = arith.constant 0 : index
    %c0_2 = arith.constant 0 : index
    %1 = vector.load %arg2[%c0_1, %c0_2] : memref<1x128xf32, #tpu.memory_space<vmem>>, vector<1x128xf32>
    %c0_3 = arith.constant 0 : index
    %c0_4 = arith.constant 0 : index
    %2 = vector.load %arg3[%c0_3, %c0_4] : memref<1x128xf32, #tpu.memory_space<vmem>>, vector<1x128xf32>
    %cst = arith.constant dense<0.000000e+00> : vector<32xf32>
    %3 = vector.multi_reduction <add>, %0, %cst [1] : vector<32x128xf32> to vector<32xf32>
    %4 = vector.shape_cast %3 : vector<32xf32> to vector<32x1xf32>
    %cst_5 = arith.constant 1.280000e+02 : f32
    %5 = vector.broadcast %cst_5 : f32 to vector<32x1xf32>
    %6 = arith.divf %4, %5 : vector<32x1xf32>
    %7 = vector.broadcast %6 : vector<32x1xf32> to vector<32x128xf32>
    %8 = arith.subf %0, %7 : vector<32x128xf32>
    %9 = arith.mulf %8, %8 : vector<32x128xf32>
    %cst_6 = arith.constant dense<0.000000e+00> : vector<32xf32>
    %10 = vector.multi_reduction <add>, %9, %cst_6 [1] : vector<32x128xf32> to vector<32xf32>
    %11 = vector.shape_cast %10 : vector<32xf32> to vector<32x1xf32>
    %cst_7 = arith.constant 1.280000e+02 : f32
    %12 = vector.broadcast %cst_7 : f32 to vector<32x1xf32>
    %13 = arith.divf %11, %12 : vector<32x1xf32>
    %14 = vector.broadcast %6 : vector<32x1xf32> to vector<32x128xf32>
    %15 = arith.subf %0, %14 : vector<32x128xf32>
    %cst_8 = arith.constant 9.99999996E-13 : f32
    %16 = vector.broadcast %cst_8 : f32 to vector<32x1xf32>
    %17 = arith.addf %13, %16 : vector<32x1xf32>
    %18 = math.rsqrt %17 : vector<32x1xf32>
    %19 = vector.broadcast %18 : vector<32x1xf32> to vector<32x128xf32>
    %20 = arith.mulf %15, %19 : vector<32x128xf32>
    %21 = vector.broadcast %1 : vector<1x128xf32> to vector<32x128xf32>
    %22 = arith.mulf %20, %21 : vector<32x128xf32>
    %23 = vector.broadcast %2 : vector<1x128xf32> to vector<32x128xf32>
    %24 = arith.addf %22, %23 : vector<32x128xf32>
    %25 = arith.truncf %24 : vector<32x128xf32> to vector<32x128xbf16>
    %c0_9 = arith.constant 0 : index
    %c0_10 = arith.constant 0 : index
    %26 = vector.load %arg4[%c0_9, %c0_10] : memref<128x384xbf16, #tpu.memory_space<vmem>>, vector<128x384xbf16>
    %cst_11 = arith.constant dense<0.000000e+00> : vector<32x384xf32>
    %27 = tpu.matmul %25, %26, %cst_11 {dimension_numbers = #tpu.dot_dimension_numbers<[1], [0], [0], [1], [0, 0, 1, 1], [], []>} : vector<32x128xbf16>, vector<128x384xbf16>, vector<32x384xf32> -> vector<32x384xf32>
    %c0_12 = arith.constant 0 : index
    %c0_13 = arith.constant 0 : index
    %28 = vector.load %arg5[%c0_12, %c0_13] : memref<1x384xf32, #tpu.memory_space<vmem>>, vector<1x384xf32>
    %29 = vector.broadcast %28 : vector<1x384xf32> to vector<32x384xf32>
    %30 = arith.addf %27, %29 : vector<32x384xf32>
    %c0_14 = arith.constant 0 : index
    %c0_15 = arith.constant 0 : index
    %31 = vector.load %arg1[%c0_14, %c0_15] : memref<4x8xf32, #tpu.memory_space<vmem>>, vector<4x8xf32>
    %32 = vector.shape_cast %31 : vector<4x8xf32> to vector<4x1x8xf32>
    %33 = vector.extract_strided_slice %30 {offsets = [0, 0], sizes = [32, 32], strides = [1, 1]} : vector<32x384xf32> to vector<32x32xf32>
    %34 = vector.shape_cast %33 : vector<32x32xf32> to vector<4x8x32xf32>
    %35 = vector.extract_strided_slice %30 {offsets = [0, 128], sizes = [32, 32], strides = [1, 1]} : vector<32x384xf32> to vector<32x32xf32>
    %36 = vector.shape_cast %35 : vector<32x32xf32> to vector<4x8x32xf32>
    %37 = vector.extract_strided_slice %30 {offsets = [0, 256], sizes = [32, 32], strides = [1, 1]} : vector<32x384xf32> to vector<32x32xf32>
    %38 = vector.shape_cast %37 : vector<32x32xf32> to vector<4x8x32xf32>
    %39 = arith.truncf %34 : vector<4x8x32xf32> to vector<4x8x32xbf16>
    %40 = arith.truncf %36 : vector<4x8x32xf32> to vector<4x8x32xbf16>
    "tpu.trace_start"() <{level = 10 : i32, message = "bqd,bkd->bqk"}> : () -> ()
    %cst_16 = arith.constant dense<0.000000e+00> : vector<4x8x8xf32>
    %41 = tpu.matmul %39, %40, %cst_16 {dimension_numbers = #tpu.dot_dimension_numbers<[2], [2], [1], [1], [0, 0, 0, 1, 1, 1], [0], [0]>} : vector<4x8x32xbf16>, vector<4x8x32xbf16>, vector<4x8x8xf32> -> vector<4x8x8xf32>
    "tpu.trace_stop"() : () -> ()
    %cst_17 = arith.constant 0.176776692 : f32
    %42 = vector.broadcast %cst_17 : f32 to vector<4x8x8xf32>
    %43 = arith.mulf %41, %42 : vector<4x8x8xf32>
    %44 = vector.broadcast %32 : vector<4x1x8xf32> to vector<4x8x8xf32>
    %45 = arith.addf %43, %44 : vector<4x8x8xf32>
    %cst_18 = arith.constant dense<0xFF800000> : vector<4x8xf32>
    %46 = vector.multi_reduction <maximumf>, %45, %cst_18 [2] : vector<4x8x8xf32> to vector<4x8xf32>
    %47 = vector.shape_cast %46 : vector<4x8xf32> to vector<4x8x1xf32>
    %48 = vector.broadcast %47 : vector<4x8x1xf32> to vector<4x8x8xf32>
    %49 = arith.subf %45, %48 : vector<4x8x8xf32>
    %50 = math.exp %49 : vector<4x8x8xf32>
    %cst_19 = arith.constant dense<0.000000e+00> : vector<4x8xf32>
    %51 = vector.multi_reduction <add>, %50, %cst_19 [2] : vector<4x8x8xf32> to vector<4x8xf32>
    %52 = vector.shape_cast %51 : vector<4x8xf32> to vector<4x8x1xf32>
    %53 = vector.broadcast %52 : vector<4x8x1xf32> to vector<4x8x8xf32>
    %54 = arith.divf %50, %53 : vector<4x8x8xf32>
    %55 = arith.truncf %54 : vector<4x8x8xf32> to vector<4x8x8xbf16>
    %56 = arith.truncf %38 : vector<4x8x32xf32> to vector<4x8x32xbf16>
    "tpu.trace_start"() <{level = 10 : i32, message = "bqk,bkd->bqd"}> : () -> ()
    %cst_20 = arith.constant dense<0.000000e+00> : vector<4x8x32xf32>
    %57 = tpu.matmul %55, %56, %cst_20 {dimension_numbers = #tpu.dot_dimension_numbers<[2], [1], [1], [2], [0, 0, 0, 1, 1, 2], [0], [0]>} : vector<4x8x8xbf16>, vector<4x8x32xbf16>, vector<4x8x32xf32> -> vector<4x8x32xf32>
    "tpu.trace_stop"() : () -> ()
    %58 = vector.extract_strided_slice %30 {offsets = [0, 32], sizes = [32, 32], strides = [1, 1]} : vector<32x384xf32> to vector<32x32xf32>
    %59 = vector.shape_cast %58 : vector<32x32xf32> to vector<4x8x32xf32>
    %60 = vector.extract_strided_slice %30 {offsets = [0, 160], sizes = [32, 32], strides = [1, 1]} : vector<32x384xf32> to vector<32x32xf32>
    %61 = vector.shape_cast %60 : vector<32x32xf32> to vector<4x8x32xf32>
    %62 = vector.extract_strided_slice %30 {offsets = [0, 288], sizes = [32, 32], strides = [1, 1]} : vector<32x384xf32> to vector<32x32xf32>
    %63 = vector.shape_cast %62 : vector<32x32xf32> to vector<4x8x32xf32>
    %64 = arith.truncf %59 : vector<4x8x32xf32> to vector<4x8x32xbf16>
    %65 = arith.truncf %61 : vector<4x8x32xf32> to vector<4x8x32xbf16>
    "tpu.trace_start"() <{level = 10 : i32, message = "bqd,bkd->bqk"}> : () -> ()
    %cst_21 = arith.constant dense<0.000000e+00> : vector<4x8x8xf32>
    %66 = tpu.matmul %64, %65, %cst_21 {dimension_numbers = #tpu.dot_dimension_numbers<[2], [2], [1], [1], [0, 0, 0, 1, 1, 1], [0], [0]>} : vector<4x8x32xbf16>, vector<4x8x32xbf16>, vector<4x8x8xf32> -> vector<4x8x8xf32>
    "tpu.trace_stop"() : () -> ()
    %cst_22 = arith.constant 0.176776692 : f32
    %67 = vector.broadcast %cst_22 : f32 to vector<4x8x8xf32>
    %68 = arith.mulf %66, %67 : vector<4x8x8xf32>
    %69 = vector.broadcast %32 : vector<4x1x8xf32> to vector<4x8x8xf32>
    %70 = arith.addf %68, %69 : vector<4x8x8xf32>
    %cst_23 = arith.constant dense<0xFF800000> : vector<4x8xf32>
    %71 = vector.multi_reduction <maximumf>, %70, %cst_23 [2] : vector<4x8x8xf32> to vector<4x8xf32>
    %72 = vector.shape_cast %71 : vector<4x8xf32> to vector<4x8x1xf32>
    %73 = vector.broadcast %72 : vector<4x8x1xf32> to vector<4x8x8xf32>
    %74 = arith.subf %70, %73 : vector<4x8x8xf32>
    %75 = math.exp %74 : vector<4x8x8xf32>
    %cst_24 = arith.constant dense<0.000000e+00> : vector<4x8xf32>
    %76 = vector.multi_reduction <add>, %75, %cst_24 [2] : vector<4x8x8xf32> to vector<4x8xf32>
    %77 = vector.shape_cast %76 : vector<4x8xf32> to vector<4x8x1xf32>
    %78 = vector.broadcast %77 : vector<4x8x1xf32> to vector<4x8x8xf32>
    %79 = arith.divf %75, %78 : vector<4x8x8xf32>
    %80 = arith.truncf %79 : vector<4x8x8xf32> to vector<4x8x8xbf16>
    %81 = arith.truncf %63 : vector<4x8x32xf32> to vector<4x8x32xbf16>
    "tpu.trace_start"() <{level = 10 : i32, message = "bqk,bkd->bqd"}> : () -> ()
    %cst_25 = arith.constant dense<0.000000e+00> : vector<4x8x32xf32>
    %82 = tpu.matmul %80, %81, %cst_25 {dimension_numbers = #tpu.dot_dimension_numbers<[2], [1], [1], [2], [0, 0, 0, 1, 1, 2], [0], [0]>} : vector<4x8x8xbf16>, vector<4x8x32xbf16>, vector<4x8x32xf32> -> vector<4x8x32xf32>
    "tpu.trace_stop"() : () -> ()
    %83 = vector.extract_strided_slice %30 {offsets = [0, 64], sizes = [32, 32], strides = [1, 1]} : vector<32x384xf32> to vector<32x32xf32>
    %84 = vector.shape_cast %83 : vector<32x32xf32> to vector<4x8x32xf32>
    %85 = vector.extract_strided_slice %30 {offsets = [0, 192], sizes = [32, 32], strides = [1, 1]} : vector<32x384xf32> to vector<32x32xf32>
    %86 = vector.shape_cast %85 : vector<32x32xf32> to vector<4x8x32xf32>
    %87 = vector.extract_strided_slice %30 {offsets = [0, 320], sizes = [32, 32], strides = [1, 1]} : vector<32x384xf32> to vector<32x32xf32>
    %88 = vector.shape_cast %87 : vector<32x32xf32> to vector<4x8x32xf32>
    %89 = arith.truncf %84 : vector<4x8x32xf32> to vector<4x8x32xbf16>
    %90 = arith.truncf %86 : vector<4x8x32xf32> to vector<4x8x32xbf16>
    "tpu.trace_start"() <{level = 10 : i32, message = "bqd,bkd->bqk"}> : () -> ()
    %cst_26 = arith.constant dense<0.000000e+00> : vector<4x8x8xf32>
    %91 = tpu.matmul %89, %90, %cst_26 {dimension_numbers = #tpu.dot_dimension_numbers<[2], [2], [1], [1], [0, 0, 0, 1, 1, 1], [0], [0]>} : vector<4x8x32xbf16>, vector<4x8x32xbf16>, vector<4x8x8xf32> -> vector<4x8x8xf32>
    "tpu.trace_stop"() : () -> ()
    %cst_27 = arith.constant 0.176776692 : f32
    %92 = vector.broadcast %cst_27 : f32 to vector<4x8x8xf32>
    %93 = arith.mulf %91, %92 : vector<4x8x8xf32>
    %94 = vector.broadcast %32 : vector<4x1x8xf32> to vector<4x8x8xf32>
    %95 = arith.addf %93, %94 : vector<4x8x8xf32>
    %cst_28 = arith.constant dense<0xFF800000> : vector<4x8xf32>
    %96 = vector.multi_reduction <maximumf>, %95, %cst_28 [2] : vector<4x8x8xf32> to vector<4x8xf32>
    %97 = vector.shape_cast %96 : vector<4x8xf32> to vector<4x8x1xf32>
    %98 = vector.broadcast %97 : vector<4x8x1xf32> to vector<4x8x8xf32>
    %99 = arith.subf %95, %98 : vector<4x8x8xf32>
    %100 = math.exp %99 : vector<4x8x8xf32>
    %cst_29 = arith.constant dense<0.000000e+00> : vector<4x8xf32>
    %101 = vector.multi_reduction <add>, %100, %cst_29 [2] : vector<4x8x8xf32> to vector<4x8xf32>
    %102 = vector.shape_cast %101 : vector<4x8xf32> to vector<4x8x1xf32>
    %103 = vector.broadcast %102 : vector<4x8x1xf32> to vector<4x8x8xf32>
    %104 = arith.divf %100, %103 : vector<4x8x8xf32>
    %105 = arith.truncf %104 : vector<4x8x8xf32> to vector<4x8x8xbf16>
    %106 = arith.truncf %88 : vector<4x8x32xf32> to vector<4x8x32xbf16>
    "tpu.trace_start"() <{level = 10 : i32, message = "bqk,bkd->bqd"}> : () -> ()
    %cst_30 = arith.constant dense<0.000000e+00> : vector<4x8x32xf32>
    %107 = tpu.matmul %105, %106, %cst_30 {dimension_numbers = #tpu.dot_dimension_numbers<[2], [1], [1], [2], [0, 0, 0, 1, 1, 2], [0], [0]>} : vector<4x8x8xbf16>, vector<4x8x32xbf16>, vector<4x8x32xf32> -> vector<4x8x32xf32>
    "tpu.trace_stop"() : () -> ()
    %108 = vector.extract_strided_slice %30 {offsets = [0, 96], sizes = [32, 32], strides = [1, 1]} : vector<32x384xf32> to vector<32x32xf32>
    %109 = vector.shape_cast %108 : vector<32x32xf32> to vector<4x8x32xf32>
    %110 = vector.extract_strided_slice %30 {offsets = [0, 224], sizes = [32, 32], strides = [1, 1]} : vector<32x384xf32> to vector<32x32xf32>
    %111 = vector.shape_cast %110 : vector<32x32xf32> to vector<4x8x32xf32>
    %112 = vector.extract_strided_slice %30 {offsets = [0, 352], sizes = [32, 32], strides = [1, 1]} : vector<32x384xf32> to vector<32x32xf32>
    %113 = vector.shape_cast %112 : vector<32x32xf32> to vector<4x8x32xf32>
    %114 = arith.truncf %109 : vector<4x8x32xf32> to vector<4x8x32xbf16>
    %115 = arith.truncf %111 : vector<4x8x32xf32> to vector<4x8x32xbf16>
    "tpu.trace_start"() <{level = 10 : i32, message = "bqd,bkd->bqk"}> : () -> ()
    %cst_31 = arith.constant dense<0.000000e+00> : vector<4x8x8xf32>
    %116 = tpu.matmul %114, %115, %cst_31 {dimension_numbers = #tpu.dot_dimension_numbers<[2], [2], [1], [1], [0, 0, 0, 1, 1, 1], [0], [0]>} : vector<4x8x32xbf16>, vector<4x8x32xbf16>, vector<4x8x8xf32> -> vector<4x8x8xf32>
    "tpu.trace_stop"() : () -> ()
    %cst_32 = arith.constant 0.176776692 : f32
    %117 = vector.broadcast %cst_32 : f32 to vector<4x8x8xf32>
    %118 = arith.mulf %116, %117 : vector<4x8x8xf32>
    %119 = vector.broadcast %32 : vector<4x1x8xf32> to vector<4x8x8xf32>
    %120 = arith.addf %118, %119 : vector<4x8x8xf32>
    %cst_33 = arith.constant dense<0xFF800000> : vector<4x8xf32>
    %121 = vector.multi_reduction <maximumf>, %120, %cst_33 [2] : vector<4x8x8xf32> to vector<4x8xf32>
    %122 = vector.shape_cast %121 : vector<4x8xf32> to vector<4x8x1xf32>
    %123 = vector.broadcast %122 : vector<4x8x1xf32> to vector<4x8x8xf32>
    %124 = arith.subf %120, %123 : vector<4x8x8xf32>
    %125 = math.exp %124 : vector<4x8x8xf32>
    %cst_34 = arith.constant dense<0.000000e+00> : vector<4x8xf32>
    %126 = vector.multi_reduction <add>, %125, %cst_34 [2] : vector<4x8x8xf32> to vector<4x8xf32>
    %127 = vector.shape_cast %126 : vector<4x8xf32> to vector<4x8x1xf32>
    %128 = vector.broadcast %127 : vector<4x8x1xf32> to vector<4x8x8xf32>
    %129 = arith.divf %125, %128 : vector<4x8x8xf32>
    %130 = arith.truncf %129 : vector<4x8x8xf32> to vector<4x8x8xbf16>
    %131 = arith.truncf %113 : vector<4x8x32xf32> to vector<4x8x32xbf16>
    "tpu.trace_start"() <{level = 10 : i32, message = "bqk,bkd->bqd"}> : () -> ()
    %cst_35 = arith.constant dense<0.000000e+00> : vector<4x8x32xf32>
    %132 = tpu.matmul %130, %131, %cst_35 {dimension_numbers = #tpu.dot_dimension_numbers<[2], [1], [1], [2], [0, 0, 0, 1, 1, 2], [0], [0]>} : vector<4x8x8xbf16>, vector<4x8x32xbf16>, vector<4x8x32xf32> -> vector<4x8x32xf32>
    "tpu.trace_stop"() : () -> ()
    %133 = tpu.concatenate %57, %82, %107, %132 in 2 : vector<4x8x32xf32>, vector<4x8x32xf32>, vector<4x8x32xf32>, vector<4x8x32xf32> -> vector<4x8x128xf32>
    %134 = vector.shape_cast %133 : vector<4x8x128xf32> to vector<32x128xf32>
    %135 = arith.truncf %134 : vector<32x128xf32> to vector<32x128xbf16>
    %c0_36 = arith.constant 0 : index
    %c0_37 = arith.constant 0 : index
    %136 = vector.load %arg6[%c0_36, %c0_37] : memref<128x128xbf16, #tpu.memory_space<vmem>>, vector<128x128xbf16>
    %cst_38 = arith.constant dense<0.000000e+00> : vector<32x128xf32>
    %137 = tpu.matmul %135, %136, %cst_38 {dimension_numbers = #tpu.dot_dimension_numbers<[1], [0], [0], [1], [0, 0, 1, 1], [], []>} : vector<32x128xbf16>, vector<128x128xbf16>, vector<32x128xf32> -> vector<32x128xf32>
    %c0_39 = arith.constant 0 : index
    %c0_40 = arith.constant 0 : index
    %138 = vector.load %arg7[%c0_39, %c0_40] : memref<1x128xf32, #tpu.memory_space<vmem>>, vector<1x128xf32>
    %139 = vector.broadcast %138 : vector<1x128xf32> to vector<32x128xf32>
    %140 = arith.addf %137, %139 : vector<32x128xf32>
    %141 = arith.addf %24, %140 : vector<32x128xf32>
    %c0_41 = arith.constant 0 : index
    %c0_42 = arith.constant 0 : index
    %142 = vector.load %arg8[%c0_41, %c0_42] : memref<1x128xf32, #tpu.memory_space<vmem>>, vector<1x128xf32>
    %c0_43 = arith.constant 0 : index
    %c0_44 = arith.constant 0 : index
    %143 = vector.load %arg9[%c0_43, %c0_44] : memref<1x128xf32, #tpu.memory_space<vmem>>, vector<1x128xf32>
    %cst_45 = arith.constant dense<0.000000e+00> : vector<32xf32>
    %144 = vector.multi_reduction <add>, %141, %cst_45 [1] : vector<32x128xf32> to vector<32xf32>
    %145 = vector.shape_cast %144 : vector<32xf32> to vector<32x1xf32>
    %cst_46 = arith.constant 1.280000e+02 : f32
    %146 = vector.broadcast %cst_46 : f32 to vector<32x1xf32>
    %147 = arith.divf %145, %146 : vector<32x1xf32>
    %148 = vector.broadcast %147 : vector<32x1xf32> to vector<32x128xf32>
    %149 = arith.subf %141, %148 : vector<32x128xf32>
    %150 = arith.mulf %149, %149 : vector<32x128xf32>
    %cst_47 = arith.constant dense<0.000000e+00> : vector<32xf32>
    %151 = vector.multi_reduction <add>, %150, %cst_47 [1] : vector<32x128xf32> to vector<32xf32>
    %152 = vector.shape_cast %151 : vector<32xf32> to vector<32x1xf32>
    %cst_48 = arith.constant 1.280000e+02 : f32
    %153 = vector.broadcast %cst_48 : f32 to vector<32x1xf32>
    %154 = arith.divf %152, %153 : vector<32x1xf32>
    %155 = vector.broadcast %147 : vector<32x1xf32> to vector<32x128xf32>
    %156 = arith.subf %141, %155 : vector<32x128xf32>
    %cst_49 = arith.constant 9.99999996E-13 : f32
    %157 = vector.broadcast %cst_49 : f32 to vector<32x1xf32>
    %158 = arith.addf %154, %157 : vector<32x1xf32>
    %159 = math.rsqrt %158 : vector<32x1xf32>
    %160 = vector.broadcast %159 : vector<32x1xf32> to vector<32x128xf32>
    %161 = arith.mulf %156, %160 : vector<32x128xf32>
    %162 = vector.broadcast %142 : vector<1x128xf32> to vector<32x128xf32>
    %163 = arith.mulf %161, %162 : vector<32x128xf32>
    %164 = vector.broadcast %143 : vector<1x128xf32> to vector<32x128xf32>
    %165 = arith.addf %163, %164 : vector<32x128xf32>
    %166 = arith.truncf %165 : vector<32x128xf32> to vector<32x128xbf16>
    %c0_50 = arith.constant 0 : index
    %c0_51 = arith.constant 0 : index
    %167 = vector.load %arg10[%c0_50, %c0_51] : memref<128x256xbf16, #tpu.memory_space<vmem>>, vector<128x256xbf16>
    %cst_52 = arith.constant dense<0.000000e+00> : vector<32x256xf32>
    %168 = tpu.matmul %166, %167, %cst_52 {dimension_numbers = #tpu.dot_dimension_numbers<[1], [0], [0], [1], [0, 0, 1, 1], [], []>} : vector<32x128xbf16>, vector<128x256xbf16>, vector<32x256xf32> -> vector<32x256xf32>
    %c0_53 = arith.constant 0 : index
    %c0_54 = arith.constant 0 : index
    %169 = vector.load %arg11[%c0_53, %c0_54] : memref<1x256xf32, #tpu.memory_space<vmem>>, vector<1x256xf32>
    %170 = vector.broadcast %169 : vector<1x256xf32> to vector<32x256xf32>
    %171 = arith.addf %168, %170 : vector<32x256xf32>
    %172 = arith.mulf %171, %171 : vector<32x256xf32>
    %173 = arith.mulf %171, %172 : vector<32x256xf32>
    %cst_55 = arith.constant 4.471500e-02 : f32
    %174 = vector.broadcast %cst_55 : f32 to vector<32x256xf32>
    %175 = arith.mulf %174, %173 : vector<32x256xf32>
    %176 = arith.addf %171, %175 : vector<32x256xf32>
    %cst_56 = arith.constant 0.797884583 : f32
    %177 = vector.broadcast %cst_56 : f32 to vector<32x256xf32>
    %178 = arith.mulf %177, %176 : vector<32x256xf32>
    %179 = math.tanh %178 : vector<32x256xf32>
    %cst_57 = arith.constant 1.000000e+00 : f32
    %180 = vector.broadcast %cst_57 : f32 to vector<32x256xf32>
    %181 = arith.addf %180, %179 : vector<32x256xf32>
    %cst_58 = arith.constant 5.000000e-01 : f32
    %182 = vector.broadcast %cst_58 : f32 to vector<32x256xf32>
    %183 = arith.mulf %182, %181 : vector<32x256xf32>
    %184 = arith.mulf %171, %183 : vector<32x256xf32>
    %185 = arith.truncf %184 : vector<32x256xf32> to vector<32x256xbf16>
    %c0_59 = arith.constant 0 : index
    %c0_60 = arith.constant 0 : index
    %186 = vector.load %arg12[%c0_59, %c0_60] : memref<256x128xbf16, #tpu.memory_space<vmem>>, vector<256x128xbf16>
    %cst_61 = arith.constant dense<0.000000e+00> : vector<32x128xf32>
    %187 = tpu.matmul %185, %186, %cst_61 {dimension_numbers = #tpu.dot_dimension_numbers<[1], [0], [0], [1], [0, 0, 1, 1], [], []>} : vector<32x256xbf16>, vector<256x128xbf16>, vector<32x128xf32> -> vector<32x128xf32>
    %c0_62 = arith.constant 0 : index
    %c0_63 = arith.constant 0 : index
    %188 = vector.load %arg13[%c0_62, %c0_63] : memref<1x128xf32, #tpu.memory_space<vmem>>, vector<1x128xf32>
    %189 = vector.broadcast %188 : vector<1x128xf32> to vector<32x128xf32>
    %190 = arith.addf %187, %189 : vector<32x128xf32>
    %191 = arith.addf %165, %190 : vector<32x128xf32>
    %c0_64 = arith.constant 0 : index
    %c0_65 = arith.constant 0 : index
    %192 = vector.load %arg14[%c0_64, %c0_65] : memref<1x128xf32, #tpu.memory_space<vmem>>, vector<1x128xf32>
    %c0_66 = arith.constant 0 : index
    %c0_67 = arith.constant 0 : index
    %193 = vector.load %arg15[%c0_66, %c0_67] : memref<1x128xf32, #tpu.memory_space<vmem>>, vector<1x128xf32>
    %cst_68 = arith.constant dense<0.000000e+00> : vector<32xf32>
    %194 = vector.multi_reduction <add>, %191, %cst_68 [1] : vector<32x128xf32> to vector<32xf32>
    %195 = vector.shape_cast %194 : vector<32xf32> to vector<32x1xf32>
    %cst_69 = arith.constant 1.280000e+02 : f32
    %196 = vector.broadcast %cst_69 : f32 to vector<32x1xf32>
    %197 = arith.divf %195, %196 : vector<32x1xf32>
    %198 = vector.broadcast %197 : vector<32x1xf32> to vector<32x128xf32>
    %199 = arith.subf %191, %198 : vector<32x128xf32>
    %200 = arith.mulf %199, %199 : vector<32x128xf32>
    %cst_70 = arith.constant dense<0.000000e+00> : vector<32xf32>
    %201 = vector.multi_reduction <add>, %200, %cst_70 [1] : vector<32x128xf32> to vector<32xf32>
    %202 = vector.shape_cast %201 : vector<32xf32> to vector<32x1xf32>
    %cst_71 = arith.constant 1.280000e+02 : f32
    %203 = vector.broadcast %cst_71 : f32 to vector<32x1xf32>
    %204 = arith.divf %202, %203 : vector<32x1xf32>
    %205 = vector.broadcast %197 : vector<32x1xf32> to vector<32x128xf32>
    %206 = arith.subf %191, %205 : vector<32x128xf32>
    %cst_72 = arith.constant 9.99999996E-13 : f32
    %207 = vector.broadcast %cst_72 : f32 to vector<32x1xf32>
    %208 = arith.addf %204, %207 : vector<32x1xf32>
    %209 = math.rsqrt %208 : vector<32x1xf32>
    %210 = vector.broadcast %209 : vector<32x1xf32> to vector<32x128xf32>
    %211 = arith.mulf %206, %210 : vector<32x128xf32>
    %212 = vector.broadcast %192 : vector<1x128xf32> to vector<32x128xf32>
    %213 = arith.mulf %211, %212 : vector<32x128xf32>
    %214 = vector.broadcast %193 : vector<1x128xf32> to vector<32x128xf32>
    %215 = arith.addf %213, %214 : vector<32x128xf32>
    %c0_73 = arith.constant 0 : index
    %c0_74 = arith.constant 0 : index
    %216 = vector.load %arg16[%c0_73, %c0_74] : memref<64x32xbf16, #tpu.memory_space<vmem>>, vector<64x32xbf16>
    %217 = arith.truncf %215 : vector<32x128xf32> to vector<32x128xbf16>
    %cst_75 = arith.constant dense<0.000000e+00> : vector<64x128xf32>
    %218 = tpu.matmul %216, %217, %cst_75 {dimension_numbers = #tpu.dot_dimension_numbers<[1], [0], [0], [1], [0, 0, 1, 1], [], []>} : vector<64x32xbf16>, vector<32x128xbf16>, vector<64x128xf32> -> vector<64x128xf32>
    %219 = arith.truncf %218 : vector<64x128xf32> to vector<64x128xbf16>
    %c0_76 = arith.constant 0 : index
    %c0_77 = arith.constant 0 : index
    %220 = vector.load %arg17[%c0_76, %c0_77] : memref<128x1024xbf16, #tpu.memory_space<vmem>>, vector<128x1024xbf16>
    %cst_78 = arith.constant dense<0.000000e+00> : vector<64x1024xf32>
    %221 = tpu.matmul %219, %220, %cst_78 {dimension_numbers = #tpu.dot_dimension_numbers<[1], [0], [0], [1], [0, 0, 1, 1], [], []>} : vector<64x128xbf16>, vector<128x1024xbf16>, vector<64x1024xf32> -> vector<64x1024xf32>
    %c0_79 = arith.constant 0 : index
    %c0_80 = arith.constant 0 : index
    %222 = vector.load %arg18[%c0_79, %c0_80] : memref<1x1024xf32, #tpu.memory_space<vmem>>, vector<1x1024xf32>
    %223 = vector.broadcast %222 : vector<1x1024xf32> to vector<64x1024xf32>
    %224 = arith.addf %221, %223 : vector<64x1024xf32>
    %c0_81 = arith.constant 0 : index
    %c0_82 = arith.constant 0 : index
    %225 = vector.load %arg30[%c0_81, %c0_82] : memref<64x1024xf32, #tpu.memory_space<vmem>>, vector<64x1024xf32>
    tpu.vector_store %arg30[%c0_81, %c0_82], %224 {strides = array<i32>} : memref<64x1024xf32, #tpu.memory_space<vmem>>, vector<64x1024xf32>,
    %cst_83 = arith.constant 0.000000e+00 : f32
    %226 = vector.broadcast %cst_83 : f32 to vector<8x128xf32>
    %cst_84 = arith.constant 0.000000e+00 : f32
    %227 = vector.broadcast %cst_84 : f32 to vector<8x128xf32>
    %cst_85 = arith.constant 0.000000e+00 : f32
    %228 = vector.broadcast %cst_85 : f32 to vector<8x128xf32>
    %cst_86 = arith.constant 0.000000e+00 : f32
    %229 = vector.broadcast %cst_86 : f32 to vector<8x128xf32>
    %cst_87 = arith.constant 0.000000e+00 : f32
    %230 = vector.broadcast %cst_87 : f32 to vector<8x128xf32>
    %cst_88 = arith.constant 0.000000e+00 : f32
    %231 = vector.broadcast %cst_88 : f32 to vector<8x128xf32>
    %c0_89 = arith.constant 0 : index
    %c0_90 = arith.constant 0 : index
    %232 = vector.load %arg30[%c0_89, %c0_90] : memref<64x1024xf32, #tpu.memory_space<vmem>>, vector<8x512xf32>
    %c56 = arith.constant 56 : index
    %c512 = arith.constant 512 : index
    %233 = vector.load %arg30[%c56, %c512] : memref<64x1024xf32, #tpu.memory_space<vmem>>, vector<8x512xf32>
    %234 = tpu.concatenate %226, %228 in 1 : vector<8x128xf32>, vector<8x128xf32> -> vector<8x256xf32>
    %235 = arith.truncf %234 : vector<8x256xf32> to vector<8x256xbf16>
    %c0_91 = arith.constant 0 : index
    %c0_92 = arith.constant 0 : index
    %236 = vector.load %arg19[%c0_91, %c0_92] : memref<256x1024xbf16, #tpu.memory_space<vmem>>, vector<256x1024xbf16>
    %cst_93 = arith.constant dense<0.000000e+00> : vector<8x1024xf32>
    %237 = tpu.matmul %235, %236, %cst_93 {dimension_numbers = #tpu.dot_dimension_numbers<[1], [0], [0], [1], [0, 0, 1, 1], [], []>} : vector<8x256xbf16>, vector<256x1024xbf16>, vector<8x1024xf32> -> vector<8x1024xf32>
    %238 = vector.extract_strided_slice %237 {offsets = [0, 0], sizes = [8, 512], strides = [1, 1]} : vector<8x1024xf32> to vector<8x512xf32>
    %239 = arith.addf %232, %238 : vector<8x512xf32>
    %240 = vector.extract_strided_slice %239 {offsets = [0, 0], sizes = [8, 128], strides = [1, 1]} : vector<8x512xf32> to vector<8x128xf32>
    %241 = arith.negf %240 : vector<8x128xf32>
    %242 = math.exp %241 : vector<8x128xf32>
    %cst_94 = arith.constant 1.000000e+00 : f32
    %243 = vector.broadcast %cst_94 : f32 to vector<8x128xf32>
    %244 = arith.addf %243, %242 : vector<8x128xf32>
    %245 = arith.divf %243, %244 : vector<8x128xf32>
    %246 = vector.extract_strided_slice %239 {offsets = [0, 128], sizes = [8, 128], strides = [1, 1]} : vector<8x512xf32> to vector<8x128xf32>
    %247 = arith.negf %246 : vector<8x128xf32>
    %248 = math.exp %247 : vector<8x128xf32>
    %cst_95 = arith.constant 1.000000e+00 : f32
    %249 = vector.broadcast %cst_95 : f32 to vector<8x128xf32>
    %250 = arith.addf %249, %248 : vector<8x128xf32>
    %251 = arith.divf %249, %250 : vector<8x128xf32>
    %252 = vector.extract_strided_slice %239 {offsets = [0, 256], sizes = [8, 128], strides = [1, 1]} : vector<8x512xf32> to vector<8x128xf32>
    %253 = math.tanh %252 : vector<8x128xf32>
    %254 = vector.extract_strided_slice %239 {offsets = [0, 384], sizes = [8, 128], strides = [1, 1]} : vector<8x512xf32> to vector<8x128xf32>
    %255 = arith.negf %254 : vector<8x128xf32>
    %256 = math.exp %255 : vector<8x128xf32>
    %cst_96 = arith.constant 1.000000e+00 : f32
    %257 = vector.broadcast %cst_96 : f32 to vector<8x128xf32>
    %258 = arith.addf %257, %256 : vector<8x128xf32>
    %259 = arith.divf %257, %258 : vector<8x128xf32>
    %260 = arith.mulf %251, %227 : vector<8x128xf32>
    %261 = arith.mulf %245, %253 : vector<8x128xf32>
    %262 = arith.addf %260, %261 : vector<8x128xf32>
    %263 = math.tanh %262 : vector<8x128xf32>
    %264 = arith.mulf %259, %263 : vector<8x128xf32>
    %265 = vector.extract_strided_slice %237 {offsets = [0, 512], sizes = [8, 512], strides = [1, 1]} : vector<8x1024xf32> to vector<8x512xf32>
    %266 = arith.addf %233, %265 : vector<8x512xf32>
    %267 = vector.extract_strided_slice %266 {offsets = [0, 0], sizes = [8, 128], strides = [1, 1]} : vector<8x512xf32> to vector<8x128xf32>
    %268 = arith.negf %267 : vector<8x128xf32>
    %269 = math.exp %268 : vector<8x128xf32>
    %cst_97 = arith.constant 1.000000e+00 : f32
    %270 = vector.broadcast %cst_97 : f32 to vector<8x128xf32>
    %271 = arith.addf %270, %269 : vector<8x128xf32>
    %272 = arith.divf %270, %271 : vector<8x128xf32>
    %273 = vector.extract_strided_slice %266 {offsets = [0, 128], sizes = [8, 128], strides = [1, 1]} : vector<8x512xf32> to vector<8x128xf32>
    %274 = arith.negf %273 : vector<8x128xf32>
    %275 = math.exp %274 : vector<8x128xf32>
    %cst_98 = arith.constant 1.000000e+00 : f32
    %276 = vector.broadcast %cst_98 : f32 to vector<8x128xf32>
    %277 = arith.addf %276, %275 : vector<8x128xf32>
    %278 = arith.divf %276, %277 : vector<8x128xf32>
    %279 = vector.extract_strided_slice %266 {offsets = [0, 256], sizes = [8, 128], strides = [1, 1]} : vector<8x512xf32> to vector<8x128xf32>
    %280 = math.tanh %279 : vector<8x128xf32>
    %281 = vector.extract_strided_slice %266 {offsets = [0, 384], sizes = [8, 128], strides = [1, 1]} : vector<8x512xf32> to vector<8x128xf32>
    %282 = arith.negf %281 : vector<8x128xf32>
    %283 = math.exp %282 : vector<8x128xf32>
    %cst_99 = arith.constant 1.000000e+00 : f32
    %284 = vector.broadcast %cst_99 : f32 to vector<8x128xf32>
    %285 = arith.addf %284, %283 : vector<8x128xf32>
    %286 = arith.divf %284, %285 : vector<8x128xf32>
    %287 = arith.mulf %278, %229 : vector<8x128xf32>
    %288 = arith.mulf %272, %280 : vector<8x128xf32>
    %289 = arith.addf %287, %288 : vector<8x128xf32>
    %290 = math.tanh %289 : vector<8x128xf32>
    %291 = arith.mulf %286, %290 : vector<8x128xf32>
    %292 = arith.addf %230, %264 : vector<8x128xf32>
    %293 = arith.addf %231, %291 : vector<8x128xf32>
    %c8 = arith.constant 8 : index
    %c0_100 = arith.constant 0 : index
    %294 = vector.load %arg30[%c8, %c0_100] : memref<64x1024xf32, #tpu.memory_space<vmem>>, vector<8x512xf32>
    %c48 = arith.constant 48 : index
    %c512_101 = arith.constant 512 : index
    %295 = vector.load %arg30[%c48, %c512_101] : memref<64x1024xf32, #tpu.memory_space<vmem>>, vector<8x512xf32>
    %296 = tpu.concatenate %264, %291 in 1 : vector<8x128xf32>, vector<8x128xf32> -> vector<8x256xf32>
    %297 = arith.truncf %296 : vector<8x256xf32> to vector<8x256xbf16>
    %c0_102 = arith.constant 0 : index
    %c0_103 = arith.constant 0 : index
    %298 = vector.load %arg19[%c0_102, %c0_103] : memref<256x1024xbf16, #tpu.memory_space<vmem>>, vector<256x1024xbf16>
    %cst_104 = arith.constant dense<0.000000e+00> : vector<8x1024xf32>
    %299 = tpu.matmul %297, %298, %cst_104 {dimension_numbers = #tpu.dot_dimension_numbers<[1], [0], [0], [1], [0, 0, 1, 1], [], []>} : vector<8x256xbf16>, vector<256x1024xbf16>, vector<8x1024xf32> -> vector<8x1024xf32>
    %300 = vector.extract_strided_slice %299 {offsets = [0, 0], sizes = [8, 512], strides = [1, 1]} : vector<8x1024xf32> to vector<8x512xf32>
    %301 = arith.addf %294, %300 : vector<8x512xf32>
    %302 = vector.extract_strided_slice %301 {offsets = [0, 0], sizes = [8, 128], strides = [1, 1]} : vector<8x512xf32> to vector<8x128xf32>
    %303 = arith.negf %302 : vector<8x128xf32>
    %304 = math.exp %303 : vector<8x128xf32>
    %cst_105 = arith.constant 1.000000e+00 : f32
    %305 = vector.broadcast %cst_105 : f32 to vector<8x128xf32>
    %306 = arith.addf %305, %304 : vector<8x128xf32>
    %307 = arith.divf %305, %306 : vector<8x128xf32>
    %308 = vector.extract_strided_slice %301 {offsets = [0, 128], sizes = [8, 128], strides = [1, 1]} : vector<8x512xf32> to vector<8x128xf32>
    %309 = arith.negf %308 : vector<8x128xf32>
    %310 = math.exp %309 : vector<8x128xf32>
    %cst_106 = arith.constant 1.000000e+00 : f32
    %311 = vector.broadcast %cst_106 : f32 to vector<8x128xf32>
    %312 = arith.addf %311, %310 : vector<8x128xf32>
    %313 = arith.divf %311, %312 : vector<8x128xf32>
    %314 = vector.extract_strided_slice %301 {offsets = [0, 256], sizes = [8, 128], strides = [1, 1]} : vector<8x512xf32> to vector<8x128xf32>
    %315 = math.tanh %314 : vector<8x128xf32>
    %316 = vector.extract_strided_slice %301 {offsets = [0, 384], sizes = [8, 128], strides = [1, 1]} : vector<8x512xf32> to vector<8x128xf32>
    %317 = arith.negf %316 : vector<8x128xf32>
    %318 = math.exp %317 : vector<8x128xf32>
    %cst_107 = arith.constant 1.000000e+00 : f32
    %319 = vector.broadcast %cst_107 : f32 to vector<8x128xf32>
    %320 = arith.addf %319, %318 : vector<8x128xf32>
    %321 = arith.divf %319, %320 : vector<8x128xf32>
    %322 = arith.mulf %313, %262 : vector<8x128xf32>
    %323 = arith.mulf %307, %315 : vector<8x128xf32>
    %324 = arith.addf %322, %323 : vector<8x128xf32>
    %325 = math.tanh %324 : vector<8x128xf32>
    %326 = arith.mulf %321, %325 : vector<8x128xf32>
    %327 = vector.extract_strided_slice %299 {offsets = [0, 512], sizes = [8, 512], strides = [1, 1]} : vector<8x1024xf32> to vector<8x512xf32>
    %328 = arith.addf %295, %327 : vector<8x512xf32>
    %329 = vector.extract_strided_slice %328 {offsets = [0, 0], sizes = [8, 128], strides = [1, 1]} : vector<8x512xf32> to vector<8x128xf32>
    %330 = arith.negf %329 : vector<8x128xf32>
    %331 = math.exp %330 : vector<8x128xf32>
    %cst_108 = arith.constant 1.000000e+00 : f32
    %332 = vector.broadcast %cst_108 : f32 to vector<8x128xf32>
    %333 = arith.addf %332, %331 : vector<8x128xf32>
    %334 = arith.divf %332, %333 : vector<8x128xf32>
    %335 = vector.extract_strided_slice %328 {offsets = [0, 128], sizes = [8, 128], strides = [1, 1]} : vector<8x512xf32> to vector<8x128xf32>
    %336 = arith.negf %335 : vector<8x128xf32>
    %337 = math.exp %336 : vector<8x128xf32>
    %cst_109 = arith.constant 1.000000e+00 : f32
    %338 = vector.broadcast %cst_109 : f32 to vector<8x128xf32>
    %339 = arith.addf %338, %337 : vector<8x128xf32>
    %340 = arith.divf %338, %339 : vector<8x128xf32>
    %341 = vector.extract_strided_slice %328 {offsets = [0, 256], sizes = [8, 128], strides = [1, 1]} : vector<8x512xf32> to vector<8x128xf32>
    %342 = math.tanh %341 : vector<8x128xf32>
    %343 = vector.extract_strided_slice %328 {offsets = [0, 384], sizes = [8, 128], strides = [1, 1]} : vector<8x512xf32> to vector<8x128xf32>
    %344 = arith.negf %343 : vector<8x128xf32>
    %345 = math.exp %344 : vector<8x128xf32>
    %cst_110 = arith.constant 1.000000e+00 : f32
    %346 = vector.broadcast %cst_110 : f32 to vector<8x128xf32>
    %347 = arith.addf %346, %345 : vector<8x128xf32>
    %348 = arith.divf %346, %347 : vector<8x128xf32>
    %349 = arith.mulf %340, %289 : vector<8x128xf32>
    %350 = arith.mulf %334, %342 : vector<8x128xf32>
    %351 = arith.addf %349, %350 : vector<8x128xf32>
    %352 = math.tanh %351 : vector<8x128xf32>
    %353 = arith.mulf %348, %352 : vector<8x128xf32>
    %354 = arith.addf %292, %326 : vector<8x128xf32>
    %355 = arith.addf %293, %353 : vector<8x128xf32>
    %c16 = arith.constant 16 : index
    %c0_111 = arith.constant 0 : index
    %356 = vector.load %arg30[%c16, %c0_111] : memref<64x1024xf32, #tpu.memory_space<vmem>>, vector<8x512xf32>
    %c40 = arith.constant 40 : index
    %c512_112 = arith.constant 512 : index
    %357 = vector.load %arg30[%c40, %c512_112] : memref<64x1024xf32, #tpu.memory_space<vmem>>, vector<8x512xf32>
    %358 = tpu.concatenate %326, %353 in 1 : vector<8x128xf32>, vector<8x128xf32> -> vector<8x256xf32>
    %359 = arith.truncf %358 : vector<8x256xf32> to vector<8x256xbf16>
    %c0_113 = arith.constant 0 : index
    %c0_114 = arith.constant 0 : index
    %360 = vector.load %arg19[%c0_113, %c0_114] : memref<256x1024xbf16, #tpu.memory_space<vmem>>, vector<256x1024xbf16>
    %cst_115 = arith.constant dense<0.000000e+00> : vector<8x1024xf32>
    %361 = tpu.matmul %359, %360, %cst_115 {dimension_numbers = #tpu.dot_dimension_numbers<[1], [0], [0], [1], [0, 0, 1, 1], [], []>} : vector<8x256xbf16>, vector<256x1024xbf16>, vector<8x1024xf32> -> vector<8x1024xf32>
    %362 = vector.extract_strided_slice %361 {offsets = [0, 0], sizes = [8, 512], strides = [1, 1]} : vector<8x1024xf32> to vector<8x512xf32>
    %363 = arith.addf %356, %362 : vector<8x512xf32>
    %364 = vector.extract_strided_slice %363 {offsets = [0, 0], sizes = [8, 128], strides = [1, 1]} : vector<8x512xf32> to vector<8x128xf32>
    %365 = arith.negf %364 : vector<8x128xf32>
    %366 = math.exp %365 : vector<8x128xf32>
    %cst_116 = arith.constant 1.000000e+00 : f32
    %367 = vector.broadcast %cst_116 : f32 to vector<8x128xf32>
    %368 = arith.addf %367, %366 : vector<8x128xf32>
    %369 = arith.divf %367, %368 : vector<8x128xf32>
    %370 = vector.extract_strided_slice %363 {offsets = [0, 128], sizes = [8, 128], strides = [1, 1]} : vector<8x512xf32> to vector<8x128xf32>
    %371 = arith.negf %370 : vector<8x128xf32>
    %372 = math.exp %371 : vector<8x128xf32>
    %cst_117 = arith.constant 1.000000e+00 : f32
    %373 = vector.broadcast %cst_117 : f32 to vector<8x128xf32>
    %374 = arith.addf %373, %372 : vector<8x128xf32>
    %375 = arith.divf %373, %374 : vector<8x128xf32>
    %376 = vector.extract_strided_slice %363 {offsets = [0, 256], sizes = [8, 128], strides = [1, 1]} : vector<8x512xf32> to vector<8x128xf32>
    %377 = math.tanh %376 : vector<8x128xf32>
    %378 = vector.extract_strided_slice %363 {offsets = [0, 384], sizes = [8, 128], strides = [1, 1]} : vector<8x512xf32> to vector<8x128xf32>
    %379 = arith.negf %378 : vector<8x128xf32>
    %380 = math.exp %379 : vector<8x128xf32>
    %cst_118 = arith.constant 1.000000e+00 : f32
    %381 = vector.broadcast %cst_118 : f32 to vector<8x128xf32>
    %382 = arith.addf %381, %380 : vector<8x128xf32>
    %383 = arith.divf %381, %382 : vector<8x128xf32>
    %384 = arith.mulf %375, %324 : vector<8x128xf32>
    %385 = arith.mulf %369, %377 : vector<8x128xf32>
    %386 = arith.addf %384, %385 : vector<8x128xf32>
    %387 = math.tanh %386 : vector<8x128xf32>
    %388 = arith.mulf %383, %387 : vector<8x128xf32>
    %389 = vector.extract_strided_slice %361 {offsets = [0, 512], sizes = [8, 512], strides = [1, 1]} : vector<8x1024xf32> to vector<8x512xf32>
    %390 = arith.addf %357, %389 : vector<8x512xf32>
    %391 = vector.extract_strided_slice %390 {offsets = [0, 0], sizes = [8, 128], strides = [1, 1]} : vector<8x512xf32> to vector<8x128xf32>
    %392 = arith.negf %391 : vector<8x128xf32>
    %393 = math.exp %392 : vector<8x128xf32>
    %cst_119 = arith.constant 1.000000e+00 : f32
    %394 = vector.broadcast %cst_119 : f32 to vector<8x128xf32>
    %395 = arith.addf %394, %393 : vector<8x128xf32>
    %396 = arith.divf %394, %395 : vector<8x128xf32>
    %397 = vector.extract_strided_slice %390 {offsets = [0, 128], sizes = [8, 128], strides = [1, 1]} : vector<8x512xf32> to vector<8x128xf32>
    %398 = arith.negf %397 : vector<8x128xf32>
    %399 = math.exp %398 : vector<8x128xf32>
    %cst_120 = arith.constant 1.000000e+00 : f32
    %400 = vector.broadcast %cst_120 : f32 to vector<8x128xf32>
    %401 = arith.addf %400, %399 : vector<8x128xf32>
    %402 = arith.divf %400, %401 : vector<8x128xf32>
    %403 = vector.extract_strided_slice %390 {offsets = [0, 256], sizes = [8, 128], strides = [1, 1]} : vector<8x512xf32> to vector<8x128xf32>
    %404 = math.tanh %403 : vector<8x128xf32>
    %405 = vector.extract_strided_slice %390 {offsets = [0, 384], sizes = [8, 128], strides = [1, 1]} : vector<8x512xf32> to vector<8x128xf32>
    %406 = arith.negf %405 : vector<8x128xf32>
    %407 = math.exp %406 : vector<8x128xf32>
    %cst_121 = arith.constant 1.000000e+00 : f32
    %408 = vector.broadcast %cst_121 : f32 to vector<8x128xf32>
    %409 = arith.addf %408, %407 : vector<8x128xf32>
    %410 = arith.divf %408, %409 : vector<8x128xf32>
    %411 = arith.mulf %402, %351 : vector<8x128xf32>
    %412 = arith.mulf %396, %404 : vector<8x128xf32>
    %413 = arith.addf %411, %412 : vector<8x128xf32>
    %414 = math.tanh %413 : vector<8x128xf32>
    %415 = arith.mulf %410, %414 : vector<8x128xf32>
    %416 = arith.addf %354, %388 : vector<8x128xf32>
    %417 = arith.addf %355, %415 : vector<8x128xf32>
    %c24 = arith.constant 24 : index
    %c0_122 = arith.constant 0 : index
    %418 = vector.load %arg30[%c24, %c0_122] : memref<64x1024xf32, #tpu.memory_space<vmem>>, vector<8x512xf32>
    %c32 = arith.constant 32 : index
    %c512_123 = arith.constant 512 : index
    %419 = vector.load %arg30[%c32, %c512_123] : memref<64x1024xf32, #tpu.memory_space<vmem>>, vector<8x512xf32>
    %420 = tpu.concatenate %388, %415 in 1 : vector<8x128xf32>, vector<8x128xf32> -> vector<8x256xf32>
    %421 = arith.truncf %420 : vector<8x256xf32> to vector<8x256xbf16>
    %c0_124 = arith.constant 0 : index
    %c0_125 = arith.constant 0 : index
    %422 = vector.load %arg19[%c0_124, %c0_125] : memref<256x1024xbf16, #tpu.memory_space<vmem>>, vector<256x1024xbf16>
    %cst_126 = arith.constant dense<0.000000e+00> : vector<8x1024xf32>
    %423 = tpu.matmul %421, %422, %cst_126 {dimension_numbers = #tpu.dot_dimension_numbers<[1], [0], [0], [1], [0, 0, 1, 1], [], []>} : vector<8x256xbf16>, vector<256x1024xbf16>, vector<8x1024xf32> -> vector<8x1024xf32>
    %424 = vector.extract_strided_slice %423 {offsets = [0, 0], sizes = [8, 512], strides = [1, 1]} : vector<8x1024xf32> to vector<8x512xf32>
    %425 = arith.addf %418, %424 : vector<8x512xf32>
    %426 = vector.extract_strided_slice %425 {offsets = [0, 0], sizes = [8, 128], strides = [1, 1]} : vector<8x512xf32> to vector<8x128xf32>
    %427 = arith.negf %426 : vector<8x128xf32>
    %428 = math.exp %427 : vector<8x128xf32>
    %cst_127 = arith.constant 1.000000e+00 : f32
    %429 = vector.broadcast %cst_127 : f32 to vector<8x128xf32>
    %430 = arith.addf %429, %428 : vector<8x128xf32>
    %431 = arith.divf %429, %430 : vector<8x128xf32>
    %432 = vector.extract_strided_slice %425 {offsets = [0, 128], sizes = [8, 128], strides = [1, 1]} : vector<8x512xf32> to vector<8x128xf32>
    %433 = arith.negf %432 : vector<8x128xf32>
    %434 = math.exp %433 : vector<8x128xf32>
    %cst_128 = arith.constant 1.000000e+00 : f32
    %435 = vector.broadcast %cst_128 : f32 to vector<8x128xf32>
    %436 = arith.addf %435, %434 : vector<8x128xf32>
    %437 = arith.divf %435, %436 : vector<8x128xf32>
    %438 = vector.extract_strided_slice %425 {offsets = [0, 256], sizes = [8, 128], strides = [1, 1]} : vector<8x512xf32> to vector<8x128xf32>
    %439 = math.tanh %438 : vector<8x128xf32>
    %440 = vector.extract_strided_slice %425 {offsets = [0, 384], sizes = [8, 128], strides = [1, 1]} : vector<8x512xf32> to vector<8x128xf32>
    %441 = arith.negf %440 : vector<8x128xf32>
    %442 = math.exp %441 : vector<8x128xf32>
    %cst_129 = arith.constant 1.000000e+00 : f32
    %443 = vector.broadcast %cst_129 : f32 to vector<8x128xf32>
    %444 = arith.addf %443, %442 : vector<8x128xf32>
    %445 = arith.divf %443, %444 : vector<8x128xf32>
    %446 = arith.mulf %437, %386 : vector<8x128xf32>
    %447 = arith.mulf %431, %439 : vector<8x128xf32>
    %448 = arith.addf %446, %447 : vector<8x128xf32>
    %449 = math.tanh %448 : vector<8x128xf32>
    %450 = arith.mulf %445, %449 : vector<8x128xf32>
    %451 = vector.extract_strided_slice %423 {offsets = [0, 512], sizes = [8, 512], strides = [1, 1]} : vector<8x1024xf32> to vector<8x512xf32>
    %452 = arith.addf %419, %451 : vector<8x512xf32>
    %453 = vector.extract_strided_slice %452 {offsets = [0, 0], sizes = [8, 128], strides = [1, 1]} : vector<8x512xf32> to vector<8x128xf32>
    %454 = arith.negf %453 : vector<8x128xf32>
    %455 = math.exp %454 : vector<8x128xf32>
    %cst_130 = arith.constant 1.000000e+00 : f32
    %456 = vector.broadcast %cst_130 : f32 to vector<8x128xf32>
    %457 = arith.addf %456, %455 : vector<8x128xf32>
    %458 = arith.divf %456, %457 : vector<8x128xf32>
    %459 = vector.extract_strided_slice %452 {offsets = [0, 128], sizes = [8, 128], strides = [1, 1]} : vector<8x512xf32> to vector<8x128xf32>
    %460 = arith.negf %459 : vector<8x128xf32>
    %461 = math.exp %460 : vector<8x128xf32>
    %cst_131 = arith.constant 1.000000e+00 : f32
    %462 = vector.broadcast %cst_131 : f32 to vector<8x128xf32>
    %463 = arith.addf %462, %461 : vector<8x128xf32>
    %464 = arith.divf %462, %463 : vector<8x128xf32>
    %465 = vector.extract_strided_slice %452 {offsets = [0, 256], sizes = [8, 128], strides = [1, 1]} : vector<8x512xf32> to vector<8x128xf32>
    %466 = math.tanh %465 : vector<8x128xf32>
    %467 = vector.extract_strided_slice %452 {offsets = [0, 384], sizes = [8, 128], strides = [1, 1]} : vector<8x512xf32> to vector<8x128xf32>
    %468 = arith.negf %467 : vector<8x128xf32>
    %469 = math.exp %468 : vector<8x128xf32>
    %cst_132 = arith.constant 1.000000e+00 : f32
    %470 = vector.broadcast %cst_132 : f32 to vector<8x128xf32>
    %471 = arith.addf %470, %469 : vector<8x128xf32>
    %472 = arith.divf %470, %471 : vector<8x128xf32>
    %473 = arith.mulf %464, %413 : vector<8x128xf32>
    %474 = arith.mulf %458, %466 : vector<8x128xf32>
    %475 = arith.addf %473, %474 : vector<8x128xf32>
    %476 = math.tanh %475 : vector<8x128xf32>
    %477 = arith.mulf %472, %476 : vector<8x128xf32>
    %478 = arith.addf %416, %450 : vector<8x128xf32>
    %479 = arith.addf %417, %477 : vector<8x128xf32>
    %c32_133 = arith.constant 32 : index
    %c0_134 = arith.constant 0 : index
    %480 = vector.load %arg30[%c32_133, %c0_134] : memref<64x1024xf32, #tpu.memory_space<vmem>>, vector<8x512xf32>
    %c24_135 = arith.constant 24 : index
    %c512_136 = arith.constant 512 : index
    %481 = vector.load %arg30[%c24_135, %c512_136] : memref<64x1024xf32, #tpu.memory_space<vmem>>, vector<8x512xf32>
    %482 = tpu.concatenate %450, %477 in 1 : vector<8x128xf32>, vector<8x128xf32> -> vector<8x256xf32>
    %483 = arith.truncf %482 : vector<8x256xf32> to vector<8x256xbf16>
    %c0_137 = arith.constant 0 : index
    %c0_138 = arith.constant 0 : index
    %484 = vector.load %arg19[%c0_137, %c0_138] : memref<256x1024xbf16, #tpu.memory_space<vmem>>, vector<256x1024xbf16>
    %cst_139 = arith.constant dense<0.000000e+00> : vector<8x1024xf32>
    %485 = tpu.matmul %483, %484, %cst_139 {dimension_numbers = #tpu.dot_dimension_numbers<[1], [0], [0], [1], [0, 0, 1, 1], [], []>} : vector<8x256xbf16>, vector<256x1024xbf16>, vector<8x1024xf32> -> vector<8x1024xf32>
    %486 = vector.extract_strided_slice %485 {offsets = [0, 0], sizes = [8, 512], strides = [1, 1]} : vector<8x1024xf32> to vector<8x512xf32>
    %487 = arith.addf %480, %486 : vector<8x512xf32>
    %488 = vector.extract_strided_slice %487 {offsets = [0, 0], sizes = [8, 128], strides = [1, 1]} : vector<8x512xf32> to vector<8x128xf32>
    %489 = arith.negf %488 : vector<8x128xf32>
    %490 = math.exp %489 : vector<8x128xf32>
    %cst_140 = arith.constant 1.000000e+00 : f32
    %491 = vector.broadcast %cst_140 : f32 to vector<8x128xf32>
    %492 = arith.addf %491, %490 : vector<8x128xf32>
    %493 = arith.divf %491, %492 : vector<8x128xf32>
    %494 = vector.extract_strided_slice %487 {offsets = [0, 128], sizes = [8, 128], strides = [1, 1]} : vector<8x512xf32> to vector<8x128xf32>
    %495 = arith.negf %494 : vector<8x128xf32>
    %496 = math.exp %495 : vector<8x128xf32>
    %cst_141 = arith.constant 1.000000e+00 : f32
    %497 = vector.broadcast %cst_141 : f32 to vector<8x128xf32>
    %498 = arith.addf %497, %496 : vector<8x128xf32>
    %499 = arith.divf %497, %498 : vector<8x128xf32>
    %500 = vector.extract_strided_slice %487 {offsets = [0, 256], sizes = [8, 128], strides = [1, 1]} : vector<8x512xf32> to vector<8x128xf32>
    %501 = math.tanh %500 : vector<8x128xf32>
    %502 = vector.extract_strided_slice %487 {offsets = [0, 384], sizes = [8, 128], strides = [1, 1]} : vector<8x512xf32> to vector<8x128xf32>
    %503 = arith.negf %502 : vector<8x128xf32>
    %504 = math.exp %503 : vector<8x128xf32>
    %cst_142 = arith.constant 1.000000e+00 : f32
    %505 = vector.broadcast %cst_142 : f32 to vector<8x128xf32>
    %506 = arith.addf %505, %504 : vector<8x128xf32>
    %507 = arith.divf %505, %506 : vector<8x128xf32>
    %508 = arith.mulf %499, %448 : vector<8x128xf32>
    %509 = arith.mulf %493, %501 : vector<8x128xf32>
    %510 = arith.addf %508, %509 : vector<8x128xf32>
    %511 = math.tanh %510 : vector<8x128xf32>
    %512 = arith.mulf %507, %511 : vector<8x128xf32>
    %513 = vector.extract_strided_slice %485 {offsets = [0, 512], sizes = [8, 512], strides = [1, 1]} : vector<8x1024xf32> to vector<8x512xf32>
    %514 = arith.addf %481, %513 : vector<8x512xf32>
    %515 = vector.extract_strided_slice %514 {offsets = [0, 0], sizes = [8, 128], strides = [1, 1]} : vector<8x512xf32> to vector<8x128xf32>
    %516 = arith.negf %515 : vector<8x128xf32>
    %517 = math.exp %516 : vector<8x128xf32>
    %cst_143 = arith.constant 1.000000e+00 : f32
    %518 = vector.broadcast %cst_143 : f32 to vector<8x128xf32>
    %519 = arith.addf %518, %517 : vector<8x128xf32>
    %520 = arith.divf %518, %519 : vector<8x128xf32>
    %521 = vector.extract_strided_slice %514 {offsets = [0, 128], sizes = [8, 128], strides = [1, 1]} : vector<8x512xf32> to vector<8x128xf32>
    %522 = arith.negf %521 : vector<8x128xf32>
    %523 = math.exp %522 : vector<8x128xf32>
    %cst_144 = arith.constant 1.000000e+00 : f32
    %524 = vector.broadcast %cst_144 : f32 to vector<8x128xf32>
    %525 = arith.addf %524, %523 : vector<8x128xf32>
    %526 = arith.divf %524, %525 : vector<8x128xf32>
    %527 = vector.extract_strided_slice %514 {offsets = [0, 256], sizes = [8, 128], strides = [1, 1]} : vector<8x512xf32> to vector<8x128xf32>
    %528 = math.tanh %527 : vector<8x128xf32>
    %529 = vector.extract_strided_slice %514 {offsets = [0, 384], sizes = [8, 128], strides = [1, 1]} : vector<8x512xf32> to vector<8x128xf32>
    %530 = arith.negf %529 : vector<8x128xf32>
    %531 = math.exp %530 : vector<8x128xf32>
    %cst_145 = arith.constant 1.000000e+00 : f32
    %532 = vector.broadcast %cst_145 : f32 to vector<8x128xf32>
    %533 = arith.addf %532, %531 : vector<8x128xf32>
    %534 = arith.divf %532, %533 : vector<8x128xf32>
    %535 = arith.mulf %526, %475 : vector<8x128xf32>
    %536 = arith.mulf %520, %528 : vector<8x128xf32>
    %537 = arith.addf %535, %536 : vector<8x128xf32>
    %538 = math.tanh %537 : vector<8x128xf32>
    %539 = arith.mulf %534, %538 : vector<8x128xf32>
    %540 = arith.addf %478, %512 : vector<8x128xf32>
    %541 = arith.addf %479, %539 : vector<8x128xf32>
    %c40_146 = arith.constant 40 : index
    %c0_147 = arith.constant 0 : index
    %542 = vector.load %arg30[%c40_146, %c0_147] : memref<64x1024xf32, #tpu.memory_space<vmem>>, vector<8x512xf32>
    %c16_148 = arith.constant 16 : index
    %c512_149 = arith.constant 512 : index
    %543 = vector.load %arg30[%c16_148, %c512_149] : memref<64x1024xf32, #tpu.memory_space<vmem>>, vector<8x512xf32>
    %544 = tpu.concatenate %512, %539 in 1 : vector<8x128xf32>, vector<8x128xf32> -> vector<8x256xf32>
    %545 = arith.truncf %544 : vector<8x256xf32> to vector<8x256xbf16>
    %c0_150 = arith.constant 0 : index
    %c0_151 = arith.constant 0 : index
    %546 = vector.load %arg19[%c0_150, %c0_151] : memref<256x1024xbf16, #tpu.memory_space<vmem>>, vector<256x1024xbf16>
    %cst_152 = arith.constant dense<0.000000e+00> : vector<8x1024xf32>
    %547 = tpu.matmul %545, %546, %cst_152 {dimension_numbers = #tpu.dot_dimension_numbers<[1], [0], [0], [1], [0, 0, 1, 1], [], []>} : vector<8x256xbf16>, vector<256x1024xbf16>, vector<8x1024xf32> -> vector<8x1024xf32>
    %548 = vector.extract_strided_slice %547 {offsets = [0, 0], sizes = [8, 512], strides = [1, 1]} : vector<8x1024xf32> to vector<8x512xf32>
    %549 = arith.addf %542, %548 : vector<8x512xf32>
    %550 = vector.extract_strided_slice %549 {offsets = [0, 0], sizes = [8, 128], strides = [1, 1]} : vector<8x512xf32> to vector<8x128xf32>
    %551 = arith.negf %550 : vector<8x128xf32>
    %552 = math.exp %551 : vector<8x128xf32>
    %cst_153 = arith.constant 1.000000e+00 : f32
    %553 = vector.broadcast %cst_153 : f32 to vector<8x128xf32>
    %554 = arith.addf %553, %552 : vector<8x128xf32>
    %555 = arith.divf %553, %554 : vector<8x128xf32>
    %556 = vector.extract_strided_slice %549 {offsets = [0, 128], sizes = [8, 128], strides = [1, 1]} : vector<8x512xf32> to vector<8x128xf32>
    %557 = arith.negf %556 : vector<8x128xf32>
    %558 = math.exp %557 : vector<8x128xf32>
    %cst_154 = arith.constant 1.000000e+00 : f32
    %559 = vector.broadcast %cst_154 : f32 to vector<8x128xf32>
    %560 = arith.addf %559, %558 : vector<8x128xf32>
    %561 = arith.divf %559, %560 : vector<8x128xf32>
    %562 = vector.extract_strided_slice %549 {offsets = [0, 256], sizes = [8, 128], strides = [1, 1]} : vector<8x512xf32> to vector<8x128xf32>
    %563 = math.tanh %562 : vector<8x128xf32>
    %564 = vector.extract_strided_slice %549 {offsets = [0, 384], sizes = [8, 128], strides = [1, 1]} : vector<8x512xf32> to vector<8x128xf32>
    %565 = arith.negf %564 : vector<8x128xf32>
    %566 = math.exp %565 : vector<8x128xf32>
    %cst_155 = arith.constant 1.000000e+00 : f32
    %567 = vector.broadcast %cst_155 : f32 to vector<8x128xf32>
    %568 = arith.addf %567, %566 : vector<8x128xf32>
    %569 = arith.divf %567, %568 : vector<8x128xf32>
    %570 = arith.mulf %561, %510 : vector<8x128xf32>
    %571 = arith.mulf %555, %563 : vector<8x128xf32>
    %572 = arith.addf %570, %571 : vector<8x128xf32>
    %573 = math.tanh %572 : vector<8x128xf32>
    %574 = arith.mulf %569, %573 : vector<8x128xf32>
    %575 = vector.extract_strided_slice %547 {offsets = [0, 512], sizes = [8, 512], strides = [1, 1]} : vector<8x1024xf32> to vector<8x512xf32>
    %576 = arith.addf %543, %575 : vector<8x512xf32>
    %577 = vector.extract_strided_slice %576 {offsets = [0, 0], sizes = [8, 128], strides = [1, 1]} : vector<8x512xf32> to vector<8x128xf32>
    %578 = arith.negf %577 : vector<8x128xf32>
    %579 = math.exp %578 : vector<8x128xf32>
    %cst_156 = arith.constant 1.000000e+00 : f32
    %580 = vector.broadcast %cst_156 : f32 to vector<8x128xf32>
    %581 = arith.addf %580, %579 : vector<8x128xf32>
    %582 = arith.divf %580, %581 : vector<8x128xf32>
    %583 = vector.extract_strided_slice %576 {offsets = [0, 128], sizes = [8, 128], strides = [1, 1]} : vector<8x512xf32> to vector<8x128xf32>
    %584 = arith.negf %583 : vector<8x128xf32>
    %585 = math.exp %584 : vector<8x128xf32>
    %cst_157 = arith.constant 1.000000e+00 : f32
    %586 = vector.broadcast %cst_157 : f32 to vector<8x128xf32>
    %587 = arith.addf %586, %585 : vector<8x128xf32>
    %588 = arith.divf %586, %587 : vector<8x128xf32>
    %589 = vector.extract_strided_slice %576 {offsets = [0, 256], sizes = [8, 128], strides = [1, 1]} : vector<8x512xf32> to vector<8x128xf32>
    %590 = math.tanh %589 : vector<8x128xf32>
    %591 = vector.extract_strided_slice %576 {offsets = [0, 384], sizes = [8, 128], strides = [1, 1]} : vector<8x512xf32> to vector<8x128xf32>
    %592 = arith.negf %591 : vector<8x128xf32>
    %593 = math.exp %592 : vector<8x128xf32>
    %cst_158 = arith.constant 1.000000e+00 : f32
    %594 = vector.broadcast %cst_158 : f32 to vector<8x128xf32>
    %595 = arith.addf %594, %593 : vector<8x128xf32>
    %596 = arith.divf %594, %595 : vector<8x128xf32>
    %597 = arith.mulf %588, %537 : vector<8x128xf32>
    %598 = arith.mulf %582, %590 : vector<8x128xf32>
    %599 = arith.addf %597, %598 : vector<8x128xf32>
    %600 = math.tanh %599 : vector<8x128xf32>
    %601 = arith.mulf %596, %600 : vector<8x128xf32>
    %602 = arith.addf %540, %574 : vector<8x128xf32>
    %603 = arith.addf %541, %601 : vector<8x128xf32>
    %c48_159 = arith.constant 48 : index
    %c0_160 = arith.constant 0 : index
    %604 = vector.load %arg30[%c48_159, %c0_160] : memref<64x1024xf32, #tpu.memory_space<vmem>>, vector<8x512xf32>
    %c8_161 = arith.constant 8 : index
    %c512_162 = arith.constant 512 : index
    %605 = vector.load %arg30[%c8_161, %c512_162] : memref<64x1024xf32, #tpu.memory_space<vmem>>, vector<8x512xf32>
    %606 = tpu.concatenate %574, %601 in 1 : vector<8x128xf32>, vector<8x128xf32> -> vector<8x256xf32>
    %607 = arith.truncf %606 : vector<8x256xf32> to vector<8x256xbf16>
    %c0_163 = arith.constant 0 : index
    %c0_164 = arith.constant 0 : index
    %608 = vector.load %arg19[%c0_163, %c0_164] : memref<256x1024xbf16, #tpu.memory_space<vmem>>, vector<256x1024xbf16>
    %cst_165 = arith.constant dense<0.000000e+00> : vector<8x1024xf32>
    %609 = tpu.matmul %607, %608, %cst_165 {dimension_numbers = #tpu.dot_dimension_numbers<[1], [0], [0], [1], [0, 0, 1, 1], [], []>} : vector<8x256xbf16>, vector<256x1024xbf16>, vector<8x1024xf32> -> vector<8x1024xf32>
    %610 = vector.extract_strided_slice %609 {offsets = [0, 0], sizes = [8, 512], strides = [1, 1]} : vector<8x1024xf32> to vector<8x512xf32>
    %611 = arith.addf %604, %610 : vector<8x512xf32>
    %612 = vector.extract_strided_slice %611 {offsets = [0, 0], sizes = [8, 128], strides = [1, 1]} : vector<8x512xf32> to vector<8x128xf32>
    %613 = arith.negf %612 : vector<8x128xf32>
    %614 = math.exp %613 : vector<8x128xf32>
    %cst_166 = arith.constant 1.000000e+00 : f32
    %615 = vector.broadcast %cst_166 : f32 to vector<8x128xf32>
    %616 = arith.addf %615, %614 : vector<8x128xf32>
    %617 = arith.divf %615, %616 : vector<8x128xf32>
    %618 = vector.extract_strided_slice %611 {offsets = [0, 128], sizes = [8, 128], strides = [1, 1]} : vector<8x512xf32> to vector<8x128xf32>
    %619 = arith.negf %618 : vector<8x128xf32>
    %620 = math.exp %619 : vector<8x128xf32>
    %cst_167 = arith.constant 1.000000e+00 : f32
    %621 = vector.broadcast %cst_167 : f32 to vector<8x128xf32>
    %622 = arith.addf %621, %620 : vector<8x128xf32>
    %623 = arith.divf %621, %622 : vector<8x128xf32>
    %624 = vector.extract_strided_slice %611 {offsets = [0, 256], sizes = [8, 128], strides = [1, 1]} : vector<8x512xf32> to vector<8x128xf32>
    %625 = math.tanh %624 : vector<8x128xf32>
    %626 = vector.extract_strided_slice %611 {offsets = [0, 384], sizes = [8, 128], strides = [1, 1]} : vector<8x512xf32> to vector<8x128xf32>
    %627 = arith.negf %626 : vector<8x128xf32>
    %628 = math.exp %627 : vector<8x128xf32>
    %cst_168 = arith.constant 1.000000e+00 : f32
    %629 = vector.broadcast %cst_168 : f32 to vector<8x128xf32>
    %630 = arith.addf %629, %628 : vector<8x128xf32>
    %631 = arith.divf %629, %630 : vector<8x128xf32>
    %632 = arith.mulf %623, %572 : vector<8x128xf32>
    %633 = arith.mulf %617, %625 : vector<8x128xf32>
    %634 = arith.addf %632, %633 : vector<8x128xf32>
    %635 = math.tanh %634 : vector<8x128xf32>
    %636 = arith.mulf %631, %635 : vector<8x128xf32>
    %637 = vector.extract_strided_slice %609 {offsets = [0, 512], sizes = [8, 512], strides = [1, 1]} : vector<8x1024xf32> to vector<8x512xf32>
    %638 = arith.addf %605, %637 : vector<8x512xf32>
    %639 = vector.extract_strided_slice %638 {offsets = [0, 0], sizes = [8, 128], strides = [1, 1]} : vector<8x512xf32> to vector<8x128xf32>
    %640 = arith.negf %639 : vector<8x128xf32>
    %641 = math.exp %640 : vector<8x128xf32>
    %cst_169 = arith.constant 1.000000e+00 : f32
    %642 = vector.broadcast %cst_169 : f32 to vector<8x128xf32>
    %643 = arith.addf %642, %641 : vector<8x128xf32>
    %644 = arith.divf %642, %643 : vector<8x128xf32>
    %645 = vector.extract_strided_slice %638 {offsets = [0, 128], sizes = [8, 128], strides = [1, 1]} : vector<8x512xf32> to vector<8x128xf32>
    %646 = arith.negf %645 : vector<8x128xf32>
    %647 = math.exp %646 : vector<8x128xf32>
    %cst_170 = arith.constant 1.000000e+00 : f32
    %648 = vector.broadcast %cst_170 : f32 to vector<8x128xf32>
    %649 = arith.addf %648, %647 : vector<8x128xf32>
    %650 = arith.divf %648, %649 : vector<8x128xf32>
    %651 = vector.extract_strided_slice %638 {offsets = [0, 256], sizes = [8, 128], strides = [1, 1]} : vector<8x512xf32> to vector<8x128xf32>
    %652 = math.tanh %651 : vector<8x128xf32>
    %653 = vector.extract_strided_slice %638 {offsets = [0, 384], sizes = [8, 128], strides = [1, 1]} : vector<8x512xf32> to vector<8x128xf32>
    %654 = arith.negf %653 : vector<8x128xf32>
    %655 = math.exp %654 : vector<8x128xf32>
    %cst_171 = arith.constant 1.000000e+00 : f32
    %656 = vector.broadcast %cst_171 : f32 to vector<8x128xf32>
    %657 = arith.addf %656, %655 : vector<8x128xf32>
    %658 = arith.divf %656, %657 : vector<8x128xf32>
    %659 = arith.mulf %650, %599 : vector<8x128xf32>
    %660 = arith.mulf %644, %652 : vector<8x128xf32>
    %661 = arith.addf %659, %660 : vector<8x128xf32>
    %662 = math.tanh %661 : vector<8x128xf32>
    %663 = arith.mulf %658, %662 : vector<8x128xf32>
    %664 = arith.addf %602, %636 : vector<8x128xf32>
    %665 = arith.addf %603, %663 : vector<8x128xf32>
    %c56_172 = arith.constant 56 : index
    %c0_173 = arith.constant 0 : index
    %666 = vector.load %arg30[%c56_172, %c0_173] : memref<64x1024xf32, #tpu.memory_space<vmem>>, vector<8x512xf32>
    %c0_174 = arith.constant 0 : index
    %c512_175 = arith.constant 512 : index
    %667 = vector.load %arg30[%c0_174, %c512_175] : memref<64x1024xf32, #tpu.memory_space<vmem>>, vector<8x512xf32>
    %668 = tpu.concatenate %636, %663 in 1 : vector<8x128xf32>, vector<8x128xf32> -> vector<8x256xf32>
    %669 = arith.truncf %668 : vector<8x256xf32> to vector<8x256xbf16>
    %c0_176 = arith.constant 0 : index
    %c0_177 = arith.constant 0 : index
    %670 = vector.load %arg19[%c0_176, %c0_177] : memref<256x1024xbf16, #tpu.memory_space<vmem>>, vector<256x1024xbf16>
    %cst_178 = arith.constant dense<0.000000e+00> : vector<8x1024xf32>
    %671 = tpu.matmul %669, %670, %cst_178 {dimension_numbers = #tpu.dot_dimension_numbers<[1], [0], [0], [1], [0, 0, 1, 1], [], []>} : vector<8x256xbf16>, vector<256x1024xbf16>, vector<8x1024xf32> -> vector<8x1024xf32>
    %672 = vector.extract_strided_slice %671 {offsets = [0, 0], sizes = [8, 512], strides = [1, 1]} : vector<8x1024xf32> to vector<8x512xf32>
    %673 = arith.addf %666, %672 : vector<8x512xf32>
    %674 = vector.extract_strided_slice %673 {offsets = [0, 0], sizes = [8, 128], strides = [1, 1]} : vector<8x512xf32> to vector<8x128xf32>
    %675 = arith.negf %674 : vector<8x128xf32>
    %676 = math.exp %675 : vector<8x128xf32>
    %cst_179 = arith.constant 1.000000e+00 : f32
    %677 = vector.broadcast %cst_179 : f32 to vector<8x128xf32>
    %678 = arith.addf %677, %676 : vector<8x128xf32>
    %679 = arith.divf %677, %678 : vector<8x128xf32>
    %680 = vector.extract_strided_slice %673 {offsets = [0, 128], sizes = [8, 128], strides = [1, 1]} : vector<8x512xf32> to vector<8x128xf32>
    %681 = arith.negf %680 : vector<8x128xf32>
    %682 = math.exp %681 : vector<8x128xf32>
    %cst_180 = arith.constant 1.000000e+00 : f32
    %683 = vector.broadcast %cst_180 : f32 to vector<8x128xf32>
    %684 = arith.addf %683, %682 : vector<8x128xf32>
    %685 = arith.divf %683, %684 : vector<8x128xf32>
    %686 = vector.extract_strided_slice %673 {offsets = [0, 256], sizes = [8, 128], strides = [1, 1]} : vector<8x512xf32> to vector<8x128xf32>
    %687 = math.tanh %686 : vector<8x128xf32>
    %688 = vector.extract_strided_slice %673 {offsets = [0, 384], sizes = [8, 128], strides = [1, 1]} : vector<8x512xf32> to vector<8x128xf32>
    %689 = arith.negf %688 : vector<8x128xf32>
    %690 = math.exp %689 : vector<8x128xf32>
    %cst_181 = arith.constant 1.000000e+00 : f32
    %691 = vector.broadcast %cst_181 : f32 to vector<8x128xf32>
    %692 = arith.addf %691, %690 : vector<8x128xf32>
    %693 = arith.divf %691, %692 : vector<8x128xf32>
    %694 = arith.mulf %685, %634 : vector<8x128xf32>
    %695 = arith.mulf %679, %687 : vector<8x128xf32>
    %696 = arith.addf %694, %695 : vector<8x128xf32>
    %697 = math.tanh %696 : vector<8x128xf32>
    %698 = arith.mulf %693, %697 : vector<8x128xf32>
    %699 = vector.extract_strided_slice %671 {offsets = [0, 512], sizes = [8, 512], strides = [1, 1]} : vector<8x1024xf32> to vector<8x512xf32>
    %700 = arith.addf %667, %699 : vector<8x512xf32>
    %701 = vector.extract_strided_slice %700 {offsets = [0, 0], sizes = [8, 128], strides = [1, 1]} : vector<8x512xf32> to vector<8x128xf32>
    %702 = arith.negf %701 : vector<8x128xf32>
    %703 = math.exp %702 : vector<8x128xf32>
    %cst_182 = arith.constant 1.000000e+00 : f32
    %704 = vector.broadcast %cst_182 : f32 to vector<8x128xf32>
    %705 = arith.addf %704, %703 : vector<8x128xf32>
    %706 = arith.divf %704, %705 : vector<8x128xf32>
    %707 = vector.extract_strided_slice %700 {offsets = [0, 128], sizes = [8, 128], strides = [1, 1]} : vector<8x512xf32> to vector<8x128xf32>
    %708 = arith.negf %707 : vector<8x128xf32>
    %709 = math.exp %708 : vector<8x128xf32>
    %cst_183 = arith.constant 1.000000e+00 : f32
    %710 = vector.broadcast %cst_183 : f32 to vector<8x128xf32>
    %711 = arith.addf %710, %709 : vector<8x128xf32>
    %712 = arith.divf %710, %711 : vector<8x128xf32>
    %713 = vector.extract_strided_slice %700 {offsets = [0, 256], sizes = [8, 128], strides = [1, 1]} : vector<8x512xf32> to vector<8x128xf32>
    %714 = math.tanh %713 : vector<8x128xf32>
    %715 = vector.extract_strided_slice %700 {offsets = [0, 384], sizes = [8, 128], strides = [1, 1]} : vector<8x512xf32> to vector<8x128xf32>
    %716 = arith.negf %715 : vector<8x128xf32>
    %717 = math.exp %716 : vector<8x128xf32>
    %cst_184 = arith.constant 1.000000e+00 : f32
    %718 = vector.broadcast %cst_184 : f32 to vector<8x128xf32>
    %719 = arith.addf %718, %717 : vector<8x128xf32>
    %720 = arith.divf %718, %719 : vector<8x128xf32>
    %721 = arith.mulf %712, %661 : vector<8x128xf32>
    %722 = arith.mulf %706, %714 : vector<8x128xf32>
    %723 = arith.addf %721, %722 : vector<8x128xf32>
    %724 = math.tanh %723 : vector<8x128xf32>
    %725 = arith.mulf %720, %724 : vector<8x128xf32>
    %726 = arith.addf %664, %698 : vector<8x128xf32>
    %727 = arith.addf %665, %725 : vector<8x128xf32>
    %728 = tpu.concatenate %726, %727 in 1 : vector<8x128xf32>, vector<8x128xf32> -> vector<8x256xf32>
    %cst_185 = arith.constant 1.250000e-01 : f32
    %729 = vector.broadcast %cst_185 : f32 to vector<8x256xf32>
    %730 = arith.mulf %728, %729 : vector<8x256xf32>
    %731 = arith.truncf %730 : vector<8x256xf32> to vector<8x256xbf16>
    %c0_186 = arith.constant 0 : index
    %c0_187 = arith.constant 0 : index
    %732 = vector.load %arg20[%c0_186, %c0_187] : memref<256x128xbf16, #tpu.memory_space<vmem>>, vector<256x128xbf16>
    %cst_188 = arith.constant dense<0.000000e+00> : vector<8x128xf32>
    %733 = tpu.matmul %731, %732, %cst_188 {dimension_numbers = #tpu.dot_dimension_numbers<[1], [0], [0], [1], [0, 0, 1, 1], [], []>} : vector<8x256xbf16>, vector<256x128xbf16>, vector<8x128xf32> -> vector<8x128xf32>
    %c0_189 = arith.constant 0 : index
    %c0_190 = arith.constant 0 : index
    %734 = vector.load %arg21[%c0_189, %c0_190] : memref<1x128xf32, #tpu.memory_space<vmem>>, vector<1x128xf32>
    %735 = vector.broadcast %734 : vector<1x128xf32> to vector<8x128xf32>
    %736 = arith.addf %733, %735 : vector<8x128xf32>
    %c0_191 = arith.constant 0 : index
    %c0_192 = arith.constant 0 : index
    %737 = vector.load %arg24[%c0_191, %c0_192] : memref<1x128xf32, #tpu.memory_space<vmem>>, vector<1x128xf32>
    %738 = vector.broadcast %737 : vector<1x128xf32> to vector<8x128xf32>
    %739 = arith.subf %736, %738 : vector<8x128xf32>
    %c0_193 = arith.constant 0 : index
    %c0_194 = arith.constant 0 : index
    %740 = vector.load %arg25[%c0_193, %c0_194] : memref<1x128xf32, #tpu.memory_space<vmem>>, vector<1x128xf32>
    %cst_195 = arith.constant 9.99999974E-6 : f32
    %741 = vector.broadcast %cst_195 : f32 to vector<1x128xf32>
    %742 = arith.addf %740, %741 : vector<1x128xf32>
    %743 = math.rsqrt %742 : vector<1x128xf32>
    %744 = vector.broadcast %743 : vector<1x128xf32> to vector<8x128xf32>
    %745 = arith.mulf %739, %744 : vector<8x128xf32>
    %c0_196 = arith.constant 0 : index
    %c0_197 = arith.constant 0 : index
    %746 = vector.load %arg22[%c0_196, %c0_197] : memref<1x128xf32, #tpu.memory_space<vmem>>, vector<1x128xf32>
    %747 = vector.broadcast %746 : vector<1x128xf32> to vector<8x128xf32>
    %748 = arith.mulf %745, %747 : vector<8x128xf32>
    %c0_198 = arith.constant 0 : index
    %c0_199 = arith.constant 0 : index
    %749 = vector.load %arg23[%c0_198, %c0_199] : memref<1x128xf32, #tpu.memory_space<vmem>>, vector<1x128xf32>
    %750 = vector.broadcast %749 : vector<1x128xf32> to vector<8x128xf32>
    %751 = arith.addf %748, %750 : vector<8x128xf32>
    %cst_200 = arith.constant 0.000000e+00 : f32
    %752 = vector.broadcast %cst_200 : f32 to vector<8x128xf32>
    %753 = arith.maximumf %751, %752 : vector<8x128xf32>
    %754 = arith.truncf %753 : vector<8x128xf32> to vector<8x128xbf16>
    %c0_201 = arith.constant 0 : index
    %c0_202 = arith.constant 0 : index
    %755 = vector.load %arg26[%c0_201, %c0_202] : memref<128x128xbf16, #tpu.memory_space<vmem>>, vector<128x128xbf16>
    %cst_203 = arith.constant dense<0.000000e+00> : vector<8x128xf32>
    %756 = tpu.matmul %754, %755, %cst_203 {dimension_numbers = #tpu.dot_dimension_numbers<[1], [0], [0], [1], [0, 0, 1, 1], [], []>} : vector<8x128xbf16>, vector<128x128xbf16>, vector<8x128xf32> -> vector<8x128xf32>
    %c0_204 = arith.constant 0 : index
    %c0_205 = arith.constant 0 : index
    %757 = vector.load %arg27[%c0_204, %c0_205] : memref<1x128xf32, #tpu.memory_space<vmem>>, vector<1x128xf32>
    %758 = vector.broadcast %757 : vector<1x128xf32> to vector<8x128xf32>
    %759 = arith.addf %756, %758 : vector<8x128xf32>
    %c0_206 = arith.constant 0 : index
    %c0_207 = arith.constant 0 : index
    %760 = vector.load %arg28[%c0_206, %c0_207] : memref<8x128xf32, #tpu.memory_space<vmem>>, vector<8x128xf32>
    tpu.vector_store %arg28[%c0_206, %c0_207], %759 {strides = array<i32>} : memref<8x128xf32, #tpu.memory_space<vmem>>, vector<8x128xf32>,
    %761 = tpu.iota {dimensions = array<i32: 1>} : vector<8x128xi32>
    %c2_i32 = arith.constant 2 : i32
    %762 = vector.broadcast %c2_i32 : i32 to vector<8x128xi32>
    %763 = arith.cmpi slt, %761, %762 : vector<8x128xi32>
    %cst_208 = arith.constant -1.000000e+30 : f32
    %764 = vector.broadcast %cst_208 : f32 to vector<8x128xf32>
    %765 = arith.select %763, %759, %764 : vector<8x128xi1>, vector<8x128xf32>
    %cst_209 = arith.constant dense<0xFF800000> : vector<8xf32>
    %766 = vector.multi_reduction <maximumf>, %765, %cst_209 [1] : vector<8x128xf32> to vector<8xf32>
    %767 = vector.shape_cast %766 : vector<8xf32> to vector<8x1xf32>
    %768 = vector.broadcast %767 : vector<8x1xf32> to vector<8x128xf32>
    %769 = arith.subf %765, %768 : vector<8x128xf32>
    %770 = math.exp %769 : vector<8x128xf32>
    %cst_210 = arith.constant dense<0.000000e+00> : vector<8xf32>
    %771 = vector.multi_reduction <add>, %770, %cst_210 [1] : vector<8x128xf32> to vector<8xf32>
    %772 = vector.shape_cast %771 : vector<8xf32> to vector<8x1xf32>
    %773 = vector.broadcast %772 : vector<8x1xf32> to vector<8x128xf32>
    %774 = arith.divf %770, %773 : vector<8x128xf32>
    %c0_211 = arith.constant 0 : index
    %c0_212 = arith.constant 0 : index
    %775 = vector.load %arg29[%c0_211, %c0_212] : memref<8x128xf32, #tpu.memory_space<vmem>>, vector<8x128xf32>
    tpu.vector_store %arg29[%c0_211, %c0_212], %774 {strides = array<i32>} : memref<8x128xf32, #tpu.memory_space<vmem>>, vector<8x128xf32>,
    return
  }
}

</mosaic_0001>

<bundles_post_ra>
// kernel: forward.1
= control target key start
LH: loop header
LB: loop body
LE: loop exit
PB: predicated region body
PF: predicated region fallthrough
CT: control target
= control target key end

     0   :  { %s8750_s6 = smov 1   ;;  %s8751_s10 = smov 2   ;;  %s11413_s0 = inlined_call_operand.smem [shape: u32[30], index: -1, kind: input, shape index: {}] }
   0x1   :  { %s8812_s5 = sld [smem:[%s11413_s0]]   ;;  %s8752_s14 = smov 3  }
   0x2   :  { %s8817_s9 = sld [smem:[%s11413_s0 + %s8750_s6]]   ;;  %s8753_s18 = smov 4  }
   0x3   :  { %s8822_s13 = sld [smem:[%s11413_s0 + %s8751_s10]]   ;;  %s8754_s22 = smov 5  }
   0x4   :  { %s8827_s17 = sld [smem:[%s11413_s0 + %s8752_s14]]   ;;  %s8755_s26 = smov 6  }
   0x5   :  { %s8832_s21 = sld [smem:[%s11413_s0 + %s8753_s18]]   ;;  %s8756_s30 = smov 7  }
   0x6   :  { %s8837_s25 = sld [smem:[%s11413_s0 + %s8754_s22]]   ;;  %s8757_s4 = smov 8  }
   0x7   :  { %s8842_s29 = sld [smem:[%s11413_s0 + %s8755_s26]]   ;;  %s8758_s10 = smov 9  }
   0x8   :  { %11696 = sst [smem:[#allocation30_spill]] %s8817_s9  ;;  %s8759_s15 = smov 10  }
   0x9   :  { %11697 = sst [smem:[#allocation31_spill]] %s8822_s13  ;;  %s8760_s20 = smov 11  }
   0xa   :  { %s8847_s3 = sld [smem:[%s11413_s0 + %s8756_s30]]   ;;  %s8761_s26 = smov 12  }
   0xb   :  { %s8852_s8 = sld [smem:[%s11413_s0 + %s8757_s4]]   ;;  %s8762_s1 = smov 13  }
   0xc   :  { %11698 = sst [smem:[#allocation32_spill]] %s8837_s25  ;;  %s8763_s7 = smov 14  }
   0xd   :  { %11699 = sst [smem:[#allocation33_spill]] %s8842_s29  ;;  %s8765_s22 = smov 16  }
   0xe   :  { %s8857_s14 = sld [smem:[%s11413_s0 + %s8758_s10]]   ;;  %s8766_s28 = smov 17  }
   0xf   :  { %s8862_s19 = sld [smem:[%s11413_s0 + %s8759_s15]]   ;;  %s8764_s15 = smov 15  }
  0x10   :  { %s8867_s24 = sld [smem:[%s11413_s0 + %s8760_s20]]  }
  0x11   :  { %11700 = sst [smem:[#allocation34_spill]] %s8852_s8 }
  0x12   :  { %s8872_s30 = sld [smem:[%s11413_s0 + %s8761_s26]]  }
  0x13   :  { %s8877_s6 = sld [smem:[%s11413_s0 + %s8762_s1]]  }
  0x14   :  { %11701 = sst [smem:[#allocation35_spill]] %s8857_s14 }
  0x15   :  { %s8882_s12 = sld [smem:[%s11413_s0 + %s8763_s7]]   ;;  %s8767_s7 = smov 18  }
  0x16   :  { %s8887_s20 = sld [smem:[%s11413_s0 + %s8764_s15]]   ;;  %s8768_s15 = smov 19  }
  0x17   :  { %s8892_s27 = sld [smem:[%s11413_s0 + %s8765_s22]]   ;;  %s8769_s22 = smov 20  }
  0x18   :  { %s8897_s4 = sld [smem:[%s11413_s0 + %s8766_s28]]   ;;  %s8770_s28 = smov 21  }
  0x1b   :  { %11702 = sst [smem:[#allocation36_spill]] %s8882_s12 }
  0x1c   :  { %11703 = sst [smem:[#allocation37_spill]] %s8887_s20 }
  0x1d   :  { %11704 = sst [smem:[#allocation38_spill]] %s8892_s27 }
  0x1e   :  { %11705 = sst [smem:[#allocation39_spill]] %s8897_s4 }
  0x1f   :  { %s8902_s12 = sld [smem:[%s11413_s0 + %s8767_s7]]   ;;  %s8771_s7 = smov 22  }
  0x20   :  { %s8907_s20 = sld [smem:[%s11413_s0 + %s8768_s15]]   ;;  %s8772_s15 = smov 23  }
  0x21   :  { %s8912_s27 = sld [smem:[%s11413_s0 + %s8769_s22]]   ;;  %s8773_s22 = smov 24  }
  0x22   :  { %s8917_s4 = sld [smem:[%s11413_s0 + %s8770_s28]]   ;;  %s8774_s28 = smov 25  }
  0x23   :  { %s8927_s14 = sld [smem:[%s11413_s0 + %s8772_s15]]   ;;  %s8776_s15 = smov 27  }
  0x24   :  { %s8932_s8 = sld [smem:[%s11413_s0 + %s8773_s22]]   ;;  %s8777_s22 = smov 28  }
  0x25   :  { %11706 = sst [smem:[#allocation40_spill]] %s8902_s12 }
  0x26   :  { %s8922_s12 = sld [smem:[%s11413_s0 + %s8771_s7]]   ;;  %s8775_s7 = smov 26  }
  0x27   :  { %s8942_s29 = sld [smem:[%s11413_s0 + %s8775_s7]]  }
  0x28   :  { %11707 = sst [smem:[#allocation41_spill]] %s8917_s4 }
  0x29   :  { %s8937_s4 = sld [smem:[%s11413_s0 + %s8774_s28]]   ;;  %s8778_s28 = smov 29  }
  0x2a   :  { %s8947_s9 = sld [smem:[%s11413_s0 + %s8776_s15]]  }
  0x2b   :  { %s8952_s25 = sld [smem:[%s11413_s0 + %s8777_s22]]  }
  0x2c   :  { %s8957_s13 = sld [smem:[%s11413_s0 + %s8778_s28]]  }
  0x2d   :  { %65 = vsyncpa [#allocation4], 0 }
  0x2e   :  { %66 = vsyncpa [#allocation6], 0 }
  0x2f   :  { %67 = vsyncpa [#allocation9], 0 }
  0x30   :  { %68 = vsyncpa [#allocation12], 0 }
  0x31   :  { %69 = vsyncpa [#allocation15], 0 }
  0x32   :  { %70 = vsyncpa [#allocation18], 0 }
  0x33   :  { %71 = vsyncpa [#allocation21], 0  ;;  %s8779_s7 = smov [#allocation5]   ;;  %s8780_s11 = smov [#allocation8]  }
  0x34   :  { %s100_s10 = sshll.u32 %s8779_s7, 4  ;;  %s126_s15 = sshll.u32 %s8780_s11, 4  ;;  %s101_s10 = int_to_ptr.vmem [resolvable:$true] %s100_s10  ;;  %s127_s15 = int_to_ptr.vmem [resolvable:$true] %s126_s15 }
  0x35   :  { %s8484_s16 = scalar_lea.vmem %s101_s10, 16  ;;  %s8488_s18 = scalar_lea.vmem %s101_s10, 32 }
  0x36   :  { %p8485_p0 = scmp.ne.s32.totalorder %s101_s10, %s8484_s16  ;;  %p8489_p1 = scmp.lt.s32.totalorder %s101_s10, %s101_s10 }
  0x37   :  { %p8490_p2 = scmp.lt.s32.totalorder %s8488_s18, %s8484_s16 }
  0x39   :  { %p8491_p3 = por %p8490_p2, %p8489_p1 }
  0x3b   :  { %p8492_p4 = pnand %p8491_p3, %p8485_p0 }
  0x3d   :  { %8495 = shalt.err (!%p8492_p4)
}
  0x3e   :  { %103 = dma.hbm_to_vmem [thread:$0]  %s8847_s3, 16, %s101_s10, [#allocation6]  }
  0x3f   :  { %s8504_s0 = scalar_lea.vmem %s127_s15, 32  ;;  %p8509_p6 = scmp.lt.s32.totalorder %s127_s15, %s127_s15 }
  0x40   :  { %p8505_p5 = scmp.ne.s32.totalorder %s127_s15, %s8504_s0  ;;  %p8510_p7 = scmp.lt.s32.totalorder %s8504_s0, %s8504_s0 }
  0x42   :  { %p8511_p8 = por %p8510_p7, %p8509_p6 }
  0x44   :  { %p8512_p9 = pnand %p8511_p8, %p8505_p5 }
  0x46   :  { %8515 = shalt.err (!%p8512_p9)
}
  0x47   :  { %129 = dma.hbm_to_vmem [thread:$0]  %s8867_s24, 32, %s127_s15, [#allocation9]  }
  0x48   :  { %s8781_s22 = smov [#allocation11]  }
  0x49   :  { %s148_s23 = sshll.u32 %s8781_s22, 4  ;;  %s149_s23 = int_to_ptr.vmem [resolvable:$true] %s148_s23 }
  0x4a   :  { %s8524_s26 = scalar_lea.vmem %s149_s23, 16  ;;  %s8528_s28 = scalar_lea.vmem %s149_s23, 32 }
  0x4b   :  { %p8525_p10 = scmp.ne.s32.totalorder %s149_s23, %s8524_s26  ;;  %p8529_p11 = scmp.lt.s32.totalorder %s149_s23, %s149_s23 }
  0x4c   :  { %p8530_p12 = scmp.lt.s32.totalorder %s8528_s28, %s8524_s26 }
  0x4e   :  { %p8531_p13 = por %p8530_p12, %p8529_p11 }
  0x50   :  { %p8532_p0 = pnand %p8531_p13, %p8525_p10 }
  0x52   :  { %8535 = shalt.err (!%p8532_p0)
}
  0x53   :  { %151 = dma.hbm_to_vmem [thread:$0]  %s8877_s6, 16, %s149_s23, [#allocation12]  }
  0x54   :  { %s8782_s3 = smov [#allocation14]   ;;  %s8783_s2 = smov [#allocation17]  }
  0x55   :  { %s179_s1 = sshll.u32 %s8782_s3, 4  ;;  %s204_s7 = sshll.u32 %s8783_s2, 4  ;;  %s180_s1 = int_to_ptr.vmem [resolvable:$true] %s179_s1  ;;  %s205_s7 = int_to_ptr.vmem [resolvable:$true] %s204_s7 }
  0x56   :  { %s8544_s10 = scalar_lea.vmem %s180_s1, 2048  ;;  %p8549_p2 = scmp.lt.s32.totalorder %s180_s1, %s180_s1 }
  0x57   :  { %p8545_p1 = scmp.ne.s32.totalorder %s180_s1, %s8544_s10  ;;  %p8550_p3 = scmp.lt.s32.totalorder %s8544_s10, %s8544_s10 }
  0x59   :  { %p8551_p4 = por %p8550_p3, %p8549_p2 }
  0x5b   :  { %p8552_p5 = pnand %p8551_p4, %p8545_p1 }
  0x5d   :  { %8555 = shalt.err (!%p8552_p5)
}
  0x5e   :  { %s8784_s24 = smov 64   ;;  %s8785_s11 = smov 4  }
  0x5f   :  { %185 = dma.hbm_to_vmem [thread:$0]  %s8912_s27, 2048, %s180_s1, [#allocation15], %s8784_s24, %s8784_s24, %s8785_s11  }
  0x60   :  { %s8564_s6 = scalar_lea.vmem %s205_s7, 16  ;;  %s8568_s15 = scalar_lea.vmem %s205_s7, 32 }
  0x61   :  { %p8565_p6 = scmp.ne.s32.totalorder %s205_s7, %s8564_s6  ;;  %p8569_p7 = scmp.lt.s32.totalorder %s205_s7, %s205_s7 }
  0x62   :  { %p8570_p8 = scmp.lt.s32.totalorder %s8568_s15, %s8564_s6 }
  0x64   :  { %p8571_p9 = por %p8570_p8, %p8569_p7 }
  0x66   :  { %p8572_p10 = pnand %p8571_p9, %p8565_p6 }
  0x68   :  { %8575 = shalt.err (!%p8572_p10)
}
  0x69   :  { %207 = dma.hbm_to_vmem [thread:$0]  %s8927_s14, 16, %s205_s7, [#allocation18]  }
  0x6a   :  { %s8786_s16 = smov [#allocation20]   ;;  %s8787_s0 = smov [#allocation3]  }
  0x6b   :  { %s224_s18 = sshll.u32 %s8786_s16, 4  ;;  %s84_s22 = sshll.u32 %s8787_s0, 4  ;;  %s225_s18 = int_to_ptr.vmem [resolvable:$true] %s224_s18  ;;  %s85_s22 = int_to_ptr.vmem [resolvable:$true] %s84_s22 }
  0x6c   :  { %s8584_s23 = scalar_lea.vmem %s225_s18, 16  ;;  %s8588_s26 = scalar_lea.vmem %s225_s18, 32 }
  0x6d   :  { %p8585_p11 = scmp.ne.s32.totalorder %s225_s18, %s8584_s23  ;;  %p8589_p12 = scmp.lt.s32.totalorder %s225_s18, %s225_s18 }
  0x6e   :  { %p8590_p13 = scmp.lt.s32.totalorder %s8588_s26, %s8584_s23 }
  0x70   :  { %p8591_p0 = por %p8590_p13, %p8589_p12 }
  0x72   :  { %p8592_p1 = pnand %p8591_p0, %p8585_p11 }
  0x74   :  { %8595 = shalt.err (!%p8592_p1)
}
  0x75   :  { %227 = dma.hbm_to_vmem [thread:$0]  %s8937_s4, 16, %s225_s18, [#allocation21]  }
  0x76   :  { %s8604_s27 = scalar_lea.vmem %s85_s22, 16  ;;  %s8608_s28 = scalar_lea.vmem %s85_s22, 32 }
  0x77   :  { %p8605_p2 = scmp.ne.s32.totalorder %s85_s22, %s8604_s27  ;;  %p8609_p3 = scmp.lt.s32.totalorder %s85_s22, %s85_s22 }
  0x78   :  { %p8610_p4 = scmp.lt.s32.totalorder %s8608_s28, %s8604_s27 }
  0x7a   :  { %p8611_p5 = por %p8610_p4, %p8609_p3 }
  0x7c   :  { %p8612_p6 = pnand %p8611_p5, %p8605_p2 }
  0x7e   :  { %8615 = shalt.err (!%p8612_p6)
}
  0x7f   :  { %87 = dma.hbm_to_vmem [thread:$0]  %s8827_s17, 16, %s85_s22, [#allocation4]  }
  0x80   :  { %s8788_s14 = smov [#allocation7]  }
  0x81   :  { %s113_s3 = sshll.u32 %s8788_s14, 4  ;;  %s114_s3 = int_to_ptr.vmem [resolvable:$true] %s113_s3 }
  0x82   :  { %s8624_s1 = scalar_lea.vmem %s114_s3, 2048  ;;  %p8629_p8 = scmp.lt.s32.totalorder %s114_s3, %s114_s3 }
  0x83   :  { %p8625_p7 = scmp.ne.s32.totalorder %s114_s3, %s8624_s1  ;;  %p8630_p9 = scmp.lt.s32.totalorder %s8624_s1, %s8624_s1 }
  0x85   :  { %p8631_p10 = por %p8630_p9, %p8629_p8 }
  0x87   :  { %p8632_p11 = pnand %p8631_p10, %p8625_p7 }
  0x89   :  { %8635 = shalt.err (!%p8632_p11)
}
  0x8a   :  { %s8789_s4 = smov 128   ;;  %s8790_s2 = smov 8  }
  0x8b   :  { %119 = dma.hbm_to_vmem [thread:$0]  %s8862_s19, 2048, %s114_s3, [#allocation6], %s8789_s4, %s8789_s4, %s8790_s2  }
  0x8c   :  { %s8791_s7 = smov [#allocation10]   ;;  %s8792_s6 = smov [#allocation13]  }
  0x8d   :  { %s135_s10 = sshll.u32 %s8791_s7, 4  ;;  %s167_s15 = sshll.u32 %s8792_s6, 4  ;;  %s136_s10 = int_to_ptr.vmem [resolvable:$true] %s135_s10  ;;  %s168_s15 = int_to_ptr.vmem [resolvable:$true] %s167_s15 }
  0x8e   :  { %s8644_s17 = scalar_lea.vmem %s136_s10, 2048  ;;  %p8649_p13 = scmp.lt.s32.totalorder %s136_s10, %s136_s10 }
  0x8f   :  { %p8645_p12 = scmp.ne.s32.totalorder %s136_s10, %s8644_s17  ;;  %p8650_p0 = scmp.lt.s32.totalorder %s8644_s17, %s8644_s17 }
  0x91   :  { %p8651_p1 = por %p8650_p0, %p8649_p13 }
  0x93   :  { %p8652_p2 = pnand %p8651_p1, %p8645_p12 }
  0x95   :  { %8655 = shalt.err (!%p8652_p2)
}
  0x96   :  { %141 = dma.hbm_to_vmem [thread:$0]  %s8872_s30, 2048, %s136_s10, [#allocation9], %s8784_s24, %s8784_s24, %s8785_s11  }
  0x97   :  { %s8664_s16 = scalar_lea.vmem %s168_s15, 16384  ;;  %p8669_p4 = scmp.lt.s32.totalorder %s168_s15, %s168_s15 }
  0x98   :  { %p8665_p3 = scmp.ne.s32.totalorder %s168_s15, %s8664_s16  ;;  %p8670_p5 = scmp.lt.s32.totalorder %s8664_s16, %s8664_s16 }
  0x9a   :  { %p8671_p6 = por %p8670_p5, %p8669_p4 }
  0x9c   :  { %p8672_p7 = pnand %p8671_p6, %p8665_p3 }
  0x9e   :  { %8675 = shalt.err (!%p8672_p7)
}
  0x9f   :  { %s8793_s19 = smov 512   ;;  %s8794_s18 = smov 32  }
  0xa0   :  { %173 = dma.hbm_to_vmem [thread:$0]  %s8907_s20, 16384, %s168_s15, [#allocation12], %s8793_s19, %s8793_s19, %s8794_s18  }
  0xa1   :  { %s8795_s0 = smov [#allocation16]   ;;  %s8796_s23 = smov [#allocation19]  }
  0xa2   :  { %s194_s22 = sshll.u32 %s8795_s0, 4  ;;  %s214_s26 = sshll.u32 %s8796_s23, 4  ;;  %s195_s22 = int_to_ptr.vmem [resolvable:$true] %s194_s22  ;;  %s215_s26 = int_to_ptr.vmem [resolvable:$true] %s214_s26 }
  0xa3   :  { %s8684_s27 = scalar_lea.vmem %s195_s22, 16  ;;  %s8688_s30 = scalar_lea.vmem %s195_s22, 32 }
  0xa4   :  { %p8685_p8 = scmp.ne.s32.totalorder %s195_s22, %s8684_s27  ;;  %p8689_p9 = scmp.lt.s32.totalorder %s195_s22, %s195_s22 }
  0xa5   :  { %p8690_p10 = scmp.lt.s32.totalorder %s8688_s30, %s8684_s27 }
  0xa7   :  { %p8691_p11 = por %p8690_p10, %p8689_p9 }
  0xa9   :  { %p8692_p12 = pnand %p8691_p11, %p8685_p8 }
  0xab   :  { %8695 = shalt.err (!%p8692_p12)
}
  0xac   :  { %197 = dma.hbm_to_vmem [thread:$0]  %s8922_s12, 16, %s195_s22, [#allocation15]  }
  0xad   :  { %s8704_s28 = scalar_lea.vmem %s215_s26, 16  ;;  %s8708_s14 = scalar_lea.vmem %s215_s26, 32 }
  0xae   :  { %p8705_p13 = scmp.ne.s32.totalorder %s215_s26, %s8704_s28  ;;  %p8709_p0 = scmp.lt.s32.totalorder %s215_s26, %s215_s26 }
  0xaf   :  { %p8710_p1 = scmp.lt.s32.totalorder %s8708_s14, %s8704_s28 }
  0xb1   :  { %p8711_p2 = por %p8710_p1, %p8709_p0 }
  0xb3   :  { %p8712_p3 = pnand %p8711_p2, %p8705_p13 }
  0xb5   :  { %8715 = shalt.err (!%p8712_p3)
}
  0xb6   :  { %217 = dma.hbm_to_vmem [thread:$0]  %s8932_s8, 16, %s215_s26, [#allocation18]  }
  0xb7   :  { %s8797_s20 = smov [#allocation22]  }
  0xb8   :  { %s233_s3 = sshll.u32 %s8797_s20, 4  ;;  %s234_s3 = int_to_ptr.vmem [resolvable:$true] %s233_s3 }
  0xb9   :  { %s8724_s1 = scalar_lea.vmem %s234_s3, 1024  ;;  %p8729_p5 = scmp.lt.s32.totalorder %s234_s3, %s234_s3 }
  0xba   :  { %p8725_p4 = scmp.ne.s32.totalorder %s234_s3, %s8724_s1  ;;  %p8730_p6 = scmp.lt.s32.totalorder %s8724_s1, %s8724_s1 }
  0xbc   :  { %p8731_p7 = por %p8730_p6, %p8729_p5 }
  0xbe   :  { %p8732_p8 = pnand %p8731_p7, %p8725_p4 }
  0xc0   :  { %8735 = shalt.err (!%p8732_p8)
}
  0xc1   :  { %239 = dma.hbm_to_vmem [thread:$0]  %s8942_s29, 1024, %s234_s3, [#allocation21], %s8784_s24, %s8784_s24, %s8785_s11  }
  0xc2   :  { %8736 = dma.done.wait [#allocation4], 16  }
  0xc3   :  { %8737 = vsyncadd [#allocation4], 4294967280 }
  0xc4   :  { %8738 = dma.done.wait [#allocation6], 2064  }
  0xc5   :  { %8739 = vsyncadd [#allocation6], 4294965232 }
  0xc6   :  { %8740 = dma.done.wait [#allocation9], 2080  }
  0xc7   :  { %8741 = vsyncadd [#allocation9], 4294965216 }
  0xc8   :  { %8742 = dma.done.wait [#allocation12], 16400  }
  0xc9   :  { %8743 = vsyncadd [#allocation12], 4294950896 }
  0xca   :  { %8744 = dma.done.wait [#allocation15], 2064  }
  0xcb   :  { %8745 = vsyncadd [#allocation15], 4294965232 }
  0xcc   :  { %8746 = dma.done.wait [#allocation18], 32  }
  0xcd   :  { %8747 = vsyncadd [#allocation18], 4294967264 }
  0xce   :  { %8748 = dma.done.wait [#allocation21], 1040  }
  0xcf   :  { %8749 = vsyncadd [#allocation21], 4294966256  ;;  %v282_v0 = vld [vmem:[%s8812_s5] sm:$0xff]  ;;  %v284_v1 = vld [vmem:[%s8812_s5 + $0x10] sm:$0xff]  ;;  %v8798_v39 = vmov 0   ;;  %vm8800_vm0 = vmmov 0  }
  0xd0   :  { %v283_v2 = vld [vmem:[%s8812_s5 + $0x8] sm:$0xff]  ;;  %288 = vadd.xlane.f32.xlu0 %v282_v0  ;;  %292 = vadd.xlane.f32.xlu1 %v284_v1  ;;  %v285_v3 = vld [vmem:[%s8812_s5 + $0x18] sm:$0xff]  ;;  %v8005_v22 = vld [vmem:[%s8832_s21 + $0x94] ss:$12 sps:$4 sm:$0xff]   ;;  %s11708_s5 = sld [smem:[#allocation31_spill]]  ;;  %vm668_vm1 = vcmask 261120  }
  0xd1   :  { %v8002_v4 = vld [vmem:[%s8832_s21 + $0xac] ss:$12 sps:$4 sm:$0xff]   ;;  %v8004_v5 = vld [vmem:[%s8832_s21 + $0xa8] ss:$12 sps:$4 sm:$0xff]   ;;  %v8007_v23 = vld [vmem:[%s8832_s21 + $0xb0] ss:$12 sps:$4 sm:$0xff]   ;;  %564 = vmatprep.mubr.bf16.mxu0 %v8798_v39 }
  0xd2   :  { %532 = vmatprep.subr.bf16.mxu0 %v8002_v4  ;;  %v8008_v24 = vld [vmem:[%s8832_s21 + $0x90] ss:$12 sps:$4 sm:$0xff]   ;;  %7654 = vmatprep.subr.bf16.mxu1 %v8007_v23  ;;  %v8011_v26 = vld [vmem:[%s8832_s21 + $0x98] ss:$12 sps:$4 sm:$0xff]   ;;  %v8015_v29 = vld [vmem:[%s8832_s21 + $0x80] ss:$12 sps:$4 sm:$0xff]  }
  0xd3   :  { %533 = vmatpush1.bf16.msra.mxu0 %v8004_v5  ;;  %7655 = vmatpush3.bf16.msra.mxu1 %v8007_v23  ;;  %v8009_v25 = vld [vmem:[%s8832_s21 + $0x7c] ss:$12 sps:$4 sm:$0xff]   ;;  %v8012_v27 = vld [vmem:[%s8832_s21 + $0x78] ss:$12 sps:$4 sm:$0xff]   ;;  %v8016_v30 = vld [vmem:[%s8832_s21 + $0x60] ss:$12 sps:$4 sm:$0xff]  }
  0xd4   :  { %290 = vadd.xlane.f32.xlu0 %v283_v2  ;;  %294 = vadd.xlane.f32.xlu1 %v285_v3  ;;  %v8013_v28 = vld [vmem:[%s8832_s21 + $0x64] ss:$12 sps:$4 sm:$0xff]   ;;  %v8017_v31 = vld [vmem:[%s8832_s21 + $0x4c] ss:$12 sps:$4 sm:$0xff]   ;;  %v8019_v32 = vld [vmem:[%s8832_s21 + $0x68] ss:$12 sps:$4 sm:$0xff]  }
  0xd5   :  { %534 = vmatprep.subr.bf16.mxu0 %v8005_v22  ;;  %7656 = vmatprep.subr.bf16.mxu1 %v8011_v26  ;;  %v8020_v33 = vld [vmem:[%s8832_s21 + $0x48] ss:$12 sps:$4 sm:$0xff]   ;;  %v8023_v35 = vld [vmem:[%s8832_s21 + $0x50] ss:$12 sps:$4 sm:$0xff]   ;;  %v8027_v38 = vld [vmem:[%s8832_s21 + $0x38] ss:$12 sps:$4 sm:$0xff]  }
  0xd6   :  { %v8021_v34 = vld [vmem:[%s8832_s21 + $0x34] ss:$12 sps:$4 sm:$0xff]   ;;  %v8024_v36 = vld [vmem:[%s8832_s21 + $0x30] ss:$12 sps:$4 sm:$0xff]   ;;  %v8028_v40 = vld [vmem:[%s8832_s21 + $0x18] ss:$12 sps:$4 sm:$0xff]  }
  0xd7   :  { %535 = vmatpush1.bf16.msra.mxu0 %v8008_v24  ;;  %7657 = vmatpush3.bf16.msra.mxu1 %v8011_v26  ;;  %v8025_v37 = vld [vmem:[%s8832_s21 + $0x1c] ss:$12 sps:$4 sm:$0xff]   ;;  %v8029_v41 = vld [vmem:[%s8832_s21 + $0x4] ss:$12 sps:$4 sm:$0xff]   ;;  %v8031_v42 = vld [vmem:[%s8832_s21 + $0x20] ss:$12 sps:$4 sm:$0xff]  }
  0xd8   :  { %536 = vmatprep.subr.bf16.mxu0 %v8009_v25  ;;  %7658 = vmatprep.subr.bf16.mxu1 %v8015_v29  ;;  %v8032_v43 = vld [vmem:[%s8832_s21] ss:$12 sps:$4 sm:$0xff]   ;;  %v8033_v44 = vld [vmem:[%s8832_s21 + $0x8] ss:$12 sps:$4 sm:$0xff]   ;;  %s11709_s21 = sld [smem:[#allocation32_spill]]  ;;  %vm937_vm2 = vcmask 1043456  }
  0xd9   :  { %v7123_v59 = vld [vmem:[%s11708_s5] ss:$0 sm:$0xff]  ;;  %s11711_s29 = sld [smem:[#allocation30_spill]]  ;;  %vm881_vm3 = vcmask 64512   ;;  %s8802_s8 = smov 96   ;;  %vm2527_vm4 = vcmask 523264  }
  0xda   :  { %s11712_s12 = sld [smem:[#allocation33_spill]]  ;;  %vm2532_vm5 = vcmask 785408  }
  0xdb   :  { %537 = vmatpush1.bf16.msra.mxu0 %v8012_v27  ;;  %7659 = vmatpush3.bf16.msra.mxu1 %v8015_v29  ;;  %s11714_s11 = sld [smem:[#allocation35_spill]] }
  0xdc   :  { %538 = vmatprep.subr.bf16.mxu0 %v8013_v28  ;;  %7660 = vmatprep.subr.bf16.mxu1 %v8019_v32  ;;  %s11715_s4 = sld [smem:[#allocation38_spill]] }
  0xdd   :  { %s11716_s2 = sld [smem:[#allocation39_spill]] }
  0xde   :  { %s11717_s7 = sld [smem:[#allocation36_spill]] }
  0xdf   :  { %539 = vmatpush1.bf16.msra.mxu0 %v8016_v30  ;;  %7661 = vmatpush3.bf16.msra.mxu1 %v8019_v32  ;;  %s11718_s10 = sld [smem:[#allocation37_spill]] }
  0xe0   :  { %540 = vmatprep.subr.bf16.mxu0 %v8017_v31  ;;  %7662 = vmatprep.subr.bf16.mxu1 %v8023_v35  ;;  %s11848_s6 = sld [smem:[#allocation40_spill]] }
  0xe1   :  { %s12569_s15 = sld [smem:[#allocation41_spill]] }
  0xe3   :  { %541 = vmatpush1.bf16.msra.mxu0 %v8020_v33  ;;  %7663 = vmatpush3.bf16.msra.mxu1 %v8023_v35 }
  0xe4   :  { %542 = vmatprep.subr.bf16.mxu0 %v8021_v34  ;;  %7664 = vmatprep.subr.bf16.mxu1 %v8027_v38 }
  0xe7   :  { %543 = vmatpush1.bf16.msra.mxu0 %v8024_v36  ;;  %7665 = vmatpush3.bf16.msra.mxu1 %v8027_v38 }
  0xe8   :  { %544 = vmatprep.subr.bf16.mxu0 %v8025_v37  ;;  %7666 = vmatprep.subr.bf16.mxu1 %v8031_v42 }
  0xeb   :  { %545 = vmatpush1.bf16.msra.mxu0 %v8028_v40  ;;  %7667 = vmatpush3.bf16.msra.mxu1 %v8031_v42 }
  0xec   :  { %546 = vmatprep.subr.bf16.mxu0 %v8029_v41  ;;  %7668 = vmatprep.subr.bf16.mxu1 %v8033_v44 }
  0xef   :  { %547 = vmatpush1.bf16.msra.mxu0 %v8032_v43  ;;  %7669 = vmatpush3.bf16.msra.mxu1 %v8033_v44 }
 0x159   :  { %v289_v6 = vpop.xlane.xlu0 %288  ;;  %v293_v7 = vpop.xlane.xlu1 %292 }
 0x15a   :  { %v297_v8 = vmul.f32 0.0078125, %v289_v6  ;;  %v299_v9 = vmul.f32 0.0078125, %v293_v7 }
 0x15c   :  { %v8988_v10 = vsub.f32 %v282_v0, %v297_v8  ;;  %v8990_v11 = vsub.f32 %v284_v1, %v299_v9  ;;  %v7124_v0 = vld [vmem:[#allocation3] ss:$0 sm:$0xff] }
 0x15d   :  { %v291_v12 = vpop.xlane.xlu0 %290  ;;  %v295_v13 = vpop.xlane.xlu1 %294 }
 0x15e   :  { %v298_v14 = vmul.f32 0.0078125, %v291_v12  ;;  %v305_v15 = vmul.f32 %v8988_v10, %v8988_v10  ;;  %v300_v16 = vmul.f32 0.0078125, %v295_v13  ;;  %v307_v19 = vmul.f32 %v8990_v11, %v8990_v11 }
 0x15f   :  { %v11418_v13 = vmov 0.0  }
 0x160   :  { %v8994_v17 = vsub.f32 %v283_v2, %v298_v14  ;;  %309 = vadd.xlane.f32.xlu0 %v305_v15  ;;  %v8996_v18 = vsub.f32 %v285_v3, %v300_v16  ;;  %7674 = vmatprep.subr.bf16.mxu1 %v11418_v13  ;;  %v11417_v14 = vlaneseq }
 0x161   :  { %7680 = vmatprep.subr.bf16.mxu0 %v11418_v13 }
 0x162   :  { %v306_v20 = vmul.f32 %v8994_v17, %v8994_v17  ;;  %v308_v21 = vmul.f32 %v8996_v18, %v8996_v18  ;;  %v9052_v15 = vshrl.u32 %v11417_v14, 7  ;;  %v4217_v14 = vld [vmem:[#allocation13 + $0x2e8] sm:$0xff] }
 0x164   :  { %313 = vadd.xlane.f32.xlu0 %v307_v19  ;;  %311 = vadd.xlane.f32.xlu1 %v306_v20  ;;  %v9055_v16 = vsub.s32 1, %v9052_v15  ;;  %v9063_v22 = vsub.s32 0, %v9052_v15 }
 0x166   :  { %11710 = vst [vmem:[#allocation42_spill] sm:$0xff] %v9063_v22 }
 0x168   :  { %315 = vadd.xlane.f32.xlu1 %v308_v21 }
 0x1e9   :  { %v310_v45 = vpop.xlane.xlu0 %309 }
 0x1ea   :  { %v317_v46 = vmul.f32 0.0078125, %v310_v45 }
 0x1ec   :  { %v321_v47 = vadd.f32 1e-12, %v317_v46 }
 0x1ed   :  { %v312_v48 = vpop.xlane.xlu1 %311  ;;  %v314_v49 = vpop.xlane.xlu0 %313 }
 0x1ee   :  { %8110 = vrsqrt.f32 %v321_v47  ;;  %v318_v50 = vmul.f32 0.0078125, %v312_v48  ;;  %v319_v51 = vmul.f32 0.0078125, %v314_v49 }
 0x1f0   :  { %v322_v52 = vadd.f32 1e-12, %v318_v50  ;;  %v323_v53 = vadd.f32 1e-12, %v319_v51 }
 0x1f1   :  { %v316_v54 = vpop.xlane.xlu1 %315 }
 0x1f2   :  { %8112 = vrsqrt.f32 %v322_v52  ;;  %v320_v55 = vmul.f32 0.0078125, %v316_v54 }
 0x1f3   :  { %8114 = vrsqrt.f32 %v323_v53 }
 0x1f4   :  { %v324_v56 = vadd.f32 1e-12, %v320_v55 }
 0x1f6   :  { %8116 = vrsqrt.f32 %v324_v56 }
 0x1fb   :  { %v8111_v57 = vpop.eup %8110 }
 0x1fc   :  { %v329_v58 = vmul.f32 %v8111_v57, %v8988_v10 }
 0x1fe   :  { %v339_v63 = vmul.f32 %v7123_v59, %v329_v58 }
 0x1ff   :  { %v8113_v60 = vpop.eup %8112 }
 0x200   :  { %v8115_v61 = vpop.eup %8114  ;;  %v330_v62 = vmul.f32 %v8113_v60, %v8994_v17  ;;  %v9031_v4 = vadd.f32 %v7124_v0, %v339_v63  ;;  %v11420_v17 = vsub.s32 2, %v9052_v15 }
 0x201   :  { %v331_v1 = vmul.f32 %v8115_v61, %v8990_v11 }
 0x202   :  { %v340_v2 = vmul.f32 %v7123_v59, %v330_v62 }
 0x203   :  { %v8117_v3 = vpop.eup %8116  ;;  %v341_v7 = vmul.f32 %v7123_v59, %v331_v1 }
 0x204   :  { %v9033_v5 = vadd.f32 %v7124_v0, %v340_v2  ;;  %v332_v6 = vmul.f32 %v8117_v3, %v8996_v18  ;;  %v387_v18 = vld [vmem:[%s11709_s21] sm:$0x7] }
 0x205   :  { %v9038_v10 = vadd.f32 %v7124_v0, %v341_v7  ;;  %v396_v19 = vrot.slane %v387_v18, %v9055_v16  ;;  %v400_v21 = vrot.slane %v387_v18, %v11420_v17  ;;  %v392_v29 = vrot.slane %v387_v18, %v9063_v22  ;;  %v4208_v17 = vld [vmem:[#allocation13 + $0x2a0] sm:$0xff] }
 0x206   :  { %v353_v8 = vpack.c.bf16 %v9033_v5, %v9031_v4  ;;  %v342_v9 = vmul.f32 %v7123_v59, %v332_v6  ;;  %v7149_v6 = vld.sshfl [vmem:[%s11711_s29] sm:$0x33 pattern:$0x75316420] }
 0x208   :  { %565 = vmatmul.mubr.bf16.vlgmr.msra.gmra.mxu0 %v353_v8  ;;  %7670 = vmatprep.mubr.bf16.mxu1 %v353_v8  ;;  %v9040_v12 = vadd.f32 %v7124_v0, %v342_v9  ;;  %v8801_v0 = vmov 1966171168   ;;  %v643_v8 = vcombine.high %v7149_v6, %v7149_v6 }
 0x209   :  { %574 = vmatprep.mubr.bf16.mxu0 %v8798_v39  ;;  %v645_v1 = vunpack.c.l.s4 %v8801_v0 }
 0x20a   :  { %v354_v11 = vpack.c.bf16 %v9040_v12, %v9038_v10 }
 0x20b   :  { %v646_v2 = vunpack.c.0.s8 %v645_v1 }
 0x20c   :  { %7671 = vmatmul.mubr.bf16.vlgmr.msra.gmra.mxu1 %v354_v11 }
 0x20d   :  { %7676 = vmatprep.mubr.msk.bf16.mxu1 %vm8800_vm0, %v11418_v13  ;;  %v649_v3 = vsub.s32 %v646_v2, %v9052_v15 }
 0x20f   :  { %v650_v7 = vrot.slane %v7149_v6, %v649_v3 }
 0x210   :  { %575 = vmatmul.mubr.bf16.gmra.mxu0 %v354_v11  ;;  %v657_v11 = vrot.slane %v643_v8, %v649_v3 }
 0x211   :  { %7682 = vmatprep.mubr.msk.bf16.mxu0 %vm8800_vm0, %v11418_v13  ;;  %v9127_v9 = vrot.slane %v650_v7, %v9063_v22 }
 0x2c8   :  { %v566_v20 = vpop.f32.mrf.mxu0 }
 0x2c9   :  { %v567_v38 = vadd.f32 %v566_v20, %v392_v29 }
 0x2ca   :  { %v568_v23 = vpop.f32.mrf.mxu0 }
 0x2cb   :  { %v569_v24 = vadd.f32 %v568_v23, %v396_v19  ;;  %v9081_v45 = vpack.c.bf16 %v567_v38, %v567_v38  ;;  %v9131_v23 = vrot.slane %v657_v11, %v9063_v22 }
 0x2cc   :  { %v570_v25 = vpop.f32.mrf.mxu0  ;;  %v7672_v26 = vpop.f32.mrf.mxu1 }
 0x2cd   :  { %v9065_v27 = vpack.c.bf16 %v569_v24, %v569_v24  ;;  %v9067_v28 = vadd.f32 %v7672_v26, %v400_v21  ;;  %v571_v46 = vadd.f32 %v570_v25, %v392_v29  ;;  %v658_v24 = vcombine.high %v650_v7, %v650_v7 }
 0x2ce   :  { %v572_v30 = vpop.f32.mrf.mxu0  ;;  %v619_v31 = vpop.f32.mrf.mxu1 }
 0x2cf   :  { %v573_v32 = vadd.f32 %v572_v30, %v396_v19  ;;  %v673_v35 = vsel %vm668_vm1, %v9065_v27, 0  ;;  %v620_v50 = vadd.f32 %v619_v31, %v400_v21  ;;  %v9092_v53 = vpack.c.bf16 %v571_v46, %v571_v46 }
 0x2d0   :  { %v576_v33 = vpop.f32.mrf.mxu0  ;;  %v7673_v34 = vpop.f32.mrf.mxu1  ;;  %7675 = vmatpush3.bf16.xpose.msra.mxu1 %v673_v35  ;;  %v659_v35 = vcombine.high %v657_v11, %v657_v11 }
 0x2d1   :  { %v9072_v36 = vpack.c.bf16 %v573_v32, %v573_v32  ;;  %v9074_v37 = vadd.f32 %v7673_v34, %v400_v21  ;;  %7686 = vmatprep.subr.bf16.mxu1 %v11418_v13  ;;  %v577_v54 = vadd.f32 %v576_v33, %v392_v29  ;;  %v9097_v56 = vpack.c.bf16 %v620_v50, %v620_v50 }
 0x2d2   :  { %v578_v40 = vpop.f32.mrf.mxu0  ;;  %v622_v51 = vpop.f32.mrf.mxu1  ;;  %v9136_v34 = vrot.slane %v658_v24, %v9063_v22 }
 0x2d3   :  { %v579_v41 = vadd.f32 %v578_v40, %v396_v19  ;;  %v719_v43 = vsel %vm668_vm1, %v9072_v36, 0  ;;  %v623_v57 = vadd.f32 %v622_v51, %v400_v21  ;;  %v9103_v58 = vpack.c.bf16 %v577_v54, %v577_v54 }
 0x2d4   :  { %v580_v42 = vpop.f32.mrf.mxu0  ;;  %7681 = vmatpush3.bf16.xpose.msra.mxu0 %v719_v43  ;;  %v939_v61 = vsel %vm937_vm2, %v9097_v56, 0 }
 0x2d5   :  { %v9079_v44 = vpack.c.bf16 %v579_v41, %v579_v41  ;;  %7692 = vmatprep.subr.bf16.mxu0 %v11418_v13  ;;  %v581_v59 = vadd.f32 %v580_v42, %v392_v29  ;;  %v9106_v60 = vpack.c.bf16 %v623_v57, %v623_v57 }
 0x2d6   :  { %v582_v47 = vpop.f32.mrf.mxu0 }
 0x2d7   :  { %v583_v48 = vadd.f32 %v582_v47, %v396_v19  ;;  %v765_v49 = vsel %vm668_vm1, %v9079_v44, 0  ;;  %7677 = vmatmul.mubr.msk.bf16.vlgmr.msra.gmra.mxu1 %vm668_vm1, %v9081_v45  ;;  %v9114_v62 = vpack.c.bf16 %v581_v59, %v581_v59  ;;  %v985_v63 = vsel %vm937_vm2, %v9106_v60, 0 }
 0x2d8   :  { %7687 = vmatpush3.bf16.xpose.msra.mxu1 %v765_v49  ;;  %7688 = vmatprep.mubr.msk.bf16.mxu1 %vm8800_vm0, %v11418_v13 }
 0x2d9   :  { %v9088_v52 = vpack.c.bf16 %v583_v48, %v583_v48  ;;  %7698 = vmatprep.subr.bf16.mxu1 %v11418_v13  ;;  %v9141_v48 = vrot.slane %v659_v35, %v9063_v22 }
 0x2db   :  { %v811_v55 = vsel %vm668_vm1, %v9088_v52, 0  ;;  %7683 = vmatmul.mubr.msk.bf16.vlgmr.msra.gmra.mxu0 %vm668_vm1, %v9092_v53 }
 0x2dc   :  { %7693 = vmatpush3.bf16.xpose.msra.mxu0 %v811_v55  ;;  %7694 = vmatprep.mubr.msk.bf16.mxu0 %vm8800_vm0, %v11418_v13 }
 0x2dd   :  { %7704 = vmatprep.subr.bf16.mxu0 %v11418_v13 }
 0x2df   :  { %7689 = vmatmul.mubr.msk.bf16.vlgmr.msra.gmra.mxu1 %vm668_vm1, %v9103_v58 }
 0x2e0   :  { %7699 = vmatpush3.bf16.msra.mxu1 %v939_v61  ;;  %7700 = vmatprep.mubr.msk.bf16.mxu1 %vm8800_vm0, %v11418_v13 }
 0x2e1   :  { %7710 = vmatprep.subr.bf16.mxu1 %v11418_v13 }
 0x2e3   :  { %7695 = vmatmul.mubr.msk.bf16.vlgmr.msra.gmra.mxu0 %vm668_vm1, %v9114_v62 }
 0x2e4   :  { %7705 = vmatpush3.bf16.msra.mxu0 %v985_v63  ;;  %7706 = vmatprep.mubr.msk.bf16.mxu0 %vm8800_vm0, %v11418_v13 }
 0x2e5   :  { %7716 = vmatprep.subr.bf16.mxu0 %v11418_v13 }
 0x397   :  { %v709_v18 = vpop.f32.mrf.mxu1 }
 0x398   :  { %v853_v19 = vmul.f32 0.17677669, %v709_v18 }
 0x399   :  { %v7678_v20 = vpop.f32.mrf.mxu1 }
 0x39a   :  { %v877_v21 = vadd.f32 %v9127_v9, %v853_v19 }
 0x39b   :  { %v712_v25 = vpop.f32.mrf.mxu1  ;;  %v755_v26 = vpop.f32.mrf.mxu0 }
 0x39c   :  { %v854_v29 = vmul.f32 0.17677669, %v755_v26  ;;  %v882_v30 = vsel %vm881_vm3, %v877_v21, -inf }
 0x39d   :  { %883 = vmax.xlane.f32.xlu0 %v882_v30  ;;  %v7679_v31 = vpop.f32.mrf.mxu1  ;;  %v7684_v32 = vpop.f32.mrf.mxu0 }
 0x39e   :  { %v878_v33 = vadd.f32 %v9131_v23, %v854_v29 }
 0x39f   :  { %v758_v38 = vpop.f32.mrf.mxu0  ;;  %v801_v40 = vpop.f32.mrf.mxu1 }
 0x3a0   :  { %v855_v41 = vmul.f32 0.17677669, %v801_v40  ;;  %v885_v42 = vsel %vm881_vm3, %v878_v33, -inf }
 0x3a1   :  { %886 = vmax.xlane.f32.xlu1 %v885_v42  ;;  %v7685_v43 = vpop.f32.mrf.mxu0  ;;  %v7690_v46 = vpop.f32.mrf.mxu1 }
 0x3a2   :  { %v879_v47 = vadd.f32 %v9136_v34, %v855_v41  ;;  %v9168_v43 = vpack.c.bf16 %v9067_v28, %v9067_v28 }
 0x3a3   :  { %v804_v49 = vpop.f32.mrf.mxu1  ;;  %v847_v50 = vpop.f32.mrf.mxu0 }
 0x3a4   :  { %v856_v51 = vmul.f32 0.17677669, %v847_v50  ;;  %v888_v54 = vsel %vm881_vm3, %v879_v47, -inf  ;;  %v9172_v50 = vpack.c.bf16 %v9074_v37, %v9074_v37 }
 0x3a5   :  { %v7696_v55 = vpop.f32.mrf.mxu0  ;;  %889 = vmax.xlane.f32.xlu0 %v888_v54  ;;  %v7691_v57 = vpop.f32.mrf.mxu1 }
 0x3a6   :  { %v880_v59 = vadd.f32 %v9141_v48, %v856_v51  ;;  %v1031_v51 = vsel %vm937_vm2, %v9168_v43, 0  ;;  %v1077_v37 = vsel %vm937_vm2, %v9172_v50, 0 }
 0x3a7   :  { %v850_v61 = vpop.f32.mrf.mxu0 }
 0x3a8   :  { %v891_v63 = vsel %vm881_vm3, %v880_v59, -inf }
 0x3a9   :  { %892 = vmax.xlane.f32.xlu1 %v891_v63  ;;  %v7697_v0 = vpop.f32.mrf.mxu0 }
 0x426   :  { %v884_v1 = vpop.xlane.xlu0 %883 }
 0x427   :  { %v894_v2 = vsub.f32 %v877_v21, %v884_v1 }
 0x429   :  { %v898_v3 = vmul.f32 1.442695, %v894_v2 }
 0x42a   :  { %v887_v6 = vpop.xlane.xlu1 %886 }
 0x42b   :  { %8118 = vpow2.f32 %v898_v3  ;;  %v895_v7 = vsub.f32 %v878_v33, %v887_v6 }
 0x42d   :  { %v900_v8 = vmul.f32 1.442695, %v895_v7 }
 0x42e   :  { %v890_v11 = vpop.xlane.xlu0 %889 }
 0x42f   :  { %8120 = vpow2.f32 %v900_v8  ;;  %v896_v18 = vsub.f32 %v879_v47, %v890_v11 }
 0x431   :  { %v902_v19 = vmul.f32 1.442695, %v896_v18 }
 0x432   :  { %v893_v30 = vpop.xlane.xlu1 %892 }
 0x433   :  { %8122 = vpow2.f32 %v902_v19  ;;  %v897_v31 = vsub.f32 %v880_v59, %v893_v30 }
 0x435   :  { %v904_v32 = vmul.f32 1.442695, %v897_v31 }
 0x437   :  { %8124 = vpow2.f32 %v904_v32 }
 0x438   :  { %v8119_v20 = vpop.eup %8118 }
 0x439   :  { %v906_v24 = vsel %vm881_vm3, %v8119_v20, 0.0 }
 0x43a   :  { %907 = vadd.xlane.f32.xlu0 %v906_v24 }
 0x43c   :  { %v8121_v25 = vpop.eup %8120 }
 0x43d   :  { %v909_v26 = vsel %vm881_vm3, %v8121_v25, 0.0 }
 0x43e   :  { %910 = vadd.xlane.f32.xlu1 %v909_v26 }
 0x440   :  { %v8123_v29 = vpop.eup %8122 }
 0x441   :  { %v912_v21 = vsel %vm881_vm3, %v8123_v29, 0.0 }
 0x442   :  { %913 = vadd.xlane.f32.xlu0 %v912_v21 }
 0x444   :  { %v8125_v33 = vpop.eup %8124 }
 0x445   :  { %v915_v35 = vsel %vm881_vm3, %v8125_v33, 0.0 }
 0x44f   :  { %1175 = vrot.lane.b32.xlu1 %v9072_v36, %s8802_s8 }
 0x453   :  { %1120 = vrot.lane.b32.xlu1 %v9081_v45, %s8802_s8 }
 0x458   :  { %1123 = vrot.lane.b32.xlu0 %v9065_v27, %s8802_s8 }
 0x45c   :  { %1227 = vrot.lane.b32.xlu0 %v9079_v44, %s8802_s8 }
 0x460   :  { %1224 = vrot.lane.b32.xlu0 %v9103_v58, %s8802_s8 }
 0x477   :  { %916 = vadd.xlane.f32.xlu1 %v915_v35 }
 0x488   :  { %1172 = vrot.lane.b32.xlu1 %v9092_v53, %s8802_s8 }
 0x48c   :  { %1279 = vrot.lane.b32.xlu1 %v9088_v52, %s8802_s8 }
 0x490   :  { %1276 = vrot.lane.b32.xlu1 %v9114_v62, %s8802_s8 }
 0x4c3   :  { %v908_v38 = vpop.xlane.xlu0 %907 }
 0x4c4   :  { %8126 = vrcp.f32 %v908_v38 }
 0x4c7   :  { %v911_v40 = vpop.xlane.xlu1 %910 }
 0x4c8   :  { %8128 = vrcp.f32 %v911_v40 }
 0x4cb   :  { %v914_v41 = vpop.xlane.xlu0 %913  ;;  %v1176_v0 = vpop.permute.xlu1 %1175 }
 0x4cc   :  { %8130 = vrcp.f32 %v914_v41 }
 0x4cf   :  { %v1124_v59 = vpop.permute.xlu0 %1123  ;;  %v1121_v2 = vpop.permute.xlu1 %1120 }
 0x4d0   :  { %v1129_v63 = vsel %vm668_vm1, %v1124_v59, 0 }
 0x4d1   :  { %v8127_v42 = vpop.eup %8126 }
 0x4d2   :  { %v919_v46 = vmul.f32 %v8127_v42, %v8119_v20  ;;  %v1181_v20 = vsel %vm668_vm1, %v1176_v0, 0 }
 0x4d3   :  { %v1228_v1 = vpop.permute.xlu0 %1227 }
 0x4d4   :  { %v926_v47 = vpack.c.bf16 %v919_v46, %v919_v46  ;;  %v1233_v3 = vsel %vm668_vm1, %v1228_v1, 0 }
 0x4d5   :  { %v8129_v49 = vpop.eup %8128 }
 0x4d6   :  { %7701 = vmatmul.mubr.msk.bf16.vlgmr.msra.gmra.mxu1 %vm881_vm3, %v926_v47  ;;  %v921_v54 = vmul.f32 %v8129_v49, %v8121_v25 }
 0x4d7   :  { %7711 = vmatpush3.bf16.msra.mxu1 %v1031_v51  ;;  %7712 = vmatprep.mubr.msk.bf16.mxu1 %vm8800_vm0, %v11418_v13  ;;  %v1225_v6 = vpop.permute.xlu0 %1224 }
 0x4d8   :  { %v927_v55 = vpack.c.bf16 %v921_v54, %v921_v54  ;;  %7722 = vmatprep.subr.bf16.mxu1 %v11418_v13 }
 0x4d9   :  { %v8131_v28 = vpop.eup %8130 }
 0x4da   :  { %7707 = vmatmul.mubr.msk.bf16.vlgmr.msra.gmra.mxu0 %vm881_vm3, %v927_v55  ;;  %v923_v57 = vmul.f32 %v8131_v28, %v8123_v29 }
 0x4db   :  { %7717 = vmatpush3.bf16.msra.mxu0 %v1077_v37  ;;  %7718 = vmatprep.mubr.msk.bf16.mxu0 %vm8800_vm0, %v11418_v13 }
 0x4dc   :  { %v928_v61 = vpack.c.bf16 %v923_v57, %v923_v57  ;;  %7728 = vmatprep.subr.bf16.mxu0 %v11418_v13 }
 0x4de   :  { %7713 = vmatmul.mubr.msk.bf16.vlgmr.msra.gmra.mxu1 %vm881_vm3, %v928_v61 }
 0x4df   :  { %7723 = vmatpush3.bf16.xpose.msra.mxu1 %v1129_v63  ;;  %7724 = vmatprep.mubr.msk.bf16.mxu1 %vm8800_vm0, %v11418_v13 }
 0x4e0   :  { %7734 = vmatprep.subr.bf16.mxu1 %v11418_v13 }
 0x4e6   :  { %7725 = vmatmul.mubr.msk.bf16.vlgmr.msra.gmra.mxu1 %vm668_vm1, %v1121_v2 }
 0x4e7   :  { %7735 = vmatpush3.bf16.xpose.msra.mxu1 %v1233_v3  ;;  %7736 = vmatprep.mubr.msk.bf16.mxu1 %vm8800_vm0, %v11418_v13 }
 0x4e8   :  { %7746 = vmatprep.subr.bf16.mxu1 %v11418_v13 }
 0x4ee   :  { %7737 = vmatmul.mubr.msk.bf16.vlgmr.msra.gmra.mxu1 %vm668_vm1, %v1225_v6 }
 0x4ef   :  { %7748 = vmatprep.mubr.msk.bf16.mxu1 %vm8800_vm0, %v11418_v13 }
 0x500   :  { %v917_v7 = vpop.xlane.xlu1 %916 }
 0x501   :  { %8132 = vrcp.f32 %v917_v7 }
 0x504   :  { %v1173_v19 = vpop.permute.xlu1 %1172 }
 0x508   :  { %v1280_v24 = vpop.permute.xlu1 %1279 }
 0x509   :  { %v1285_v25 = vsel %vm668_vm1, %v1280_v24, 0 }
 0x50c   :  { %v1277_v26 = vpop.permute.xlu1 %1276 }
 0x50e   :  { %v8133_v8 = vpop.eup %8132 }
 0x50f   :  { %v925_v11 = vmul.f32 %v8133_v8, %v8125_v33 }
 0x511   :  { %v929_v18 = vpack.c.bf16 %v925_v11, %v925_v11 }
 0x513   :  { %7719 = vmatmul.mubr.msk.bf16.vlgmr.msra.gmra.mxu0 %vm881_vm3, %v929_v18 }
 0x514   :  { %7729 = vmatpush3.bf16.xpose.msra.mxu0 %v1181_v20  ;;  %7730 = vmatprep.mubr.msk.bf16.mxu0 %vm8800_vm0, %v11418_v13 }
 0x515   :  { %7740 = vmatprep.subr.bf16.mxu0 %v11418_v13 }
 0x51b   :  { %7731 = vmatmul.mubr.msk.bf16.vlgmr.msra.gmra.mxu0 %vm668_vm1, %v1173_v19 }
 0x51c   :  { %7741 = vmatpush3.bf16.xpose.msra.mxu0 %v1285_v25  ;;  %7742 = vmatprep.mubr.msk.bf16.mxu0 %vm8800_vm0, %v11418_v13 }
 0x51d   :  { %7752 = vmatprep.subr.bf16.mxu0 %v11418_v13 }
 0x523   :  { %7743 = vmatmul.mubr.msk.bf16.vlgmr.msra.gmra.mxu0 %vm668_vm1, %v1277_v26 }
 0x524   :  { %7754 = vmatprep.mubr.msk.bf16.mxu0 %vm8800_vm0, %v11418_v13 }
 0x596   :  { %v9212_v29 = vpop.f32.mrf.mxu1 }
 0x598   :  { %v7702_v21 = vpop.f32.mrf.mxu1 }
 0x59a   :  { %v978_v30 = vpop.f32.mrf.mxu1  ;;  %v9214_v31 = vpop.f32.mrf.mxu0 }
 0x59c   :  { %v7703_v32 = vpop.f32.mrf.mxu1  ;;  %v7708_v33 = vpop.f32.mrf.mxu0 }
 0x59e   :  { %v1024_v35 = vpop.f32.mrf.mxu0  ;;  %v9216_v38 = vpop.f32.mrf.mxu1 }
 0x5a0   :  { %v7709_v40 = vpop.f32.mrf.mxu0  ;;  %v7714_v41 = vpop.f32.mrf.mxu1 }
 0x5a2   :  { %v1070_v42 = vpop.f32.mrf.mxu1 }
 0x5a4   :  { %v7715_v46 = vpop.f32.mrf.mxu1 }
 0x5a6   :  { %v1165_v47 = vpop.f32.mrf.mxu1 }
 0x5a7   :  { %v1327_v49 = vmul.f32 0.17677669, %v1165_v47 }
 0x5a8   :  { %v7726_v51 = vpop.f32.mrf.mxu1 }
 0x5a9   :  { %v1331_v54 = vadd.f32 %v1327_v49, %v9127_v9 }
 0x5aa   :  { %v1168_v55 = vpop.f32.mrf.mxu1 }
 0x5ab   :  { %v1335_v28 = vsel %vm881_vm3, %v1331_v54, -inf }
 0x5ac   :  { %1336 = vmax.xlane.f32.xlu0 %v1335_v28  ;;  %v7727_v37 = vpop.f32.mrf.mxu1 }
 0x5ae   :  { %v1269_v57 = vpop.f32.mrf.mxu1 }
 0x5af   :  { %v1329_v59 = vmul.f32 0.17677669, %v1269_v57 }
 0x5b0   :  { %v7738_v61 = vpop.f32.mrf.mxu1 }
 0x5b1   :  { %v1333_v63 = vadd.f32 %v1329_v59, %v9136_v34 }
 0x5b2   :  { %v1272_v0 = vpop.f32.mrf.mxu1 }
 0x5b3   :  { %v1341_v1 = vsel %vm881_vm3, %v1333_v63, -inf }
 0x5b4   :  { %1342 = vmax.xlane.f32.xlu0 %v1341_v1  ;;  %v7739_v2 = vpop.f32.mrf.mxu1 }
 0x5d3   :  { %v9222_v3 = vpop.f32.mrf.mxu0 }
 0x5d5   :  { %v7720_v6 = vpop.f32.mrf.mxu0 }
 0x5d7   :  { %v1116_v7 = vpop.f32.mrf.mxu0 }
 0x5d9   :  { %v7721_v8 = vpop.f32.mrf.mxu0 }
 0x5db   :  { %v1217_v11 = vpop.f32.mrf.mxu0 }
 0x5dc   :  { %v1328_v18 = vmul.f32 0.17677669, %v1217_v11 }
 0x5dd   :  { %v7732_v19 = vpop.f32.mrf.mxu0 }
 0x5de   :  { %v1332_v20 = vadd.f32 %v1328_v18, %v9131_v23 }
 0x5df   :  { %v1220_v24 = vpop.f32.mrf.mxu0 }
 0x5e0   :  { %v1338_v25 = vsel %vm881_vm3, %v1332_v20, -inf }
 0x5e1   :  { %1339 = vmax.xlane.f32.xlu1 %v1338_v25  ;;  %v7733_v26 = vpop.f32.mrf.mxu0 }
 0x5e3   :  { %v1321_v21 = vpop.f32.mrf.mxu0 }
 0x5e4   :  { %v1330_v30 = vmul.f32 0.17677669, %v1321_v21 }
 0x5e5   :  { %v7744_v32 = vpop.f32.mrf.mxu0 }
 0x5e6   :  { %v1334_v33 = vadd.f32 %v1330_v30, %v9141_v48 }
 0x5e7   :  { %v1324_v35 = vpop.f32.mrf.mxu0 }
 0x5e8   :  { %v1344_v40 = vsel %vm881_vm3, %v1334_v33, -inf }
 0x5e9   :  { %v7745_v41 = vpop.f32.mrf.mxu0  ;;  %1345 = vmax.xlane.f32.xlu0 %v1344_v40 }
 0x5f2   :  { %1433 = vrot.lane.b32.xlu1 %v9106_v60, %s8802_s8 }
 0x5f6   :  { %1482 = vrot.lane.b32.xlu1 %v9168_v43, %s8802_s8 }
 0x5fa   :  { %1531 = vrot.lane.b32.xlu1 %v9172_v50, %s8802_s8 }
 0x635   :  { %v1337_v42 = vpop.xlane.xlu0 %1336 }
 0x636   :  { %v1347_v46 = vsub.f32 %v1331_v54, %v1337_v42 }
 0x638   :  { %v1351_v47 = vmul.f32 1.442695, %v1347_v46 }
 0x63a   :  { %8134 = vpow2.f32 %v1351_v47 }
 0x63d   :  { %v1343_v55 = vpop.xlane.xlu0 %1342 }
 0x63e   :  { %v1349_v28 = vsub.f32 %v1333_v63, %v1343_v55 }
 0x640   :  { %v1355_v37 = vmul.f32 1.442695, %v1349_v28 }
 0x642   :  { %8136 = vpow2.f32 %v1355_v37 }
 0x647   :  { %v8135_v49 = vpop.eup %8134 }
 0x648   :  { %v1359_v51 = vsel %vm881_vm3, %v8135_v49, 0.0 }
 0x649   :  { %1360 = vadd.xlane.f32.xlu0 %v1359_v51 }
 0x64f   :  { %v8137_v1 = vpop.eup %8136 }
 0x650   :  { %v1365_v7 = vsel %vm881_vm3, %v8137_v1, 0.0 }
 0x65f   :  { %1384 = vrot.lane.b32.xlu0 %v9097_v56, %s8802_s8 }
 0x66a   :  { %v1340_v57 = vpop.xlane.xlu1 %1339 }
 0x66b   :  { %v1348_v59 = vsub.f32 %v1332_v20, %v1340_v57 }
 0x66d   :  { %v1353_v61 = vmul.f32 1.442695, %v1348_v59 }
 0x66e   :  { %v1434_v0 = vpop.permute.xlu1 %1433 }
 0x66f   :  { %8138 = vpow2.f32 %v1353_v61  ;;  %v1439_v54 = vsel %vm937_vm2, %v1434_v0, 0 }
 0x670   :  { %7753 = vmatpush3.bf16.msra.mxu0 %v1439_v54 }
 0x671   :  { %7764 = vmatprep.subr.bf16.mxu0 %v11418_v13 }
 0x672   :  { %v1346_v63 = vpop.xlane.xlu0 %1345  ;;  %v1483_v30 = vpop.permute.xlu1 %1482 }
 0x673   :  { %v1350_v8 = vsub.f32 %v1334_v33, %v1346_v63  ;;  %v1488_v33 = vsel %vm937_vm2, %v1483_v30, 0 }
 0x675   :  { %v1357_v11 = vmul.f32 1.442695, %v1350_v8 }
 0x676   :  { %v1532_v35 = vpop.permute.xlu1 %1531 }
 0x677   :  { %8140 = vpow2.f32 %v1357_v11  ;;  %v1537_v37 = vsel %vm937_vm2, %v1532_v35, 0 }
 0x67c   :  { %v8139_v2 = vpop.eup %8138 }
 0x67d   :  { %v1362_v6 = vsel %vm881_vm3, %v8139_v2, 0.0 }
 0x67e   :  { %1363 = vadd.xlane.f32.xlu1 %v1362_v6  ;;  %1366 = vadd.xlane.f32.xlu0 %v1365_v7 }
 0x684   :  { %v8141_v18 = vpop.eup %8140 }
 0x685   :  { %v1368_v19 = vsel %vm881_vm3, %v8141_v18, 0.0 }
 0x68f   :  { %1631 = vrot.lane.b32.xlu1 %v9072_v36, %s8784_s24 }
 0x694   :  { %1581 = vrot.lane.b32.xlu0 %v9065_v27, %s8784_s24 }
 0x698   :  { %1579 = vrot.lane.b32.xlu0 %v9081_v45, %s8784_s24 }
 0x69c   :  { %1681 = vrot.lane.b32.xlu0 %v9079_v44, %s8784_s24 }
 0x6a0   :  { %1679 = vrot.lane.b32.xlu0 %v9103_v58, %s8784_s24 }
 0x6b3   :  { %1369 = vadd.xlane.f32.xlu1 %v1368_v19 }
 0x6c4   :  { %1629 = vrot.lane.b32.xlu1 %v9092_v53, %s8784_s24 }
 0x6c8   :  { %1731 = vrot.lane.b32.xlu1 %v9088_v52, %s8784_s24 }
 0x6cc   :  { %1729 = vrot.lane.b32.xlu1 %v9114_v62, %s8784_s24 }
 0x6d2   :  { %v1361_v20 = vpop.xlane.xlu0 %1360 }
 0x6d3   :  { %8142 = vrcp.f32 %v1361_v20 }
 0x6d6   :  { %v1385_v24 = vpop.permute.xlu0 %1384 }
 0x6d7   :  { %v1390_v25 = vsel %vm937_vm2, %v1385_v24, 0 }
 0x6d8   :  { %7747 = vmatpush3.bf16.msra.mxu1 %v1390_v25 }
 0x6d9   :  { %7758 = vmatprep.subr.bf16.mxu1 %v11418_v13 }
 0x6e0   :  { %v8143_v26 = vpop.eup %8142 }
 0x6e1   :  { %v1372_v21 = vmul.f32 %v8143_v26, %v8135_v49 }
 0x6e3   :  { %v1379_v32 = vpack.c.bf16 %v1372_v21, %v1372_v21 }
 0x6e5   :  { %7749 = vmatmul.mubr.msk.bf16.vlgmr.msra.gmra.mxu1 %vm881_vm3, %v1379_v32 }
 0x6e6   :  { %7759 = vmatpush3.bf16.msra.mxu1 %v1488_v33  ;;  %7760 = vmatprep.mubr.msk.bf16.mxu1 %vm8800_vm0, %v11418_v13 }
 0x6e7   :  { %7770 = vmatprep.subr.bf16.mxu1 %v11418_v13 }
 0x707   :  { %v1364_v40 = vpop.xlane.xlu1 %1363  ;;  %v1367_v41 = vpop.xlane.xlu0 %1366 }
 0x708   :  { %8144 = vrcp.f32 %v1364_v40 }
 0x709   :  { %8146 = vrcp.f32 %v1367_v41 }
 0x70b   :  { %v1582_v42 = vpop.permute.xlu0 %1581 }
 0x70c   :  { %v1587_v59 = vsel %vm668_vm1, %v1582_v42, 0 }
 0x70f   :  { %v1580_v57 = vpop.permute.xlu0 %1579 }
 0x713   :  { %v1682_v61 = vpop.permute.xlu0 %1681 }
 0x714   :  { %v1687_v0 = vsel %vm668_vm1, %v1682_v61, 0 }
 0x715   :  { %v8145_v46 = vpop.eup %8144 }
 0x716   :  { %v8147_v47 = vpop.eup %8146  ;;  %v1374_v49 = vmul.f32 %v8145_v46, %v8139_v2 }
 0x717   :  { %v1376_v51 = vmul.f32 %v8147_v47, %v8137_v1  ;;  %v1680_v54 = vpop.permute.xlu0 %1679  ;;  %v1632_v1 = vpop.permute.xlu1 %1631 }
 0x718   :  { %v1380_v55 = vpack.c.bf16 %v1374_v49, %v1374_v49  ;;  %v1637_v11 = vsel %vm668_vm1, %v1632_v1, 0 }
 0x719   :  { %v1381_v28 = vpack.c.bf16 %v1376_v51, %v1376_v51 }
 0x71a   :  { %7755 = vmatmul.mubr.msk.bf16.vlgmr.msra.gmra.mxu0 %vm881_vm3, %v1380_v55 }
 0x71b   :  { %7761 = vmatmul.mubr.msk.bf16.vlgmr.msra.gmra.mxu1 %vm881_vm3, %v1381_v28  ;;  %7765 = vmatpush3.bf16.msra.mxu0 %v1537_v37 }
 0x71c   :  { %7771 = vmatpush3.bf16.xpose.msra.mxu1 %v1587_v59  ;;  %7772 = vmatprep.mubr.msk.bf16.mxu1 %vm8800_vm0, %v11418_v13 }
 0x71d   :  { %7782 = vmatprep.subr.bf16.mxu1 %v11418_v13  ;;  %7766 = vmatprep.mubr.msk.bf16.mxu0 %vm8800_vm0, %v11418_v13 }
 0x71e   :  { %7776 = vmatprep.subr.bf16.mxu0 %v11418_v13 }
 0x723   :  { %7773 = vmatmul.mubr.msk.bf16.vlgmr.msra.gmra.mxu1 %vm668_vm1, %v1580_v57 }
 0x724   :  { %7783 = vmatpush3.bf16.xpose.msra.mxu1 %v1687_v0  ;;  %7784 = vmatprep.mubr.msk.bf16.mxu1 %vm8800_vm0, %v11418_v13 }
 0x725   :  { %7794 = vmatprep.subr.bf16.mxu1 %v11418_v13 }
 0x72b   :  { %7785 = vmatmul.mubr.msk.bf16.vlgmr.msra.gmra.mxu1 %vm668_vm1, %v1680_v54 }
 0x72c   :  { %7796 = vmatprep.mubr.msk.bf16.mxu1 %vm8800_vm0, %v11418_v13 }
 0x73c   :  { %v1370_v2 = vpop.xlane.xlu1 %1369 }
 0x73d   :  { %8148 = vrcp.f32 %v1370_v2 }
 0x740   :  { %v1630_v8 = vpop.permute.xlu1 %1629 }
 0x744   :  { %v1732_v19 = vpop.permute.xlu1 %1731 }
 0x745   :  { %v1737_v20 = vsel %vm668_vm1, %v1732_v19, 0 }
 0x74a   :  { %v8149_v6 = vpop.eup %8148 }
 0x74b   :  { %v1378_v7 = vmul.f32 %v8149_v6, %v8141_v18  ;;  %v1730_v18 = vpop.permute.xlu1 %1729 }
 0x74d   :  { %v1382_v63 = vpack.c.bf16 %v1378_v7, %v1378_v7 }
 0x74f   :  { %7767 = vmatmul.mubr.msk.bf16.vlgmr.msra.gmra.mxu0 %vm881_vm3, %v1382_v63 }
 0x750   :  { %7777 = vmatpush3.bf16.xpose.msra.mxu0 %v1637_v11  ;;  %7778 = vmatprep.mubr.msk.bf16.mxu0 %vm8800_vm0, %v11418_v13 }
 0x751   :  { %7788 = vmatprep.subr.bf16.mxu0 %v11418_v13 }
 0x757   :  { %7779 = vmatmul.mubr.msk.bf16.vlgmr.msra.gmra.mxu0 %vm668_vm1, %v1630_v8 }
 0x758   :  { %7789 = vmatpush3.bf16.xpose.msra.mxu0 %v1737_v20  ;;  %7790 = vmatprep.mubr.msk.bf16.mxu0 %vm8800_vm0, %v11418_v13 }
 0x759   :  { %7800 = vmatprep.subr.bf16.mxu0 %v11418_v13 }
 0x75f   :  { %7791 = vmatmul.mubr.msk.bf16.vlgmr.msra.gmra.mxu0 %vm668_vm1, %v1730_v18 }
 0x760   :  { %7802 = vmatprep.mubr.msk.bf16.mxu0 %vm8800_vm0, %v11418_v13 }
 0x7a5   :  { %v9296_v24 = vpop.f32.mrf.mxu1 }
 0x7a7   :  { %v7750_v25 = vpop.f32.mrf.mxu1 }
 0x7a9   :  { %v1429_v26 = vpop.f32.mrf.mxu1 }
 0x7ab   :  { %v7751_v21 = vpop.f32.mrf.mxu1 }
 0x7da   :  { %v9298_v30 = vpop.f32.mrf.mxu0 }
 0x7db   :  { %v7972_v32 = vpack.i.bf16 %v9298_v30, %v9296_v24  ;;  %v9302_v33 = vpop.f32.mrf.mxu1 }
 0x7dc   :  { %v7756_v35 = vpop.f32.mrf.mxu0 }
 0x7dd   :  { %v7762_v40 = vpop.f32.mrf.mxu1 }
 0x7de   :  { %v1478_v41 = vpop.f32.mrf.mxu0 }
 0x7df   :  { %v1527_v42 = vpop.f32.mrf.mxu1 }
 0x7e0   :  { %v7757_v46 = vpop.f32.mrf.mxu0 }
 0x7e1   :  { %v7763_v47 = vpop.f32.mrf.mxu1 }
 0x7e3   :  { %v1623_v49 = vpop.f32.mrf.mxu1 }
 0x7e4   :  { %v1779_v51 = vmul.f32 0.17677669, %v1623_v49 }
 0x7e5   :  { %v7774_v55 = vpop.f32.mrf.mxu1 }
 0x7e6   :  { %v1783_v28 = vadd.f32 %v1779_v51, %v9127_v9 }
 0x7e7   :  { %v1626_v37 = vpop.f32.mrf.mxu1 }
 0x7e8   :  { %v1787_v57 = vsel %vm881_vm3, %v1783_v28, -inf }
 0x7e9   :  { %1788 = vmax.xlane.f32.xlu0 %v1787_v57  ;;  %v7775_v59 = vpop.f32.mrf.mxu1 }
 0x7eb   :  { %v1723_v61 = vpop.f32.mrf.mxu1 }
 0x7ec   :  { %v1781_v0 = vmul.f32 0.17677669, %v1723_v61 }
 0x7ed   :  { %v7786_v54 = vpop.f32.mrf.mxu1 }
 0x7ee   :  { %v1785_v1 = vadd.f32 %v1781_v0, %v9136_v34 }
 0x7ef   :  { %v1726_v2 = vpop.f32.mrf.mxu1 }
 0x7f0   :  { %v1793_v6 = vsel %vm881_vm3, %v1785_v1, -inf }
 0x7f1   :  { %1794 = vmax.xlane.f32.xlu0 %v1793_v6  ;;  %v7787_v7 = vpop.f32.mrf.mxu1 }
 0x80f   :  { %v9308_v63 = vpop.f32.mrf.mxu0 }
 0x810   :  { %v7977_v8 = vpack.i.bf16 %v9308_v63, %v9302_v33 }
 0x811   :  { %v7768_v11 = vpop.f32.mrf.mxu0 }
 0x813   :  { %v1576_v19 = vpop.f32.mrf.mxu0 }
 0x815   :  { %v7769_v20 = vpop.f32.mrf.mxu0 }
 0x817   :  { %v1673_v18 = vpop.f32.mrf.mxu0 }
 0x818   :  { %v1780_v25 = vmul.f32 0.17677669, %v1673_v18 }
 0x819   :  { %v7780_v26 = vpop.f32.mrf.mxu0 }
 0x81a   :  { %v1784_v21 = vadd.f32 %v1780_v25, %v9131_v23 }
 0x81b   :  { %v1676_v35 = vpop.f32.mrf.mxu0 }
 0x81c   :  { %v1790_v40 = vsel %vm881_vm3, %v1784_v21, -inf }
 0x81d   :  { %1791 = vmax.xlane.f32.xlu1 %v1790_v40  ;;  %v7781_v41 = vpop.f32.mrf.mxu0 }
 0x81f   :  { %v1773_v42 = vpop.f32.mrf.mxu0 }
 0x820   :  { %v1782_v46 = vmul.f32 0.17677669, %v1773_v42 }
 0x821   :  { %v7792_v47 = vpop.f32.mrf.mxu0 }
 0x822   :  { %v1786_v49 = vadd.f32 %v1782_v46, %v9141_v48 }
 0x823   :  { %v1776_v51 = vpop.f32.mrf.mxu0 }
 0x824   :  { %v1796_v55 = vsel %vm881_vm3, %v1786_v49, -inf }
 0x825   :  { %v7793_v37 = vpop.f32.mrf.mxu0  ;;  %1797 = vmax.xlane.f32.xlu0 %v1796_v55 }
 0x82e   :  { %1883 = vrot.lane.b32.xlu1 %v9106_v60, %s8784_s24 }
 0x832   :  { %1931 = vrot.lane.b32.xlu1 %v9168_v43, %s8784_s24 }
 0x836   :  { %1979 = vrot.lane.b32.xlu1 %v9172_v50, %s8784_s24 }
 0x872   :  { %v1789_v57 = vpop.xlane.xlu0 %1788 }
 0x873   :  { %v1799_v59 = vsub.f32 %v1783_v28, %v1789_v57 }
 0x875   :  { %v1803_v61 = vmul.f32 1.442695, %v1799_v59 }
 0x877   :  { %8150 = vpow2.f32 %v1803_v61 }
 0x87a   :  { %v1795_v2 = vpop.xlane.xlu0 %1794 }
 0x87b   :  { %v1801_v6 = vsub.f32 %v1785_v1, %v1795_v2 }
 0x87d   :  { %v1807_v7 = vmul.f32 1.442695, %v1801_v6 }
 0x87f   :  { %8152 = vpow2.f32 %v1807_v7 }
 0x884   :  { %v8151_v0 = vpop.eup %8150 }
 0x885   :  { %v1811_v54 = vsel %vm881_vm3, %v8151_v0, 0.0 }
 0x886   :  { %1812 = vadd.xlane.f32.xlu0 %v1811_v54 }
 0x88c   :  { %v8153_v25 = vpop.eup %8152 }
 0x88d   :  { %v1817_v40 = vsel %vm881_vm3, %v8153_v25, 0.0 }
 0x89c   :  { %1835 = vrot.lane.b32.xlu0 %v9097_v56, %s8784_s24 }
 0x8a6   :  { %v1792_v11 = vpop.xlane.xlu1 %1791 }
 0x8a7   :  { %v1800_v19 = vsub.f32 %v1784_v21, %v1792_v11 }
 0x8a9   :  { %v1805_v20 = vmul.f32 1.442695, %v1800_v19 }
 0x8aa   :  { %v1884_v18 = vpop.permute.xlu1 %1883 }
 0x8ab   :  { %8154 = vpow2.f32 %v1805_v20  ;;  %v1889_v28 = vsel %vm937_vm2, %v1884_v18, 0 }
 0x8ac   :  { %7801 = vmatpush3.bf16.msra.mxu0 %v1889_v28 }
 0x8ad   :  { %7812 = vmatprep.subr.bf16.mxu0 %v11418_v13 }
 0x8ae   :  { %v1798_v1 = vpop.xlane.xlu0 %1797  ;;  %v1932_v47 = vpop.permute.xlu1 %1931 }
 0x8af   :  { %v1802_v21 = vsub.f32 %v1786_v49, %v1798_v1 }
 0x8b1   :  { %v1809_v41 = vmul.f32 1.442695, %v1802_v21 }
 0x8b3   :  { %8156 = vpow2.f32 %v1809_v41 }
 0x8b8   :  { %v8155_v26 = vpop.eup %8154 }
 0x8b9   :  { %v1814_v35 = vsel %vm881_vm3, %v8155_v26, 0.0 }
 0x8ba   :  { %1815 = vadd.xlane.f32.xlu1 %v1814_v35 }
 0x8bb   :  { %1818 = vadd.xlane.f32.xlu0 %v1817_v40 }
 0x8c0   :  { %v8157_v42 = vpop.eup %8156 }
 0x8c1   :  { %v1820_v46 = vsel %vm881_vm3, %v8157_v42, 0.0 }
 0x8cb   :  { %2079 = vrot.lane.b32.xlu1 %v9072_v36, %s8794_s18 }
 0x8d1   :  { %2029 = vrot.lane.b32.xlu0 %v9065_v27, %s8794_s18 }
 0x8d5   :  { %2027 = vrot.lane.b32.xlu0 %v9081_v45, %s8794_s18 }
 0x8d9   :  { %2129 = vrot.lane.b32.xlu0 %v9079_v44, %s8794_s18 }
 0x8dd   :  { %2127 = vrot.lane.b32.xlu0 %v9103_v58, %s8794_s18 }
 0x8ef   :  { %1821 = vadd.xlane.f32.xlu1 %v1820_v46 }
 0x900   :  { %2077 = vrot.lane.b32.xlu1 %v9092_v53, %s8794_s18  ;;  %v1937_v53 = vsel %vm937_vm2, %v1932_v47, 0 }
 0x904   :  { %2179 = vrot.lane.b32.xlu1 %v9088_v52, %s8794_s18  ;;  %v1980_v52 = vpop.permute.xlu1 %1979 }
 0x905   :  { %v1985_v2 = vsel %vm937_vm2, %v1980_v52, 0 }
 0x908   :  { %2177 = vrot.lane.b32.xlu1 %v9114_v62, %s8794_s18 }
 0x90f   :  { %v1813_v27 = vpop.xlane.xlu0 %1812 }
 0x910   :  { %8158 = vrcp.f32 %v1813_v27 }
 0x913   :  { %v1836_v36 = vpop.permute.xlu0 %1835 }
 0x914   :  { %v1841_v44 = vsel %vm937_vm2, %v1836_v36, 0 }
 0x915   :  { %7795 = vmatpush3.bf16.msra.mxu1 %v1841_v44 }
 0x916   :  { %7806 = vmatprep.subr.bf16.mxu1 %v11418_v13 }
 0x91d   :  { %v8159_v45 = vpop.eup %8158 }
 0x91e   :  { %v1824_v58 = vmul.f32 %v8159_v45, %v8151_v0 }
 0x920   :  { %v1831_v49 = vpack.c.bf16 %v1824_v58, %v1824_v58 }
 0x922   :  { %7797 = vmatmul.mubr.msk.bf16.vlgmr.msra.gmra.mxu1 %vm881_vm3, %v1831_v49 }
 0x923   :  { %7807 = vmatpush3.bf16.msra.mxu1 %v1937_v53  ;;  %7808 = vmatprep.mubr.msk.bf16.mxu1 %vm8800_vm0, %v11418_v13 }
 0x924   :  { %7818 = vmatprep.subr.bf16.mxu1 %v11418_v13 }
 0x943   :  { %v1816_v62 = vpop.xlane.xlu1 %1815 }
 0x944   :  { %8160 = vrcp.f32 %v1816_v62  ;;  %v1819_v51 = vpop.xlane.xlu0 %1818 }
 0x945   :  { %8162 = vrcp.f32 %v1819_v51 }
 0x947   :  { %v2080_v18 = vpop.permute.xlu1 %2079 }
 0x948   :  { %v2030_v55 = vpop.permute.xlu0 %2029  ;;  %v2085_v1 = vsel %vm668_vm1, %v2080_v18, 0 }
 0x949   :  { %v2035_v7 = vsel %vm668_vm1, %v2030_v55, 0 }
 0x94c   :  { %v2028_v6 = vpop.permute.xlu0 %2027 }
 0x950   :  { %v2130_v11 = vpop.permute.xlu0 %2129 }
 0x951   :  { %v8161_v37 = vpop.eup %8160  ;;  %v2135_v19 = vsel %vm668_vm1, %v2130_v11, 0 }
 0x952   :  { %v8163_v57 = vpop.eup %8162  ;;  %v1826_v59 = vmul.f32 %v8161_v37, %v8155_v26 }
 0x953   :  { %v1828_v61 = vmul.f32 %v8163_v57, %v8153_v25 }
 0x954   :  { %v1832_v0 = vpack.c.bf16 %v1826_v59, %v1826_v59  ;;  %v2128_v20 = vpop.permute.xlu0 %2127 }
 0x955   :  { %v1833_v54 = vpack.c.bf16 %v1828_v61, %v1828_v61 }
 0x956   :  { %7803 = vmatmul.mubr.msk.bf16.vlgmr.msra.gmra.mxu0 %vm881_vm3, %v1832_v0 }
 0x957   :  { %7809 = vmatmul.mubr.msk.bf16.vlgmr.msra.gmra.mxu1 %vm881_vm3, %v1833_v54  ;;  %7813 = vmatpush3.bf16.msra.mxu0 %v1985_v2 }
 0x958   :  { %7819 = vmatpush3.bf16.xpose.msra.mxu1 %v2035_v7  ;;  %7820 = vmatprep.mubr.msk.bf16.mxu1 %vm8800_vm0, %v11418_v13 }
 0x959   :  { %7830 = vmatprep.subr.bf16.mxu1 %v11418_v13  ;;  %7814 = vmatprep.mubr.msk.bf16.mxu0 %vm8800_vm0, %v11418_v13 }
 0x95a   :  { %7824 = vmatprep.subr.bf16.mxu0 %v11418_v13 }
 0x95f   :  { %7821 = vmatmul.mubr.msk.bf16.vlgmr.msra.gmra.mxu1 %vm668_vm1, %v2028_v6 }
 0x960   :  { %7831 = vmatpush3.bf16.xpose.msra.mxu1 %v2135_v19  ;;  %7832 = vmatprep.mubr.msk.bf16.mxu1 %vm8800_vm0, %v11418_v13 }
 0x961   :  { %7842 = vmatprep.subr.bf16.mxu1 %v11418_v13 }
 0x967   :  { %7833 = vmatmul.mubr.msk.bf16.vlgmr.msra.gmra.mxu1 %vm668_vm1, %v2128_v20 }
 0x968   :  { %7844 = vmatprep.mubr.msk.bf16.mxu1 %vm8800_vm0, %v11418_v13 }
 0x978   :  { %v1822_v28 = vpop.xlane.xlu1 %1821 }
 0x979   :  { %8164 = vrcp.f32 %v1822_v28 }
 0x97c   :  { %v2078_v40 = vpop.permute.xlu1 %2077 }
 0x980   :  { %v2180_v21 = vpop.permute.xlu1 %2179 }
 0x981   :  { %v2185_v41 = vsel %vm668_vm1, %v2180_v21, 0 }
 0x986   :  { %v8165_v25 = vpop.eup %8164 }
 0x987   :  { %v1830_v26 = vmul.f32 %v8165_v25, %v8157_v42  ;;  %v2178_v42 = vpop.permute.xlu1 %2177 }
 0x989   :  { %v1834_v35 = vpack.c.bf16 %v1830_v26, %v1830_v26 }
 0x98b   :  { %7815 = vmatmul.mubr.msk.bf16.vlgmr.msra.gmra.mxu0 %vm881_vm3, %v1834_v35 }
 0x98c   :  { %7825 = vmatpush3.bf16.xpose.msra.mxu0 %v2085_v1  ;;  %7826 = vmatprep.mubr.msk.bf16.mxu0 %vm8800_vm0, %v11418_v13 }
 0x98d   :  { %7836 = vmatprep.subr.bf16.mxu0 %v11418_v13 }
 0x993   :  { %7827 = vmatmul.mubr.msk.bf16.vlgmr.msra.gmra.mxu0 %vm668_vm1, %v2078_v40 }
 0x994   :  { %7837 = vmatpush3.bf16.xpose.msra.mxu0 %v2185_v41  ;;  %7838 = vmatprep.mubr.msk.bf16.mxu0 %vm8800_vm0, %v11418_v13 }
 0x995   :  { %7848 = vmatprep.subr.bf16.mxu0 %v11418_v13 }
 0x99b   :  { %7839 = vmatmul.mubr.msk.bf16.vlgmr.msra.gmra.mxu0 %vm668_vm1, %v2178_v42 }
 0x99c   :  { %7850 = vmatprep.mubr.msk.bf16.mxu0 %vm8800_vm0, %v11418_v13 }
 0x9e2   :  { %v9384_v46 = vpop.f32.mrf.mxu1 }
 0x9e4   :  { %v7798_v27 = vpop.f32.mrf.mxu1 }
 0x9e6   :  { %v1880_v36 = vpop.f32.mrf.mxu1 }
 0x9e8   :  { %v7799_v44 = vpop.f32.mrf.mxu1 }
 0xa16   :  { %v9386_v45 = vpop.f32.mrf.mxu0 }
 0xa17   :  { %v7982_v58 = vpack.i.bf16 %v9386_v45, %v9384_v46  ;;  %v9390_v47 = vpop.f32.mrf.mxu1 }
 0xa18   :  { %v7804_v49 = vpop.f32.mrf.mxu0 }
 0xa19   :  { %v7810_v53 = vpop.f32.mrf.mxu1 }
 0xa1a   :  { %v1928_v52 = vpop.f32.mrf.mxu0 }
 0xa1b   :  { %v1976_v62 = vpop.f32.mrf.mxu1 }
 0xa1c   :  { %v7805_v51 = vpop.f32.mrf.mxu0 }
 0xa1d   :  { %v7811_v55 = vpop.f32.mrf.mxu1 }
 0xa1f   :  { %v2071_v37 = vpop.f32.mrf.mxu1 }
 0xa20   :  { %v2227_v57 = vmul.f32 0.17677669, %v2071_v37 }
 0xa21   :  { %v7822_v59 = vpop.f32.mrf.mxu1 }
 0xa22   :  { %v2231_v61 = vadd.f32 %v2227_v57, %v9127_v9 }
 0xa23   :  { %v2074_v0 = vpop.f32.mrf.mxu1 }
 0xa24   :  { %v2235_v54 = vsel %vm881_vm3, %v2231_v61, -inf }
 0xa25   :  { %2236 = vmax.xlane.f32.xlu0 %v2235_v54  ;;  %v7823_v2 = vpop.f32.mrf.mxu1 }
 0xa27   :  { %v2171_v6 = vpop.f32.mrf.mxu1 }
 0xa28   :  { %v2229_v7 = vmul.f32 0.17677669, %v2171_v6 }
 0xa29   :  { %v7834_v11 = vpop.f32.mrf.mxu1 }
 0xa2a   :  { %v2233_v19 = vadd.f32 %v2229_v7, %v9136_v34 }
 0xa2b   :  { %v2174_v20 = vpop.f32.mrf.mxu1 }
 0xa2c   :  { %v2241_v18 = vsel %vm881_vm3, %v2233_v19, -inf }
 0xa2d   :  { %2242 = vmax.xlane.f32.xlu0 %v2241_v18  ;;  %v7835_v28 = vpop.f32.mrf.mxu1 }
 0xa4b   :  { %v2021_v25 = vpop.f32.mrf.mxu0 }
 0xa4c   :  { %v7987_v26 = vpack.i.bf16 %v2021_v25, %v9390_v47 }
 0xa4d   :  { %v7816_v35 = vpop.f32.mrf.mxu0 }
 0xa4f   :  { %v2024_v9 = vpop.f32.mrf.mxu0 }
 0xa51   :  { %v7817_v40 = vpop.f32.mrf.mxu0 }
 0xa53   :  { %v2121_v1 = vpop.f32.mrf.mxu0 }
 0xa54   :  { %v2228_v21 = vmul.f32 0.17677669, %v2121_v1 }
 0xa55   :  { %v7828_v41 = vpop.f32.mrf.mxu0 }
 0xa56   :  { %v2232_v42 = vadd.f32 %v2228_v21, %v9131_v23 }
 0xa57   :  { %v2124_v27 = vpop.f32.mrf.mxu0 }
 0xa58   :  { %v2238_v36 = vsel %vm881_vm3, %v2232_v42, -inf }
 0xa59   :  { %2239 = vmax.xlane.f32.xlu1 %v2238_v36  ;;  %v7829_v34 = vpop.f32.mrf.mxu0 }
 0xa5b   :  { %v2221_v44 = vpop.f32.mrf.mxu0 }
 0xa5c   :  { %v2230_v49 = vmul.f32 0.17677669, %v2221_v44 }
 0xa5d   :  { %v7840_v53 = vpop.f32.mrf.mxu0 }
 0xa5e   :  { %v2234_v52 = vadd.f32 %v2230_v49, %v9141_v48 }
 0xa5f   :  { %v2224_v62 = vpop.f32.mrf.mxu0 }
 0xa60   :  { %v2244_v47 = vsel %vm881_vm3, %v2234_v52, -inf }
 0xa61   :  { %v7841_v51 = vpop.f32.mrf.mxu0  ;;  %2245 = vmax.xlane.f32.xlu0 %v2244_v47 }
 0xaae   :  { %v2237_v55 = vpop.xlane.xlu0 %2236 }
 0xaaf   :  { %v2247_v37 = vsub.f32 %v2231_v61, %v2237_v55  ;;  %v8034_v55 = vld [vmem:[%s11712_s12 + $0x38] sm:$0xff]  }
 0xab1   :  { %v2251_v57 = vmul.f32 1.442695, %v2247_v37  ;;  %v8035_v37 = vld [vmem:[%s11712_s12 + $0x30] sm:$0xff]  }
 0xab3   :  { %8166 = vpow2.f32 %v2251_v57 }
 0xab6   :  { %v2243_v23 = vpop.xlane.xlu0 %2242 }
 0xab7   :  { %v2249_v59 = vsub.f32 %v2233_v19, %v2243_v23 }
 0xab9   :  { %v2255_v0 = vmul.f32 1.442695, %v2249_v59  ;;  %v8036_v59 = vld [vmem:[%s11712_s12 + $0x28] sm:$0xff]  }
 0xabb   :  { %8168 = vpow2.f32 %v2255_v0 }
 0xac0   :  { %v8167_v54 = vpop.eup %8166 }
 0xac1   :  { %v2259_v2 = vsel %vm881_vm3, %v8167_v54, 0.0 }
 0xac2   :  { %2260 = vadd.xlane.f32.xlu0 %v2259_v2 }
 0xac8   :  { %v8169_v6 = vpop.eup %8168 }
 0xac9   :  { %v2265_v48 = vsel %vm881_vm3, %v8169_v6, 0.0 }
 0xaca   :  { %2266 = vadd.xlane.f32.xlu0 %v2265_v48  ;;  %v8037_v48 = vld [vmem:[%s11712_s12 + $0x20] sm:$0xff]  }
 0xae0   :  { %2283 = vrot.lane.b32.xlu0 %v9097_v56, %s8794_s18 }
 0xae2   :  { %v2240_v7 = vpop.xlane.xlu1 %2239 }
 0xae3   :  { %v2248_v11 = vsub.f32 %v2232_v42, %v2240_v7 }
 0xae4   :  { %7973 = vrot.lane.b32.xlu0 %v7972_v32, %s8794_s18 }
 0xae5   :  { %v2253_v61 = vmul.f32 1.442695, %v2248_v11 }
 0xae7   :  { %8170 = vpow2.f32 %v2253_v61  ;;  %v8038_v61 = vld [vmem:[%s11712_s12 + $0x18] sm:$0xff]  }
 0xae8   :  { %7983 = vrot.lane.b32.xlu0 %v7982_v58, %s8784_s24 }
 0xaea   :  { %v2246_v56 = vpop.xlane.xlu0 %2245 }
 0xaeb   :  { %v2250_v24 = vsub.f32 %v2234_v52, %v2246_v56  ;;  %v8041_v56 = vld [vmem:[%s11712_s12] sm:$0xff]  }
 0xaed   :  { %v2257_v30 = vmul.f32 1.442695, %v2250_v24 }
 0xaef   :  { %8172 = vpow2.f32 %v2257_v30 }
 0xaf4   :  { %v8171_v19 = vpop.eup %8170 }
 0xaf5   :  { %v2262_v20 = vsel %vm881_vm3, %v8171_v19, 0.0 }
 0xaf6   :  { %2263 = vadd.xlane.f32.xlu1 %v2262_v20  ;;  %v8040_v20 = vld [vmem:[%s11712_s12 + $0x8] sm:$0xff]  }
 0xafc   :  { %v8173_v32 = vpop.eup %8172 }
 0xafd   :  { %v2268_v18 = vsel %vm881_vm3, %v8173_v32, 0.0 }
 0xb07   :  { %2331 = vrot.lane.b32.xlu1 %v9106_v60, %s8794_s18 }
 0xb0b   :  { %2379 = vrot.lane.b32.xlu1 %v9168_v43, %s8794_s18 }
 0xb2f   :  { %2269 = vadd.xlane.f32.xlu1 %v2268_v18 }
 0xb40   :  { %2427 = vrot.lane.b32.xlu1 %v9172_v50, %s8794_s18 }
 0xb44   :  { %7978 = vrot.lane.b32.xlu1 %v7977_v8, %s8794_s18 }
 0xb48   :  { %7988 = vrot.lane.b32.xlu1 %v7987_v26, %s8784_s24  ;;  %s11713_s24 = sld [smem:[#allocation34_spill]] }
 0xb4b   :  { %v2261_v60 = vpop.xlane.xlu0 %2260 }
 0xb4c   :  { %8174 = vrcp.f32 %v2261_v60 }
 0xb53   :  { %v2267_v43 = vpop.xlane.xlu0 %2266 }
 0xb54   :  { %8176 = vrcp.f32 %v2267_v43 }
 0xb57   :  { %v2284_v46 = vpop.permute.xlu0 %2283 }
 0xb58   :  { %v2289_v45 = vsel %vm937_vm2, %v2284_v46, 0 }
 0xb59   :  { %v8175_v58 = vpop.eup %8174  ;;  %7843 = vmatpush3.bf16.msra.mxu1 %v2289_v45 }
 0xb5a   :  { %v2272_v28 = vmul.f32 %v8175_v58, %v8167_v54  ;;  %7854 = vmatprep.subr.bf16.mxu1 %v11418_v13 }
 0xb5b   :  { %v7974_v43 = vpop.permute.xlu0 %7973 }
 0xb5c   :  { %v2279_v25 = vpack.c.bf16 %v2272_v28, %v2272_v28  ;;  %v7976_v45 = vunpack.i.h.bf16 %v7974_v43  ;;  %v7975_v58 = vunpack.i.l.bf16 %v7974_v43 }
 0xb5e   :  { %7845 = vmatmul.mubr.msk.bf16.vlgmr.msra.gmra.mxu1 %vm881_vm3, %v2279_v25 }
 0xb5f   :  { %7856 = vmatprep.mubr.msk.bf16.mxu1 %vm8800_vm0, %v11418_v13  ;;  %v7984_v46 = vpop.permute.xlu0 %7983 }
 0xb60   :  { %v7986_v28 = vunpack.i.h.bf16 %v7984_v46  ;;  %v7985_v25 = vunpack.i.l.bf16 %v7984_v46 }
 0xb61   :  { %v8177_v33 = vpop.eup %8176 }
 0xb62   :  { %v2276_v26 = vmul.f32 %v8177_v33, %v8169_v6  ;;  %v2524_v33 = vsel %vm668_vm1, %v9214_v31, %v7976_v45 }
 0xb64   :  { %v2281_v40 = vpack.c.bf16 %v2276_v26, %v2276_v26 }
 0xb7f   :  { %v2264_v50 = vpop.xlane.xlu1 %2263 }
 0xb80   :  { %8178 = vrcp.f32 %v2264_v50 }
 0xb83   :  { %v2332_v63 = vpop.permute.xlu1 %2331 }
 0xb84   :  { %v2337_v8 = vsel %vm937_vm2, %v2332_v63, 0  ;;  %v2523_v63 = vsel %vm668_vm1, %v9212_v29, %v7975_v58 }
 0xb85   :  { %7849 = vmatpush3.bf16.msra.mxu0 %v2337_v8 }
 0xb86   :  { %7860 = vmatprep.subr.bf16.mxu0 %v11418_v13 }
 0xb87   :  { %v2380_v35 = vpop.permute.xlu1 %2379 }
 0xb88   :  { %v2385_v9 = vsel %vm937_vm2, %v2380_v35, 0  ;;  %v2528_v35 = vsel %vm2527_vm4, %v2523_v63, %v7985_v25  ;;  %v8050_v63 = vld [vmem:[#allocation7 + $0x54] ss:$8 sps:$4 sm:$0xff]  }
 0xb89   :  { %7855 = vmatpush3.bf16.msra.mxu1 %v2385_v9  ;;  %v2529_v9 = vsel %vm2527_vm4, %v2524_v33, %v7986_v28  ;;  %v8045_v33 = vld [vmem:[#allocation7 + $0x60] ss:$8 sps:$4 sm:$0xff]  }
 0xb8a   :  { %7866 = vmatprep.subr.bf16.mxu1 %v8034_v55 }
 0xb8c   :  { %7857 = vmatmul.mubr.msk.bf16.vlgmr.msra.gmra.mxu1 %vm881_vm3, %v2281_v40 }
 0xb8d   :  { %v8179_v1 = vpop.eup %8178  ;;  %7867 = vmatpush3.bf16.msra.mxu1 %v8034_v55 }
 0xb8e   :  { %v2274_v21 = vmul.f32 %v8179_v1, %v8171_v19  ;;  %7868 = vmatprep.subr.bf16.mxu1 %v8035_v37  ;;  %v8039_v19 = vld [vmem:[%s11712_s12 + $0x10] sm:$0xff]  }
 0xb90   :  { %v2280_v41 = vpack.c.bf16 %v2274_v21, %v2274_v21 }
 0xb91   :  { %7869 = vmatpush3.bf16.msra.mxu1 %v8035_v37 }
 0xb92   :  { %7851 = vmatmul.mubr.msk.bf16.vlgmr.msra.gmra.mxu0 %vm881_vm3, %v2280_v41  ;;  %7870 = vmatprep.subr.bf16.mxu1 %v8036_v59 }
 0xb93   :  { %7862 = vmatprep.mubr.msk.bf16.mxu0 %vm8800_vm0, %v11418_v13  ;;  %v4204_v13 = vld [vmem:[#allocation13 + $0x280] sm:$0xff] }
 0xb95   :  { %7871 = vmatpush3.bf16.msra.mxu1 %v8036_v59 }
 0xb96   :  { %7872 = vmatprep.subr.bf16.mxu1 %v8037_v48 }
 0xb99   :  { %7873 = vmatpush3.bf16.msra.mxu1 %v8037_v48 }
 0xb9a   :  { %7874 = vmatprep.subr.bf16.mxu1 %v8038_v61 }
 0xb9d   :  { %7875 = vmatpush3.bf16.msra.mxu1 %v8038_v61 }
 0xb9e   :  { %7876 = vmatprep.subr.bf16.mxu1 %v8039_v19 }
 0xba1   :  { %7877 = vmatpush3.bf16.msra.mxu1 %v8039_v19  ;;  %v8042_v19 = vld [vmem:[#allocation7 + $0x70] ss:$8 sps:$4 sm:$0xff]  }
 0xba2   :  { %7878 = vmatprep.subr.bf16.mxu1 %v8040_v20 }
 0xba5   :  { %7879 = vmatpush3.bf16.msra.mxu1 %v8040_v20  ;;  %v8044_v20 = vld [vmem:[#allocation7 + $0x74] ss:$8 sps:$4 sm:$0xff]  }
 0xba6   :  { %7880 = vmatprep.subr.bf16.mxu1 %v8041_v56 }
 0xba9   :  { %7881 = vmatpush3.bf16.msra.mxu1 %v8041_v56 }
 0xbb8   :  { %v2270_v42 = vpop.xlane.xlu1 %2269 }
 0xbb9   :  { %8180 = vrcp.f32 %v2270_v42 }
 0xbbc   :  { %v2428_v27 = vpop.permute.xlu1 %2427 }
 0xbbd   :  { %v2433_v36 = vsel %vm937_vm2, %v2428_v27, 0 }
 0xbbe   :  { %7861 = vmatpush3.bf16.msra.mxu0 %v2433_v36 }
 0xbbf   :  { %2839 = vmatprep.subr.bf16.mxu0 %v8044_v20 }
 0xbc0   :  { %v7979_v41 = vpop.permute.xlu1 %7978 }
 0xbc1   :  { %v7981_v27 = vunpack.i.h.bf16 %v7979_v41  ;;  %v7980_v36 = vunpack.i.l.bf16 %v7979_v41  ;;  %v8062_v41 = vld [vmem:[#allocation7 + $0x14] ss:$8 sps:$4 sm:$0xff]  }
 0xbc3   :  { %v2526_v29 = vsel %vm668_vm1, %v9222_v3, %v7981_v27  ;;  %v8065_v27 = vld [vmem:[#allocation7 + $0x4] ss:$8 sps:$4 sm:$0xff]  }
 0xbc4   :  { %v7989_v42 = vpop.permute.xlu1 %7988 }
 0xbc5   :  { %v7991_v31 = vunpack.i.h.bf16 %v7989_v42 }
 0xbc6   :  { %v8181_v34 = vpop.eup %8180 }
 0xbc7   :  { %v2278_v44 = vmul.f32 %v8181_v34, %v8173_v32  ;;  %v7990_v34 = vunpack.i.l.bf16 %v7989_v42  ;;  %v8060_v42 = vld [vmem:[#allocation7 + $0x10] ss:$8 sps:$4 sm:$0xff]  }
 0xbc9   :  { %v2282_v49 = vpack.c.bf16 %v2278_v44, %v2278_v44 }
 0xbcb   :  { %7863 = vmatmul.mubr.msk.bf16.vlgmr.msra.gmra.mxu0 %vm881_vm3, %v2282_v49  ;;  %v2525_v49 = vsel %vm668_vm1, %v9216_v38, %v7980_v36  ;;  %v8063_v36 = vld [vmem:[#allocation7] ss:$8 sps:$4 sm:$0xff]  }
 0xbcc   :  { %2871 = vmatprep.mubr.bf16.mxu0 %v8798_v39  ;;  %2840 = vmatpush1.bf16.msra.mxu0 %v8042_v19 }
 0xc1e   :  { %v2325_v53 = vpop.f32.mrf.mxu1 }
 0xc20   :  { %v7846_v52 = vpop.f32.mrf.mxu1 }
 0xc22   :  { %v2328_v62 = vpop.f32.mrf.mxu1 }
 0xc23   :  { %v2530_v62 = vsel %vm2527_vm4, %v2525_v49, %v7990_v34 }
 0xc24   :  { %v7847_v47 = vpop.f32.mrf.mxu1 }
 0xc25   :  { %v2531_v47 = vsel %vm2527_vm4, %v2526_v29, %v7991_v31 }
 0xc4c   :  { %v2421_v51 = vpop.f32.mrf.mxu1 }
 0xc4e   :  { %v7858_v57 = vpop.f32.mrf.mxu1 }
 0xc50   :  { %v2424_v23 = vpop.f32.mrf.mxu1 }
 0xc51   :  { %v7182_v23 = vld [vmem:[#allocation5] ss:$0 sm:$0xff] }
 0xc52   :  { %v2373_v0 = vpop.f32.mrf.mxu0  ;;  %v7859_v54 = vpop.f32.mrf.mxu1 }
 0xc53   :  { %v7992_v2 = vpack.i.bf16 %v2373_v0, %v2325_v53 }
 0xc54   :  { %v7852_v6 = vpop.f32.mrf.mxu0 }
 0xc55   :  { %7993 = vrot.lane.b32.xlu0 %v7992_v2, %s8802_s8 }
 0xc56   :  { %v2376_v7 = vpop.f32.mrf.mxu0 }
 0xc58   :  { %v7853_v11 = vpop.f32.mrf.mxu0 }
 0xc8b   :  { %v2469_v24 = vpop.f32.mrf.mxu0 }
 0xc8c   :  { %v7997_v30 = vpack.i.bf16 %v2469_v24, %v2421_v51 }
 0xc8d   :  { %v7864_v32 = vpop.f32.mrf.mxu0 }
 0xc8e   :  { %7998 = vrot.lane.b32.xlu1 %v7997_v30, %s8802_s8 }
 0xc8f   :  { %v2472_v18 = vpop.f32.mrf.mxu0 }
 0xc91   :  { %v7865_v60 = vpop.f32.mrf.mxu0 }
 0xcc7   :  { %v7994_v50 = vpop.permute.xlu0 %7993 }
 0xcc8   :  { %v7996_v8 = vunpack.i.h.bf16 %v7994_v50  ;;  %v7995_v26 = vunpack.i.l.bf16 %v7994_v50  ;;  %v8047_v50 = vld [vmem:[#allocation7 + $0x64] ss:$8 sps:$4 sm:$0xff]  }
 0xcc9   :  { %2841 = vmatprep.subr.bf16.mxu0 %v8047_v50  ;;  %v8077_v50 = vld [vmem:[#allocation10 + $0x10] sm:$0xff]  }
 0xcca   :  { %v2533_v40 = vsel %vm2532_vm5, %v2528_v35, %v7995_v26  ;;  %v2534_v1 = vsel %vm2532_vm5, %v2529_v9, %v7996_v8  ;;  %2842 = vmatpush1.bf16.msra.mxu0 %v8045_v33  ;;  %v8048_v8 = vld [vmem:[#allocation7 + $0x50] ss:$8 sps:$4 sm:$0xff]   ;;  %v8053_v26 = vld [vmem:[#allocation7 + $0x44] ss:$8 sps:$4 sm:$0xff]   ;;  %v8051_v35 = vld [vmem:[#allocation7 + $0x40] ss:$8 sps:$4 sm:$0xff]  }
 0xccb   :  { %v2537_v21 = vpack.c.bf16 %v2534_v1, %v2533_v40  ;;  %2843 = vmatprep.subr.bf16.mxu0 %v8050_v63  ;;  %v8056_v9 = vld [vmem:[#allocation7 + $0x34] ss:$8 sps:$4 sm:$0xff]   ;;  %v8054_v40 = vld [vmem:[#allocation7 + $0x30] ss:$8 sps:$4 sm:$0xff]   ;;  %v8059_v1 = vld [vmem:[#allocation7 + $0x24] ss:$8 sps:$4 sm:$0xff]  }
 0xccc   :  { %v8078_v33 = vld [vmem:[#allocation10 + $0x48] sm:$0xff]  }
 0xccd   :  { %7882 = vmatprep.mubr.bf16.mxu1 %v2537_v21  ;;  %v8057_v21 = vld [vmem:[#allocation7 + $0x20] ss:$8 sps:$4 sm:$0xff]  }
 0xcce   :  { %2844 = vmatpush1.bf16.msra.mxu0 %v8048_v8  ;;  %v8079_v63 = vld [vmem:[#allocation10 + $0x8] sm:$0xff]   ;;  %v8080_v8 = vld [vmem:[#allocation10 + $0x40] sm:$0xff]  }
 0xccf   :  { %2845 = vmatprep.subr.bf16.mxu0 %v8053_v26  ;;  %v8081_v26 = vld [vmem:[#allocation10] sm:$0xff]  }
 0xcd2   :  { %2846 = vmatpush1.bf16.msra.mxu0 %v8051_v35  ;;  %v2747_v35 = vld [vmem:[#allocation8] sm:$0x3] }
 0xcd3   :  { %2847 = vmatprep.subr.bf16.mxu0 %v8056_v9  ;;  %v2752_v9 = vrot.slane %v2747_v35, %v9063_v22 }
 0xcd6   :  { %2848 = vmatpush1.bf16.msra.mxu0 %v8054_v40  ;;  %v2756_v40 = vrot.slane %v2747_v35, %v9055_v16 }
 0xcd7   :  { %2849 = vmatprep.subr.bf16.mxu0 %v8059_v1 }
 0xcda   :  { %2850 = vmatpush1.bf16.msra.mxu0 %v8057_v21 }
 0xcdb   :  { %2851 = vmatprep.subr.bf16.mxu0 %v8062_v41 }
 0xcde   :  { %2852 = vmatpush1.bf16.msra.mxu0 %v8060_v42 }
 0xcdf   :  { %2853 = vmatprep.subr.bf16.mxu0 %v8065_v27 }
 0xce2   :  { %2854 = vmatpush1.bf16.msra.mxu0 %v8063_v36 }
 0xd00   :  { %v7999_v44 = vpop.permute.xlu1 %7998 }
 0xd01   :  { %v8001_v53 = vunpack.i.h.bf16 %v7999_v44  ;;  %v8000_v52 = vunpack.i.l.bf16 %v7999_v44 }
 0xd03   :  { %v2536_v51 = vsel %vm2532_vm5, %v2531_v47, %v8001_v53  ;;  %v2535_v55 = vsel %vm2532_vm5, %v2530_v62, %v8000_v52 }
 0xd04   :  { %v2538_v37 = vpack.c.bf16 %v2536_v51, %v2535_v55 }
 0xd06   :  { %7883 = vmatmul.mubr.bf16.vlgmr.msra.gmra.mxu1 %v2538_v37 }
 0xdc6   :  { %v7884_v57 = vpop.f32.mrf.mxu1 }
 0xdc7   :  { %v2653_v54 = vadd.f32 %v7884_v57, %v7182_v23 }
 0xdc8   :  { %v2644_v59 = vpop.f32.mrf.mxu1 }
 0xdc9   :  { %v2645_v0 = vadd.f32 %v7182_v23, %v2644_v59  ;;  %v2661_v11 = vadd.f32 %v2653_v54, %v9038_v10  ;;  %v7191_v59 = vld [vmem:[%s11713_s24] ss:$0 sm:$0xff] }
 0xdca   :  { %v7885_v3 = vpop.f32.mrf.mxu1 }
 0xdcb   :  { %v2659_v38 = vadd.f32 %v2645_v0, %v9031_v4  ;;  %v2656_v48 = vadd.f32 %v7885_v3, %v7182_v23 }
 0xdcc   :  { %v2647_v2 = vpop.f32.mrf.mxu1 }
 0xdcd   :  { %v2648_v6 = vadd.f32 %v7182_v23, %v2647_v2  ;;  %2665 = vadd.xlane.f32.xlu0 %v2659_v38  ;;  %v2662_v61 = vadd.f32 %v2656_v48, %v9040_v12  ;;  %v7192_v2 = vld [vmem:[%s11714_s11] ss:$0 sm:$0xff] }
 0xdcf   :  { %v2660_v7 = vadd.f32 %v2648_v6, %v9033_v5 }
 0xdd1   :  { %2667 = vadd.xlane.f32.xlu1 %v2660_v7  ;;  %2669 = vadd.xlane.f32.xlu0 %v2661_v11 }
 0xdd5   :  { %2671 = vadd.xlane.f32.xlu0 %v2662_v61 }
 0xe56   :  { %v2666_v56 = vpop.xlane.xlu0 %2665 }
 0xe57   :  { %v2673_v24 = vmul.f32 0.0078125, %v2666_v56 }
 0xe59   :  { %v9471_v4 = vsub.f32 %v2659_v38, %v2673_v24 }
 0xe5a   :  { %v2668_v30 = vpop.xlane.xlu1 %2667  ;;  %v2670_v32 = vpop.xlane.xlu0 %2669 }
 0xe5b   :  { %v2674_v18 = vmul.f32 0.0078125, %v2668_v30  ;;  %v2675_v60 = vmul.f32 0.0078125, %v2670_v32  ;;  %v2681_v5 = vmul.f32 %v9471_v4, %v9471_v4 }
 0xe5d   :  { %v2678_v10 = vsub.f32 %v2660_v7, %v2674_v18  ;;  %v9475_v43 = vsub.f32 %v2661_v11, %v2675_v60  ;;  %2685 = vadd.xlane.f32.xlu0 %v2681_v5  ;;  %v8066_v18 = vld [vmem:[#allocation10 + $0x78] sm:$0xff]   ;;  %v8068_v5 = vld [vmem:[#allocation10 + $0x70] sm:$0xff]  }
 0xe5e   :  { %v2672_v12 = vpop.xlane.xlu0 %2671  ;;  %v8067_v60 = vld [vmem:[#allocation10 + $0x38] sm:$0xff]   ;;  %7589 = vmatprep.subr.bf16.mxu1 %v8066_v18 }
 0xe5f   :  { %v2676_v46 = vmul.f32 0.0078125, %v2672_v12  ;;  %v2682_v45 = vmul.f32 %v2678_v10, %v2678_v10  ;;  %v2683_v58 = vmul.f32 %v9475_v43, %v9475_v43  ;;  %7590 = vmatpush3.bf16.msra.mxu1 %v8067_v60  ;;  %v8071_v12 = vld [vmem:[#allocation10 + $0x28] sm:$0xff]  }
 0xe60   :  { %7591 = vmatprep.subr.bf16.mxu1 %v8068_v5 }
 0xe61   :  { %v2680_v28 = vsub.f32 %v2662_v61, %v2676_v46  ;;  %2687 = vadd.xlane.f32.xlu1 %v2682_v45  ;;  %2689 = vadd.xlane.f32.xlu0 %v2683_v58  ;;  %v8072_v46 = vld [vmem:[#allocation10 + $0x60] sm:$0xff]   ;;  %v8074_v58 = vld [vmem:[#allocation10 + $0x58] sm:$0xff]  }
 0xe62   :  { %v8073_v45 = vld [vmem:[#allocation10 + $0x20] sm:$0xff]  }
 0xe63   :  { %v2684_v25 = vmul.f32 %v2680_v28, %v2680_v28 }
 0xe65   :  { %2691 = vadd.xlane.f32.xlu1 %v2684_v25  ;;  %v8076_v25 = vld [vmem:[#allocation10 + $0x50] sm:$0xff]  }
 0xee6   :  { %v2686_v31 = vpop.xlane.xlu0 %2685 }
 0xee7   :  { %v2693_v34 = vmul.f32 0.0078125, %v2686_v31 }
 0xee9   :  { %v2697_v44 = vadd.f32 1e-12, %v2693_v34 }
 0xeea   :  { %v2688_v29 = vpop.xlane.xlu1 %2687  ;;  %v2690_v49 = vpop.xlane.xlu0 %2689 }
 0xeeb   :  { %8182 = vrsqrt.f32 %v2697_v44  ;;  %v2694_v53 = vmul.f32 0.0078125, %v2688_v29  ;;  %v2695_v52 = vmul.f32 0.0078125, %v2690_v49 }
 0xeed   :  { %v2698_v62 = vadd.f32 1e-12, %v2694_v53  ;;  %v2699_v47 = vadd.f32 1e-12, %v2695_v52 }
 0xeee   :  { %v2692_v51 = vpop.xlane.xlu1 %2691 }
 0xeef   :  { %8184 = vrsqrt.f32 %v2698_v62  ;;  %v2696_v55 = vmul.f32 0.0078125, %v2692_v51 }
 0xef0   :  { %8186 = vrsqrt.f32 %v2699_v47 }
 0xef1   :  { %v2700_v37 = vadd.f32 1e-12, %v2696_v55 }
 0xef3   :  { %8188 = vrsqrt.f32 %v2700_v37 }
 0xef8   :  { %v8183_v57 = vpop.eup %8182 }
 0xef9   :  { %v2705_v23 = vmul.f32 %v8183_v57, %v9471_v4 }
 0xefb   :  { %v2715_v54 = vmul.f32 %v7191_v59, %v2705_v23 }
 0xefc   :  { %v8185_v0 = vpop.eup %8184 }
 0xefd   :  { %v2706_v3 = vmul.f32 %v8185_v0, %v2678_v10  ;;  %v8187_v38 = vpop.eup %8186  ;;  %v9482_v7 = vadd.f32 %v7192_v2, %v2715_v54  ;;  %v8069_v10 = vld [vmem:[#allocation10 + $0x30] sm:$0xff]  }
 0xefe   :  { %v2707_v61 = vmul.f32 %v8187_v38, %v9475_v43  ;;  %7592 = vmatpush3.bf16.msra.mxu1 %v8069_v10  ;;  %v8070_v43 = vld [vmem:[#allocation10 + $0x68] sm:$0xff]  }
 0xeff   :  { %v2716_v6 = vmul.f32 %v7191_v59, %v2706_v3  ;;  %7593 = vmatprep.subr.bf16.mxu1 %v8070_v43 }
 0xf00   :  { %v8189_v48 = vpop.eup %8188  ;;  %v2717_v24 = vmul.f32 %v7191_v59, %v2707_v61 }
 0xf01   :  { %v9484_v11 = vadd.f32 %v7192_v2, %v2716_v6  ;;  %v2708_v19 = vmul.f32 %v8189_v48, %v2680_v28  ;;  %v8075_v28 = vld [vmem:[#allocation10 + $0x18] sm:$0xff]  }
 0xf02   :  { %v9492_v30 = vadd.f32 %v7192_v2, %v2717_v24  ;;  %7594 = vmatpush3.bf16.msra.mxu1 %v8071_v12 }
 0xf03   :  { %v2729_v20 = vpack.c.bf16 %v9484_v11, %v9482_v7  ;;  %v2718_v56 = vmul.f32 %v7191_v59, %v2708_v19  ;;  %7595 = vmatprep.subr.bf16.mxu1 %v8072_v46 }
 0xf05   :  { %2872 = vmatmul.mubr.bf16.vlgmr.msra.gmra.mxu0 %v2729_v20  ;;  %v9490_v4 = vadd.f32 %v7192_v2, %v2718_v56 }
 0xf06   :  { %2881 = vmatprep.mubr.bf16.mxu0 %v8798_v39  ;;  %7596 = vmatpush3.bf16.msra.mxu1 %v8073_v45 }
 0xf07   :  { %v2730_v32 = vpack.c.bf16 %v9490_v4, %v9492_v30  ;;  %7597 = vmatprep.subr.bf16.mxu1 %v8074_v58 }
 0xf0a   :  { %7598 = vmatpush3.bf16.msra.mxu1 %v8075_v28 }
 0xf0b   :  { %7599 = vmatprep.subr.bf16.mxu1 %v8076_v25 }
 0xf0d   :  { %2882 = vmatmul.mubr.bf16.gmra.mxu0 %v2730_v32 }
 0xf0e   :  { %7600 = vmatpush3.bf16.msra.mxu1 %v8077_v50 }
 0xf0f   :  { %7601 = vmatprep.subr.bf16.mxu1 %v8078_v33 }
 0xf12   :  { %7602 = vmatpush3.bf16.msra.mxu1 %v8079_v63 }
 0xf13   :  { %7603 = vmatprep.subr.bf16.mxu1 %v8080_v8 }
 0xf16   :  { %7604 = vmatpush3.bf16.msra.mxu1 %v8081_v26 }
 0xfc5   :  { %v2873_v1 = vpop.f32.mrf.mxu0 }
 0xfc6   :  { %v9498_v21 = vadd.f32 %v2873_v1, %v2752_v9 }
 0xfc7   :  { %v2875_v41 = vpop.f32.mrf.mxu0 }
 0xfc8   :  { %v2892_v42 = vmul.f32 %v9498_v21, %v9498_v21  ;;  %v9502_v27 = vadd.f32 %v2875_v41, %v2756_v40 }
 0xfc9   :  { %v2877_v36 = vpop.f32.mrf.mxu0 }
 0xfca   :  { %v2900_v31 = vmul.f32 %v2892_v42, %v9498_v21  ;;  %v2893_v34 = vmul.f32 %v9502_v27, %v9502_v27  ;;  %v9507_v44 = vadd.f32 %v2877_v36, %v2752_v9 }
 0xfcb   :  { %v2879_v29 = vpop.f32.mrf.mxu0 }
 0xfcc   :  { %v2908_v49 = vmul.f32 0.044715, %v2900_v31  ;;  %v2901_v53 = vmul.f32 %v2893_v34, %v9502_v27  ;;  %v2894_v52 = vmul.f32 %v9507_v44, %v9507_v44  ;;  %v9512_v62 = vadd.f32 %v2879_v29, %v2756_v40 }
 0xfcd   :  { %v2883_v47 = vpop.f32.mrf.mxu0 }
 0xfce   :  { %v2916_v51 = vadd.f32 %v2908_v49, %v9498_v21  ;;  %v2909_v55 = vmul.f32 0.044715, %v2901_v53  ;;  %v2902_v37 = vmul.f32 %v2894_v52, %v9507_v44  ;;  %v2895_v57 = vmul.f32 %v9512_v62, %v9512_v62 }
 0xfcf   :  { %v9518_v23 = vadd.f32 %v2883_v47, %v2752_v9  ;;  %v2885_v59 = vpop.f32.mrf.mxu0 }
 0xfd0   :  { %v2924_v0 = vmul.f32 0.7978846, %v2916_v51  ;;  %v2917_v3 = vadd.f32 %v2909_v55, %v9502_v27  ;;  %v2910_v54 = vmul.f32 0.044715, %v2902_v37  ;;  %v2903_v38 = vmul.f32 %v2895_v57, %v9512_v62 }
 0xfd1   :  { %v2896_v2 = vmul.f32 %v9518_v23, %v9518_v23  ;;  %v9524_v6 = vadd.f32 %v2885_v59, %v2756_v40  ;;  %v2887_v48 = vpop.f32.mrf.mxu0 }
 0xfd2   :  { %v2925_v61 = vmul.f32 0.7978846, %v2917_v3  ;;  %v2918_v19 = vadd.f32 %v2910_v54, %v9507_v44  ;;  %v2911_v20 = vmul.f32 0.044715, %v2903_v38  ;;  %8190 = vtanh.f32 %v2924_v0 }
 0xfd3   :  { %v2904_v56 = vmul.f32 %v2896_v2, %v9518_v23  ;;  %v2897_v24 = vmul.f32 %v9524_v6, %v9524_v6  ;;  %v2888_v32 = vadd.f32 %v2887_v48, %v2752_v9  ;;  %v2889_v18 = vpop.f32.mrf.mxu0 }
 0xfd4   :  { %8192 = vtanh.f32 %v2925_v61  ;;  %v2926_v60 = vmul.f32 0.7978846, %v2918_v19  ;;  %v2919_v5 = vadd.f32 %v2911_v20, %v9512_v62  ;;  %v2890_v10 = vadd.f32 %v2889_v18, %v2756_v40 }
 0xfd5   :  { %v2912_v43 = vmul.f32 0.044715, %v2904_v56  ;;  %v2905_v12 = vmul.f32 %v2897_v24, %v9524_v6  ;;  %v2898_v46 = vmul.f32 %v2888_v32, %v2888_v32 }
 0xfd6   :  { %8194 = vtanh.f32 %v2926_v60  ;;  %v2927_v45 = vmul.f32 0.7978846, %v2919_v5  ;;  %v2899_v58 = vmul.f32 %v2890_v10, %v2890_v10 }
 0xfd7   :  { %v2920_v28 = vadd.f32 %v2912_v43, %v9518_v23  ;;  %v2913_v25 = vmul.f32 0.044715, %v2905_v12  ;;  %v2906_v50 = vmul.f32 %v2898_v46, %v2888_v32 }
 0xfd8   :  { %8196 = vtanh.f32 %v2927_v45  ;;  %v2907_v33 = vmul.f32 %v2899_v58, %v2890_v10 }
 0xfd9   :  { %v2928_v63 = vmul.f32 0.7978846, %v2920_v28  ;;  %v2921_v8 = vadd.f32 %v2913_v25, %v9524_v6  ;;  %v2914_v26 = vmul.f32 0.044715, %v2906_v50 }
 0xfda   :  { %v2915_v35 = vmul.f32 0.044715, %v2907_v33 }
 0xfdb   :  { %8198 = vtanh.f32 %v2928_v63  ;;  %v2929_v9 = vmul.f32 0.7978846, %v2921_v8  ;;  %v2922_v40 = vadd.f32 %v2914_v26, %v2888_v32 }
 0xfdc   :  { %v2923_v1 = vadd.f32 %v2915_v35, %v2890_v10 }
 0xfdd   :  { %8200 = vtanh.f32 %v2929_v9  ;;  %v2930_v41 = vmul.f32 0.7978846, %v2922_v40 }
 0xfde   :  { %v2931_v42 = vmul.f32 0.7978846, %v2923_v1 }
 0xfdf   :  { %8202 = vtanh.f32 %v2930_v41  ;;  %v8191_v36 = vpop.eup %8190 }
 0xfe0   :  { %8204 = vtanh.f32 %v2931_v42  ;;  %v2940_v49 = vadd.f32 1.0, %v8191_v36 }
 0xfe1   :  { %v8193_v31 = vpop.eup %8192 }
 0xfe2   :  { %v2941_v34 = vadd.f32 1.0, %v8193_v31  ;;  %v2948_v37 = vmul.f32 0.5, %v2940_v49 }
 0xfe3   :  { %v8195_v29 = vpop.eup %8194 }
 0xfe4   :  { %v2942_v53 = vadd.f32 1.0, %v8195_v29  ;;  %v2949_v55 = vmul.f32 0.5, %v2941_v34  ;;  %v2956_v2 = vmul.f32 %v2948_v37, %v9498_v21 }
 0xfe5   :  { %v8197_v52 = vpop.eup %8196 }
 0xfe6   :  { %v2950_v47 = vmul.f32 0.5, %v2942_v53  ;;  %v2943_v51 = vadd.f32 1.0, %v8197_v52  ;;  %v2957_v54 = vmul.f32 %v2949_v55, %v9502_v27 }
 0xfe8   :  { %v8199_v57 = vpop.eup %8198  ;;  %v2951_v59 = vmul.f32 0.5, %v2943_v51  ;;  %v2958_v0 = vmul.f32 %v2950_v47, %v9507_v44 }
 0xfe9   :  { %v2944_v61 = vadd.f32 1.0, %v8199_v57 }
 0xfea   :  { %v8201_v3 = vpop.eup %8200  ;;  %v2959_v38 = vmul.f32 %v2951_v59, %v9512_v62  ;;  %v2964_v24 = vpack.c.bf16 %v2958_v0, %v2956_v2  ;;  %v3390_v2 = vld [vmem:[%s11716_s2 + $0x1c8] sm:$0xff] }
 0xfeb   :  { %v2945_v48 = vadd.f32 1.0, %v8201_v3  ;;  %v2952_v43 = vmul.f32 0.5, %v2944_v61 }
 0xfec   :  { %v8203_v19 = vpop.eup %8202  ;;  %v2965_v20 = vpack.c.bf16 %v2959_v38, %v2957_v54  ;;  %v8082_v38 = vld [vmem:[%s11715_s4] sm:$0xff]  }
 0xfed   :  { %v8205_v56 = vpop.eup %8204  ;;  %v2946_v18 = vadd.f32 1.0, %v8203_v19  ;;  %v2953_v5 = vmul.f32 0.5, %v2945_v48  ;;  %v2960_v21 = vmul.f32 %v2952_v43, %v9518_v23  ;;  %7890 = vmatprep.mubr.msk.bf16.mxu0 %vm668_vm1, %v8082_v38  ;;  %v3394_v48 = vld [vmem:[%s11716_s2 + $0x1e8] sm:$0xff]  ;;  %v3389_v38 = vld [vmem:[%s11716_s2 + $0x1c0] sm:$0xff] }
 0xfee   :  { %3135 = vmatprep.mubr.bf16.mxu1 %v2965_v20  ;;  %v2947_v60 = vadd.f32 1.0, %v8205_v56  ;;  %v7294_v61 = vcombine.low %v3390_v2, %v3394_v48  ;;  %v7295_v19 = vcombine.high %v3390_v2, %v3394_v48  ;;  %v3382_v20 = vld [vmem:[%s11716_s2 + $0x188] sm:$0xff]  ;;  %v3393_v2 = vld [vmem:[%s11716_s2 + $0x1e0] sm:$0xff] }
 0xfef   :  { %3136 = vmatmul.mubr.bf16.vlgmr.msra.gmra.mxu1 %v2964_v24  ;;  %v2954_v44 = vmul.f32 0.5, %v2946_v18  ;;  %v2961_v27 = vmul.f32 %v2953_v5, %v9524_v6  ;;  %v3386_v56 = vld [vmem:[%s11716_s2 + $0x1a8] sm:$0xff] }
 0xff0   :  { %v2955_v12 = vmul.f32 0.5, %v2947_v60  ;;  %v7287_v24 = vcombine.high %v3382_v20, %v3386_v56  ;;  %v3374_v18 = vld [vmem:[%s11716_s2 + $0x148] sm:$0xff]  ;;  %3832 = vmatprep.subr.bf16.mxu1 %v7295_v19  ;;  %v7286_v5 = vcombine.low %v3382_v20, %v3386_v56  ;;  %v3381_v19 = vld [vmem:[%s11716_s2 + $0x180] sm:$0xff]  ;;  %v8084_v56 = vld [vmem:[%s11715_s4 + $0x10] sm:$0xff]  }
 0xff1   :  { %v2962_v46 = vmul.f32 %v2954_v44, %v2888_v32  ;;  %v7209_v32 = vld [vmem:[#allocation11] ss:$0 sm:$0xff]  ;;  %v3378_v60 = vld [vmem:[%s11716_s2 + $0x168] sm:$0xff]  ;;  %3833 = vmatpush1.bf16.msra.mxu1 %v7294_v61  ;;  %v7293_v61 = vcombine.high %v3389_v38, %v3393_v2 }
 0xff2   :  { %v2963_v62 = vmul.f32 %v2955_v12, %v2890_v10  ;;  %3834 = vmatprep.subr.bf16.mxu1 %v7287_v24  ;;  %v7279_v43 = vcombine.high %v3374_v18, %v3378_v60  ;;  %v3366_v44 = vld [vmem:[%s11716_s2 + $0x108] sm:$0xff]  ;;  %v3385_v20 = vld [vmem:[%s11716_s2 + $0x1a0] sm:$0xff]  ;;  %v7292_v24 = vcombine.low %v3389_v38, %v3393_v2  ;;  %v3387_v2 = vld [vmem:[%s11716_s2 + $0x1b0] sm:$0xff] }
 0xff3   :  { %v2966_v58 = vpack.c.bf16 %v2962_v46, %v2960_v21  ;;  %v3370_v12 = vld [vmem:[%s11716_s2 + $0x128] sm:$0xff]  ;;  %v7278_v46 = vcombine.low %v3374_v18, %v3378_v60  ;;  %v7285_v18 = vcombine.high %v3381_v19, %v3385_v20  ;;  %v3373_v60 = vld [vmem:[%s11716_s2 + $0x140] sm:$0xff] }
 0xff4   :  { %v2967_v45 = vpack.c.bf16 %v2963_v62, %v2961_v27  ;;  %v7271_v27 = vcombine.high %v3366_v44, %v3370_v12  ;;  %v3358_v62 = vld [vmem:[%s11716_s2 + $0xc8] sm:$0xff] }
 0xff5   :  { %3835 = vmatpush1.bf16.msra.mxu1 %v7286_v5  ;;  %v3362_v21 = vld [vmem:[%s11716_s2 + $0xe8] sm:$0xff]  ;;  %v3377_v5 = vld [vmem:[%s11716_s2 + $0x160] sm:$0xff] }
 0xff6   :  { %3143 = vmatprep.mubr.bf16.mxu1 %v2967_v45  ;;  %3836 = vmatprep.subr.bf16.mxu1 %v7279_v43  ;;  %v7270_v45 = vcombine.low %v3366_v44, %v3370_v12  ;;  %v7284_v43 = vcombine.low %v3381_v19, %v3385_v20  ;;  %v7277_v44 = vcombine.high %v3373_v60, %v3377_v5  ;;  %v3365_v12 = vld [vmem:[%s11716_s2 + $0x100] sm:$0xff] }
 0xff7   :  { %3144 = vmatmul.mubr.bf16.gmra.mxu1 %v2966_v58  ;;  %v7263_v58 = vcombine.high %v3358_v62, %v3362_v21 }
 0xff8   :  { %3864 = vmatprep.mubr.bf16.mxu1 %v8798_v39 }
 0xff9   :  { %3837 = vmatpush1.bf16.msra.mxu1 %v7278_v46  ;;  %v3369_v46 = vld [vmem:[%s11716_s2 + $0x120] sm:$0xff] }
 0xffa   :  { %3838 = vmatprep.subr.bf16.mxu1 %v7271_v27  ;;  %v8085_v27 = vld [vmem:[%s11715_s4 + $0x18] sm:$0xff]  }
 0xffd   :  { %3839 = vmatpush1.bf16.msra.mxu1 %v7270_v45  ;;  %v3357_v45 = vld [vmem:[%s11716_s2 + $0xc0] sm:$0xff] }
 0xffe   :  { %3840 = vmatprep.subr.bf16.mxu1 %v7263_v58  ;;  %v3361_v58 = vld [vmem:[%s11716_s2 + $0xe0] sm:$0xff] }
0x10af   :  { %v7605_v28 = vpop.f32.mrf.mxu1 }
0x10b1   :  { %v7606_v25 = vpop.f32.mrf.mxu1 }
0x10b2   :  { %v7607_v26 = vadd.f32 %v7606_v25, %v7605_v28  ;;  %v3350_v28 = vld [vmem:[%s11716_s2 + $0x88] sm:$0xff] }
0x10b3   :  { %v7608_v50 = vpop.f32.mrf.mxu1  ;;  %v3354_v25 = vld [vmem:[%s11716_s2 + $0xa8] sm:$0xff] }
0x10b4   :  { %v3138_v40 = vadd.f32 %v7607_v26, %v7209_v32 }
0x10b5   :  { %v7609_v33 = vpop.f32.mrf.mxu1 }
0x10b6   :  { %v7610_v23 = vadd.f32 %v7609_v33, %v7608_v50  ;;  %v3152_v34 = vadd.f32 %v3138_v40, %v9482_v7  ;;  %v7262_v50 = vcombine.low %v3358_v62, %v3362_v21  ;;  %v7255_v33 = vcombine.high %v3350_v28, %v3354_v25 }
0x10b7   :  { %v7611_v63 = vpop.f32.mrf.mxu1  ;;  %v7276_v62 = vcombine.low %v3373_v60, %v3377_v5  ;;  %v7269_v21 = vcombine.high %v3365_v12, %v3369_v46  ;;  %v3380_v60 = vld [vmem:[%s11716_s2 + $0x178] sm:$0xff] }
0x10b8   :  { %v3141_v36 = vadd.f32 %v7610_v23, %v7209_v32  ;;  %3841 = vmatpush1.bf16.msra.mxu1 %v7262_v50  ;;  %v3349_v50 = vld [vmem:[%s11716_s2 + $0x80] sm:$0xff] }
0x10b9   :  { %v7612_v8 = vpop.f32.mrf.mxu1  ;;  %3842 = vmatprep.subr.bf16.mxu1 %v7255_v33  ;;  %v3353_v33 = vld [vmem:[%s11716_s2 + $0xa0] sm:$0xff] }
0x10ba   :  { %v7613_v35 = vadd.f32 %v7612_v8, %v7611_v63  ;;  %v3153_v29 = vadd.f32 %v3141_v36, %v9484_v11  ;;  %v7254_v63 = vcombine.low %v3350_v28, %v3354_v25  ;;  %v7268_v28 = vcombine.low %v3365_v12, %v3369_v46  ;;  %v3367_v46 = vld [vmem:[%s11716_s2 + $0x110] sm:$0xff] }
0x10bb   :  { %v7614_v9 = vpop.f32.mrf.mxu1  ;;  %v7261_v25 = vcombine.high %v3357_v45, %v3361_v58 }
0x10bc   :  { %v3146_v6 = vadd.f32 %v7613_v35, %v7209_v32  ;;  %3843 = vmatpush1.bf16.msra.mxu1 %v7254_v63  ;;  %v7260_v63 = vcombine.low %v3357_v45, %v3361_v58  ;;  %v3372_v45 = vld [vmem:[%s11716_s2 + $0x138] sm:$0xff] }
0x10bd   :  { %v7615_v10 = vpop.f32.mrf.mxu1 }
0x10be   :  { %v7616_v1 = vadd.f32 %v7615_v10, %v7614_v9  ;;  %v3154_v41 = vadd.f32 %v3146_v6, %v9492_v30 }
0x10c0   :  { %v3149_v42 = vadd.f32 %v7616_v1, %v7209_v32  ;;  %3162 = vadd.xlane.f32.xlu0 %v3154_v41 }
0x10c2   :  { %v3155_v31 = vadd.f32 %v3149_v42, %v9490_v4 }
0x10c4   :  { %3164 = vadd.xlane.f32.xlu1 %v3155_v31  ;;  %3158 = vadd.xlane.f32.xlu0 %v3152_v34 }
0x10c8   :  { %3160 = vadd.xlane.f32.xlu1 %v3153_v29 }
0x1149   :  { %v3163_v49 = vpop.xlane.xlu0 %3162 }
0x114a   :  { %v3168_v53 = vmul.f32 0.0078125, %v3163_v49 }
0x114c   :  { %v9545_v52 = vsub.f32 %v3154_v41, %v3168_v53 }
0x114d   :  { %v3165_v47 = vpop.xlane.xlu1 %3164  ;;  %v3159_v51 = vpop.xlane.xlu0 %3158 }
0x114e   :  { %v3169_v30 = vmul.f32 0.0078125, %v3165_v47  ;;  %v3166_v55 = vmul.f32 0.0078125, %v3159_v51  ;;  %v3176_v4 = vmul.f32 %v9545_v52, %v9545_v52  ;;  %v7227_v51 = vld [vmem:[%s11718_s10] ss:$0 sm:$0xff] }
0x1150   :  { %v9549_v7 = vsub.f32 %v3155_v31, %v3169_v30  ;;  %v9551_v37 = vsub.f32 %v3152_v34, %v3166_v55  ;;  %3182 = vadd.xlane.f32.xlu0 %v3176_v4  ;;  %v7226_v34 = vld [vmem:[%s11717_s7] ss:$0 sm:$0xff] }
0x1151   :  { %v3161_v11 = vpop.xlane.xlu1 %3160 }
0x1152   :  { %v3167_v57 = vmul.f32 0.0078125, %v3161_v11  ;;  %v3177_v59 = vmul.f32 %v9549_v7, %v9549_v7  ;;  %v3174_v0 = vmul.f32 %v9551_v37, %v9551_v37 }
0x1154   :  { %v9557_v3 = vsub.f32 %v3153_v29, %v3167_v57  ;;  %3184 = vadd.xlane.f32.xlu1 %v3177_v59  ;;  %3178 = vadd.xlane.f32.xlu0 %v3174_v0 }
0x1156   :  { %v3175_v54 = vmul.f32 %v9557_v3, %v9557_v3 }
0x1158   :  { %3180 = vadd.xlane.f32.xlu1 %v3175_v54 }
0x11d9   :  { %v3183_v8 = vpop.xlane.xlu0 %3182 }
0x11da   :  { %v3188_v26 = vmul.f32 0.0078125, %v3183_v8  ;;  %v7253_v8 = vcombine.high %v3349_v50, %v3353_v33 }
0x11dc   :  { %v3192_v35 = vadd.f32 1e-12, %v3188_v26  ;;  %v7252_v26 = vcombine.low %v3349_v50, %v3353_v33 }
0x11dd   :  { %v3185_v32 = vpop.xlane.xlu1 %3184  ;;  %v3179_v9 = vpop.xlane.xlu0 %3178 }
0x11de   :  { %8206 = vrsqrt.f32 %v3192_v35  ;;  %v3189_v6 = vmul.f32 0.0078125, %v3185_v32  ;;  %v3186_v10 = vmul.f32 0.0078125, %v3179_v9  ;;  %v3341_v35 = vld [vmem:[%s11716_s2 + $0x40] sm:$0xff]  ;;  %v3342_v9 = vld [vmem:[%s11716_s2 + $0x48] sm:$0xff] }
0x11df   :  { %v3345_v32 = vld [vmem:[%s11716_s2 + $0x60] sm:$0xff] }
0x11e0   :  { %v3193_v40 = vadd.f32 1e-12, %v3189_v6  ;;  %v3190_v23 = vadd.f32 1e-12, %v3186_v10  ;;  %v7244_v6 = vcombine.low %v3341_v35, %v3345_v32  ;;  %v7245_v10 = vcombine.high %v3341_v35, %v3345_v32  ;;  %v3360_v35 = vld [vmem:[%s11716_s2 + $0xd8] sm:$0xff] }
0x11e1   :  { %v3181_v1 = vpop.xlane.xlu1 %3180  ;;  %v3364_v32 = vld [vmem:[%s11716_s2 + $0xf8] sm:$0xff] }
0x11e2   :  { %8208 = vrsqrt.f32 %v3193_v40  ;;  %v3187_v41 = vmul.f32 0.0078125, %v3181_v1  ;;  %v3346_v40 = vld [vmem:[%s11716_s2 + $0x68] sm:$0xff] }
0x11e3   :  { %8210 = vrsqrt.f32 %v3190_v23  ;;  %v7246_v23 = vcombine.low %v3342_v9, %v3346_v40  ;;  %v7247_v1 = vcombine.high %v3342_v9, %v3346_v40  ;;  %v7267_v40 = vcombine.high %v3360_v35, %v3364_v32 }
0x11e4   :  { %v3191_v42 = vadd.f32 1e-12, %v3187_v41  ;;  %v3333_v41 = vld [vmem:[%s11716_s2] sm:$0xff] }
0x11e5   :  { %3844 = vmatprep.subr.bf16.mxu1 %v7247_v1 }
0x11e6   :  { %8212 = vrsqrt.f32 %v3191_v42  ;;  %v3337_v42 = vld [vmem:[%s11716_s2 + $0x20] sm:$0xff]  ;;  %3845 = vmatpush1.bf16.msra.mxu1 %v7246_v23  ;;  %v3351_v23 = vld [vmem:[%s11716_s2 + $0x90] sm:$0xff] }
0x11eb   :  { %v8207_v36 = vpop.eup %8206 }
0x11ec   :  { %v3200_v31 = vmul.f32 %v8207_v36, %v9545_v52  ;;  %v3334_v36 = vld [vmem:[%s11716_s2 + $0x8] sm:$0xff] }
0x11ee   :  { %v3210_v47 = vmul.f32 %v7226_v34, %v3200_v31  ;;  %v7237_v31 = vcombine.high %v3333_v41, %v3337_v42 }
0x11ef   :  { %v8209_v29 = vpop.eup %8208 }
0x11f0   :  { %v8211_v49 = vpop.eup %8210  ;;  %v3201_v53 = vmul.f32 %v8209_v29, %v9549_v7  ;;  %v3220_v11 = vadd.f32 %v7227_v51, %v3210_v47  ;;  %v7236_v29 = vcombine.low %v3333_v41, %v3337_v42  ;;  %v3391_v47 = vld [vmem:[%s11716_s2 + $0x1d0] sm:$0xff]  ;;  %v3352_v42 = vld [vmem:[%s11716_s2 + $0x98] sm:$0xff] }
0x11f1   :  { %v3198_v30 = vmul.f32 %v8211_v49, %v9551_v37  ;;  %v3355_v41 = vld [vmem:[%s11716_s2 + $0xb0] sm:$0xff] }
0x11f2   :  { %v3211_v55 = vmul.f32 %v7226_v34, %v3201_v53 }
0x11f3   :  { %v8213_v4 = vpop.eup %8212  ;;  %v3208_v59 = vmul.f32 %v7226_v34, %v3198_v30  ;;  %v3392_v30 = vld [vmem:[%s11716_s2 + $0x1d8] sm:$0xff] }
0x11f4   :  { %v3221_v57 = vadd.f32 %v7227_v51, %v3211_v55  ;;  %v3199_v52 = vmul.f32 %v8213_v4, %v9557_v3  ;;  %v8083_v3 = vld [vmem:[%s11715_s4 + $0x8] sm:$0xff]  }
0x11f5   :  { %v3218_v7 = vadd.f32 %v7227_v51, %v3208_v59 }
0x11f6   :  { %v3231_v0 = vpack.c.bf16 %v3221_v57, %v3220_v11  ;;  %v3209_v54 = vmul.f32 %v7226_v34, %v3199_v52  ;;  %v3338_v34 = vld [vmem:[%s11716_s2 + $0x28] sm:$0xff]  ;;  %v3396_v11 = vld [vmem:[%s11716_s2 + $0x1f8] sm:$0xff] }
0x11f7   :  { %v7238_v49 = vcombine.low %v3334_v36, %v3338_v34  ;;  %v7239_v53 = vcombine.high %v3334_v36, %v3338_v34  ;;  %v7298_v57 = vcombine.low %v3392_v30, %v3396_v11  ;;  %v7299_v52 = vcombine.high %v3392_v30, %v3396_v11  ;;  %v3356_v36 = vld [vmem:[%s11716_s2 + $0xb8] sm:$0xff] }
0x11f8   :  { %7886 = vmatprep.subr.bf16.mxu0 %v3231_v0  ;;  %v3219_v37 = vadd.f32 %v7227_v51, %v3209_v54  ;;  %v3395_v51 = vld [vmem:[%s11716_s2 + $0x1f0] sm:$0xff]  ;;  %v7266_v34 = vcombine.low %v3360_v35, %v3364_v32  ;;  %v3344_v30 = vld [vmem:[%s11716_s2 + $0x58] sm:$0xff]  ;;  %v7258_v11 = vcombine.low %v3352_v42, %v3356_v36 }
0x11f9   :  { %7887 = vmatpush3.bf16.msra.mxu0 %v3231_v0  ;;  %3846 = vmatprep.subr.bf16.mxu1 %v7239_v53  ;;  %v7296_v55 = vcombine.low %v3391_v47, %v3395_v51  ;;  %v7297_v4 = vcombine.high %v3391_v47, %v3395_v51  ;;  %v3383_v54 = vld [vmem:[%s11716_s2 + $0x190] sm:$0xff]  ;;  %v7259_v53 = vcombine.high %v3352_v42, %v3356_v36  ;;  %v4148_v42 = vld [vmem:[#allocation13 + $0xc0] sm:$0xff] }
0x11fa   :  { %v3230_v48 = vpack.c.bf16 %v3219_v37, %v3218_v7  ;;  %3847 = vmatpush1.bf16.msra.mxu1 %v7238_v49  ;;  %v3384_v7 = vld [vmem:[%s11716_s2 + $0x198] sm:$0xff]  ;;  %v7289_v19 = vcombine.high %v3383_v54, %v3387_v2  ;;  %v7288_v5 = vcombine.low %v3383_v54, %v3387_v2  ;;  %v7257_v49 = vcombine.high %v3351_v23, %v3355_v41  ;;  %v3343_v47 = vld [vmem:[%s11716_s2 + $0x50] sm:$0xff]  ;;  %v4152_v36 = vld [vmem:[#allocation13 + $0xe0] sm:$0xff] }
0x11fb   :  { %3978 = vmatprep.subr.bf16.mxu1 %v7299_v52  ;;  %v3388_v37 = vld [vmem:[%s11716_s2 + $0x1b8] sm:$0xff]  ;;  %v3347_v51 = vld [vmem:[%s11716_s2 + $0x70] sm:$0xff] }
0x11fc   :  { %7888 = vmatprep.subr.bf16.mxu0 %v3230_v48  ;;  %v7291_v20 = vcombine.high %v3384_v7, %v3388_v37  ;;  %v3336_v54 = vld [vmem:[%s11716_s2 + $0x18] sm:$0xff]  ;;  %v7248_v2 = vcombine.low %v3343_v47, %v3347_v51 }
0x11fd   :  { %7889 = vmatpush3.bf16.msra.mxu0 %v3230_v48 }
0x11fe   :  { %3759 = vmatprep.subr.bf16.mxu0 %v7293_v61 }
0x1200   :  { %7891 = vmatmul.mubr.msk.bf16.vlgmr.msra.gmra.mxu0 %vm668_vm1, %v8083_v3  ;;  %v3375_v3 = vld [vmem:[%s11716_s2 + $0x150] sm:$0xff] }
0x1201   :  { %7894 = vmatprep.mubr.msk.bf16.mxu0 %vm668_vm1, %v8084_v56  ;;  %3760 = vmatpush1.bf16.msra.mxu0 %v7292_v24  ;;  %v3379_v24 = vld [vmem:[%s11716_s2 + $0x170] sm:$0xff] }
0x1202   :  { %3761 = vmatprep.subr.bf16.mxu0 %v7285_v18  ;;  %v3376_v18 = vld [vmem:[%s11716_s2 + $0x158] sm:$0xff]  ;;  %v7280_v58 = vcombine.low %v3375_v3, %v3379_v24 }
0x1203   :  { %v7283_v12 = vcombine.high %v3376_v18, %v3380_v60 }
0x1205   :  { %3762 = vmatpush1.bf16.msra.mxu0 %v7284_v43  ;;  %v7290_v43 = vcombine.low %v3384_v7, %v3388_v37 }
0x1206   :  { %3763 = vmatprep.subr.bf16.mxu0 %v7277_v44  ;;  %v7281_v44 = vcombine.high %v3375_v3, %v3379_v24  ;;  %v4184_v3 = vld [vmem:[#allocation13 + $0x1e0] sm:$0xff]  ;;  %v4181_v24 = vld [vmem:[#allocation13 + $0x1c8] sm:$0xff] }
0x1208   :  { %7895 = vmatmul.mubr.msk.bf16.gmra.mxu0 %vm668_vm1, %v8085_v27 }
0x1209   :  { %3764 = vmatpush1.bf16.msra.mxu0 %v7276_v62  ;;  %3791 = vmatprep.mubr.bf16.mxu0 %v8798_v39  ;;  %v3371_v62 = vld [vmem:[%s11716_s2 + $0x130] sm:$0xff] }
0x120a   :  { %3765 = vmatprep.subr.bf16.mxu0 %v7269_v21  ;;  %v3368_v21 = vld [vmem:[%s11716_s2 + $0x118] sm:$0xff]  ;;  %v7273_v50 = vcombine.high %v3367_v46, %v3371_v62  ;;  %v7272_v9 = vcombine.low %v3367_v46, %v3371_v62  ;;  %v4173_v46 = vld [vmem:[#allocation13 + $0x188] sm:$0xff] }
0x120b   :  { %v7275_v33 = vcombine.high %v3368_v21, %v3372_v45 }
0x120d   :  { %3766 = vmatpush1.bf16.msra.mxu0 %v7268_v28  ;;  %v7282_v28 = vcombine.low %v3376_v18, %v3380_v60  ;;  %v4185_v18 = vld [vmem:[#allocation13 + $0x1e8] sm:$0xff] }
0x120e   :  { %3767 = vmatprep.subr.bf16.mxu0 %v7261_v25 }
0x1211   :  { %3768 = vmatpush1.bf16.msra.mxu0 %v7260_v63  ;;  %v3359_v63 = vld [vmem:[%s11716_s2 + $0xd0] sm:$0xff] }
0x1212   :  { %3769 = vmatprep.subr.bf16.mxu0 %v7253_v8 }
0x1215   :  { %3770 = vmatpush1.bf16.msra.mxu0 %v7252_v26  ;;  %v3363_v26 = vld [vmem:[%s11716_s2 + $0xf0] sm:$0xff] }
0x1216   :  { %3771 = vmatprep.subr.bf16.mxu0 %v7245_v10  ;;  %v7265_v10 = vcombine.high %v3359_v63, %v3363_v26 }
0x1219   :  { %3772 = vmatpush1.bf16.msra.mxu0 %v7244_v6  ;;  %v7274_v6 = vcombine.low %v3368_v21, %v3372_v45  ;;  %v9673_v21 = vcombine.low %v4181_v24, %v4185_v18 }
0x121a   :  { %3773 = vmatprep.subr.bf16.mxu0 %v7237_v31  ;;  %v7264_v31 = vcombine.low %v3359_v63, %v3363_v26  ;;  %v4169_v63 = vld [vmem:[#allocation13 + $0x168] sm:$0xff] }
0x121b   :  { %11722 = vst [vmem:[#allocation46_spill] sm:$0xff] %v9673_v21 }
0x121d   :  { %3774 = vmatpush1.bf16.msra.mxu0 %v7236_v29 }
0x121e   :  { %3905 = vmatprep.subr.bf16.mxu0 %v7297_v4  ;;  %v7256_v4 = vcombine.low %v3351_v23, %v3355_v41 }
0x12c0   :  { %v7892_v59 = vpop.f32.mrf.mxu0 }
0x12c2   :  { %v3298_v0 = vpop.f32.mrf.mxu0 }
0x12c4   :  { %v7893_v38 = vpop.f32.mrf.mxu0 }
0x12c5   :  { %v9632_v25 = vpack.c.bf16 %v7893_v38, %v7892_v59  ;;  %v3335_v59 = vld [vmem:[%s11716_s2 + $0x10] sm:$0xff]  ;;  %v3340_v38 = vld [vmem:[%s11716_s2 + $0x38] sm:$0xff] }
0x12c6   :  { %v3301_v48 = vpop.f32.mrf.mxu0 }
0x12c7   :  { %v9616_v61 = vpack.c.bf16 %v3301_v48, %v3298_v0  ;;  %v3339_v0 = vld [vmem:[%s11716_s2 + $0x30] sm:$0xff] }
0x12c8   :  { %v9619_v56 = vpop.f32.mrf.mxu0  ;;  %v7241_v48 = vcombine.high %v3335_v59, %v3339_v0  ;;  %v7240_v60 = vcombine.low %v3335_v59, %v3339_v0  ;;  %v4132_v0 = vld [vmem:[#allocation13 + $0x40] sm:$0xff] }
0x12c9   :  { %3792 = vmatmul.mubr.bf16.vlgmr.msra.gmra.mxu0 %v9616_v61  ;;  %3865 = vmatmul.mubr.bf16.vlgmr.msra.gmra.mxu1 %v9616_v61 }
0x12ca   :  { %3906 = vmatpush1.bf16.msra.mxu0 %v7296_v55  ;;  %3979 = vmatpush1.bf16.msra.mxu1 %v7298_v57  ;;  %v3314_v27 = vpop.f32.mrf.mxu0  ;;  %v3348_v55 = vld [vmem:[%s11716_s2 + $0x78] sm:$0xff]  ;;  %v7249_v57 = vcombine.high %v3343_v47, %v3347_v51  ;;  %v9719_v47 = vcombine.high %v4148_v42, %v4152_v36 }
0x12cb   :  { %3907 = vmatprep.subr.bf16.mxu0 %v7289_v19  ;;  %3980 = vmatprep.subr.bf16.mxu1 %v7291_v20  ;;  %v7251_v52 = vcombine.high %v3344_v30, %v3348_v55  ;;  %v7250_v7 = vcombine.low %v3344_v30, %v3348_v55  ;;  %v7243_v19 = vcombine.high %v3336_v54, %v3340_v38  ;;  %v4180_v20 = vld [vmem:[#allocation13 + $0x1c0] sm:$0xff]  ;;  %v4141_v55 = vld [vmem:[#allocation13 + $0x88] sm:$0xff] }
0x12cc   :  { %3801 = vmatprep.mubr.bf16.mxu0 %v8798_v39  ;;  %3874 = vmatprep.mubr.bf16.mxu1 %v8798_v39  ;;  %v7897_v8 = vpop.f32.mrf.mxu0  ;;  %v9671_v62 = vcombine.low %v4180_v20, %v4184_v3  ;;  %11735 = vst [vmem:[#allocation59_spill] sm:$0xff] %v9719_v47  ;;  %v4140_v30 = vld [vmem:[#allocation13 + $0x80] sm:$0xff] }
0x12cd   :  { %v9661_v37 = vpack.c.bf16 %v7897_v8, %v9619_v56  ;;  %v9665_v56 = vcombine.high %v4180_v20, %v4184_v3  ;;  %v4124_v3 = vld [vmem:[#allocation13] sm:$0xff] }
0x12ce   :  { %3908 = vmatpush1.bf16.msra.mxu0 %v7288_v5  ;;  %3981 = vmatpush1.bf16.msra.mxu1 %v7290_v43  ;;  %v3317_v1 = vpop.f32.mrf.mxu0  ;;  %v7242_v5 = vcombine.low %v3336_v54, %v3340_v38  ;;  %v9667_v43 = vcombine.high %v4181_v24, %v4185_v18  ;;  %11721 = vst [vmem:[#allocation45_spill] sm:$0xff] %v9671_v62  ;;  %v4136_v54 = vld [vmem:[#allocation13 + $0x60] sm:$0xff]  ;;  %v4133_v38 = vld [vmem:[#allocation13 + $0x48] sm:$0xff] }
0x12cf   :  { %3909 = vmatprep.subr.bf16.mxu0 %v7281_v44  ;;  %3982 = vmatprep.subr.bf16.mxu1 %v7283_v12  ;;  %v9646_v29 = vpack.c.bf16 %v3317_v1, %v3314_v27  ;;  %11719 = vst [vmem:[#allocation43_spill] sm:$0xff] %v9665_v56  ;;  %v4172_v44 = vld [vmem:[#allocation13 + $0x180] sm:$0xff]  ;;  %v4177_v27 = vld [vmem:[#allocation13 + $0x1a8] sm:$0xff] }
0x12d0   :  { %11720 = vst [vmem:[#allocation44_spill] sm:$0xff] %v9667_v43  ;;  %v4176_v12 = vld [vmem:[#allocation13 + $0x1a0] sm:$0xff]  ;;  %v9687_v26 = vcombine.low %v4173_v46, %v4177_v27  ;;  %v4125_v24 = vld [vmem:[#allocation13 + $0x8] sm:$0xff] }
0x12d1   :  { %3802 = vmatmul.mubr.bf16.gmra.mxu0 %v9632_v25  ;;  %3875 = vmatmul.mubr.bf16.gmra.mxu1 %v9632_v25  ;;  %v9677_v45 = vcombine.high %v4172_v44, %v4176_v12  ;;  %v9685_v8 = vcombine.low %v4172_v44, %v4176_v12  ;;  %v4129_v18 = vld [vmem:[#allocation13 + $0x28] sm:$0xff] }
0x12d2   :  { %3910 = vmatpush1.bf16.msra.mxu0 %v7280_v58  ;;  %3983 = vmatpush1.bf16.msra.mxu1 %v7282_v28  ;;  %v9679_v58 = vcombine.high %v4173_v46, %v4177_v27  ;;  %v4164_v28 = vld [vmem:[#allocation13 + $0x140] sm:$0xff]  ;;  %11726 = vst [vmem:[#allocation50_spill] sm:$0xff] %v9687_v26  ;;  %v9763_v12 = vcombine.high %v4125_v24, %v4129_v18  ;;  %v4245_v27 = vld [vmem:[#allocation13 + $0x3c8] sm:$0xff] }
0x12d3   :  { %3911 = vmatprep.subr.bf16.mxu0 %v7273_v50  ;;  %3984 = vmatprep.subr.bf16.mxu1 %v7275_v33  ;;  %11723 = vst [vmem:[#allocation47_spill] sm:$0xff] %v9677_v45  ;;  %v4168_v50 = vld [vmem:[#allocation13 + $0x160] sm:$0xff]  ;;  %v4165_v33 = vld [vmem:[#allocation13 + $0x148] sm:$0xff]  ;;  %11725 = vst [vmem:[#allocation49_spill] sm:$0xff] %v9685_v8 }
0x12d4   :  { %3811 = vmatprep.mubr.bf16.mxu0 %v8798_v39  ;;  %3884 = vmatprep.mubr.bf16.mxu1 %v8798_v39  ;;  %11724 = vst [vmem:[#allocation48_spill] sm:$0xff] %v9679_v58  ;;  %v9691_v35 = vcombine.high %v4164_v28, %v4168_v50  ;;  %v9693_v32 = vcombine.high %v4165_v33, %v4169_v63  ;;  %11748 = vst [vmem:[#allocation72_spill] sm:$0xff] %v9763_v12  ;;  %v4248_v46 = vld [vmem:[#allocation13 + $0x3e0] sm:$0xff] }
0x12d5   :  { %v9701_v23 = vcombine.low %v4165_v33, %v4169_v63  ;;  %v9771_v33 = vcombine.low %v4125_v24, %v4129_v18  ;;  %v4224_v24 = vld [vmem:[#allocation13 + $0x320] sm:$0xff]  ;;  %v4221_v18 = vld [vmem:[#allocation13 + $0x308] sm:$0xff] }
0x12d6   :  { %3912 = vmatpush1.bf16.msra.mxu0 %v7272_v9  ;;  %3985 = vmatpush1.bf16.msra.mxu1 %v7274_v6  ;;  %11727 = vst [vmem:[#allocation51_spill] sm:$0xff] %v9691_v35  ;;  %11728 = vst [vmem:[#allocation52_spill] sm:$0xff] %v9693_v32  ;;  %v4156_v9 = vld [vmem:[#allocation13 + $0x100] sm:$0xff]  ;;  %v4157_v6 = vld [vmem:[#allocation13 + $0x108] sm:$0xff] }
0x12d7   :  { %3913 = vmatprep.subr.bf16.mxu0 %v7265_v10  ;;  %3986 = vmatprep.subr.bf16.mxu1 %v7267_v40  ;;  %v4161_v10 = vld [vmem:[#allocation13 + $0x128] sm:$0xff]  ;;  %v9699_v40 = vcombine.low %v4164_v28, %v4168_v50  ;;  %11730 = vst [vmem:[#allocation54_spill] sm:$0xff] %v9701_v23  ;;  %11750 = vst [vmem:[#allocation74_spill] sm:$0xff] %v9771_v33 }
0x12d8   :  { %v9707_v41 = vcombine.high %v4157_v6, %v4161_v10  ;;  %v4249_v28 = vld [vmem:[#allocation13 + $0x3e8] sm:$0xff] }
0x12d9   :  { %3812 = vmatmul.mubr.bf16.gmra.mxu0 %v9646_v29  ;;  %3885 = vmatmul.mubr.bf16.gmra.mxu1 %v9646_v29  ;;  %11729 = vst [vmem:[#allocation53_spill] sm:$0xff] %v9699_v40 }
0x12da   :  { %3914 = vmatpush1.bf16.msra.mxu0 %v7264_v31  ;;  %3987 = vmatpush1.bf16.msra.mxu1 %v7266_v34  ;;  %11732 = vst [vmem:[#allocation56_spill] sm:$0xff] %v9707_v41  ;;  %v4149_v31 = vld [vmem:[#allocation13 + $0xc8] sm:$0xff] }
0x12db   :  { %3915 = vmatprep.subr.bf16.mxu0 %v7257_v49  ;;  %3988 = vmatprep.subr.bf16.mxu1 %v7259_v53  ;;  %v4153_v34 = vld [vmem:[#allocation13 + $0xe8] sm:$0xff]  ;;  %v9715_v53 = vcombine.low %v4157_v6, %v4161_v10  ;;  %v4240_v6 = vld [vmem:[#allocation13 + $0x3a0] sm:$0xff] }
0x12dc   :  { %3821 = vmatprep.mubr.bf16.mxu0 %v8798_v39  ;;  %3894 = vmatprep.mubr.bf16.mxu1 %v8798_v39  ;;  %v9721_v51 = vcombine.high %v4149_v31, %v4153_v34  ;;  %v4237_v10 = vld [vmem:[#allocation13 + $0x388] sm:$0xff] }
0x12dd   :  { %11734 = vst [vmem:[#allocation58_spill] sm:$0xff] %v9715_v53 }
0x12de   :  { %3916 = vmatpush1.bf16.msra.mxu0 %v7256_v4  ;;  %3989 = vmatpush1.bf16.msra.mxu1 %v7258_v11  ;;  %11736 = vst [vmem:[#allocation60_spill] sm:$0xff] %v9721_v51  ;;  %v4145_v4 = vld [vmem:[#allocation13 + $0xa8] sm:$0xff]  ;;  %v9727_v11 = vcombine.low %v4148_v42, %v4152_v36  ;;  %v11421_v42 = vmov 0.0|0.0  }
0x12df   :  { %3917 = vmatprep.subr.bf16.mxu0 %v7249_v57  ;;  %3990 = vmatprep.subr.bf16.mxu1 %v7251_v52  ;;  %v9729_v57 = vcombine.low %v4149_v31, %v4153_v34  ;;  %v9735_v59 = vcombine.high %v4141_v55, %v4145_v4  ;;  %v9785_v31 = vcombine.low %v4245_v27, %v4249_v28 }
0x12e0   :  { %11737 = vst [vmem:[#allocation61_spill] sm:$0xff] %v9727_v11 }
0x12e1   :  { %3822 = vmatmul.mubr.bf16.gmra.mxu0 %v9661_v37  ;;  %3895 = vmatmul.mubr.bf16.gmra.mxu1 %v9661_v37  ;;  %11738 = vst [vmem:[#allocation62_spill] sm:$0xff] %v9729_v57  ;;  %11740 = vst [vmem:[#allocation64_spill] sm:$0xff] %v9735_v59 }
0x12e2   :  { %3918 = vmatpush1.bf16.msra.mxu0 %v7248_v2  ;;  %3991 = vmatpush1.bf16.msra.mxu1 %v7250_v7  ;;  %v4137_v2 = vld [vmem:[#allocation13 + $0x68] sm:$0xff]  ;;  %11754 = vst [vmem:[#allocation78_spill] sm:$0xff] %v9785_v31 }
0x12e3   :  { %3919 = vmatprep.subr.bf16.mxu0 %v7241_v48  ;;  %3992 = vmatprep.subr.bf16.mxu1 %v7243_v19  ;;  %v9743_v48 = vcombine.low %v4141_v55, %v4145_v4  ;;  %v9747_v19 = vcombine.high %v4132_v0, %v4136_v54  ;;  %v9749_v20 = vcombine.high %v4133_v38, %v4137_v2  ;;  %v4232_v55 = vld [vmem:[#allocation13 + $0x360] sm:$0xff]  ;;  %v4229_v4 = vld [vmem:[#allocation13 + $0x348] sm:$0xff] }
0x12e4   :  { %3937 = vmatprep.mubr.bf16.mxu0 %v8798_v39  ;;  %4010 = vmatprep.mubr.bf16.mxu1 %v8798_v39 }
0x12e5   :  { %11742 = vst [vmem:[#allocation66_spill] sm:$0xff] %v9743_v48  ;;  %11743 = vst [vmem:[#allocation67_spill] sm:$0xff] %v9747_v19 }
0x12e6   :  { %3920 = vmatpush1.bf16.msra.mxu0 %v7240_v60  ;;  %3993 = vmatpush1.bf16.msra.mxu1 %v7242_v5  ;;  %11744 = vst [vmem:[#allocation68_spill] sm:$0xff] %v9749_v20  ;;  %v9755_v60 = vcombine.low %v4132_v0, %v4136_v54  ;;  %v9757_v5 = vcombine.low %v4133_v38, %v4137_v2  ;;  %v4233_v0 = vld [vmem:[#allocation13 + $0x368] sm:$0xff] }
0x12e7   :  { %4892 = vmatprep.subr.bf16.mxu0 %v9665_v56  ;;  %4933 = vmatprep.subr.bf16.mxu1 %v9667_v43 }
0x12e8   :  { %11745 = vst [vmem:[#allocation69_spill] sm:$0xff] %v9755_v60  ;;  %11746 = vst [vmem:[#allocation70_spill] sm:$0xff] %v9757_v5 }
0x12e9   :  { %3938 = vmatmul.mubr.bf16.vlgmr.msra.gmra.mxu0 %v9616_v61  ;;  %4011 = vmatmul.mubr.bf16.vlgmr.msra.gmra.mxu1 %v9616_v61  ;;  %v4160_v61 = vld [vmem:[#allocation13 + $0x120] sm:$0xff] }
0x12ea   :  { %4893 = vmatpush1.bf16.msra.mxu0 %v9671_v62  ;;  %4934 = vmatpush1.bf16.msra.mxu1 %v9673_v21  ;;  %v9705_v1 = vcombine.high %v4156_v9, %v4160_v61  ;;  %v9713_v49 = vcombine.low %v4156_v9, %v4160_v61  ;;  %v9777_v9 = vcombine.high %v4245_v27, %v4249_v28  ;;  %v4236_v61 = vld [vmem:[#allocation13 + $0x380] sm:$0xff] }
0x12eb   :  { %4894 = vmatprep.subr.bf16.mxu0 %v9677_v45  ;;  %4935 = vmatprep.subr.bf16.mxu1 %v9679_v58  ;;  %v9789_v34 = vcombine.high %v4236_v61, %v4240_v6  ;;  %v9795_v54 = vcombine.low %v4236_v61, %v4240_v6  ;;  %v9809_v27 = vcombine.low %v4229_v4, %v4233_v0  ;;  %v4212_v6 = vld [vmem:[#allocation13 + $0x2c0] sm:$0xff] }
0x12ec   :  { %3947 = vmatprep.mubr.bf16.mxu0 %v8798_v39  ;;  %4020 = vmatprep.mubr.bf16.mxu1 %v8798_v39  ;;  %11731 = vst [vmem:[#allocation55_spill] sm:$0xff] %v9705_v1  ;;  %11733 = vst [vmem:[#allocation57_spill] sm:$0xff] %v9713_v49 }
0x12ed   :  { %11752 = vst [vmem:[#allocation76_spill] sm:$0xff] %v9777_v9  ;;  %11755 = vst [vmem:[#allocation79_spill] sm:$0xff] %v9789_v34 }
0x12ee   :  { %4895 = vmatpush1.bf16.msra.mxu0 %v9685_v8  ;;  %4936 = vmatpush1.bf16.msra.mxu1 %v9687_v26  ;;  %11757 = vst [vmem:[#allocation81_spill] sm:$0xff] %v9795_v54  ;;  %11762 = vst [vmem:[#allocation86_spill] sm:$0xff] %v9809_v27 }
0x12ef   :  { %4896 = vmatprep.subr.bf16.mxu0 %v9691_v35  ;;  %4937 = vmatprep.subr.bf16.mxu1 %v9693_v32 }
0x12f1   :  { %3948 = vmatmul.mubr.bf16.gmra.mxu0 %v9632_v25  ;;  %4021 = vmatmul.mubr.bf16.gmra.mxu1 %v9632_v25  ;;  %v4144_v25 = vld [vmem:[#allocation13 + $0xa0] sm:$0xff] }
0x12f2   :  { %4897 = vmatpush1.bf16.msra.mxu0 %v9699_v40  ;;  %4938 = vmatpush1.bf16.msra.mxu1 %v9701_v23  ;;  %v9733_v52 = vcombine.high %v4140_v30, %v4144_v25  ;;  %v9741_v7 = vcombine.low %v4140_v30, %v4144_v25  ;;  %v4228_v25 = vld [vmem:[#allocation13 + $0x340] sm:$0xff] }
0x12f3   :  { %4898 = vmatprep.subr.bf16.mxu0 %v9705_v1  ;;  %4939 = vmatprep.subr.bf16.mxu1 %v9707_v41  ;;  %v9801_v2 = vcombine.high %v4228_v25, %v4232_v55 }
0x12f4   :  { %3957 = vmatprep.mubr.bf16.mxu0 %v8798_v39  ;;  %4030 = vmatprep.mubr.bf16.mxu1 %v8798_v39  ;;  %11739 = vst [vmem:[#allocation63_spill] sm:$0xff] %v9733_v52  ;;  %11741 = vst [vmem:[#allocation65_spill] sm:$0xff] %v9741_v7 }
0x12f5   :  { %11759 = vst [vmem:[#allocation83_spill] sm:$0xff] %v9801_v2 }
0x12f6   :  { %4899 = vmatpush1.bf16.msra.mxu0 %v9713_v49  ;;  %4940 = vmatpush1.bf16.msra.mxu1 %v9715_v53 }
0x12f7   :  { %4900 = vmatprep.subr.bf16.mxu0 %v9719_v47  ;;  %4941 = vmatprep.subr.bf16.mxu1 %v9721_v51 }
0x12f9   :  { %3958 = vmatmul.mubr.bf16.gmra.mxu0 %v9646_v29  ;;  %4031 = vmatmul.mubr.bf16.gmra.mxu1 %v9646_v29  ;;  %v4128_v29 = vld [vmem:[#allocation13 + $0x20] sm:$0xff] }
0x12fa   :  { %4901 = vmatpush1.bf16.msra.mxu0 %v9727_v11  ;;  %4942 = vmatpush1.bf16.msra.mxu1 %v9729_v57  ;;  %v9761_v44 = vcombine.high %v4124_v3, %v4128_v29  ;;  %v9769_v50 = vcombine.low %v4124_v3, %v4128_v29  ;;  %v9803_v3 = vcombine.high %v4229_v4, %v4233_v0  ;;  %v4220_v29 = vld [vmem:[#allocation13 + $0x300] sm:$0xff] }
0x12fb   :  { %4902 = vmatprep.subr.bf16.mxu0 %v9733_v52  ;;  %4943 = vmatprep.subr.bf16.mxu1 %v9735_v59  ;;  %v9813_v28 = vcombine.high %v4220_v29, %v4224_v24 }
0x12fc   :  { %3967 = vmatprep.mubr.bf16.mxu0 %v8798_v39  ;;  %4040 = vmatprep.mubr.bf16.mxu1 %v8798_v39  ;;  %11747 = vst [vmem:[#allocation71_spill] sm:$0xff] %v9761_v44  ;;  %v4244_v39 = vld [vmem:[#allocation13 + $0x3c0] sm:$0xff]  ;;  %11749 = vst [vmem:[#allocation73_spill] sm:$0xff] %v9769_v50 }
0x12fd   :  { %v9775_v63 = vcombine.high %v4244_v39, %v4248_v46  ;;  %v9783_v36 = vcombine.low %v4244_v39, %v4248_v46  ;;  %11760 = vst [vmem:[#allocation84_spill] sm:$0xff] %v9803_v3  ;;  %v4225_v39 = vld [vmem:[#allocation13 + $0x328] sm:$0xff]  ;;  %v9807_v46 = vcombine.low %v4228_v25, %v4232_v55  ;;  %11763 = vst [vmem:[#allocation87_spill] sm:$0xff] %v9813_v28 }
0x12fe   :  { %4903 = vmatpush1.bf16.msra.mxu0 %v9741_v7  ;;  %4944 = vmatpush1.bf16.msra.mxu1 %v9743_v48  ;;  %v9815_v61 = vcombine.high %v4221_v18, %v4225_v39  ;;  %v9819_v25 = vcombine.low %v4220_v29, %v4224_v24  ;;  %v9821_v55 = vcombine.low %v4221_v18, %v4225_v39 }
0x12ff   :  { %4904 = vmatprep.subr.bf16.mxu0 %v9747_v19  ;;  %4945 = vmatprep.subr.bf16.mxu1 %v9749_v20  ;;  %11751 = vst [vmem:[#allocation75_spill] sm:$0xff] %v9775_v63  ;;  %11753 = vst [vmem:[#allocation77_spill] sm:$0xff] %v9783_v36  ;;  %v9837_v18 = vcombine.high %v4204_v13, %v4208_v17 }
0x1300   :  { %11761 = vst [vmem:[#allocation85_spill] sm:$0xff] %v9807_v46  ;;  %11764 = vst [vmem:[#allocation88_spill] sm:$0xff] %v9815_v61 }
0x1301   :  { %3968 = vmatmul.mubr.bf16.gmra.mxu0 %v9661_v37  ;;  %4041 = vmatmul.mubr.bf16.gmra.mxu1 %v9661_v37  ;;  %v4241_v37 = vld [vmem:[#allocation13 + $0x3a8] sm:$0xff]  ;;  %11765 = vst [vmem:[#allocation89_spill] sm:$0xff] %v9819_v25  ;;  %11766 = vst [vmem:[#allocation90_spill] sm:$0xff] %v9821_v55 }
0x1302   :  { %4905 = vmatpush1.bf16.msra.mxu0 %v9755_v60  ;;  %4946 = vmatpush1.bf16.msra.mxu1 %v9757_v5  ;;  %v9791_v30 = vcombine.high %v4237_v10, %v4241_v37  ;;  %v9797_v38 = vcombine.low %v4237_v10, %v4241_v37  ;;  %v4216_v10 = vld [vmem:[#allocation13 + $0x2e0] sm:$0xff]  ;;  %v4213_v37 = vld [vmem:[#allocation13 + $0x2c8] sm:$0xff]  ;;  %11771 = vst [vmem:[#allocation95_spill] sm:$0xff] %v9837_v18 }
0x1303   :  { %4906 = vmatprep.subr.bf16.mxu0 %v9761_v44  ;;  %4947 = vmatprep.subr.bf16.mxu1 %v9763_v12  ;;  %v9825_v4 = vcombine.high %v4212_v6, %v4216_v10  ;;  %v9827_v0 = vcombine.high %v4213_v37, %v4217_v14  ;;  %v9831_v29 = vcombine.low %v4212_v6, %v4216_v10 }
0x1304   :  { %4924 = vmatprep.mubr.bf16.mxu0 %v11421_v42  ;;  %4965 = vmatprep.mubr.bf16.mxu1 %v11421_v42  ;;  %11756 = vst [vmem:[#allocation80_spill] sm:$0xff] %v9791_v30  ;;  %11758 = vst [vmem:[#allocation82_spill] sm:$0xff] %v9797_v38  ;;  %v4205_v42 = vld [vmem:[#allocation13 + $0x288] sm:$0xff]  ;;  %v9833_v24 = vcombine.low %v4213_v37, %v4217_v14  ;;  %v9843_v6 = vcombine.low %v4204_v13, %v4208_v17 }
0x1305   :  { %11767 = vst [vmem:[#allocation91_spill] sm:$0xff] %v9825_v4  ;;  %11768 = vst [vmem:[#allocation92_spill] sm:$0xff] %v9827_v0 }
0x1306   :  { %4907 = vmatpush1.bf16.msra.mxu0 %v9769_v50  ;;  %4948 = vmatpush1.bf16.msra.mxu1 %v9771_v33  ;;  %11769 = vst [vmem:[#allocation93_spill] sm:$0xff] %v9831_v29  ;;  %11770 = vst [vmem:[#allocation94_spill] sm:$0xff] %v9833_v24 }
0x1307   :  { %4908 = vmatprep.subr.bf16.mxu0 %v9775_v63  ;;  %4949 = vmatprep.subr.bf16.mxu1 %v9777_v9  ;;  %11773 = vst [vmem:[#allocation97_spill] sm:$0xff] %v9843_v6 }
0x130a   :  { %4909 = vmatpush2.bf16.msra.mxu0 %v9783_v36  ;;  %4950 = vmatpush2.bf16.msra.mxu1 %v9785_v31 }
0x130b   :  { %4910 = vmatprep.subr.bf16.mxu0 %v9789_v34  ;;  %4951 = vmatprep.subr.bf16.mxu1 %v9791_v30 }
0x130e   :  { %4911 = vmatpush2.bf16.msra.mxu0 %v9795_v54  ;;  %4952 = vmatpush2.bf16.msra.mxu1 %v9797_v38 }
0x130f   :  { %4912 = vmatprep.subr.bf16.mxu0 %v9801_v2  ;;  %4953 = vmatprep.subr.bf16.mxu1 %v9803_v3  ;;  %v4209_v3 = vld [vmem:[#allocation13 + $0x2a8] sm:$0xff]  ;;  %v11789_v2 = vmov 0.0|0.0  }
0x1310   :  { %v9839_v39 = vcombine.high %v4205_v42, %v4209_v3  ;;  %v9845_v14 = vcombine.low %v4205_v42, %v4209_v3 }
0x1312   :  { %4913 = vmatpush2.bf16.msra.mxu0 %v9807_v46  ;;  %4954 = vmatpush2.bf16.msra.mxu1 %v9809_v27  ;;  %11772 = vst [vmem:[#allocation96_spill] sm:$0xff] %v9839_v39  ;;  %v4197_v27 = vld [vmem:[#allocation13 + $0x248] sm:$0xff]  ;;  %11774 = vst [vmem:[#allocation98_spill] sm:$0xff] %v9845_v14 }
0x1313   :  { %4914 = vmatprep.subr.bf16.mxu0 %v9813_v28  ;;  %4955 = vmatprep.subr.bf16.mxu1 %v9815_v61  ;;  %v4196_v61 = vld [vmem:[#allocation13 + $0x240] sm:$0xff]  ;;  %v4201_v46 = vld [vmem:[#allocation13 + $0x268] sm:$0xff] }
0x1314   :  { %v4200_v28 = vld [vmem:[#allocation13 + $0x260] sm:$0xff]  ;;  %v9851_v37 = vcombine.high %v4197_v27, %v4201_v46  ;;  %v9857_v17 = vcombine.low %v4197_v27, %v4201_v46 }
0x1315   :  { %v9849_v10 = vcombine.high %v4196_v61, %v4200_v28  ;;  %v9855_v13 = vcombine.low %v4196_v61, %v4200_v28 }
0x1316   :  { %4915 = vmatpush2.bf16.msra.mxu0 %v9819_v25  ;;  %4956 = vmatpush2.bf16.msra.mxu1 %v9821_v55  ;;  %11776 = vst [vmem:[#allocation100_spill] sm:$0xff] %v9851_v37  ;;  %v4189_v55 = vld [vmem:[#allocation13 + $0x208] sm:$0xff]  ;;  %11778 = vst [vmem:[#allocation102_spill] sm:$0xff] %v9857_v17 }
0x1317   :  { %4916 = vmatprep.subr.bf16.mxu0 %v9825_v4  ;;  %4957 = vmatprep.subr.bf16.mxu1 %v9827_v0  ;;  %11775 = vst [vmem:[#allocation99_spill] sm:$0xff] %v9849_v10  ;;  %v4188_v0 = vld [vmem:[#allocation13 + $0x200] sm:$0xff]  ;;  %v4193_v25 = vld [vmem:[#allocation13 + $0x228] sm:$0xff]  ;;  %11777 = vst [vmem:[#allocation101_spill] sm:$0xff] %v9855_v13 }
0x1318   :  { %v4192_v4 = vld [vmem:[#allocation13 + $0x220] sm:$0xff]  ;;  %v9863_v3 = vcombine.high %v4189_v55, %v4193_v25  ;;  %v9869_v46 = vcombine.low %v4189_v55, %v4193_v25 }
0x1319   :  { %v9861_v42 = vcombine.high %v4188_v0, %v4192_v4  ;;  %v9867_v28 = vcombine.low %v4188_v0, %v4192_v4 }
0x131a   :  { %4917 = vmatpush2.bf16.msra.mxu0 %v9831_v29  ;;  %4958 = vmatpush2.bf16.msra.mxu1 %v9833_v24  ;;  %11780 = vst [vmem:[#allocation104_spill] sm:$0xff] %v9863_v3  ;;  %v4183_v24 = vld [vmem:[#allocation13 + $0x1d8] sm:$0xff]  ;;  %11782 = vst [vmem:[#allocation106_spill] sm:$0xff] %v9869_v46 }
0x131b   :  { %4918 = vmatprep.subr.bf16.mxu0 %v9837_v18  ;;  %4959 = vmatprep.subr.bf16.mxu1 %v9839_v39  ;;  %11779 = vst [vmem:[#allocation103_spill] sm:$0xff] %v9861_v42  ;;  %v4182_v39 = vld [vmem:[#allocation13 + $0x1d0] sm:$0xff]  ;;  %v4187_v29 = vld [vmem:[#allocation13 + $0x1f8] sm:$0xff]  ;;  %11781 = vst [vmem:[#allocation105_spill] sm:$0xff] %v9867_v28 }
0x131c   :  { %v4186_v18 = vld [vmem:[#allocation13 + $0x1f0] sm:$0xff]  ;;  %v9875_v61 = vcombine.high %v4183_v24, %v4187_v29  ;;  %v9881_v25 = vcombine.low %v4183_v24, %v4187_v29 }
0x131d   :  { %v9873_v27 = vcombine.high %v4182_v39, %v4186_v18  ;;  %v9879_v4 = vcombine.low %v4182_v39, %v4186_v18 }
0x131e   :  { %4919 = vmatpush2.bf16.msra.mxu0 %v9843_v6  ;;  %4960 = vmatpush2.bf16.msra.mxu1 %v9845_v14  ;;  %11784 = vst [vmem:[#allocation108_spill] sm:$0xff] %v9875_v61  ;;  %v4175_v14 = vld [vmem:[#allocation13 + $0x198] sm:$0xff]  ;;  %11786 = vst [vmem:[#allocation110_spill] sm:$0xff] %v9881_v25 }
0x131f   :  { %4920 = vmatprep.subr.bf16.mxu0 %v9849_v10  ;;  %4961 = vmatprep.subr.bf16.mxu1 %v9851_v37  ;;  %11783 = vst [vmem:[#allocation107_spill] sm:$0xff] %v9873_v27  ;;  %v4174_v37 = vld [vmem:[#allocation13 + $0x190] sm:$0xff]  ;;  %v4179_v6 = vld [vmem:[#allocation13 + $0x1b8] sm:$0xff]  ;;  %11785 = vst [vmem:[#allocation109_spill] sm:$0xff] %v9879_v4 }
0x1320   :  { %v4178_v10 = vld [vmem:[#allocation13 + $0x1b0] sm:$0xff]  ;;  %v9887_v0 = vcombine.high %v4175_v14, %v4179_v6  ;;  %v9895_v24 = vcombine.low %v4175_v14, %v4179_v6 }
0x1321   :  { %v9885_v55 = vcombine.high %v4174_v37, %v4178_v10  ;;  %v9893_v29 = vcombine.low %v4174_v37, %v4178_v10 }
0x1322   :  { %4921 = vmatpush2.bf16.msra.mxu0 %v9855_v13  ;;  %4962 = vmatpush2.bf16.msra.mxu1 %v9857_v17  ;;  %11788 = vst [vmem:[#allocation112_spill] sm:$0xff] %v9887_v0  ;;  %v4167_v17 = vld [vmem:[#allocation13 + $0x158] sm:$0xff]  ;;  %11791 = vst [vmem:[#allocation114_spill] sm:$0xff] %v9895_v24 }
0x1323   :  { %4922 = vmatprep.subr.bf16.mxu0 %v9861_v42  ;;  %4963 = vmatprep.subr.bf16.mxu1 %v9863_v3  ;;  %11787 = vst [vmem:[#allocation111_spill] sm:$0xff] %v9885_v55  ;;  %v4166_v3 = vld [vmem:[#allocation13 + $0x150] sm:$0xff]  ;;  %v4171_v13 = vld [vmem:[#allocation13 + $0x178] sm:$0xff]  ;;  %11790 = vst [vmem:[#allocation113_spill] sm:$0xff] %v9893_v29 }
0x1324   :  { %v4170_v42 = vld [vmem:[#allocation13 + $0x170] sm:$0xff]  ;;  %v9901_v39 = vcombine.high %v4167_v17, %v4171_v13  ;;  %v9909_v14 = vcombine.low %v4167_v17, %v4171_v13 }
0x1325   :  { %v9899_v18 = vcombine.high %v4166_v3, %v4170_v42  ;;  %v9907_v6 = vcombine.low %v4166_v3, %v4170_v42 }
0x1326   :  { %4923 = vmatpush2.bf16.msra.mxu0 %v9867_v28  ;;  %4964 = vmatpush2.bf16.msra.mxu1 %v9869_v46  ;;  %11793 = vst [vmem:[#allocation116_spill] sm:$0xff] %v9901_v39  ;;  %v4159_v46 = vld [vmem:[#allocation13 + $0x118] sm:$0xff]  ;;  %11795 = vst [vmem:[#allocation118_spill] sm:$0xff] %v9909_v14 }
0x1327   :  { %4974 = vmatprep.subr.bf16.mxu0 %v9873_v27  ;;  %5015 = vmatprep.subr.bf16.mxu1 %v9875_v61  ;;  %11792 = vst [vmem:[#allocation115_spill] sm:$0xff] %v9899_v18  ;;  %v4158_v61 = vld [vmem:[#allocation13 + $0x110] sm:$0xff]  ;;  %v4163_v28 = vld [vmem:[#allocation13 + $0x138] sm:$0xff]  ;;  %11794 = vst [vmem:[#allocation117_spill] sm:$0xff] %v9907_v6 }
0x1328   :  { %v4162_v27 = vld [vmem:[#allocation13 + $0x130] sm:$0xff]  ;;  %v9915_v37 = vcombine.high %v4159_v46, %v4163_v28  ;;  %v9921_v13 = vcombine.low %v4159_v46, %v4163_v28 }
0x1329   :  { %4925 = vmatmul.mubr.bf16.vlgmr.msra.gmra.mxu0 %v11789_v2  ;;  %4966 = vmatmul.mubr.bf16.vlgmr.msra.gmra.mxu1 %v11789_v2  ;;  %v9913_v10 = vcombine.high %v4158_v61, %v4162_v27  ;;  %v9919_v42 = vcombine.low %v4158_v61, %v4162_v27 }
0x132a   :  { %4975 = vmatpush1.bf16.msra.mxu0 %v9879_v4  ;;  %5016 = vmatpush1.bf16.msra.mxu1 %v9881_v25  ;;  %11797 = vst [vmem:[#allocation120_spill] sm:$0xff] %v9915_v37  ;;  %v4151_v25 = vld [vmem:[#allocation13 + $0xd8] sm:$0xff]  ;;  %11799 = vst [vmem:[#allocation122_spill] sm:$0xff] %v9921_v13 }
0x132b   :  { %4976 = vmatprep.subr.bf16.mxu0 %v9885_v55  ;;  %5017 = vmatprep.subr.bf16.mxu1 %v9887_v0  ;;  %11796 = vst [vmem:[#allocation119_spill] sm:$0xff] %v9913_v10  ;;  %v4150_v0 = vld [vmem:[#allocation13 + $0xd0] sm:$0xff]  ;;  %v4155_v4 = vld [vmem:[#allocation13 + $0xf8] sm:$0xff]  ;;  %11798 = vst [vmem:[#allocation121_spill] sm:$0xff] %v9919_v42 }
0x132c   :  { %5006 = vmatprep.mubr.bf16.mxu0 %v11789_v2  ;;  %5047 = vmatprep.mubr.bf16.mxu1 %v11789_v2  ;;  %v4154_v55 = vld [vmem:[#allocation13 + $0xf0] sm:$0xff]  ;;  %v9927_v3 = vcombine.high %v4151_v25, %v4155_v4  ;;  %v9933_v28 = vcombine.low %v4151_v25, %v4155_v4 }
0x132d   :  { %v9925_v17 = vcombine.high %v4150_v0, %v4154_v55  ;;  %v9931_v27 = vcombine.low %v4150_v0, %v4154_v55 }
0x132e   :  { %4977 = vmatpush1.bf16.msra.mxu0 %v9893_v29  ;;  %5018 = vmatpush1.bf16.msra.mxu1 %v9895_v24  ;;  %11801 = vst [vmem:[#allocation124_spill] sm:$0xff] %v9927_v3  ;;  %v4143_v24 = vld [vmem:[#allocation13 + $0x98] sm:$0xff]  ;;  %11803 = vst [vmem:[#allocation126_spill] sm:$0xff] %v9933_v28 }
0x132f   :  { %4978 = vmatprep.subr.bf16.mxu0 %v9899_v18  ;;  %5019 = vmatprep.subr.bf16.mxu1 %v9901_v39  ;;  %11800 = vst [vmem:[#allocation123_spill] sm:$0xff] %v9925_v17  ;;  %v4142_v39 = vld [vmem:[#allocation13 + $0x90] sm:$0xff]  ;;  %v4147_v29 = vld [vmem:[#allocation13 + $0xb8] sm:$0xff]  ;;  %11802 = vst [vmem:[#allocation125_spill] sm:$0xff] %v9931_v27 }
0x1330   :  { %v4146_v18 = vld [vmem:[#allocation13 + $0xb0] sm:$0xff]  ;;  %v9939_v61 = vcombine.high %v4143_v24, %v4147_v29  ;;  %v9945_v4 = vcombine.low %v4143_v24, %v4147_v29 }
0x1331   :  { %v9937_v46 = vcombine.high %v4142_v39, %v4146_v18  ;;  %v9943_v55 = vcombine.low %v4142_v39, %v4146_v18 }
0x1332   :  { %4979 = vmatpush1.bf16.msra.mxu0 %v9907_v6  ;;  %5020 = vmatpush1.bf16.msra.mxu1 %v9909_v14  ;;  %11805 = vst [vmem:[#allocation128_spill] sm:$0xff] %v9939_v61  ;;  %v4135_v14 = vld [vmem:[#allocation13 + $0x58] sm:$0xff]  ;;  %11807 = vst [vmem:[#allocation130_spill] sm:$0xff] %v9945_v4 }
0x1333   :  { %4980 = vmatprep.subr.bf16.mxu0 %v9913_v10  ;;  %5021 = vmatprep.subr.bf16.mxu1 %v9915_v37  ;;  %11804 = vst [vmem:[#allocation127_spill] sm:$0xff] %v9937_v46  ;;  %v4134_v37 = vld [vmem:[#allocation13 + $0x50] sm:$0xff]  ;;  %v4139_v6 = vld [vmem:[#allocation13 + $0x78] sm:$0xff]  ;;  %11806 = vst [vmem:[#allocation129_spill] sm:$0xff] %v9943_v55 }
0x1334   :  { %v4138_v10 = vld [vmem:[#allocation13 + $0x70] sm:$0xff]  ;;  %v9951_v0 = vcombine.high %v4135_v14, %v4139_v6  ;;  %v9957_v29 = vcombine.low %v4135_v14, %v4139_v6 }
0x1335   :  { %v9949_v25 = vcombine.high %v4134_v37, %v4138_v10  ;;  %v9955_v18 = vcombine.low %v4134_v37, %v4138_v10 }
0x1336   :  { %4981 = vmatpush1.bf16.msra.mxu0 %v9919_v42  ;;  %5022 = vmatpush1.bf16.msra.mxu1 %v9921_v13  ;;  %11809 = vst [vmem:[#allocation132_spill] sm:$0xff] %v9951_v0  ;;  %v4127_v13 = vld [vmem:[#allocation13 + $0x18] sm:$0xff]  ;;  %11811 = vst [vmem:[#allocation134_spill] sm:$0xff] %v9957_v29 }
0x1337   :  { %4982 = vmatprep.subr.bf16.mxu0 %v9925_v17  ;;  %5023 = vmatprep.subr.bf16.mxu1 %v9927_v3  ;;  %11808 = vst [vmem:[#allocation131_spill] sm:$0xff] %v9949_v25  ;;  %v4126_v3 = vld [vmem:[#allocation13 + $0x10] sm:$0xff]  ;;  %v4131_v42 = vld [vmem:[#allocation13 + $0x38] sm:$0xff]  ;;  %11810 = vst [vmem:[#allocation133_spill] sm:$0xff] %v9955_v18 }
0x1338   :  { %v4130_v17 = vld [vmem:[#allocation13 + $0x30] sm:$0xff]  ;;  %v9963_v39 = vcombine.high %v4127_v13, %v4131_v42  ;;  %v9969_v6 = vcombine.low %v4127_v13, %v4131_v42 }
0x1339   :  { %v9961_v24 = vcombine.high %v4126_v3, %v4130_v17  ;;  %v9967_v10 = vcombine.low %v4126_v3, %v4130_v17 }
0x133a   :  { %4983 = vmatpush1.bf16.msra.mxu0 %v9931_v27  ;;  %5024 = vmatpush1.bf16.msra.mxu1 %v9933_v28  ;;  %11813 = vst [vmem:[#allocation136_spill] sm:$0xff] %v9963_v39  ;;  %v4247_v28 = vld [vmem:[#allocation13 + $0x3d8] sm:$0xff]  ;;  %11815 = vst [vmem:[#allocation138_spill] sm:$0xff] %v9969_v6 }
0x133b   :  { %4984 = vmatprep.subr.bf16.mxu0 %v9937_v46  ;;  %5025 = vmatprep.subr.bf16.mxu1 %v9939_v61  ;;  %11812 = vst [vmem:[#allocation135_spill] sm:$0xff] %v9961_v24  ;;  %v4246_v61 = vld [vmem:[#allocation13 + $0x3d0] sm:$0xff]  ;;  %v4251_v27 = vld [vmem:[#allocation13 + $0x3f8] sm:$0xff]  ;;  %11814 = vst [vmem:[#allocation137_spill] sm:$0xff] %v9967_v10 }
0x133c   :  { %v4250_v46 = vld [vmem:[#allocation13 + $0x3f0] sm:$0xff]  ;;  %v9975_v37 = vcombine.high %v4247_v28, %v4251_v27  ;;  %v9981_v42 = vcombine.low %v4247_v28, %v4251_v27 }
0x133d   :  { %v9973_v14 = vcombine.high %v4246_v61, %v4250_v46  ;;  %v9979_v17 = vcombine.low %v4246_v61, %v4250_v46 }
0x133e   :  { %4985 = vmatpush1.bf16.msra.mxu0 %v9943_v55  ;;  %5026 = vmatpush1.bf16.msra.mxu1 %v9945_v4  ;;  %11817 = vst [vmem:[#allocation140_spill] sm:$0xff] %v9975_v37  ;;  %v4239_v4 = vld [vmem:[#allocation13 + $0x398] sm:$0xff]  ;;  %11819 = vst [vmem:[#allocation142_spill] sm:$0xff] %v9981_v42 }
0x133f   :  { %4986 = vmatprep.subr.bf16.mxu0 %v9949_v25  ;;  %5027 = vmatprep.subr.bf16.mxu1 %v9951_v0  ;;  %11816 = vst [vmem:[#allocation139_spill] sm:$0xff] %v9973_v14  ;;  %v4238_v0 = vld [vmem:[#allocation13 + $0x390] sm:$0xff]  ;;  %v4243_v55 = vld [vmem:[#allocation13 + $0x3b8] sm:$0xff]  ;;  %11818 = vst [vmem:[#allocation141_spill] sm:$0xff] %v9979_v17 }
0x1340   :  { %v4242_v25 = vld [vmem:[#allocation13 + $0x3b0] sm:$0xff]  ;;  %v9987_v3 = vcombine.high %v4239_v4, %v4243_v55  ;;  %v9993_v27 = vcombine.low %v4239_v4, %v4243_v55 }
0x1341   :  { %v9985_v13 = vcombine.high %v4238_v0, %v4242_v25  ;;  %v9991_v46 = vcombine.low %v4238_v0, %v4242_v25 }
0x1342   :  { %4987 = vmatpush1.bf16.msra.mxu0 %v9955_v18  ;;  %5028 = vmatpush1.bf16.msra.mxu1 %v9957_v29  ;;  %11821 = vst [vmem:[#allocation144_spill] sm:$0xff] %v9987_v3  ;;  %v4231_v29 = vld [vmem:[#allocation13 + $0x358] sm:$0xff]  ;;  %11823 = vst [vmem:[#allocation146_spill] sm:$0xff] %v9993_v27 }
0x1343   :  { %4988 = vmatprep.subr.bf16.mxu0 %v9961_v24  ;;  %5029 = vmatprep.subr.bf16.mxu1 %v9963_v39  ;;  %11820 = vst [vmem:[#allocation143_spill] sm:$0xff] %v9985_v13  ;;  %v4230_v39 = vld [vmem:[#allocation13 + $0x350] sm:$0xff]  ;;  %v4235_v18 = vld [vmem:[#allocation13 + $0x378] sm:$0xff]  ;;  %11822 = vst [vmem:[#allocation145_spill] sm:$0xff] %v9991_v46 }
0x1344   :  { %v4234_v24 = vld [vmem:[#allocation13 + $0x370] sm:$0xff]  ;;  %v9999_v61 = vcombine.high %v4231_v29, %v4235_v18  ;;  %v10005_v55 = vcombine.low %v4231_v29, %v4235_v18 }
0x1345   :  { %v9997_v28 = vcombine.high %v4230_v39, %v4234_v24  ;;  %v10003_v25 = vcombine.low %v4230_v39, %v4234_v24 }
0x1346   :  { %4989 = vmatpush1.bf16.msra.mxu0 %v9967_v10  ;;  %5030 = vmatpush1.bf16.msra.mxu1 %v9969_v6  ;;  %11825 = vst [vmem:[#allocation148_spill] sm:$0xff] %v9999_v61  ;;  %v4223_v6 = vld [vmem:[#allocation13 + $0x318] sm:$0xff]  ;;  %11827 = vst [vmem:[#allocation150_spill] sm:$0xff] %v10005_v55 }
0x1347   :  { %4990 = vmatprep.subr.bf16.mxu0 %v9973_v14  ;;  %5031 = vmatprep.subr.bf16.mxu1 %v9975_v37  ;;  %11824 = vst [vmem:[#allocation147_spill] sm:$0xff] %v9997_v28  ;;  %v4222_v37 = vld [vmem:[#allocation13 + $0x310] sm:$0xff]  ;;  %v4227_v10 = vld [vmem:[#allocation13 + $0x338] sm:$0xff]  ;;  %11826 = vst [vmem:[#allocation149_spill] sm:$0xff] %v10003_v25 }
0x1348   :  { %v4226_v14 = vld [vmem:[#allocation13 + $0x330] sm:$0xff]  ;;  %v10011_v0 = vcombine.high %v4223_v6, %v4227_v10  ;;  %v10017_v18 = vcombine.low %v4223_v6, %v4227_v10 }
0x1349   :  { %v10009_v4 = vcombine.high %v4222_v37, %v4226_v14  ;;  %v10015_v24 = vcombine.low %v4222_v37, %v4226_v14 }
0x134a   :  { %4991 = vmatpush2.bf16.msra.mxu0 %v9979_v17  ;;  %5032 = vmatpush2.bf16.msra.mxu1 %v9981_v42  ;;  %11829 = vst [vmem:[#allocation152_spill] sm:$0xff] %v10011_v0  ;;  %v4215_v42 = vld [vmem:[#allocation13 + $0x2d8] sm:$0xff]  ;;  %11831 = vst [vmem:[#allocation154_spill] sm:$0xff] %v10017_v18 }
0x134b   :  { %4992 = vmatprep.subr.bf16.mxu0 %v9985_v13  ;;  %5033 = vmatprep.subr.bf16.mxu1 %v9987_v3  ;;  %11828 = vst [vmem:[#allocation151_spill] sm:$0xff] %v10009_v4  ;;  %v4214_v3 = vld [vmem:[#allocation13 + $0x2d0] sm:$0xff]  ;;  %v4219_v17 = vld [vmem:[#allocation13 + $0x2f8] sm:$0xff]  ;;  %11830 = vst [vmem:[#allocation153_spill] sm:$0xff] %v10015_v24 }
0x134c   :  { %v4218_v13 = vld [vmem:[#allocation13 + $0x2f0] sm:$0xff]  ;;  %v10023_v39 = vcombine.high %v4215_v42, %v4219_v17  ;;  %v10029_v10 = vcombine.low %v4215_v42, %v4219_v17 }
0x134d   :  { %v10021_v29 = vcombine.high %v4214_v3, %v4218_v13  ;;  %v10027_v14 = vcombine.low %v4214_v3, %v4218_v13 }
0x134e   :  { %4993 = vmatpush2.bf16.msra.mxu0 %v9991_v46  ;;  %5034 = vmatpush2.bf16.msra.mxu1 %v9993_v27  ;;  %11833 = vst [vmem:[#allocation156_spill] sm:$0xff] %v10023_v39  ;;  %v4207_v27 = vld [vmem:[#allocation13 + $0x298] sm:$0xff]  ;;  %11835 = vst [vmem:[#allocation158_spill] sm:$0xff] %v10029_v10 }
0x134f   :  { %4994 = vmatprep.subr.bf16.mxu0 %v9997_v28  ;;  %5035 = vmatprep.subr.bf16.mxu1 %v9999_v61  ;;  %11832 = vst [vmem:[#allocation155_spill] sm:$0xff] %v10021_v29  ;;  %v4206_v61 = vld [vmem:[#allocation13 + $0x290] sm:$0xff]  ;;  %v4211_v46 = vld [vmem:[#allocation13 + $0x2b8] sm:$0xff]  ;;  %11834 = vst [vmem:[#allocation157_spill] sm:$0xff] %v10027_v14 }
0x1350   :  { %v4210_v28 = vld [vmem:[#allocation13 + $0x2b0] sm:$0xff]  ;;  %v10035_v37 = vcombine.high %v4207_v27, %v4211_v46  ;;  %v10041_v17 = vcombine.low %v4207_v27, %v4211_v46 }
0x1351   :  { %v10033_v6 = vcombine.high %v4206_v61, %v4210_v28  ;;  %v10039_v13 = vcombine.low %v4206_v61, %v4210_v28 }
0x1352   :  { %4995 = vmatpush2.bf16.msra.mxu0 %v10003_v25  ;;  %5036 = vmatpush2.bf16.msra.mxu1 %v10005_v55  ;;  %11837 = vst [vmem:[#allocation160_spill] sm:$0xff] %v10035_v37  ;;  %v4199_v55 = vld [vmem:[#allocation13 + $0x258] sm:$0xff]  ;;  %11839 = vst [vmem:[#allocation162_spill] sm:$0xff] %v10041_v17 }
0x1353   :  { %4996 = vmatprep.subr.bf16.mxu0 %v10009_v4  ;;  %5037 = vmatprep.subr.bf16.mxu1 %v10011_v0  ;;  %11836 = vst [vmem:[#allocation159_spill] sm:$0xff] %v10033_v6  ;;  %v4198_v0 = vld [vmem:[#allocation13 + $0x250] sm:$0xff]  ;;  %v4203_v25 = vld [vmem:[#allocation13 + $0x278] sm:$0xff]  ;;  %11838 = vst [vmem:[#allocation161_spill] sm:$0xff] %v10039_v13 }
0x1354   :  { %v4202_v4 = vld [vmem:[#allocation13 + $0x270] sm:$0xff]  ;;  %v10047_v3 = vcombine.high %v4199_v55, %v4203_v25  ;;  %v10053_v46 = vcombine.low %v4199_v55, %v4203_v25  ;;  %v11849_v25 = vsub.s32 2, %v9052_v15 }
0x1355   :  { %v10045_v42 = vcombine.high %v4198_v0, %v4202_v4  ;;  %v10051_v28 = vcombine.low %v4198_v0, %v4202_v4 }
0x1356   :  { %4997 = vmatpush2.bf16.msra.mxu0 %v10015_v24  ;;  %5038 = vmatpush2.bf16.msra.mxu1 %v10017_v18  ;;  %11841 = vst [vmem:[#allocation164_spill] sm:$0xff] %v10047_v3  ;;  %v4191_v18 = vld [vmem:[#allocation13 + $0x218] sm:$0xff]  ;;  %11843 = vst [vmem:[#allocation166_spill] sm:$0xff] %v10053_v46 }
0x1357   :  { %4998 = vmatprep.subr.bf16.mxu0 %v10021_v29  ;;  %5039 = vmatprep.subr.bf16.mxu1 %v10023_v39  ;;  %11840 = vst [vmem:[#allocation163_spill] sm:$0xff] %v10045_v42  ;;  %v4190_v39 = vld [vmem:[#allocation13 + $0x210] sm:$0xff]  ;;  %v4195_v24 = vld [vmem:[#allocation13 + $0x238] sm:$0xff]  ;;  %11842 = vst [vmem:[#allocation165_spill] sm:$0xff] %v10051_v28 }
0x1358   :  { %v4194_v29 = vld [vmem:[#allocation13 + $0x230] sm:$0xff]  ;;  %v10059_v61 = vcombine.high %v4191_v18, %v4195_v24 }
0x1359   :  { %v10057_v27 = vcombine.high %v4190_v39, %v4194_v29 }
0x135a   :  { %4999 = vmatpush2.bf16.msra.mxu0 %v10027_v14  ;;  %5040 = vmatpush2.bf16.msra.mxu1 %v10029_v10  ;;  %11845 = vst [vmem:[#allocation168_spill] sm:$0xff] %v10059_v61 }
0x135b   :  { %5000 = vmatprep.subr.bf16.mxu0 %v10033_v6  ;;  %5041 = vmatprep.subr.bf16.mxu1 %v10035_v37  ;;  %11844 = vst [vmem:[#allocation167_spill] sm:$0xff] %v10057_v27  ;;  %v10063_v37 = vcombine.low %v4190_v39, %v4194_v29 }
0x135d   :  { %11846 = vst [vmem:[#allocation169_spill] sm:$0xff] %v10063_v37 }
0x135e   :  { %5001 = vmatpush2.bf16.msra.mxu0 %v10039_v13  ;;  %5042 = vmatpush2.bf16.msra.mxu1 %v10041_v17  ;;  %v10065_v13 = vcombine.low %v4191_v18, %v4195_v24  ;;  %v3413_v18 = vsub.s32 3, %v9052_v15 }
0x135f   :  { %5002 = vmatprep.subr.bf16.mxu0 %v10045_v42  ;;  %5043 = vmatprep.subr.bf16.mxu1 %v10047_v3 }
0x1360   :  { %11847 = vst [vmem:[#allocation170_spill] sm:$0xff] %v10065_v13 }
0x1362   :  { %5003 = vmatpush2.bf16.msra.mxu0 %v10051_v28  ;;  %5044 = vmatpush2.bf16.msra.mxu1 %v10053_v46 }
0x1363   :  { %5004 = vmatprep.subr.bf16.mxu0 %v10057_v27  ;;  %5045 = vmatprep.subr.bf16.mxu1 %v10059_v61 }
0x1366   :  { %5005 = vmatpush2.bf16.msra.mxu0 %v10063_v37  ;;  %5046 = vmatpush2.bf16.msra.mxu1 %v10065_v13 }
0x1367   :  { %5124 = vmatprep.subr.bf16.mxu0 %v9665_v56  ;;  %5165 = vmatprep.subr.bf16.mxu1 %v9667_v43 }
0x1369   :  { %5007 = vmatmul.mubr.bf16.vlgmr.msra.gmra.mxu0 %v11789_v2  ;;  %5048 = vmatmul.mubr.bf16.vlgmr.msra.gmra.mxu1 %v11789_v2  ;;  %v10102_v2 = vld [vmem:[%s11848_s6] sm:$0xff] }
0x136a   :  { %5125 = vmatpush1.bf16.msra.mxu0 %v9671_v62  ;;  %5166 = vmatpush1.bf16.msra.mxu1 %v9673_v21  ;;  %v10109_v55 = vrot.slane %v10102_v2, %v11849_v25  ;;  %v10131_v25 = vrot.slane %v10102_v2, %v9063_v22 }
0x136b   :  { %5126 = vmatprep.subr.bf16.mxu0 %v9677_v45  ;;  %5167 = vmatprep.subr.bf16.mxu1 %v9679_v58 }
0x136e   :  { %5127 = vmatpush1.bf16.msra.mxu0 %v9685_v8  ;;  %5168 = vmatpush1.bf16.msra.mxu1 %v9687_v26 }
0x136f   :  { %5128 = vmatprep.subr.bf16.mxu0 %v9691_v35  ;;  %5169 = vmatprep.subr.bf16.mxu1 %v9693_v32 }
0x1372   :  { %5129 = vmatpush1.bf16.msra.mxu0 %v9699_v40  ;;  %5170 = vmatpush1.bf16.msra.mxu1 %v9701_v23 }
0x1373   :  { %5130 = vmatprep.subr.bf16.mxu0 %v9705_v1  ;;  %5171 = vmatprep.subr.bf16.mxu1 %v9707_v41 }
0x1376   :  { %5131 = vmatpush1.bf16.msra.mxu0 %v9713_v49  ;;  %5172 = vmatpush1.bf16.msra.mxu1 %v9715_v53 }
0x1377   :  { %5132 = vmatprep.subr.bf16.mxu0 %v9719_v47  ;;  %5173 = vmatprep.subr.bf16.mxu1 %v9721_v51 }
0x137a   :  { %5133 = vmatpush1.bf16.msra.mxu0 %v9727_v11  ;;  %5174 = vmatpush1.bf16.msra.mxu1 %v9729_v57 }
0x137b   :  { %5134 = vmatprep.subr.bf16.mxu0 %v9733_v52  ;;  %5175 = vmatprep.subr.bf16.mxu1 %v9735_v59 }
0x137e   :  { %5135 = vmatpush1.bf16.msra.mxu0 %v9741_v7  ;;  %5176 = vmatpush1.bf16.msra.mxu1 %v9743_v48 }
0x137f   :  { %5136 = vmatprep.subr.bf16.mxu0 %v9747_v19  ;;  %5177 = vmatprep.subr.bf16.mxu1 %v9749_v20 }
0x1382   :  { %5137 = vmatpush1.bf16.msra.mxu0 %v9755_v60  ;;  %5178 = vmatpush1.bf16.msra.mxu1 %v9757_v5  ;;  %v11901_v5 = vld [vmem:[#allocation108_spill] sm:$0xff] }
0x1383   :  { %5138 = vmatprep.subr.bf16.mxu0 %v9761_v44  ;;  %5179 = vmatprep.subr.bf16.mxu1 %v9763_v12  ;;  %v11860_v12 = vld [vmem:[#allocation87_spill] sm:$0xff] }
0x1386   :  { %5139 = vmatpush1.bf16.msra.mxu0 %v9769_v50  ;;  %5180 = vmatpush1.bf16.msra.mxu1 %v9771_v33  ;;  %v11852_v33 = vld [vmem:[#allocation83_spill] sm:$0xff] }
0x1387   :  { %5140 = vmatprep.subr.bf16.mxu0 %v9775_v63  ;;  %5181 = vmatprep.subr.bf16.mxu1 %v9777_v9 }
0x1389   :  { %v10115_v4 = vpop.f32.mrf.mxu0  ;;  %v3866_v0 = vpop.f32.mrf.mxu1 }
0x138a   :  { %v10118_v24 = vadd.f32 %v3866_v0, %v10109_v55  ;;  %5141 = vmatpush2.bf16.msra.mxu0 %v9783_v36  ;;  %5182 = vmatpush2.bf16.msra.mxu1 %v9785_v31  ;;  %v10135_v0 = vrot.slane %v10102_v2, %v9055_v16  ;;  %v10138_v31 = vrot.slane %v10102_v2, %v3413_v18  ;;  %v11853_v16 = vld [vmem:[#allocation84_spill] sm:$0xff] }
0x138b   :  { %v10123_v29 = vpop.f32.mrf.mxu0  ;;  %v10125_v39 = vpop.f32.mrf.mxu1  ;;  %5142 = vmatprep.subr.bf16.mxu0 %v9789_v34  ;;  %5183 = vmatprep.subr.bf16.mxu1 %v9791_v30 }
0x138d   :  { %v3797_v9 = vpop.f32.mrf.mxu0  ;;  %v3870_v36 = vpop.f32.mrf.mxu1 }
0x138e   :  { %v10141_v63 = vadd.f32 %v3797_v9, %v10131_v25  ;;  %v10144_v34 = vadd.f32 %v3870_v36, %v10109_v55  ;;  %5143 = vmatpush2.bf16.msra.mxu0 %v9795_v54  ;;  %5184 = vmatpush2.bf16.msra.mxu1 %v9797_v38  ;;  %v11858_v38 = vld [vmem:[#allocation85_spill] sm:$0xff]  ;;  %v11859_v54 = vld [vmem:[#allocation86_spill] sm:$0xff] }
0x138f   :  { %v3799_v22 = vpop.f32.mrf.mxu0  ;;  %v3872_v30 = vpop.f32.mrf.mxu1  ;;  %5144 = vmatprep.subr.bf16.mxu0 %v11852_v33  ;;  %5185 = vmatprep.subr.bf16.mxu1 %v11853_v16 }
0x1390   :  { %11850 = vst [vmem:[#allocation171_spill] sm:$0xff] %v10141_v63  ;;  %11851 = vst [vmem:[#allocation172_spill] sm:$0xff] %v10144_v34  ;;  %v10151_v50 = vadd.f32 %v3799_v22, %v10135_v0  ;;  %v10154_v18 = vadd.f32 %v3872_v30, %v10138_v31  ;;  %v11861_v22 = vld [vmem:[#allocation88_spill] sm:$0xff] }
0x1391   :  { %v3803_v9 = vpop.f32.mrf.mxu0  ;;  %v3876_v63 = vpop.f32.mrf.mxu1 }
0x1392   :  { %11854 = vst [vmem:[#allocation173_spill] sm:$0xff] %v10151_v50  ;;  %11855 = vst [vmem:[#allocation174_spill] sm:$0xff] %v10154_v18  ;;  %v10157_v36 = vadd.f32 %v3803_v9, %v10131_v25  ;;  %v10160_v34 = vadd.f32 %v3876_v63, %v10109_v55  ;;  %5145 = vmatpush2.bf16.msra.mxu0 %v11858_v38  ;;  %5186 = vmatpush2.bf16.msra.mxu1 %v11859_v54  ;;  %v11866_v50 = vld [vmem:[#allocation89_spill] sm:$0xff]  ;;  %v11867_v54 = vld [vmem:[#allocation90_spill] sm:$0xff] }
0x1393   :  { %v3805_v33 = vpop.f32.mrf.mxu0  ;;  %v3878_v16 = vpop.f32.mrf.mxu1  ;;  %5146 = vmatprep.subr.bf16.mxu0 %v11860_v12  ;;  %5187 = vmatprep.subr.bf16.mxu1 %v11861_v22  ;;  %v11868_v38 = vld [vmem:[#allocation91_spill] sm:$0xff] }
0x1394   :  { %11856 = vst [vmem:[#allocation175_spill] sm:$0xff] %v10157_v36  ;;  %11857 = vst [vmem:[#allocation176_spill] sm:$0xff] %v10160_v34  ;;  %v10167_v30 = vadd.f32 %v3805_v33, %v10135_v0  ;;  %v10170_v18 = vadd.f32 %v3878_v16, %v10138_v31  ;;  %v11869_v33 = vld [vmem:[#allocation92_spill] sm:$0xff] }
0x1395   :  { %v3807_v9 = vpop.f32.mrf.mxu0  ;;  %v3880_v36 = vpop.f32.mrf.mxu1 }
0x1396   :  { %11862 = vst [vmem:[#allocation177_spill] sm:$0xff] %v10167_v30  ;;  %11863 = vst [vmem:[#allocation178_spill] sm:$0xff] %v10170_v18  ;;  %v10173_v63 = vadd.f32 %v3807_v9, %v10131_v25  ;;  %v10176_v34 = vadd.f32 %v3880_v36, %v10109_v55  ;;  %5147 = vmatpush2.bf16.msra.mxu0 %v11866_v50  ;;  %5188 = vmatpush2.bf16.msra.mxu1 %v11867_v54  ;;  %v11874_v30 = vld [vmem:[#allocation93_spill] sm:$0xff]  ;;  %v11875_v54 = vld [vmem:[#allocation94_spill] sm:$0xff] }
0x1397   :  { %v3809_v12 = vpop.f32.mrf.mxu0  ;;  %v3882_v22 = vpop.f32.mrf.mxu1  ;;  %5148 = vmatprep.subr.bf16.mxu0 %v11868_v38  ;;  %5189 = vmatprep.subr.bf16.mxu1 %v11869_v33  ;;  %v11876_v50 = vld [vmem:[#allocation95_spill] sm:$0xff] }
0x1398   :  { %11864 = vst [vmem:[#allocation179_spill] sm:$0xff] %v10173_v63  ;;  %11865 = vst [vmem:[#allocation180_spill] sm:$0xff] %v10176_v34  ;;  %v10183_v16 = vadd.f32 %v3809_v12, %v10135_v0  ;;  %v10186_v18 = vadd.f32 %v3882_v22, %v10138_v31  ;;  %v11877_v12 = vld [vmem:[#allocation96_spill] sm:$0xff] }
0x1399   :  { %v3813_v9 = vpop.f32.mrf.mxu0  ;;  %v3886_v63 = vpop.f32.mrf.mxu1 }
0x139a   :  { %11870 = vst [vmem:[#allocation181_spill] sm:$0xff] %v10183_v16  ;;  %11871 = vst [vmem:[#allocation182_spill] sm:$0xff] %v10186_v18  ;;  %v10189_v36 = vadd.f32 %v3813_v9, %v10131_v25  ;;  %v10192_v34 = vadd.f32 %v3886_v63, %v10109_v55  ;;  %5149 = vmatpush2.bf16.msra.mxu0 %v11874_v30  ;;  %5190 = vmatpush2.bf16.msra.mxu1 %v11875_v54  ;;  %v11882_v16 = vld [vmem:[#allocation97_spill] sm:$0xff]  ;;  %v11883_v54 = vld [vmem:[#allocation98_spill] sm:$0xff] }
0x139b   :  { %v3815_v38 = vpop.f32.mrf.mxu0  ;;  %v3888_v33 = vpop.f32.mrf.mxu1  ;;  %5150 = vmatprep.subr.bf16.mxu0 %v11876_v50  ;;  %5191 = vmatprep.subr.bf16.mxu1 %v11877_v12  ;;  %v11884_v30 = vld [vmem:[#allocation99_spill] sm:$0xff] }
0x139c   :  { %11872 = vst [vmem:[#allocation183_spill] sm:$0xff] %v10189_v36  ;;  %11873 = vst [vmem:[#allocation184_spill] sm:$0xff] %v10192_v34  ;;  %v10199_v22 = vadd.f32 %v3815_v38, %v10135_v0  ;;  %v10202_v18 = vadd.f32 %v3888_v33, %v10138_v31  ;;  %v11885_v38 = vld [vmem:[#allocation100_spill] sm:$0xff] }
0x139d   :  { %v3817_v9 = vpop.f32.mrf.mxu0  ;;  %v3890_v36 = vpop.f32.mrf.mxu1 }
0x139e   :  { %11878 = vst [vmem:[#allocation185_spill] sm:$0xff] %v10199_v22  ;;  %11879 = vst [vmem:[#allocation186_spill] sm:$0xff] %v10202_v18  ;;  %v10205_v63 = vadd.f32 %v3817_v9, %v10131_v25  ;;  %v10208_v34 = vadd.f32 %v3890_v36, %v10109_v55  ;;  %5151 = vmatpush2.bf16.msra.mxu0 %v11882_v16  ;;  %5192 = vmatpush2.bf16.msra.mxu1 %v11883_v54  ;;  %v3417_v36 = vsub.s32 4, %v9052_v15  ;;  %v11890_v54 = vld [vmem:[#allocation101_spill] sm:$0xff] }
0x139f   :  { %v3819_v50 = vpop.f32.mrf.mxu0  ;;  %v3892_v12 = vpop.f32.mrf.mxu1  ;;  %5152 = vmatprep.subr.bf16.mxu0 %v11884_v30  ;;  %5193 = vmatprep.subr.bf16.mxu1 %v11885_v38  ;;  %v3425_v30 = vsub.s32 6, %v9052_v15  ;;  %v11891_v38 = vld [vmem:[#allocation102_spill] sm:$0xff] }
0x13a0   :  { %11880 = vst [vmem:[#allocation187_spill] sm:$0xff] %v10205_v63  ;;  %11881 = vst [vmem:[#allocation188_spill] sm:$0xff] %v10208_v34  ;;  %v10215_v33 = vadd.f32 %v3819_v50, %v10135_v0  ;;  %v10218_v18 = vadd.f32 %v3892_v12, %v10138_v31  ;;  %v11892_v12 = vld [vmem:[#allocation103_spill] sm:$0xff] }
0x13a1   :  { %v3823_v9 = vpop.f32.mrf.mxu0  ;;  %v3896_v63 = vpop.f32.mrf.mxu1 }
0x13a2   :  { %11886 = vst [vmem:[#allocation189_spill] sm:$0xff] %v10215_v33  ;;  %11887 = vst [vmem:[#allocation190_spill] sm:$0xff] %v10218_v18  ;;  %v10222_v34 = vadd.f32 %v3823_v9, %v10131_v25  ;;  %v10225_v22 = vadd.f32 %v3896_v63, %v10109_v55  ;;  %5153 = vmatpush2.bf16.msra.mxu0 %v11890_v54  ;;  %5194 = vmatpush2.bf16.msra.mxu1 %v11891_v38  ;;  %v11893_v18 = vld [vmem:[#allocation104_spill] sm:$0xff]  ;;  %v3421_v63 = vsub.s32 5, %v9052_v15 }
0x13a3   :  { %v3825_v50 = vpop.f32.mrf.mxu0  ;;  %v3898_v33 = vpop.f32.mrf.mxu1  ;;  %5154 = vmatprep.subr.bf16.mxu0 %v11892_v12  ;;  %5195 = vmatprep.subr.bf16.mxu1 %v11893_v18  ;;  %v10241_v38 = vrot.slane %v10102_v2, %v3417_v36  ;;  %v11900_v12 = vld [vmem:[#allocation107_spill] sm:$0xff] }
0x13a4   :  { %11888 = vst [vmem:[#allocation191_spill] sm:$0xff] %v10222_v34  ;;  %11889 = vst [vmem:[#allocation192_spill] sm:$0xff] %v10225_v22  ;;  %v10233_v16 = vadd.f32 %v3825_v50, %v10135_v0  ;;  %v10236_v9 = vadd.f32 %v3898_v33, %v10138_v31  ;;  %v3429_v22 = vsub.s32 7, %v9052_v15  ;;  %v10250_v50 = vrot.slane %v10102_v2, %v3425_v30  ;;  %v11898_v33 = vld [vmem:[#allocation105_spill] sm:$0xff] }
0x13a5   :  { %v3827_v34 = vpop.f32.mrf.mxu0  ;;  %v3900_v54 = vpop.f32.mrf.mxu1 }
0x13a6   :  { %11894 = vst [vmem:[#allocation193_spill] sm:$0xff] %v10233_v16  ;;  %11895 = vst [vmem:[#allocation194_spill] sm:$0xff] %v10236_v9  ;;  %v10244_v44 = vadd.f32 %v3827_v34, %v10131_v25  ;;  %v10247_v18 = vadd.f32 %v3900_v54, %v10109_v55  ;;  %5155 = vmatpush2.bf16.msra.mxu0 %v11898_v33  ;;  %v11899_v9 = vld [vmem:[#allocation106_spill] sm:$0xff]  ;;  %v10263_v54 = vrot.slane %v10102_v2, %v3421_v63 }
0x13a7   :  { %5196 = vmatpush2.bf16.msra.mxu1 %v11899_v9  ;;  %v3829_v16 = vpop.f32.mrf.mxu0  ;;  %v3902_v15 = vpop.f32.mrf.mxu1  ;;  %5206 = vmatprep.subr.bf16.mxu0 %v11900_v12  ;;  %v10266_v55 = vrot.slane %v10102_v2, %v3429_v22  ;;  %v3794_v9 = vadd.f32 %v10115_v4, %v10131_v25 }
0x13a8   :  { %11896 = vst [vmem:[#allocation195_spill] sm:$0xff] %v10244_v44  ;;  %11897 = vst [vmem:[#allocation196_spill] sm:$0xff] %v10247_v18  ;;  %5247 = vmatprep.subr.bf16.mxu1 %v11901_v5  ;;  %v10257_v36 = vadd.f32 %v3829_v16, %v10135_v0  ;;  %v10260_v34 = vadd.f32 %v3902_v15, %v10138_v31 }
0x13a9   :  { %v3939_v30 = vpop.f32.mrf.mxu0  ;;  %v4012_v18 = vpop.f32.mrf.mxu1 }
0x13aa   :  { %11902 = vst [vmem:[#allocation197_spill] sm:$0xff] %v10257_v36  ;;  %11903 = vst [vmem:[#allocation198_spill] sm:$0xff] %v10260_v34  ;;  %v10269_v44 = vadd.f32 %v3939_v30, %v10241_v38  ;;  %v10272_v12 = vadd.f32 %v4012_v18, %v10250_v50 }
0x13ab   :  { %v3941_v5 = vpop.f32.mrf.mxu0  ;;  %v4014_v16 = vpop.f32.mrf.mxu1 }
0x13ac   :  { %11904 = vst [vmem:[#allocation199_spill] sm:$0xff] %v10269_v44  ;;  %11905 = vst [vmem:[#allocation200_spill] sm:$0xff] %v10272_v12  ;;  %v10275_v36 = vadd.f32 %v3941_v5, %v10263_v54  ;;  %v10278_v15 = vadd.f32 %v4014_v16, %v10266_v55 }
0x13ad   :  { %v3943_v63 = vpop.f32.mrf.mxu0  ;;  %v4016_v34 = vpop.f32.mrf.mxu1 }
0x13ae   :  { %11906 = vst [vmem:[#allocation201_spill] sm:$0xff] %v10275_v36  ;;  %11907 = vst [vmem:[#allocation202_spill] sm:$0xff] %v10278_v15  ;;  %v10281_v2 = vadd.f32 %v3943_v63, %v10241_v38  ;;  %v10284_v22 = vadd.f32 %v4016_v34, %v10250_v50 }
0x13af   :  { %v3945_v30 = vpop.f32.mrf.mxu0  ;;  %v4018_v44 = vpop.f32.mrf.mxu1 }
0x13b0   :  { %11908 = vst [vmem:[#allocation203_spill] sm:$0xff] %v10281_v2  ;;  %11909 = vst [vmem:[#allocation204_spill] sm:$0xff] %v10284_v22  ;;  %v10287_v18 = vadd.f32 %v3945_v30, %v10263_v54  ;;  %v10290_v12 = vadd.f32 %v4018_v44, %v10266_v55 }
0x13b1   :  { %v3949_v5 = vpop.f32.mrf.mxu0  ;;  %v4022_v36 = vpop.f32.mrf.mxu1 }
0x13b2   :  { %11910 = vst [vmem:[#allocation205_spill] sm:$0xff] %v10287_v18  ;;  %11911 = vst [vmem:[#allocation206_spill] sm:$0xff] %v10290_v12  ;;  %v10293_v16 = vadd.f32 %v3949_v5, %v10241_v38  ;;  %v10296_v15 = vadd.f32 %v4022_v36, %v10250_v50 }
0x13b3   :  { %v3951_v63 = vpop.f32.mrf.mxu0  ;;  %v4024_v2 = vpop.f32.mrf.mxu1 }
0x13b4   :  { %11912 = vst [vmem:[#allocation207_spill] sm:$0xff] %v10293_v16  ;;  %11913 = vst [vmem:[#allocation208_spill] sm:$0xff] %v10296_v15  ;;  %v10299_v34 = vadd.f32 %v3951_v63, %v10263_v54  ;;  %v10302_v22 = vadd.f32 %v4024_v2, %v10266_v55 }
0x13b5   :  { %v3953_v30 = vpop.f32.mrf.mxu0  ;;  %v4026_v18 = vpop.f32.mrf.mxu1 }
0x13b6   :  { %11914 = vst [vmem:[#allocation209_spill] sm:$0xff] %v10299_v34  ;;  %11915 = vst [vmem:[#allocation210_spill] sm:$0xff] %v10302_v22  ;;  %v10305_v44 = vadd.f32 %v3953_v30, %v10241_v38  ;;  %v10308_v12 = vadd.f32 %v4026_v18, %v10250_v50 }
0x13b7   :  { %v3955_v5 = vpop.f32.mrf.mxu0  ;;  %v4028_v16 = vpop.f32.mrf.mxu1 }
0x13b8   :  { %11916 = vst [vmem:[#allocation211_spill] sm:$0xff] %v10305_v44  ;;  %11917 = vst [vmem:[#allocation212_spill] sm:$0xff] %v10308_v12  ;;  %v10311_v36 = vadd.f32 %v3955_v5, %v10263_v54  ;;  %v10314_v15 = vadd.f32 %v4028_v16, %v10266_v55 }
0x13b9   :  { %v3959_v63 = vpop.f32.mrf.mxu0  ;;  %v4032_v34 = vpop.f32.mrf.mxu1 }
0x13ba   :  { %11918 = vst [vmem:[#allocation213_spill] sm:$0xff] %v10311_v36  ;;  %11919 = vst [vmem:[#allocation214_spill] sm:$0xff] %v10314_v15  ;;  %v10317_v2 = vadd.f32 %v3959_v63, %v10241_v38  ;;  %v10320_v22 = vadd.f32 %v4032_v34, %v10250_v50 }
0x13bb   :  { %v3961_v30 = vpop.f32.mrf.mxu0  ;;  %v4034_v44 = vpop.f32.mrf.mxu1 }
0x13bc   :  { %11920 = vst [vmem:[#allocation215_spill] sm:$0xff] %v10317_v2  ;;  %11921 = vst [vmem:[#allocation216_spill] sm:$0xff] %v10320_v22  ;;  %v10323_v18 = vadd.f32 %v3961_v30, %v10263_v54  ;;  %v10326_v12 = vadd.f32 %v4034_v44, %v10266_v55 }
0x13bd   :  { %v3963_v5 = vpop.f32.mrf.mxu0  ;;  %v4036_v36 = vpop.f32.mrf.mxu1 }
0x13be   :  { %11922 = vst [vmem:[#allocation217_spill] sm:$0xff] %v10323_v18  ;;  %11923 = vst [vmem:[#allocation218_spill] sm:$0xff] %v10326_v12  ;;  %v10329_v16 = vadd.f32 %v3963_v5, %v10241_v38  ;;  %v10332_v15 = vadd.f32 %v4036_v36, %v10250_v50 }
0x13bf   :  { %v3965_v63 = vpop.f32.mrf.mxu0  ;;  %v4038_v2 = vpop.f32.mrf.mxu1 }
0x13c0   :  { %11924 = vst [vmem:[#allocation219_spill] sm:$0xff] %v10329_v16  ;;  %11925 = vst [vmem:[#allocation220_spill] sm:$0xff] %v10332_v15  ;;  %v10335_v34 = vadd.f32 %v3965_v63, %v10263_v54  ;;  %v10338_v22 = vadd.f32 %v4038_v2, %v10266_v55 }
0x13c1   :  { %v3969_v30 = vpop.f32.mrf.mxu0  ;;  %v4042_v18 = vpop.f32.mrf.mxu1 }
0x13c2   :  { %11926 = vst [vmem:[#allocation221_spill] sm:$0xff] %v10335_v34  ;;  %11927 = vst [vmem:[#allocation222_spill] sm:$0xff] %v10338_v22  ;;  %v10341_v44 = vadd.f32 %v3969_v30, %v10241_v38  ;;  %v10344_v12 = vadd.f32 %v4042_v18, %v10250_v50  ;;  %v3796_v18 = vadd.f32 %v10123_v29, %v10135_v0 }
0x13c3   :  { %v3971_v5 = vpop.f32.mrf.mxu0  ;;  %v4044_v16 = vpop.f32.mrf.mxu1 }
0x13c4   :  { %11928 = vst [vmem:[#allocation223_spill] sm:$0xff] %v10341_v44  ;;  %11929 = vst [vmem:[#allocation224_spill] sm:$0xff] %v10344_v12  ;;  %v10347_v36 = vadd.f32 %v3971_v5, %v10263_v54  ;;  %v10350_v15 = vadd.f32 %v4044_v16, %v10266_v55  ;;  %v3869_v12 = vadd.f32 %v10125_v39, %v10138_v31 }
0x13c5   :  { %v3973_v63 = vpop.f32.mrf.mxu0  ;;  %v4046_v34 = vpop.f32.mrf.mxu1 }
0x13c6   :  { %11930 = vst [vmem:[#allocation225_spill] sm:$0xff] %v10347_v36  ;;  %11931 = vst [vmem:[#allocation226_spill] sm:$0xff] %v10350_v15 }
0x13c7   :  { %v3975_v2 = vpop.f32.mrf.mxu0  ;;  %v4048_v22 = vpop.f32.mrf.mxu1 }
0x13e9   :  { %v4926_v30 = vpop.f32.mrf.mxu0  ;;  %v4967_v44 = vpop.f32.mrf.mxu1 }
0x13ea   :  { %v5056_v5 = vadd.f32 %v4926_v30, %v3794_v9  ;;  %v5058_v36 = vadd.f32 %v4967_v44, %v10118_v24 }
0x13eb   :  { %v4928_v16 = vpop.f32.mrf.mxu0  ;;  %v4969_v15 = vpop.f32.mrf.mxu1 }
0x13ec   :  { %v7428_v33 = vmul.f32 -1.442695, %v5056_v5  ;;  %v5057_v60 = vadd.f32 %v4928_v16, %v3796_v18  ;;  %v5059_v20 = vadd.f32 %v4969_v15, %v3869_v12 }
0x13ed   :  { %v4930_v19 = vpop.f32.mrf.mxu0  ;;  %v4971_v48 = vpop.f32.mrf.mxu1 }
0x13ee   :  { %8214 = vpow2.f32 %v7428_v33  ;;  %v7429_v4 = vmul.f32 -1.442695, %v5057_v60  ;;  %v3974_v48 = vadd.f32 %v3973_v63, %v10241_v38  ;;  %v4047_v38 = vadd.f32 %v4046_v34, %v10250_v50 }
0x13ef   :  { %v4931_v25 = vpop.f32.mrf.mxu0  ;;  %v4972_v7 = vpop.f32.mrf.mxu1  ;;  %v7430_v63 = vmul.f32 -1.442695, %v5059_v20 }
0x13f0   :  { %8216 = vpow2.f32 %v7429_v4  ;;  %v3976_v7 = vadd.f32 %v3975_v2, %v10263_v54 }
0x13f1   :  { %8218 = vtanh.f32 %v5058_v36 }
0x13fb   :  { %v8215_v59 = vpop.eup %8214 }
0x13fc   :  { %v5063_v29 = vadd.f32 1.0, %v8215_v59 }
0x13fd   :  { %v8217_v0 = vpop.eup %8216 }
0x13fe   :  { %8220 = vrcp.f32 %v5063_v29  ;;  %v5069_v31 = vadd.f32 1.0, %v8217_v0  ;;  %v8219_v24 = vpop.eup %8218  ;;  %v4049_v0 = vadd.f32 %v4048_v22, %v10266_v55 }
0x1400   :  { %8222 = vrcp.f32 %v5069_v31 }
0x140b   :  { %v8221_v39 = vpop.eup %8220 }
0x140c   :  { %v5080_v9 = vmul.f32 %v8221_v39, %v8219_v24 }
0x140d   :  { %v8223_v44 = vpop.eup %8222 }
0x140e   :  { %v5079_v30 = vmul.f32 0.0, %v8223_v44 }
0x1410   :  { %v10359_v12 = vadd.f32 %v5080_v9, %v5079_v30 }
0x1429   :  { %v5008_v19 = vpop.f32.mrf.mxu0  ;;  %v5049_v60 = vpop.f32.mrf.mxu1 }
0x142a   :  { %v5084_v33 = vadd.f32 %v5008_v19, %v3974_v48  ;;  %v5086_v24 = vadd.f32 %v5049_v60, %v4047_v38  ;;  %v11938_v38 = vld [vmem:[#allocation113_spill] sm:$0xff] }
0x142b   :  { %v5010_v59 = vpop.f32.mrf.mxu0  ;;  %v5051_v15 = vpop.f32.mrf.mxu1 }
0x142c   :  { %v7431_v36 = vmul.f32 -1.442695, %v5084_v33  ;;  %v5085_v18 = vadd.f32 %v5010_v59, %v3976_v7  ;;  %v5087_v31 = vadd.f32 %v5051_v15, %v4049_v0  ;;  %v11936_v0 = vld [vmem:[#allocation111_spill] sm:$0xff] }
0x142d   :  { %v5012_v5 = vpop.f32.mrf.mxu0  ;;  %v5053_v16 = vpop.f32.mrf.mxu1 }
0x142e   :  { %8224 = vpow2.f32 %v7431_v36  ;;  %v7432_v4 = vmul.f32 -1.442695, %v5085_v18  ;;  %v7433_v54 = vmul.f32 -1.442695, %v5087_v31  ;;  %v11937_v31 = vld [vmem:[#allocation112_spill] sm:$0xff] }
0x142f   :  { %v5013_v25 = vpop.f32.mrf.mxu0  ;;  %v5054_v29 = vpop.f32.mrf.mxu1 }
0x1430   :  { %8226 = vpow2.f32 %v7432_v4  ;;  %v11934_v25 = vld [vmem:[#allocation109_spill] sm:$0xff]  ;;  %v11935_v29 = vld [vmem:[#allocation110_spill] sm:$0xff] }
0x1431   :  { %8228 = vpow2.f32 %v7430_v63  ;;  %v11939_v63 = vld [vmem:[#allocation114_spill] sm:$0xff] }
0x1432   :  { %8230 = vtanh.f32 %v5086_v24  ;;  %v11940_v24 = vld [vmem:[#allocation115_spill] sm:$0xff] }
0x1433   :  { %8232 = vpow2.f32 %v7433_v54  ;;  %v11941_v54 = vld [vmem:[#allocation116_spill] sm:$0xff] }
0x143b   :  { %v8225_v2 = vpop.eup %8224 }
0x143c   :  { %v5091_v39 = vadd.f32 1.0, %v8225_v2  ;;  %v11942_v2 = vld [vmem:[#allocation117_spill] sm:$0xff] }
0x143d   :  { %v8227_v9 = vpop.eup %8226 }
0x143e   :  { %8234 = vrcp.f32 %v5091_v39  ;;  %v5097_v44 = vadd.f32 1.0, %v8227_v9  ;;  %v8229_v30 = vpop.eup %8228  ;;  %v11943_v39 = vld [vmem:[#allocation118_spill] sm:$0xff]  ;;  %v11944_v9 = vld [vmem:[#allocation119_spill] sm:$0xff] }
0x143f   :  { %v8231_v48 = vpop.eup %8230  ;;  %v5076_v55 = vadd.f32 1.0, %v8229_v30  ;;  %v11946_v30 = vld [vmem:[#allocation121_spill] sm:$0xff] }
0x1440   :  { %8236 = vrcp.f32 %v5097_v44  ;;  %v8233_v19 = vpop.eup %8232  ;;  %v11945_v44 = vld [vmem:[#allocation120_spill] sm:$0xff] }
0x1441   :  { %v5104_v50 = vadd.f32 1.0, %v8233_v19  ;;  %8238 = vtanh.f32 %v10359_v12  ;;  %v11948_v19 = vld [vmem:[#allocation123_spill] sm:$0xff] }
0x1442   :  { %8240 = vrcp.f32 %v5076_v55  ;;  %v11950_v55 = vld [vmem:[#allocation125_spill] sm:$0xff] }
0x1443   :  { %8242 = vrcp.f32 %v5104_v50  ;;  %v11953_v50 = vld [vmem:[#allocation128_spill] sm:$0xff] }
0x144b   :  { %v8235_v7 = vpop.eup %8234 }
0x144c   :  { %v5108_v22 = vmul.f32 %v8235_v7, %v8231_v48  ;;  %v11947_v48 = vld [vmem:[#allocation122_spill] sm:$0xff]  ;;  %v11949_v7 = vld [vmem:[#allocation124_spill] sm:$0xff] }
0x144d   :  { %v8237_v33 = vpop.eup %8236 }
0x144e   :  { %v5107_v20 = vmul.f32 0.0, %v8237_v33  ;;  %v8239_v60 = vpop.eup %8238  ;;  %v11952_v33 = vld [vmem:[#allocation127_spill] sm:$0xff] }
0x144f   :  { %v8241_v59 = vpop.eup %8240 }
0x1450   :  { %v10366_v34 = vadd.f32 %v5108_v22, %v5107_v20  ;;  %v8243_v15 = vpop.eup %8242  ;;  %v10369_v18 = vmul.f32 %v8241_v59, %v8239_v60  ;;  %v11951_v22 = vld [vmem:[#allocation126_spill] sm:$0xff]  ;;  %v11954_v20 = vld [vmem:[#allocation129_spill] sm:$0xff]  ;;  %v11956_v59 = vld [vmem:[#allocation131_spill] sm:$0xff] }
0x1451   :  { %v11955_v60 = vld [vmem:[#allocation130_spill] sm:$0xff] }
0x1452   :  { %8244 = vtanh.f32 %v10366_v34  ;;  %11932 = vst [vmem:[#allocation227_spill] sm:$0xff] %v10369_v18  ;;  %v10377_v4 = vpack.c.bf16 %v10369_v18, %v10369_v18  ;;  %v11961_v18 = vld [vmem:[#allocation136_spill] sm:$0xff] }
0x145f   :  { %v8245_v36 = vpop.eup %8244 }
0x1460   :  { %v10371_v5 = vmul.f32 %v8245_v36, %v8243_v15  ;;  %v11957_v15 = vld [vmem:[#allocation132_spill] sm:$0xff]  ;;  %v11958_v36 = vld [vmem:[#allocation133_spill] sm:$0xff] }
0x1462   :  { %11933 = vst [vmem:[#allocation228_spill] sm:$0xff] %v10371_v5  ;;  %v5123_v16 = vpack.c.bf16 %v10371_v5, %v10371_v5  ;;  %v11960_v5 = vld [vmem:[#allocation135_spill] sm:$0xff] }
0x1464   :  { %5156 = vmatprep.mubr.bf16.mxu0 %v5123_v16  ;;  %5197 = vmatprep.mubr.bf16.mxu1 %v5123_v16 }
0x1465   :  { %5157 = vmatmul.mubr.bf16.vlgmr.msra.gmra.mxu0 %v10377_v4  ;;  %5198 = vmatmul.mubr.bf16.vlgmr.msra.gmra.mxu1 %v10377_v4 }
0x1466   :  { %5207 = vmatpush1.bf16.msra.mxu0 %v11934_v25  ;;  %5248 = vmatpush1.bf16.msra.mxu1 %v11935_v29 }
0x1467   :  { %5238 = vmatprep.mubr.bf16.mxu0 %v5123_v16  ;;  %5279 = vmatprep.mubr.bf16.mxu1 %v5123_v16  ;;  %v11959_v16 = vld [vmem:[#allocation134_spill] sm:$0xff] }
0x1468   :  { %5208 = vmatprep.subr.bf16.mxu0 %v11936_v0  ;;  %5249 = vmatprep.subr.bf16.mxu1 %v11937_v31 }
0x146a   :  { %5209 = vmatpush1.bf16.msra.mxu0 %v11938_v38  ;;  %5250 = vmatpush1.bf16.msra.mxu1 %v11939_v63 }
0x146b   :  { %5210 = vmatprep.subr.bf16.mxu0 %v11940_v24  ;;  %5251 = vmatprep.subr.bf16.mxu1 %v11941_v54 }
0x146e   :  { %5211 = vmatpush1.bf16.msra.mxu0 %v11942_v2  ;;  %5252 = vmatpush1.bf16.msra.mxu1 %v11943_v39 }
0x146f   :  { %5212 = vmatprep.subr.bf16.mxu0 %v11944_v9  ;;  %5253 = vmatprep.subr.bf16.mxu1 %v11945_v44 }
0x1472   :  { %5213 = vmatpush1.bf16.msra.mxu0 %v11946_v30  ;;  %5254 = vmatpush1.bf16.msra.mxu1 %v11947_v48 }
0x1473   :  { %5214 = vmatprep.subr.bf16.mxu0 %v11948_v19  ;;  %5255 = vmatprep.subr.bf16.mxu1 %v11949_v7 }
0x1476   :  { %5215 = vmatpush1.bf16.msra.mxu0 %v11950_v55  ;;  %5256 = vmatpush1.bf16.msra.mxu1 %v11951_v22  ;;  %v11962_v22 = vld [vmem:[#allocation137_spill] sm:$0xff] }
0x1477   :  { %5216 = vmatprep.subr.bf16.mxu0 %v11952_v33  ;;  %5257 = vmatprep.subr.bf16.mxu1 %v11953_v50  ;;  %v11963_v33 = vld [vmem:[#allocation138_spill] sm:$0xff]  ;;  %v11964_v50 = vld [vmem:[#allocation139_spill] sm:$0xff] }
0x147a   :  { %5217 = vmatpush1.bf16.msra.mxu0 %v11954_v20  ;;  %5258 = vmatpush1.bf16.msra.mxu1 %v11955_v60  ;;  %v11965_v20 = vld [vmem:[#allocation140_spill] sm:$0xff]  ;;  %v11966_v60 = vld [vmem:[#allocation141_spill] sm:$0xff] }
0x147b   :  { %5218 = vmatprep.subr.bf16.mxu0 %v11956_v59  ;;  %5259 = vmatprep.subr.bf16.mxu1 %v11957_v15  ;;  %v11967_v59 = vld [vmem:[#allocation142_spill] sm:$0xff]  ;;  %v11968_v15 = vld [vmem:[#allocation143_spill] sm:$0xff] }
0x147e   :  { %5219 = vmatpush1.bf16.msra.mxu0 %v11958_v36  ;;  %5260 = vmatpush1.bf16.msra.mxu1 %v11959_v16  ;;  %v11969_v36 = vld [vmem:[#allocation144_spill] sm:$0xff]  ;;  %v11970_v16 = vld [vmem:[#allocation145_spill] sm:$0xff] }
0x147f   :  { %5220 = vmatprep.subr.bf16.mxu0 %v11960_v5  ;;  %5261 = vmatprep.subr.bf16.mxu1 %v11961_v18  ;;  %v11971_v5 = vld [vmem:[#allocation146_spill] sm:$0xff]  ;;  %v11972_v18 = vld [vmem:[#allocation147_spill] sm:$0xff] }
0x1482   :  { %5221 = vmatpush1.bf16.msra.mxu0 %v11962_v22  ;;  %5262 = vmatpush1.bf16.msra.mxu1 %v11963_v33  ;;  %v11973_v22 = vld [vmem:[#allocation148_spill] sm:$0xff]  ;;  %v11974_v33 = vld [vmem:[#allocation149_spill] sm:$0xff] }
0x1483   :  { %5222 = vmatprep.subr.bf16.mxu0 %v11964_v50  ;;  %5263 = vmatprep.subr.bf16.mxu1 %v11965_v20  ;;  %v11975_v50 = vld [vmem:[#allocation150_spill] sm:$0xff]  ;;  %v11976_v20 = vld [vmem:[#allocation151_spill] sm:$0xff] }
0x1486   :  { %5223 = vmatpush2.bf16.msra.mxu0 %v11966_v60  ;;  %5264 = vmatpush2.bf16.msra.mxu1 %v11967_v59  ;;  %v11977_v60 = vld [vmem:[#allocation152_spill] sm:$0xff]  ;;  %v11978_v59 = vld [vmem:[#allocation153_spill] sm:$0xff] }
0x1487   :  { %5224 = vmatprep.subr.bf16.mxu0 %v11968_v15  ;;  %5265 = vmatprep.subr.bf16.mxu1 %v11969_v36  ;;  %v11979_v15 = vld [vmem:[#allocation154_spill] sm:$0xff]  ;;  %v11980_v36 = vld [vmem:[#allocation155_spill] sm:$0xff] }
0x148a   :  { %5225 = vmatpush2.bf16.msra.mxu0 %v11970_v16  ;;  %5266 = vmatpush2.bf16.msra.mxu1 %v11971_v5  ;;  %v11981_v16 = vld [vmem:[#allocation156_spill] sm:$0xff] }
0x148b   :  { %5226 = vmatprep.subr.bf16.mxu0 %v11972_v18  ;;  %5267 = vmatprep.subr.bf16.mxu1 %v11973_v22 }
0x148e   :  { %5227 = vmatpush2.bf16.msra.mxu0 %v11974_v33  ;;  %5268 = vmatpush2.bf16.msra.mxu1 %v11975_v50  ;;  %v11982_v33 = vld [vmem:[#allocation160_spill] sm:$0xff]  ;;  %v11983_v50 = vld [vmem:[#allocation161_spill] sm:$0xff] }
0x148f   :  { %5228 = vmatprep.subr.bf16.mxu0 %v11976_v20  ;;  %5269 = vmatprep.subr.bf16.mxu1 %v11977_v60 }
0x1492   :  { %5229 = vmatpush2.bf16.msra.mxu0 %v11978_v59  ;;  %5270 = vmatpush2.bf16.msra.mxu1 %v11979_v15 }
0x1493   :  { %5230 = vmatprep.subr.bf16.mxu0 %v11980_v36  ;;  %5271 = vmatprep.subr.bf16.mxu1 %v11981_v16 }
0x1496   :  { %5231 = vmatpush2.bf16.msra.mxu0 %v10027_v14  ;;  %5272 = vmatpush2.bf16.msra.mxu1 %v10029_v10 }
0x1497   :  { %5232 = vmatprep.subr.bf16.mxu0 %v10033_v6  ;;  %5273 = vmatprep.subr.bf16.mxu1 %v11982_v33 }
0x149a   :  { %5233 = vmatpush2.bf16.msra.mxu0 %v11983_v50  ;;  %5274 = vmatpush2.bf16.msra.mxu1 %v10041_v17 }
0x149b   :  { %5234 = vmatprep.subr.bf16.mxu0 %v10045_v42  ;;  %5275 = vmatprep.subr.bf16.mxu1 %v10047_v3 }
0x149e   :  { %5235 = vmatpush2.bf16.msra.mxu0 %v10051_v28  ;;  %5276 = vmatpush2.bf16.msra.mxu1 %v10053_v46 }
0x149f   :  { %5236 = vmatprep.subr.bf16.mxu0 %v10057_v27  ;;  %5277 = vmatprep.subr.bf16.mxu1 %v10059_v61 }
0x14a2   :  { %5237 = vmatpush2.bf16.msra.mxu0 %v10063_v37  ;;  %5278 = vmatpush2.bf16.msra.mxu1 %v10065_v13 }
0x14a3   :  { %5356 = vmatprep.subr.bf16.mxu0 %v9665_v56  ;;  %5397 = vmatprep.subr.bf16.mxu1 %v9667_v43 }
0x14a5   :  { %5239 = vmatmul.mubr.bf16.vlgmr.msra.gmra.mxu0 %v10377_v4  ;;  %5280 = vmatmul.mubr.bf16.vlgmr.msra.gmra.mxu1 %v10377_v4  ;;  %v11984_v4 = vld [vmem:[#allocation64_spill] sm:$0xff] }
0x14a6   :  { %5357 = vmatpush1.bf16.msra.mxu0 %v9671_v62  ;;  %5398 = vmatpush1.bf16.msra.mxu1 %v9673_v21 }
0x14a7   :  { %5358 = vmatprep.subr.bf16.mxu0 %v9677_v45  ;;  %5399 = vmatprep.subr.bf16.mxu1 %v9679_v58 }
0x14aa   :  { %5359 = vmatpush1.bf16.msra.mxu0 %v9685_v8  ;;  %5400 = vmatpush1.bf16.msra.mxu1 %v9687_v26 }
0x14ab   :  { %5360 = vmatprep.subr.bf16.mxu0 %v9691_v35  ;;  %5401 = vmatprep.subr.bf16.mxu1 %v9693_v32  ;;  %v12030_v32 = vld [vmem:[#allocation172_spill] sm:$0xff] }
0x14ae   :  { %5361 = vmatpush1.bf16.msra.mxu0 %v9699_v40  ;;  %5402 = vmatpush1.bf16.msra.mxu1 %v9701_v23  ;;  %v11985_v23 = vld [vmem:[#allocation65_spill] sm:$0xff]  ;;  %v12029_v40 = vld [vmem:[#allocation171_spill] sm:$0xff] }
0x14af   :  { %5362 = vmatprep.subr.bf16.mxu0 %v9705_v1  ;;  %5403 = vmatprep.subr.bf16.mxu1 %v9707_v41  ;;  %v11986_v1 = vld [vmem:[#allocation66_spill] sm:$0xff]  ;;  %v11987_v41 = vld [vmem:[#allocation67_spill] sm:$0xff] }
0x14b2   :  { %5363 = vmatpush1.bf16.msra.mxu0 %v9713_v49  ;;  %5404 = vmatpush1.bf16.msra.mxu1 %v9715_v53  ;;  %v11988_v49 = vld [vmem:[#allocation68_spill] sm:$0xff]  ;;  %v11989_v53 = vld [vmem:[#allocation69_spill] sm:$0xff] }
0x14b3   :  { %5364 = vmatprep.subr.bf16.mxu0 %v9719_v47  ;;  %5405 = vmatprep.subr.bf16.mxu1 %v9721_v51  ;;  %v11990_v47 = vld [vmem:[#allocation70_spill] sm:$0xff]  ;;  %v11991_v51 = vld [vmem:[#allocation71_spill] sm:$0xff] }
0x14b6   :  { %5365 = vmatpush1.bf16.msra.mxu0 %v9727_v11  ;;  %5406 = vmatpush1.bf16.msra.mxu1 %v9729_v57  ;;  %v11992_v11 = vld [vmem:[#allocation72_spill] sm:$0xff]  ;;  %v11993_v57 = vld [vmem:[#allocation73_spill] sm:$0xff] }
0x14b7   :  { %5366 = vmatprep.subr.bf16.mxu0 %v9733_v52  ;;  %5407 = vmatprep.subr.bf16.mxu1 %v11984_v4  ;;  %v11994_v52 = vld [vmem:[#allocation74_spill] sm:$0xff]  ;;  %v11995_v4 = vld [vmem:[#allocation75_spill] sm:$0xff] }
0x14ba   :  { %5367 = vmatpush1.bf16.msra.mxu0 %v11985_v23  ;;  %5408 = vmatpush1.bf16.msra.mxu1 %v11986_v1  ;;  %v11996_v23 = vld [vmem:[#allocation76_spill] sm:$0xff]  ;;  %v11997_v1 = vld [vmem:[#allocation77_spill] sm:$0xff] }
0x14bb   :  { %5368 = vmatprep.subr.bf16.mxu0 %v11987_v41  ;;  %5409 = vmatprep.subr.bf16.mxu1 %v11988_v49  ;;  %v11998_v41 = vld [vmem:[#allocation78_spill] sm:$0xff]  ;;  %v11999_v49 = vld [vmem:[#allocation79_spill] sm:$0xff] }
0x14be   :  { %5369 = vmatpush1.bf16.msra.mxu0 %v11989_v53  ;;  %5410 = vmatpush1.bf16.msra.mxu1 %v11990_v47  ;;  %v12000_v53 = vld [vmem:[#allocation80_spill] sm:$0xff]  ;;  %v12001_v47 = vld [vmem:[#allocation81_spill] sm:$0xff] }
0x14bf   :  { %5370 = vmatprep.subr.bf16.mxu0 %v11991_v51  ;;  %5411 = vmatprep.subr.bf16.mxu1 %v11992_v11  ;;  %v12002_v51 = vld [vmem:[#allocation82_spill] sm:$0xff]  ;;  %v12003_v11 = vld [vmem:[#allocation83_spill] sm:$0xff] }
0x14c2   :  { %5371 = vmatpush1.bf16.msra.mxu0 %v11993_v57  ;;  %5412 = vmatpush1.bf16.msra.mxu1 %v11994_v52  ;;  %v12004_v57 = vld [vmem:[#allocation84_spill] sm:$0xff]  ;;  %v12005_v52 = vld [vmem:[#allocation85_spill] sm:$0xff] }
0x14c3   :  { %5372 = vmatprep.subr.bf16.mxu0 %v11995_v4  ;;  %5413 = vmatprep.subr.bf16.mxu1 %v11996_v23  ;;  %v12006_v4 = vld [vmem:[#allocation86_spill] sm:$0xff]  ;;  %v12007_v23 = vld [vmem:[#allocation87_spill] sm:$0xff] }
0x14c6   :  { %5373 = vmatpush2.bf16.msra.mxu0 %v11997_v1  ;;  %5414 = vmatpush2.bf16.msra.mxu1 %v11998_v41  ;;  %v12008_v1 = vld [vmem:[#allocation88_spill] sm:$0xff]  ;;  %v12009_v41 = vld [vmem:[#allocation89_spill] sm:$0xff] }
0x14c7   :  { %5374 = vmatprep.subr.bf16.mxu0 %v11999_v49  ;;  %5415 = vmatprep.subr.bf16.mxu1 %v12000_v53  ;;  %v12010_v49 = vld [vmem:[#allocation90_spill] sm:$0xff]  ;;  %v12011_v53 = vld [vmem:[#allocation91_spill] sm:$0xff] }
0x14ca   :  { %5375 = vmatpush2.bf16.msra.mxu0 %v12001_v47  ;;  %5416 = vmatpush2.bf16.msra.mxu1 %v12002_v51  ;;  %v12012_v47 = vld [vmem:[#allocation92_spill] sm:$0xff]  ;;  %v12013_v51 = vld [vmem:[#allocation93_spill] sm:$0xff] }
0x14cb   :  { %5376 = vmatprep.subr.bf16.mxu0 %v12003_v11  ;;  %5417 = vmatprep.subr.bf16.mxu1 %v12004_v57  ;;  %v12014_v11 = vld [vmem:[#allocation94_spill] sm:$0xff]  ;;  %v12015_v57 = vld [vmem:[#allocation95_spill] sm:$0xff] }
0x14ce   :  { %5377 = vmatpush2.bf16.msra.mxu0 %v12005_v52  ;;  %5418 = vmatpush2.bf16.msra.mxu1 %v12006_v4  ;;  %v12016_v52 = vld [vmem:[#allocation96_spill] sm:$0xff]  ;;  %v12017_v4 = vld [vmem:[#allocation97_spill] sm:$0xff] }
0x14cf   :  { %5378 = vmatprep.subr.bf16.mxu0 %v12007_v23  ;;  %5419 = vmatprep.subr.bf16.mxu1 %v12008_v1  ;;  %v12018_v23 = vld [vmem:[#allocation98_spill] sm:$0xff]  ;;  %v12019_v1 = vld [vmem:[#allocation99_spill] sm:$0xff] }
0x14d2   :  { %5379 = vmatpush2.bf16.msra.mxu0 %v12009_v41  ;;  %5420 = vmatpush2.bf16.msra.mxu1 %v12010_v49  ;;  %v12020_v41 = vld [vmem:[#allocation100_spill] sm:$0xff]  ;;  %v12021_v49 = vld [vmem:[#allocation101_spill] sm:$0xff] }
0x14d3   :  { %5380 = vmatprep.subr.bf16.mxu0 %v12011_v53  ;;  %5421 = vmatprep.subr.bf16.mxu1 %v12012_v47  ;;  %v12022_v53 = vld [vmem:[#allocation102_spill] sm:$0xff]  ;;  %v12023_v47 = vld [vmem:[#allocation103_spill] sm:$0xff] }
0x14d6   :  { %5381 = vmatpush2.bf16.msra.mxu0 %v12013_v51  ;;  %5422 = vmatpush2.bf16.msra.mxu1 %v12014_v11  ;;  %v12024_v51 = vld [vmem:[#allocation104_spill] sm:$0xff]  ;;  %v12025_v11 = vld [vmem:[#allocation105_spill] sm:$0xff] }
0x14d7   :  { %5382 = vmatprep.subr.bf16.mxu0 %v12015_v57  ;;  %5423 = vmatprep.subr.bf16.mxu1 %v12016_v52  ;;  %v12026_v57 = vld [vmem:[#allocation106_spill] sm:$0xff]  ;;  %v12027_v52 = vld [vmem:[#allocation107_spill] sm:$0xff] }
0x14da   :  { %5383 = vmatpush2.bf16.msra.mxu0 %v12017_v4  ;;  %5424 = vmatpush2.bf16.msra.mxu1 %v12018_v23  ;;  %v12028_v4 = vld [vmem:[#allocation108_spill] sm:$0xff] }
0x14db   :  { %5384 = vmatprep.subr.bf16.mxu0 %v12019_v1  ;;  %5425 = vmatprep.subr.bf16.mxu1 %v12020_v41 }
0x14de   :  { %5385 = vmatpush2.bf16.msra.mxu0 %v12021_v49  ;;  %5426 = vmatpush2.bf16.msra.mxu1 %v12022_v53 }
0x14df   :  { %5386 = vmatprep.subr.bf16.mxu0 %v12023_v47  ;;  %5427 = vmatprep.subr.bf16.mxu1 %v12024_v51  ;;  %v12031_v47 = vld [vmem:[#allocation173_spill] sm:$0xff]  ;;  %v12032_v51 = vld [vmem:[#allocation174_spill] sm:$0xff] }
0x14e2   :  { %5387 = vmatpush2.bf16.msra.mxu0 %v12025_v11  ;;  %5428 = vmatpush2.bf16.msra.mxu1 %v12026_v57 }
0x14e3   :  { %5438 = vmatprep.subr.bf16.mxu0 %v12027_v52  ;;  %5479 = vmatprep.subr.bf16.mxu1 %v12028_v4 }
0x1525   :  { %v5158_v23 = vpop.f32.mrf.mxu0  ;;  %v5199_v1 = vpop.f32.mrf.mxu1 }
0x1526   :  { %v5288_v41 = vadd.f32 %v5158_v23, %v12029_v40  ;;  %v5290_v49 = vadd.f32 %v5199_v1, %v12030_v32 }
0x1527   :  { %v5160_v35 = vpop.f32.mrf.mxu0  ;;  %v5201_v53 = vpop.f32.mrf.mxu1 }
0x1528   :  { %v7434_v26 = vmul.f32 -1.442695, %v5288_v41  ;;  %v5289_v8 = vadd.f32 %v5160_v35, %v12031_v47  ;;  %v5291_v58 = vadd.f32 %v5201_v53, %v12032_v51 }
0x1529   :  { %v5162_v11 = vpop.f32.mrf.mxu0  ;;  %v5203_v45 = vpop.f32.mrf.mxu1 }
0x152a   :  { %8246 = vpow2.f32 %v7434_v26  ;;  %v7435_v57 = vmul.f32 -1.442695, %v5289_v8  ;;  %v12033_v26 = vld [vmem:[#allocation223_spill] sm:$0xff] }
0x152b   :  { %v5163_v52 = vpop.f32.mrf.mxu0  ;;  %v5204_v21 = vpop.f32.mrf.mxu1 }
0x152c   :  { %8248 = vpow2.f32 %v7435_v57  ;;  %v12034_v57 = vld [vmem:[#allocation225_spill] sm:$0xff] }
0x152d   :  { %8250 = vtanh.f32 %v5290_v49 }
0x1537   :  { %v8247_v4 = vpop.eup %8246 }
0x1538   :  { %v5295_v62 = vadd.f32 1.0, %v8247_v4 }
0x1539   :  { %v8249_v43 = vpop.eup %8248 }
0x153a   :  { %8252 = vrcp.f32 %v5295_v62  ;;  %v5301_v32 = vadd.f32 1.0, %v8249_v43  ;;  %v8251_v40 = vpop.eup %8250 }
0x153c   :  { %8254 = vrcp.f32 %v5301_v32 }
0x1547   :  { %v8253_v23 = vpop.eup %8252 }
0x1548   :  { %v5312_v1 = vmul.f32 %v8253_v23, %v8251_v40  ;;  %v12035_v40 = vld [vmem:[#allocation226_spill] sm:$0xff]  ;;  %v7436_v23 = vmul.f32 -1.442695, %v5291_v58 }
0x1549   :  { %v8255_v35 = vpop.eup %8254 }
0x154a   :  { %v5311_v41 = vmul.f32 %v8255_v35, %v10359_v12 }
0x154c   :  { %v10516_v53 = vadd.f32 %v5312_v1, %v5311_v41  ;;  %v12036_v1 = vld [vmem:[#allocation224_spill] sm:$0xff] }
0x1565   :  { %v5240_v45 = vpop.f32.mrf.mxu0  ;;  %v5281_v8 = vpop.f32.mrf.mxu1 }
0x1566   :  { %v5316_v21 = vadd.f32 %v5240_v45, %v12033_v26  ;;  %v5318_v35 = vadd.f32 %v5281_v8, %v12036_v1 }
0x1567   :  { %v5242_v47 = vpop.f32.mrf.mxu0  ;;  %v5283_v51 = vpop.f32.mrf.mxu1 }
0x1568   :  { %v7437_v11 = vmul.f32 -1.442695, %v5316_v21  ;;  %v5317_v49 = vadd.f32 %v5242_v47, %v12034_v57  ;;  %v5319_v12 = vadd.f32 %v5283_v51, %v12035_v40 }
0x1569   :  { %v5244_v62 = vpop.f32.mrf.mxu0  ;;  %v5285_v43 = vpop.f32.mrf.mxu1 }
0x156a   :  { %8256 = vpow2.f32 %v7437_v11  ;;  %v7438_v52 = vmul.f32 -1.442695, %v5317_v49  ;;  %v7439_v41 = vmul.f32 -1.442695, %v5319_v12 }
0x156b   :  { %v5245_v4 = vpop.f32.mrf.mxu0  ;;  %v5286_v32 = vpop.f32.mrf.mxu1 }
0x156c   :  { %8258 = vpow2.f32 %v7438_v52 }
0x156d   :  { %8260 = vpow2.f32 %v7436_v23 }
0x156e   :  { %8262 = vtanh.f32 %v5318_v35  ;;  %v12037_v35 = vld [vmem:[#allocation126_spill] sm:$0xff] }
0x156f   :  { %8264 = vpow2.f32 %v7439_v41  ;;  %v12038_v41 = vld [vmem:[#allocation127_spill] sm:$0xff] }
0x1577   :  { %v8257_v56 = vpop.eup %8256 }
0x1578   :  { %v5323_v45 = vadd.f32 1.0, %v8257_v56 }
0x1579   :  { %v8259_v26 = vpop.eup %8258 }
0x157a   :  { %8266 = vrcp.f32 %v5323_v45  ;;  %v5329_v21 = vadd.f32 1.0, %v8259_v26  ;;  %v8261_v47 = vpop.eup %8260  ;;  %v12039_v45 = vld [vmem:[#allocation128_spill] sm:$0xff]  ;;  %v12040_v26 = vld [vmem:[#allocation129_spill] sm:$0xff] }
0x157b   :  { %v8263_v11 = vpop.eup %8262  ;;  %v5308_v62 = vadd.f32 1.0, %v8261_v47  ;;  %v12042_v47 = vld [vmem:[#allocation131_spill] sm:$0xff] }
0x157c   :  { %8268 = vrcp.f32 %v5329_v21  ;;  %v8265_v57 = vpop.eup %8264  ;;  %v12041_v21 = vld [vmem:[#allocation130_spill] sm:$0xff] }
0x157d   :  { %v5336_v58 = vadd.f32 1.0, %v8265_v57  ;;  %8270 = vtanh.f32 %v10516_v53  ;;  %v12044_v57 = vld [vmem:[#allocation133_spill] sm:$0xff] }
0x157e   :  { %8272 = vrcp.f32 %v5308_v62  ;;  %v12046_v62 = vld [vmem:[#allocation135_spill] sm:$0xff] }
0x157f   :  { %8274 = vrcp.f32 %v5336_v58  ;;  %v12049_v58 = vld [vmem:[#allocation138_spill] sm:$0xff] }
0x1587   :  { %v8267_v49 = vpop.eup %8266 }
0x1588   :  { %v5340_v43 = vmul.f32 %v8267_v49, %v8263_v11  ;;  %v12043_v11 = vld [vmem:[#allocation132_spill] sm:$0xff]  ;;  %v12045_v49 = vld [vmem:[#allocation134_spill] sm:$0xff] }
0x1589   :  { %v8269_v51 = vpop.eup %8268 }
0x158a   :  { %v5339_v8 = vmul.f32 %v8269_v51, %v10366_v34  ;;  %v8271_v52 = vpop.eup %8270  ;;  %v12048_v51 = vld [vmem:[#allocation137_spill] sm:$0xff] }
0x158b   :  { %v8273_v4 = vpop.eup %8272 }
0x158c   :  { %v10524_v56 = vadd.f32 %v5340_v43, %v5339_v8  ;;  %v8275_v32 = vpop.eup %8274  ;;  %v10527_v12 = vmul.f32 %v8273_v4, %v8271_v52  ;;  %v12047_v43 = vld [vmem:[#allocation136_spill] sm:$0xff]  ;;  %v12050_v8 = vld [vmem:[#allocation139_spill] sm:$0xff]  ;;  %v12052_v4 = vld [vmem:[#allocation141_spill] sm:$0xff] }
0x158d   :  { %v12051_v52 = vld [vmem:[#allocation140_spill] sm:$0xff] }
0x158e   :  { %8276 = vtanh.f32 %v10524_v56  ;;  %v10535_v34 = vpack.c.bf16 %v10527_v12, %v10527_v12 }
0x159b   :  { %v8277_v40 = vpop.eup %8276 }
0x159c   :  { %v10529_v23 = vmul.f32 %v8277_v40, %v8275_v32  ;;  %v12053_v32 = vld [vmem:[#allocation142_spill] sm:$0xff]  ;;  %v12054_v40 = vld [vmem:[#allocation143_spill] sm:$0xff] }
0x159e   :  { %v5355_v1 = vpack.c.bf16 %v10529_v23, %v10529_v23 }
0x15a0   :  { %5388 = vmatprep.mubr.bf16.mxu0 %v5355_v1  ;;  %5429 = vmatprep.mubr.bf16.mxu1 %v5355_v1 }
0x15a1   :  { %5389 = vmatmul.mubr.bf16.vlgmr.msra.gmra.mxu0 %v10535_v34  ;;  %5430 = vmatmul.mubr.bf16.vlgmr.msra.gmra.mxu1 %v10535_v34 }
0x15a2   :  { %5439 = vmatpush1.bf16.msra.mxu0 %v11934_v25  ;;  %5480 = vmatpush1.bf16.msra.mxu1 %v11935_v29 }
0x15a3   :  { %5470 = vmatprep.mubr.bf16.mxu0 %v5355_v1  ;;  %5511 = vmatprep.mubr.bf16.mxu1 %v5355_v1  ;;  %v12055_v1 = vld [vmem:[#allocation144_spill] sm:$0xff] }
0x15a4   :  { %5440 = vmatprep.subr.bf16.mxu0 %v11936_v0  ;;  %5481 = vmatprep.subr.bf16.mxu1 %v11937_v31 }
0x15a6   :  { %5441 = vmatpush1.bf16.msra.mxu0 %v11938_v38  ;;  %5482 = vmatpush1.bf16.msra.mxu1 %v11939_v63 }
0x15a7   :  { %5442 = vmatprep.subr.bf16.mxu0 %v11940_v24  ;;  %5483 = vmatprep.subr.bf16.mxu1 %v11941_v54 }
0x15aa   :  { %5443 = vmatpush1.bf16.msra.mxu0 %v11942_v2  ;;  %5484 = vmatpush1.bf16.msra.mxu1 %v11943_v39 }
0x15ab   :  { %5444 = vmatprep.subr.bf16.mxu0 %v11944_v9  ;;  %5485 = vmatprep.subr.bf16.mxu1 %v11945_v44 }
0x15ae   :  { %5445 = vmatpush1.bf16.msra.mxu0 %v11946_v30  ;;  %5486 = vmatpush1.bf16.msra.mxu1 %v11947_v48 }
0x15af   :  { %5446 = vmatprep.subr.bf16.mxu0 %v11948_v19  ;;  %5487 = vmatprep.subr.bf16.mxu1 %v11949_v7 }
0x15b2   :  { %5447 = vmatpush1.bf16.msra.mxu0 %v11950_v55  ;;  %5488 = vmatpush1.bf16.msra.mxu1 %v12037_v35 }
0x15b3   :  { %5448 = vmatprep.subr.bf16.mxu0 %v12038_v41  ;;  %5489 = vmatprep.subr.bf16.mxu1 %v12039_v45 }
0x15b6   :  { %5449 = vmatpush1.bf16.msra.mxu0 %v12040_v26  ;;  %5490 = vmatpush1.bf16.msra.mxu1 %v12041_v21 }
0x15b7   :  { %5450 = vmatprep.subr.bf16.mxu0 %v12042_v47  ;;  %5491 = vmatprep.subr.bf16.mxu1 %v12043_v11 }
0x15ba   :  { %5451 = vmatpush1.bf16.msra.mxu0 %v12044_v57  ;;  %5492 = vmatpush1.bf16.msra.mxu1 %v12045_v49  ;;  %v12056_v49 = vld [vmem:[#allocation145_spill] sm:$0xff] }
0x15bb   :  { %5452 = vmatprep.subr.bf16.mxu0 %v12046_v62  ;;  %5493 = vmatprep.subr.bf16.mxu1 %v12047_v43 }
0x15be   :  { %5453 = vmatpush1.bf16.msra.mxu0 %v12048_v51  ;;  %5494 = vmatpush1.bf16.msra.mxu1 %v12049_v58  ;;  %v12057_v58 = vld [vmem:[#allocation149_spill] sm:$0xff] }
0x15bf   :  { %5454 = vmatprep.subr.bf16.mxu0 %v12050_v8  ;;  %5495 = vmatprep.subr.bf16.mxu1 %v12051_v52  ;;  %v12058_v8 = vld [vmem:[#allocation150_spill] sm:$0xff] }
0x15c2   :  { %5455 = vmatpush2.bf16.msra.mxu0 %v12052_v4  ;;  %5496 = vmatpush2.bf16.msra.mxu1 %v12053_v32 }
0x15c3   :  { %5456 = vmatprep.subr.bf16.mxu0 %v12054_v40  ;;  %5497 = vmatprep.subr.bf16.mxu1 %v12055_v1 }
0x15c6   :  { %5457 = vmatpush2.bf16.msra.mxu0 %v12056_v49  ;;  %5498 = vmatpush2.bf16.msra.mxu1 %v11971_v5 }
0x15c7   :  { %5458 = vmatprep.subr.bf16.mxu0 %v11972_v18  ;;  %5499 = vmatprep.subr.bf16.mxu1 %v11973_v22 }
0x15ca   :  { %5459 = vmatpush2.bf16.msra.mxu0 %v12057_v58  ;;  %5500 = vmatpush2.bf16.msra.mxu1 %v12058_v8 }
0x15cb   :  { %5460 = vmatprep.subr.bf16.mxu0 %v11976_v20  ;;  %5501 = vmatprep.subr.bf16.mxu1 %v11977_v60 }
0x15ce   :  { %5461 = vmatpush2.bf16.msra.mxu0 %v11978_v59  ;;  %5502 = vmatpush2.bf16.msra.mxu1 %v11979_v15 }
0x15cf   :  { %5462 = vmatprep.subr.bf16.mxu0 %v11980_v36  ;;  %5503 = vmatprep.subr.bf16.mxu1 %v11981_v16 }
0x15d2   :  { %5463 = vmatpush2.bf16.msra.mxu0 %v10027_v14  ;;  %5504 = vmatpush2.bf16.msra.mxu1 %v10029_v10 }
0x15d3   :  { %5464 = vmatprep.subr.bf16.mxu0 %v10033_v6  ;;  %5505 = vmatprep.subr.bf16.mxu1 %v11982_v33  ;;  %v12059_v33 = vld [vmem:[#allocation43_spill] sm:$0xff]  ;;  %v12126_v6 = vld [vmem:[#allocation176_spill] sm:$0xff] }
0x15d6   :  { %5465 = vmatpush2.bf16.msra.mxu0 %v11983_v50  ;;  %5506 = vmatpush2.bf16.msra.mxu1 %v10041_v17  ;;  %v12060_v50 = vld [vmem:[#allocation44_spill] sm:$0xff]  ;;  %v12125_v17 = vld [vmem:[#allocation175_spill] sm:$0xff] }
0x15d7   :  { %5466 = vmatprep.subr.bf16.mxu0 %v10045_v42  ;;  %5507 = vmatprep.subr.bf16.mxu1 %v10047_v3  ;;  %v12061_v3 = vld [vmem:[#allocation45_spill] sm:$0xff]  ;;  %v12070_v42 = vld [vmem:[#allocation54_spill] sm:$0xff] }
0x15da   :  { %5467 = vmatpush2.bf16.msra.mxu0 %v10051_v28  ;;  %5508 = vmatpush2.bf16.msra.mxu1 %v10053_v46  ;;  %v12062_v28 = vld [vmem:[#allocation46_spill] sm:$0xff]  ;;  %v12063_v46 = vld [vmem:[#allocation47_spill] sm:$0xff] }
0x15db   :  { %5468 = vmatprep.subr.bf16.mxu0 %v10057_v27  ;;  %5509 = vmatprep.subr.bf16.mxu1 %v10059_v61  ;;  %v12064_v27 = vld [vmem:[#allocation48_spill] sm:$0xff]  ;;  %v12065_v61 = vld [vmem:[#allocation49_spill] sm:$0xff] }
0x15de   :  { %5469 = vmatpush2.bf16.msra.mxu0 %v10063_v37  ;;  %5510 = vmatpush2.bf16.msra.mxu1 %v10065_v13  ;;  %v12066_v37 = vld [vmem:[#allocation50_spill] sm:$0xff]  ;;  %v12067_v13 = vld [vmem:[#allocation51_spill] sm:$0xff] }
0x15df   :  { %5588 = vmatprep.subr.bf16.mxu0 %v12059_v33  ;;  %5629 = vmatprep.subr.bf16.mxu1 %v12060_v50  ;;  %v12068_v33 = vld [vmem:[#allocation52_spill] sm:$0xff]  ;;  %v12069_v50 = vld [vmem:[#allocation53_spill] sm:$0xff] }
0x15e1   :  { %5471 = vmatmul.mubr.bf16.vlgmr.msra.gmra.mxu0 %v10535_v34  ;;  %5512 = vmatmul.mubr.bf16.vlgmr.msra.gmra.mxu1 %v10535_v34  ;;  %v12071_v34 = vld [vmem:[#allocation55_spill] sm:$0xff] }
0x15e2   :  { %5589 = vmatpush1.bf16.msra.mxu0 %v12061_v3  ;;  %5630 = vmatpush1.bf16.msra.mxu1 %v12062_v28  ;;  %v12072_v3 = vld [vmem:[#allocation56_spill] sm:$0xff]  ;;  %v12073_v28 = vld [vmem:[#allocation57_spill] sm:$0xff] }
0x15e3   :  { %5590 = vmatprep.subr.bf16.mxu0 %v12063_v46  ;;  %5631 = vmatprep.subr.bf16.mxu1 %v12064_v27  ;;  %v12074_v46 = vld [vmem:[#allocation58_spill] sm:$0xff]  ;;  %v12075_v27 = vld [vmem:[#allocation59_spill] sm:$0xff] }
0x15e6   :  { %5591 = vmatpush1.bf16.msra.mxu0 %v12065_v61  ;;  %5632 = vmatpush1.bf16.msra.mxu1 %v12066_v37  ;;  %v12076_v61 = vld [vmem:[#allocation60_spill] sm:$0xff]  ;;  %v12077_v37 = vld [vmem:[#allocation61_spill] sm:$0xff] }
0x15e7   :  { %5592 = vmatprep.subr.bf16.mxu0 %v12067_v13  ;;  %5633 = vmatprep.subr.bf16.mxu1 %v12068_v33  ;;  %v12078_v13 = vld [vmem:[#allocation62_spill] sm:$0xff]  ;;  %v12079_v33 = vld [vmem:[#allocation63_spill] sm:$0xff] }
0x15ea   :  { %5593 = vmatpush1.bf16.msra.mxu0 %v12069_v50  ;;  %5634 = vmatpush1.bf16.msra.mxu1 %v12070_v42  ;;  %v12080_v50 = vld [vmem:[#allocation64_spill] sm:$0xff]  ;;  %v12081_v42 = vld [vmem:[#allocation65_spill] sm:$0xff] }
0x15eb   :  { %5594 = vmatprep.subr.bf16.mxu0 %v12071_v34  ;;  %5635 = vmatprep.subr.bf16.mxu1 %v12072_v3  ;;  %v12082_v34 = vld [vmem:[#allocation66_spill] sm:$0xff]  ;;  %v12083_v3 = vld [vmem:[#allocation67_spill] sm:$0xff] }
0x15ee   :  { %5595 = vmatpush1.bf16.msra.mxu0 %v12073_v28  ;;  %5636 = vmatpush1.bf16.msra.mxu1 %v12074_v46  ;;  %v12084_v28 = vld [vmem:[#allocation68_spill] sm:$0xff]  ;;  %v12085_v46 = vld [vmem:[#allocation69_spill] sm:$0xff] }
0x15ef   :  { %5596 = vmatprep.subr.bf16.mxu0 %v12075_v27  ;;  %5637 = vmatprep.subr.bf16.mxu1 %v12076_v61  ;;  %v12086_v27 = vld [vmem:[#allocation70_spill] sm:$0xff]  ;;  %v12087_v61 = vld [vmem:[#allocation71_spill] sm:$0xff] }
0x15f2   :  { %5597 = vmatpush1.bf16.msra.mxu0 %v12077_v37  ;;  %5638 = vmatpush1.bf16.msra.mxu1 %v12078_v13  ;;  %v12088_v37 = vld [vmem:[#allocation72_spill] sm:$0xff]  ;;  %v12089_v13 = vld [vmem:[#allocation73_spill] sm:$0xff] }
0x15f3   :  { %5598 = vmatprep.subr.bf16.mxu0 %v12079_v33  ;;  %5639 = vmatprep.subr.bf16.mxu1 %v12080_v50  ;;  %v12090_v33 = vld [vmem:[#allocation74_spill] sm:$0xff]  ;;  %v12091_v50 = vld [vmem:[#allocation75_spill] sm:$0xff] }
0x15f6   :  { %5599 = vmatpush1.bf16.msra.mxu0 %v12081_v42  ;;  %5640 = vmatpush1.bf16.msra.mxu1 %v12082_v34  ;;  %v12092_v42 = vld [vmem:[#allocation76_spill] sm:$0xff]  ;;  %v12093_v34 = vld [vmem:[#allocation77_spill] sm:$0xff] }
0x15f7   :  { %5600 = vmatprep.subr.bf16.mxu0 %v12083_v3  ;;  %5641 = vmatprep.subr.bf16.mxu1 %v12084_v28  ;;  %v12094_v3 = vld [vmem:[#allocation78_spill] sm:$0xff]  ;;  %v12095_v28 = vld [vmem:[#allocation79_spill] sm:$0xff] }
0x15fa   :  { %5601 = vmatpush1.bf16.msra.mxu0 %v12085_v46  ;;  %5642 = vmatpush1.bf16.msra.mxu1 %v12086_v27  ;;  %v12096_v46 = vld [vmem:[#allocation80_spill] sm:$0xff]  ;;  %v12097_v27 = vld [vmem:[#allocation81_spill] sm:$0xff] }
0x15fb   :  { %5602 = vmatprep.subr.bf16.mxu0 %v12087_v61  ;;  %5643 = vmatprep.subr.bf16.mxu1 %v12088_v37  ;;  %v12098_v61 = vld [vmem:[#allocation82_spill] sm:$0xff]  ;;  %v12099_v37 = vld [vmem:[#allocation83_spill] sm:$0xff] }
0x15fe   :  { %5603 = vmatpush1.bf16.msra.mxu0 %v12089_v13  ;;  %5644 = vmatpush1.bf16.msra.mxu1 %v12090_v33  ;;  %v12100_v13 = vld [vmem:[#allocation84_spill] sm:$0xff]  ;;  %v12101_v33 = vld [vmem:[#allocation85_spill] sm:$0xff] }
0x15ff   :  { %5604 = vmatprep.subr.bf16.mxu0 %v12091_v50  ;;  %5645 = vmatprep.subr.bf16.mxu1 %v12092_v42  ;;  %v12102_v50 = vld [vmem:[#allocation86_spill] sm:$0xff]  ;;  %v12103_v42 = vld [vmem:[#allocation87_spill] sm:$0xff] }
0x1602   :  { %5605 = vmatpush2.bf16.msra.mxu0 %v12093_v34  ;;  %5646 = vmatpush2.bf16.msra.mxu1 %v12094_v3  ;;  %v12104_v34 = vld [vmem:[#allocation88_spill] sm:$0xff]  ;;  %v12105_v3 = vld [vmem:[#allocation89_spill] sm:$0xff] }
0x1603   :  { %5606 = vmatprep.subr.bf16.mxu0 %v12095_v28  ;;  %5647 = vmatprep.subr.bf16.mxu1 %v12096_v46  ;;  %v12106_v28 = vld [vmem:[#allocation90_spill] sm:$0xff]  ;;  %v12107_v46 = vld [vmem:[#allocation91_spill] sm:$0xff] }
0x1606   :  { %5607 = vmatpush2.bf16.msra.mxu0 %v12097_v27  ;;  %5648 = vmatpush2.bf16.msra.mxu1 %v12098_v61  ;;  %v12108_v27 = vld [vmem:[#allocation92_spill] sm:$0xff]  ;;  %v12109_v61 = vld [vmem:[#allocation93_spill] sm:$0xff] }
0x1607   :  { %5608 = vmatprep.subr.bf16.mxu0 %v12099_v37  ;;  %5649 = vmatprep.subr.bf16.mxu1 %v12100_v13  ;;  %v12110_v37 = vld [vmem:[#allocation94_spill] sm:$0xff]  ;;  %v12111_v13 = vld [vmem:[#allocation95_spill] sm:$0xff] }
0x160a   :  { %5609 = vmatpush2.bf16.msra.mxu0 %v12101_v33  ;;  %5650 = vmatpush2.bf16.msra.mxu1 %v12102_v50  ;;  %v12112_v33 = vld [vmem:[#allocation96_spill] sm:$0xff]  ;;  %v12113_v50 = vld [vmem:[#allocation97_spill] sm:$0xff] }
0x160b   :  { %5610 = vmatprep.subr.bf16.mxu0 %v12103_v42  ;;  %5651 = vmatprep.subr.bf16.mxu1 %v12104_v34  ;;  %v12114_v42 = vld [vmem:[#allocation98_spill] sm:$0xff]  ;;  %v12115_v34 = vld [vmem:[#allocation99_spill] sm:$0xff] }
0x160e   :  { %5611 = vmatpush2.bf16.msra.mxu0 %v12105_v3  ;;  %5652 = vmatpush2.bf16.msra.mxu1 %v12106_v28  ;;  %v12116_v3 = vld [vmem:[#allocation100_spill] sm:$0xff]  ;;  %v12117_v28 = vld [vmem:[#allocation101_spill] sm:$0xff] }
0x160f   :  { %5612 = vmatprep.subr.bf16.mxu0 %v12107_v46  ;;  %5653 = vmatprep.subr.bf16.mxu1 %v12108_v27  ;;  %v12118_v46 = vld [vmem:[#allocation102_spill] sm:$0xff]  ;;  %v12119_v27 = vld [vmem:[#allocation103_spill] sm:$0xff] }
0x1612   :  { %5613 = vmatpush2.bf16.msra.mxu0 %v12109_v61  ;;  %5654 = vmatpush2.bf16.msra.mxu1 %v12110_v37  ;;  %v12120_v61 = vld [vmem:[#allocation104_spill] sm:$0xff]  ;;  %v12121_v37 = vld [vmem:[#allocation105_spill] sm:$0xff] }
0x1613   :  { %5614 = vmatprep.subr.bf16.mxu0 %v12111_v13  ;;  %5655 = vmatprep.subr.bf16.mxu1 %v12112_v33  ;;  %v12122_v13 = vld [vmem:[#allocation106_spill] sm:$0xff]  ;;  %v12123_v33 = vld [vmem:[#allocation107_spill] sm:$0xff] }
0x1616   :  { %5615 = vmatpush2.bf16.msra.mxu0 %v12113_v50  ;;  %5656 = vmatpush2.bf16.msra.mxu1 %v12114_v42  ;;  %v12124_v50 = vld [vmem:[#allocation108_spill] sm:$0xff] }
0x1617   :  { %5616 = vmatprep.subr.bf16.mxu0 %v12115_v34  ;;  %5657 = vmatprep.subr.bf16.mxu1 %v12116_v3 }
0x161a   :  { %5617 = vmatpush2.bf16.msra.mxu0 %v12117_v28  ;;  %5658 = vmatpush2.bf16.msra.mxu1 %v12118_v46 }
0x161b   :  { %5618 = vmatprep.subr.bf16.mxu0 %v12119_v27  ;;  %5659 = vmatprep.subr.bf16.mxu1 %v12120_v61  ;;  %v12127_v27 = vld [vmem:[#allocation177_spill] sm:$0xff]  ;;  %v12128_v61 = vld [vmem:[#allocation178_spill] sm:$0xff] }
0x161e   :  { %5619 = vmatpush2.bf16.msra.mxu0 %v12121_v37  ;;  %5660 = vmatpush2.bf16.msra.mxu1 %v12122_v13 }
0x161f   :  { %5670 = vmatprep.subr.bf16.mxu0 %v12123_v33  ;;  %5711 = vmatprep.subr.bf16.mxu1 %v12124_v50 }
0x1661   :  { %v5390_v42 = vpop.f32.mrf.mxu0  ;;  %v5431_v34 = vpop.f32.mrf.mxu1 }
0x1662   :  { %v5520_v3 = vadd.f32 %v5390_v42, %v12125_v17  ;;  %v5522_v28 = vadd.f32 %v5431_v34, %v12126_v6 }
0x1663   :  { %v5392_v10 = vpop.f32.mrf.mxu0  ;;  %v5433_v46 = vpop.f32.mrf.mxu1 }
0x1664   :  { %v7440_v14 = vmul.f32 -1.442695, %v5520_v3  ;;  %v5521_v16 = vadd.f32 %v5392_v10, %v12127_v27  ;;  %v5523_v36 = vadd.f32 %v5433_v46, %v12128_v61 }
0x1665   :  { %v5394_v37 = vpop.f32.mrf.mxu0  ;;  %v5435_v15 = vpop.f32.mrf.mxu1 }
0x1666   :  { %8278 = vpow2.f32 %v7440_v14  ;;  %v7441_v13 = vmul.f32 -1.442695, %v5521_v16  ;;  %v7442_v50 = vmul.f32 -1.442695, %v5523_v36  ;;  %v12131_v36 = vld [vmem:[#allocation219_spill] sm:$0xff] }
0x1667   :  { %v5395_v33 = vpop.f32.mrf.mxu0  ;;  %v5436_v59 = vpop.f32.mrf.mxu1 }
0x1668   :  { %8280 = vpow2.f32 %v7441_v13  ;;  %v12129_v33 = vld [vmem:[#allocation227_spill] sm:$0xff] }
0x1669   :  { %8282 = vtanh.f32 %v5522_v28 }
0x166a   :  { %8284 = vpow2.f32 %v7442_v50  ;;  %v5344_v50 = vadd.f32 %v10527_v12, %v12129_v33  ;;  %v12133_v12 = vld [vmem:[#allocation222_spill] sm:$0xff] }
0x1673   :  { %v8279_v60 = vpop.eup %8278 }
0x1674   :  { %v5527_v20 = vadd.f32 1.0, %v8279_v60 }
0x1675   :  { %v8281_v17 = vpop.eup %8280 }
0x1676   :  { %8286 = vrcp.f32 %v5527_v20  ;;  %v5533_v6 = vadd.f32 1.0, %v8281_v17  ;;  %v8283_v42 = vpop.eup %8282 }
0x1677   :  { %v8285_v10 = vpop.eup %8284 }
0x1678   :  { %8288 = vrcp.f32 %v5533_v6  ;;  %v5540_v27 = vadd.f32 1.0, %v8285_v10  ;;  %v12132_v6 = vld [vmem:[#allocation221_spill] sm:$0xff] }
0x167a   :  { %8290 = vrcp.f32 %v5540_v27 }
0x1683   :  { %v8287_v3 = vpop.eup %8286 }
0x1684   :  { %v5544_v46 = vmul.f32 %v8287_v3, %v8283_v42 }
0x1685   :  { %v8289_v37 = vpop.eup %8288 }
0x1686   :  { %v5543_v14 = vmul.f32 %v8289_v37, %v10516_v53 }
0x1687   :  { %v8291_v13 = vpop.eup %8290 }
0x1688   :  { %v10674_v61 = vadd.f32 %v5544_v46, %v5543_v14 }
0x168a   :  { %8292 = vtanh.f32 %v10674_v61 }
0x1697   :  { %v8293_v28 = vpop.eup %8292 }
0x1698   :  { %v5547_v20 = vmul.f32 %v8293_v28, %v8291_v13  ;;  %v12134_v13 = vld [vmem:[#allocation220_spill] sm:$0xff] }
0x169a   :  { %v10679_v60 = vadd.f32 %v5547_v20, %v5344_v50 }
0x169c   :  { %12130 = vst [vmem:[#allocation109_spill] sm:$0xff] %v10679_v60 }
0x16a1   :  { %v5472_v59 = vpop.f32.mrf.mxu0  ;;  %v5513_v15 = vpop.f32.mrf.mxu1 }
0x16a2   :  { %v5548_v16 = vadd.f32 %v5472_v59, %v12131_v36  ;;  %v5550_v28 = vadd.f32 %v5513_v15, %v12134_v13  ;;  %v10693_v13 = vpack.c.bf16 %v5547_v20, %v5547_v20  ;;  %v12138_v20 = vld [vmem:[#allocation139_spill] sm:$0xff] }
0x16a3   :  { %v5474_v34 = vpop.f32.mrf.mxu0  ;;  %v5515_v17 = vpop.f32.mrf.mxu1 }
0x16a4   :  { %v7443_v53 = vmul.f32 -1.442695, %v5548_v16  ;;  %v5549_v42 = vadd.f32 %v5474_v34, %v12132_v6  ;;  %v5551_v14 = vadd.f32 %v5515_v17, %v12133_v12 }
0x16a5   :  { %v5476_v10 = vpop.f32.mrf.mxu0  ;;  %v5517_v3 = vpop.f32.mrf.mxu1 }
0x16a6   :  { %8294 = vpow2.f32 %v7443_v53  ;;  %v7444_v46 = vmul.f32 -1.442695, %v5549_v42  ;;  %v7445_v33 = vmul.f32 -1.442695, %v5551_v14 }
0x16a7   :  { %v5477_v37 = vpop.f32.mrf.mxu0  ;;  %v5518_v27 = vpop.f32.mrf.mxu1 }
0x16a8   :  { %8296 = vpow2.f32 %v7444_v46  ;;  %v12135_v37 = vld [vmem:[#allocation228_spill] sm:$0xff] }
0x16a9   :  { %8298 = vtanh.f32 %v5550_v28  ;;  %v12139_v28 = vld [vmem:[#allocation151_spill] sm:$0xff] }
0x16aa   :  { %8300 = vpow2.f32 %v7445_v33  ;;  %v12140_v33 = vld [vmem:[#allocation152_spill] sm:$0xff] }
0x16b3   :  { %v8295_v50 = vpop.eup %8294 }
0x16b4   :  { %v5555_v60 = vadd.f32 1.0, %v8295_v50  ;;  %v12141_v50 = vld [vmem:[#allocation153_spill] sm:$0xff] }
0x16b5   :  { %v8297_v59 = vpop.eup %8296 }
0x16b6   :  { %8302 = vrcp.f32 %v5555_v60  ;;  %v5561_v36 = vadd.f32 1.0, %v8297_v59  ;;  %v8299_v16 = vpop.eup %8298  ;;  %v5345_v60 = vadd.f32 %v10529_v23, %v12135_v37  ;;  %v12137_v23 = vld [vmem:[#allocation138_spill] sm:$0xff]  ;;  %v12153_v37 = vld [vmem:[#allocation165_spill] sm:$0xff] }
0x16b7   :  { %v8301_v34 = vpop.eup %8300  ;;  %v12142_v59 = vld [vmem:[#allocation154_spill] sm:$0xff] }
0x16b8   :  { %8304 = vrcp.f32 %v5561_v36  ;;  %v5568_v10 = vadd.f32 1.0, %v8301_v34  ;;  %v12143_v36 = vld [vmem:[#allocation155_spill] sm:$0xff]  ;;  %v12145_v34 = vld [vmem:[#allocation157_spill] sm:$0xff] }
0x16ba   :  { %8306 = vrcp.f32 %v5568_v10  ;;  %v12149_v10 = vld [vmem:[#allocation161_spill] sm:$0xff] }
0x16c3   :  { %v8303_v53 = vpop.eup %8302 }
0x16c4   :  { %v5572_v6 = vmul.f32 %v8303_v53, %v8299_v16  ;;  %v12144_v16 = vld [vmem:[#allocation156_spill] sm:$0xff]  ;;  %v12146_v53 = vld [vmem:[#allocation158_spill] sm:$0xff] }
0x16c5   :  { %v8305_v42 = vpop.eup %8304 }
0x16c6   :  { %v5571_v3 = vmul.f32 %v8305_v42, %v10524_v56  ;;  %v12136_v56 = vld [vmem:[#allocation134_spill] sm:$0xff]  ;;  %v12148_v42 = vld [vmem:[#allocation160_spill] sm:$0xff] }
0x16c7   :  { %v8307_v15 = vpop.eup %8306 }
0x16c8   :  { %v10686_v17 = vadd.f32 %v5572_v6, %v5571_v3  ;;  %v12147_v6 = vld [vmem:[#allocation159_spill] sm:$0xff]  ;;  %v12150_v3 = vld [vmem:[#allocation162_spill] sm:$0xff] }
0x16ca   :  { %8308 = vtanh.f32 %v10686_v17 }
0x16d7   :  { %v8309_v46 = vpop.eup %8308 }
0x16d8   :  { %v5575_v27 = vmul.f32 %v8309_v46, %v8307_v15  ;;  %v12151_v15 = vld [vmem:[#allocation163_spill] sm:$0xff]  ;;  %v12152_v46 = vld [vmem:[#allocation164_spill] sm:$0xff] }
0x16da   :  { %v10691_v12 = vadd.f32 %v5575_v27, %v5345_v60  ;;  %v5587_v14 = vpack.c.bf16 %v5575_v27, %v5575_v27  ;;  %v12154_v60 = vld [vmem:[#allocation166_spill] sm:$0xff]  ;;  %v12155_v27 = vld [vmem:[#allocation167_spill] sm:$0xff] }
0x16dc   :  { %5620 = vmatprep.mubr.bf16.mxu0 %v5587_v14  ;;  %5661 = vmatprep.mubr.bf16.mxu1 %v5587_v14 }
0x16dd   :  { %5621 = vmatmul.mubr.bf16.vlgmr.msra.gmra.mxu0 %v10693_v13  ;;  %5662 = vmatmul.mubr.bf16.vlgmr.msra.gmra.mxu1 %v10693_v13 }
0x16de   :  { %5671 = vmatpush1.bf16.msra.mxu0 %v11934_v25  ;;  %5712 = vmatpush1.bf16.msra.mxu1 %v11935_v29 }
0x16df   :  { %5702 = vmatprep.mubr.bf16.mxu0 %v5587_v14  ;;  %5743 = vmatprep.mubr.bf16.mxu1 %v5587_v14  ;;  %v12156_v14 = vld [vmem:[#allocation168_spill] sm:$0xff] }
0x16e0   :  { %5672 = vmatprep.subr.bf16.mxu0 %v11936_v0  ;;  %5713 = vmatprep.subr.bf16.mxu1 %v11937_v31 }
0x16e2   :  { %5673 = vmatpush1.bf16.msra.mxu0 %v11938_v38  ;;  %5714 = vmatpush1.bf16.msra.mxu1 %v11939_v63 }
0x16e3   :  { %5674 = vmatprep.subr.bf16.mxu0 %v11940_v24  ;;  %5715 = vmatprep.subr.bf16.mxu1 %v11941_v54 }
0x16e6   :  { %5675 = vmatpush1.bf16.msra.mxu0 %v11942_v2  ;;  %5716 = vmatpush1.bf16.msra.mxu1 %v11943_v39 }
0x16e7   :  { %5676 = vmatprep.subr.bf16.mxu0 %v11944_v9  ;;  %5717 = vmatprep.subr.bf16.mxu1 %v11945_v44 }
0x16ea   :  { %5677 = vmatpush1.bf16.msra.mxu0 %v11946_v30  ;;  %5718 = vmatpush1.bf16.msra.mxu1 %v11947_v48 }
0x16eb   :  { %5678 = vmatprep.subr.bf16.mxu0 %v11948_v19  ;;  %5719 = vmatprep.subr.bf16.mxu1 %v11949_v7 }
0x16ee   :  { %5679 = vmatpush1.bf16.msra.mxu0 %v11950_v55  ;;  %5720 = vmatpush1.bf16.msra.mxu1 %v12037_v35 }
0x16ef   :  { %5680 = vmatprep.subr.bf16.mxu0 %v12038_v41  ;;  %5721 = vmatprep.subr.bf16.mxu1 %v12039_v45 }
0x16f2   :  { %5681 = vmatpush1.bf16.msra.mxu0 %v12040_v26  ;;  %5722 = vmatpush1.bf16.msra.mxu1 %v12041_v21 }
0x16f3   :  { %5682 = vmatprep.subr.bf16.mxu0 %v12042_v47  ;;  %5723 = vmatprep.subr.bf16.mxu1 %v12043_v11 }
0x16f6   :  { %5683 = vmatpush1.bf16.msra.mxu0 %v12044_v57  ;;  %5724 = vmatpush1.bf16.msra.mxu1 %v12136_v56 }
0x16f7   :  { %5684 = vmatprep.subr.bf16.mxu0 %v12046_v62  ;;  %5725 = vmatprep.subr.bf16.mxu1 %v12047_v43 }
0x16fa   :  { %5685 = vmatpush1.bf16.msra.mxu0 %v12048_v51  ;;  %5726 = vmatpush1.bf16.msra.mxu1 %v12137_v23 }
0x16fb   :  { %5686 = vmatprep.subr.bf16.mxu0 %v12138_v20  ;;  %5727 = vmatprep.subr.bf16.mxu1 %v12051_v52 }
0x16fe   :  { %5687 = vmatpush2.bf16.msra.mxu0 %v12052_v4  ;;  %5728 = vmatpush2.bf16.msra.mxu1 %v12053_v32 }
0x16ff   :  { %5688 = vmatprep.subr.bf16.mxu0 %v12054_v40  ;;  %5729 = vmatprep.subr.bf16.mxu1 %v12055_v1 }
0x1702   :  { %5689 = vmatpush2.bf16.msra.mxu0 %v12056_v49  ;;  %5730 = vmatpush2.bf16.msra.mxu1 %v11971_v5 }
0x1703   :  { %5690 = vmatprep.subr.bf16.mxu0 %v11972_v18  ;;  %5731 = vmatprep.subr.bf16.mxu1 %v11973_v22 }
0x1706   :  { %5691 = vmatpush2.bf16.msra.mxu0 %v12057_v58  ;;  %5732 = vmatpush2.bf16.msra.mxu1 %v12058_v8 }
0x1707   :  { %5692 = vmatprep.subr.bf16.mxu0 %v12139_v28  ;;  %5733 = vmatprep.subr.bf16.mxu1 %v12140_v33 }
0x170a   :  { %5693 = vmatpush2.bf16.msra.mxu0 %v12141_v50  ;;  %5734 = vmatpush2.bf16.msra.mxu1 %v12142_v59 }
0x170b   :  { %5694 = vmatprep.subr.bf16.mxu0 %v12143_v36  ;;  %5735 = vmatprep.subr.bf16.mxu1 %v12144_v16 }
0x170e   :  { %5695 = vmatpush2.bf16.msra.mxu0 %v12145_v34  ;;  %5736 = vmatpush2.bf16.msra.mxu1 %v12146_v53  ;;  %v12157_v53 = vld [vmem:[#allocation169_spill] sm:$0xff]  ;;  %v12226_v34 = vld [vmem:[#allocation180_spill] sm:$0xff] }
0x170f   :  { %5696 = vmatprep.subr.bf16.mxu0 %v12147_v6  ;;  %5737 = vmatprep.subr.bf16.mxu1 %v12148_v42  ;;  %v12158_v6 = vld [vmem:[#allocation170_spill] sm:$0xff]  ;;  %v12159_v42 = vld [vmem:[#allocation43_spill] sm:$0xff] }
0x1712   :  { %5697 = vmatpush2.bf16.msra.mxu0 %v12149_v10  ;;  %5738 = vmatpush2.bf16.msra.mxu1 %v12150_v3  ;;  %v12160_v10 = vld [vmem:[#allocation44_spill] sm:$0xff]  ;;  %v12225_v3 = vld [vmem:[#allocation179_spill] sm:$0xff] }
0x1713   :  { %5698 = vmatprep.subr.bf16.mxu0 %v12151_v15  ;;  %5739 = vmatprep.subr.bf16.mxu1 %v12152_v46  ;;  %v12161_v46 = vld [vmem:[#allocation45_spill] sm:$0xff]  ;;  %v12170_v15 = vld [vmem:[#allocation54_spill] sm:$0xff] }
0x1716   :  { %5699 = vmatpush2.bf16.msra.mxu0 %v12153_v37  ;;  %5740 = vmatpush2.bf16.msra.mxu1 %v12154_v60  ;;  %v12162_v37 = vld [vmem:[#allocation46_spill] sm:$0xff]  ;;  %v12163_v60 = vld [vmem:[#allocation47_spill] sm:$0xff] }
0x1717   :  { %5700 = vmatprep.subr.bf16.mxu0 %v12155_v27  ;;  %5741 = vmatprep.subr.bf16.mxu1 %v12156_v14  ;;  %v12164_v27 = vld [vmem:[#allocation48_spill] sm:$0xff]  ;;  %v12165_v14 = vld [vmem:[#allocation49_spill] sm:$0xff] }
0x171a   :  { %5701 = vmatpush2.bf16.msra.mxu0 %v12157_v53  ;;  %5742 = vmatpush2.bf16.msra.mxu1 %v12158_v6  ;;  %v12166_v53 = vld [vmem:[#allocation50_spill] sm:$0xff]  ;;  %v12167_v6 = vld [vmem:[#allocation51_spill] sm:$0xff] }
0x171b   :  { %5820 = vmatprep.subr.bf16.mxu0 %v12159_v42  ;;  %5861 = vmatprep.subr.bf16.mxu1 %v12160_v10  ;;  %v12168_v42 = vld [vmem:[#allocation52_spill] sm:$0xff]  ;;  %v12169_v10 = vld [vmem:[#allocation53_spill] sm:$0xff] }
0x171d   :  { %5703 = vmatmul.mubr.bf16.vlgmr.msra.gmra.mxu0 %v10693_v13  ;;  %5744 = vmatmul.mubr.bf16.vlgmr.msra.gmra.mxu1 %v10693_v13  ;;  %v12171_v13 = vld [vmem:[#allocation55_spill] sm:$0xff] }
0x171e   :  { %5821 = vmatpush1.bf16.msra.mxu0 %v12161_v46  ;;  %5862 = vmatpush1.bf16.msra.mxu1 %v12162_v37  ;;  %v12172_v46 = vld [vmem:[#allocation56_spill] sm:$0xff]  ;;  %v12173_v37 = vld [vmem:[#allocation57_spill] sm:$0xff] }
0x171f   :  { %5822 = vmatprep.subr.bf16.mxu0 %v12163_v60  ;;  %5863 = vmatprep.subr.bf16.mxu1 %v12164_v27  ;;  %v12174_v60 = vld [vmem:[#allocation58_spill] sm:$0xff]  ;;  %v12175_v27 = vld [vmem:[#allocation59_spill] sm:$0xff] }
0x1722   :  { %5823 = vmatpush1.bf16.msra.mxu0 %v12165_v14  ;;  %5864 = vmatpush1.bf16.msra.mxu1 %v12166_v53  ;;  %v12176_v14 = vld [vmem:[#allocation60_spill] sm:$0xff]  ;;  %v12177_v53 = vld [vmem:[#allocation61_spill] sm:$0xff] }
0x1723   :  { %5824 = vmatprep.subr.bf16.mxu0 %v12167_v6  ;;  %5865 = vmatprep.subr.bf16.mxu1 %v12168_v42  ;;  %v12178_v6 = vld [vmem:[#allocation62_spill] sm:$0xff]  ;;  %v12179_v42 = vld [vmem:[#allocation63_spill] sm:$0xff] }
0x1726   :  { %5825 = vmatpush1.bf16.msra.mxu0 %v12169_v10  ;;  %5866 = vmatpush1.bf16.msra.mxu1 %v12170_v15  ;;  %v12180_v10 = vld [vmem:[#allocation64_spill] sm:$0xff]  ;;  %v12181_v15 = vld [vmem:[#allocation65_spill] sm:$0xff] }
0x1727   :  { %5826 = vmatprep.subr.bf16.mxu0 %v12171_v13  ;;  %5867 = vmatprep.subr.bf16.mxu1 %v12172_v46  ;;  %v12182_v13 = vld [vmem:[#allocation66_spill] sm:$0xff]  ;;  %v12183_v46 = vld [vmem:[#allocation67_spill] sm:$0xff] }
0x172a   :  { %5827 = vmatpush1.bf16.msra.mxu0 %v12173_v37  ;;  %5868 = vmatpush1.bf16.msra.mxu1 %v12174_v60  ;;  %v12184_v37 = vld [vmem:[#allocation68_spill] sm:$0xff]  ;;  %v12185_v60 = vld [vmem:[#allocation69_spill] sm:$0xff] }
0x172b   :  { %5828 = vmatprep.subr.bf16.mxu0 %v12175_v27  ;;  %5869 = vmatprep.subr.bf16.mxu1 %v12176_v14  ;;  %v12186_v27 = vld [vmem:[#allocation70_spill] sm:$0xff]  ;;  %v12187_v14 = vld [vmem:[#allocation71_spill] sm:$0xff] }
0x172e   :  { %5829 = vmatpush1.bf16.msra.mxu0 %v12177_v53  ;;  %5870 = vmatpush1.bf16.msra.mxu1 %v12178_v6  ;;  %v12188_v53 = vld [vmem:[#allocation72_spill] sm:$0xff]  ;;  %v12189_v6 = vld [vmem:[#allocation73_spill] sm:$0xff] }
0x172f   :  { %5830 = vmatprep.subr.bf16.mxu0 %v12179_v42  ;;  %5871 = vmatprep.subr.bf16.mxu1 %v12180_v10  ;;  %v12190_v42 = vld [vmem:[#allocation74_spill] sm:$0xff]  ;;  %v12191_v10 = vld [vmem:[#allocation75_spill] sm:$0xff] }
0x1732   :  { %5831 = vmatpush1.bf16.msra.mxu0 %v12181_v15  ;;  %5872 = vmatpush1.bf16.msra.mxu1 %v12182_v13  ;;  %v12192_v15 = vld [vmem:[#allocation76_spill] sm:$0xff]  ;;  %v12193_v13 = vld [vmem:[#allocation77_spill] sm:$0xff] }
0x1733   :  { %5832 = vmatprep.subr.bf16.mxu0 %v12183_v46  ;;  %5873 = vmatprep.subr.bf16.mxu1 %v12184_v37  ;;  %v12194_v46 = vld [vmem:[#allocation78_spill] sm:$0xff]  ;;  %v12195_v37 = vld [vmem:[#allocation79_spill] sm:$0xff] }
0x1736   :  { %5833 = vmatpush1.bf16.msra.mxu0 %v12185_v60  ;;  %5874 = vmatpush1.bf16.msra.mxu1 %v12186_v27  ;;  %v12196_v60 = vld [vmem:[#allocation80_spill] sm:$0xff]  ;;  %v12197_v27 = vld [vmem:[#allocation81_spill] sm:$0xff] }
0x1737   :  { %5834 = vmatprep.subr.bf16.mxu0 %v12187_v14  ;;  %5875 = vmatprep.subr.bf16.mxu1 %v12188_v53  ;;  %v12198_v14 = vld [vmem:[#allocation82_spill] sm:$0xff]  ;;  %v12199_v53 = vld [vmem:[#allocation83_spill] sm:$0xff] }
0x173a   :  { %5835 = vmatpush1.bf16.msra.mxu0 %v12189_v6  ;;  %5876 = vmatpush1.bf16.msra.mxu1 %v12190_v42  ;;  %v12200_v6 = vld [vmem:[#allocation84_spill] sm:$0xff]  ;;  %v12201_v42 = vld [vmem:[#allocation85_spill] sm:$0xff] }
0x173b   :  { %5836 = vmatprep.subr.bf16.mxu0 %v12191_v10  ;;  %5877 = vmatprep.subr.bf16.mxu1 %v12192_v15  ;;  %v12202_v10 = vld [vmem:[#allocation86_spill] sm:$0xff]  ;;  %v12203_v15 = vld [vmem:[#allocation87_spill] sm:$0xff] }
0x173e   :  { %5837 = vmatpush2.bf16.msra.mxu0 %v12193_v13  ;;  %5878 = vmatpush2.bf16.msra.mxu1 %v12194_v46  ;;  %v12204_v13 = vld [vmem:[#allocation88_spill] sm:$0xff]  ;;  %v12205_v46 = vld [vmem:[#allocation89_spill] sm:$0xff] }
0x173f   :  { %5838 = vmatprep.subr.bf16.mxu0 %v12195_v37  ;;  %5879 = vmatprep.subr.bf16.mxu1 %v12196_v60  ;;  %v12206_v37 = vld [vmem:[#allocation90_spill] sm:$0xff]  ;;  %v12207_v60 = vld [vmem:[#allocation91_spill] sm:$0xff] }
0x1742   :  { %5839 = vmatpush2.bf16.msra.mxu0 %v12197_v27  ;;  %5880 = vmatpush2.bf16.msra.mxu1 %v12198_v14  ;;  %v12208_v27 = vld [vmem:[#allocation92_spill] sm:$0xff]  ;;  %v12209_v14 = vld [vmem:[#allocation93_spill] sm:$0xff] }
0x1743   :  { %5840 = vmatprep.subr.bf16.mxu0 %v12199_v53  ;;  %5881 = vmatprep.subr.bf16.mxu1 %v12200_v6  ;;  %v12210_v53 = vld [vmem:[#allocation94_spill] sm:$0xff]  ;;  %v12211_v6 = vld [vmem:[#allocation95_spill] sm:$0xff] }
0x1746   :  { %5841 = vmatpush2.bf16.msra.mxu0 %v12201_v42  ;;  %5882 = vmatpush2.bf16.msra.mxu1 %v12202_v10  ;;  %v12212_v42 = vld [vmem:[#allocation96_spill] sm:$0xff]  ;;  %v12213_v10 = vld [vmem:[#allocation97_spill] sm:$0xff] }
0x1747   :  { %5842 = vmatprep.subr.bf16.mxu0 %v12203_v15  ;;  %5883 = vmatprep.subr.bf16.mxu1 %v12204_v13  ;;  %v12214_v15 = vld [vmem:[#allocation98_spill] sm:$0xff]  ;;  %v12215_v13 = vld [vmem:[#allocation99_spill] sm:$0xff] }
0x174a   :  { %5843 = vmatpush2.bf16.msra.mxu0 %v12205_v46  ;;  %5884 = vmatpush2.bf16.msra.mxu1 %v12206_v37  ;;  %v12216_v46 = vld [vmem:[#allocation100_spill] sm:$0xff]  ;;  %v12217_v37 = vld [vmem:[#allocation101_spill] sm:$0xff] }
0x174b   :  { %5844 = vmatprep.subr.bf16.mxu0 %v12207_v60  ;;  %5885 = vmatprep.subr.bf16.mxu1 %v12208_v27  ;;  %v12218_v60 = vld [vmem:[#allocation102_spill] sm:$0xff]  ;;  %v12219_v27 = vld [vmem:[#allocation103_spill] sm:$0xff] }
0x174e   :  { %5845 = vmatpush2.bf16.msra.mxu0 %v12209_v14  ;;  %5886 = vmatpush2.bf16.msra.mxu1 %v12210_v53  ;;  %v12220_v14 = vld [vmem:[#allocation104_spill] sm:$0xff]  ;;  %v12221_v53 = vld [vmem:[#allocation105_spill] sm:$0xff] }
0x174f   :  { %5846 = vmatprep.subr.bf16.mxu0 %v12211_v6  ;;  %5887 = vmatprep.subr.bf16.mxu1 %v12212_v42  ;;  %v12222_v6 = vld [vmem:[#allocation106_spill] sm:$0xff]  ;;  %v12223_v42 = vld [vmem:[#allocation107_spill] sm:$0xff] }
0x1752   :  { %5847 = vmatpush2.bf16.msra.mxu0 %v12213_v10  ;;  %5888 = vmatpush2.bf16.msra.mxu1 %v12214_v15  ;;  %v12224_v10 = vld [vmem:[#allocation108_spill] sm:$0xff] }
0x1753   :  { %5848 = vmatprep.subr.bf16.mxu0 %v12215_v13  ;;  %5889 = vmatprep.subr.bf16.mxu1 %v12216_v46 }
0x1756   :  { %5849 = vmatpush2.bf16.msra.mxu0 %v12217_v37  ;;  %5890 = vmatpush2.bf16.msra.mxu1 %v12218_v60 }
0x1757   :  { %5850 = vmatprep.subr.bf16.mxu0 %v12219_v27  ;;  %5891 = vmatprep.subr.bf16.mxu1 %v12220_v14  ;;  %v12227_v27 = vld [vmem:[#allocation181_spill] sm:$0xff]  ;;  %v12228_v14 = vld [vmem:[#allocation182_spill] sm:$0xff] }
0x175a   :  { %5851 = vmatpush2.bf16.msra.mxu0 %v12221_v53  ;;  %5892 = vmatpush2.bf16.msra.mxu1 %v12222_v6 }
0x175b   :  { %5902 = vmatprep.subr.bf16.mxu0 %v12223_v42  ;;  %5943 = vmatprep.subr.bf16.mxu1 %v12224_v10 }
0x179d   :  { %v5622_v15 = vpop.f32.mrf.mxu0  ;;  %v5663_v13 = vpop.f32.mrf.mxu1 }
0x179e   :  { %v5752_v46 = vadd.f32 %v5622_v15, %v12225_v3  ;;  %v5754_v37 = vadd.f32 %v5663_v13, %v12226_v34 }
0x179f   :  { %v5624_v16 = vpop.f32.mrf.mxu0  ;;  %v5665_v60 = vpop.f32.mrf.mxu1 }
0x17a0   :  { %v7446_v36 = vmul.f32 -1.442695, %v5752_v46  ;;  %v5753_v59 = vadd.f32 %v5624_v16, %v12227_v27  ;;  %v5755_v50 = vadd.f32 %v5665_v60, %v12228_v14 }
0x17a1   :  { %v5626_v53 = vpop.f32.mrf.mxu0  ;;  %v5667_v33 = vpop.f32.mrf.mxu1 }
0x17a2   :  { %8310 = vpow2.f32 %v7446_v36  ;;  %v7447_v6 = vmul.f32 -1.442695, %v5753_v59  ;;  %v7448_v10 = vmul.f32 -1.442695, %v5755_v50 }
0x17a3   :  { %v5627_v42 = vpop.f32.mrf.mxu0  ;;  %v5668_v28 = vpop.f32.mrf.mxu1 }
0x17a4   :  { %8312 = vpow2.f32 %v7447_v6  ;;  %v12230_v6 = vld [vmem:[#allocation109_spill] sm:$0xff] }
0x17a5   :  { %8314 = vtanh.f32 %v5754_v37  ;;  %v12232_v37 = vld [vmem:[#allocation215_spill] sm:$0xff] }
0x17a6   :  { %8316 = vpow2.f32 %v7448_v10 }
0x17af   :  { %v8311_v8 = vpop.eup %8310 }
0x17b0   :  { %v5759_v58 = vadd.f32 1.0, %v8311_v8 }
0x17b1   :  { %v8313_v3 = vpop.eup %8312 }
0x17b2   :  { %8318 = vrcp.f32 %v5759_v58  ;;  %v5765_v34 = vadd.f32 1.0, %v8313_v3  ;;  %v8315_v15 = vpop.eup %8314 }
0x17b3   :  { %v8317_v16 = vpop.eup %8316 }
0x17b4   :  { %8320 = vrcp.f32 %v5765_v34  ;;  %v5772_v33 = vadd.f32 1.0, %v8317_v16  ;;  %v12233_v34 = vld [vmem:[#allocation217_spill] sm:$0xff] }
0x17b6   :  { %8322 = vrcp.f32 %v5772_v33  ;;  %v12234_v33 = vld [vmem:[#allocation218_spill] sm:$0xff] }
0x17bf   :  { %v8319_v46 = vpop.eup %8318 }
0x17c0   :  { %v5776_v60 = vmul.f32 %v8319_v46, %v8315_v15 }
0x17c1   :  { %v8321_v53 = vpop.eup %8320 }
0x17c2   :  { %v5775_v59 = vmul.f32 %v8321_v53, %v10674_v61 }
0x17c3   :  { %v8323_v8 = vpop.eup %8322 }
0x17c4   :  { %v10832_v36 = vadd.f32 %v5776_v60, %v5775_v59 }
0x17c6   :  { %12229 = vst [vmem:[#allocation110_spill] sm:$0xff] %v10832_v36  ;;  %8324 = vtanh.f32 %v10832_v36 }
0x17d3   :  { %v8325_v28 = vpop.eup %8324 }
0x17d4   :  { %v5779_v50 = vmul.f32 %v8325_v28, %v8323_v8  ;;  %v12235_v8 = vld [vmem:[#allocation216_spill] sm:$0xff] }
0x17d6   :  { %v10836_v58 = vadd.f32 %v5779_v50, %v12230_v6 }
0x17d8   :  { %12231 = vst [vmem:[#allocation111_spill] sm:$0xff] %v10836_v58 }
0x17dd   :  { %v5704_v42 = vpop.f32.mrf.mxu0  ;;  %v5745_v10 = vpop.f32.mrf.mxu1 }
0x17de   :  { %v5780_v27 = vadd.f32 %v5704_v42, %v12232_v37  ;;  %v5782_v28 = vadd.f32 %v5745_v10, %v12235_v8  ;;  %v12241_v8 = vld [vmem:[#allocation154_spill] sm:$0xff] }
0x17df   :  { %v5706_v14 = vpop.f32.mrf.mxu0  ;;  %v5747_v13 = vpop.f32.mrf.mxu1 }
0x17e0   :  { %v7449_v3 = vmul.f32 -1.442695, %v5780_v27  ;;  %v5781_v61 = vadd.f32 %v5706_v14, %v12233_v34  ;;  %v5783_v59 = vadd.f32 %v5747_v13, %v12234_v33  ;;  %v12239_v33 = vld [vmem:[#allocation152_spill] sm:$0xff] }
0x17e1   :  { %v5708_v15 = vpop.f32.mrf.mxu0  ;;  %v5749_v16 = vpop.f32.mrf.mxu1 }
0x17e2   :  { %8326 = vpow2.f32 %v7449_v3  ;;  %v7450_v46 = vmul.f32 -1.442695, %v5781_v61  ;;  %v7451_v6 = vmul.f32 -1.442695, %v5783_v59  ;;  %v12240_v59 = vld [vmem:[#allocation153_spill] sm:$0xff] }
0x17e3   :  { %v5709_v60 = vpop.f32.mrf.mxu0  ;;  %v5750_v53 = vpop.f32.mrf.mxu1 }
0x17e4   :  { %8328 = vpow2.f32 %v7450_v46  ;;  %v10849_v53 = vpack.c.bf16 %v5779_v50, %v5779_v50  ;;  %v12238_v50 = vld [vmem:[#allocation151_spill] sm:$0xff] }
0x17e5   :  { %8330 = vtanh.f32 %v5782_v28  ;;  %v12242_v28 = vld [vmem:[#allocation155_spill] sm:$0xff] }
0x17e6   :  { %8332 = vpow2.f32 %v7451_v6  ;;  %v12243_v6 = vld [vmem:[#allocation156_spill] sm:$0xff] }
0x17ef   :  { %v8327_v58 = vpop.eup %8326 }
0x17f0   :  { %v5787_v36 = vadd.f32 1.0, %v8327_v58 }
0x17f1   :  { %v8329_v42 = vpop.eup %8328 }
0x17f2   :  { %8334 = vrcp.f32 %v5787_v36  ;;  %v5793_v37 = vadd.f32 1.0, %v8329_v42  ;;  %v8331_v27 = vpop.eup %8330  ;;  %v12244_v42 = vld [vmem:[#allocation157_spill] sm:$0xff] }
0x17f3   :  { %v8333_v14 = vpop.eup %8332 }
0x17f4   :  { %8336 = vrcp.f32 %v5793_v37  ;;  %v5800_v15 = vadd.f32 1.0, %v8333_v14  ;;  %v12245_v37 = vld [vmem:[#allocation158_spill] sm:$0xff]  ;;  %v12247_v14 = vld [vmem:[#allocation160_spill] sm:$0xff] }
0x17f6   :  { %8338 = vrcp.f32 %v5800_v15  ;;  %v12251_v15 = vld [vmem:[#allocation164_spill] sm:$0xff] }
0x17ff   :  { %v8335_v3 = vpop.eup %8334 }
0x1800   :  { %v5804_v34 = vmul.f32 %v8335_v3, %v8331_v27  ;;  %v12246_v27 = vld [vmem:[#allocation159_spill] sm:$0xff]  ;;  %v12248_v3 = vld [vmem:[#allocation161_spill] sm:$0xff] }
0x1801   :  { %v8337_v61 = vpop.eup %8336 }
0x1802   :  { %v5803_v16 = vmul.f32 %v8337_v61, %v10686_v17  ;;  %v12236_v17 = vld [vmem:[#allocation149_spill] sm:$0xff]  ;;  %v12250_v61 = vld [vmem:[#allocation163_spill] sm:$0xff] }
0x1803   :  { %v8339_v58 = vpop.eup %8338 }
0x1804   :  { %v10843_v13 = vadd.f32 %v5804_v34, %v5803_v16  ;;  %v12249_v34 = vld [vmem:[#allocation162_spill] sm:$0xff]  ;;  %v12252_v16 = vld [vmem:[#allocation165_spill] sm:$0xff] }
0x1806   :  { %8340 = vtanh.f32 %v10843_v13 }
0x1813   :  { %v8341_v10 = vpop.eup %8340 }
0x1814   :  { %v5807_v46 = vmul.f32 %v8341_v10, %v8339_v58  ;;  %v12253_v58 = vld [vmem:[#allocation166_spill] sm:$0xff]  ;;  %v12254_v10 = vld [vmem:[#allocation167_spill] sm:$0xff] }
0x1816   :  { %v10847_v36 = vadd.f32 %v5807_v46, %v10691_v12  ;;  %v5819_v60 = vpack.c.bf16 %v5807_v46, %v5807_v46  ;;  %v12237_v12 = vld [vmem:[#allocation150_spill] sm:$0xff]  ;;  %v12255_v46 = vld [vmem:[#allocation168_spill] sm:$0xff] }
0x1818   :  { %5852 = vmatprep.mubr.bf16.mxu0 %v5819_v60  ;;  %5893 = vmatprep.mubr.bf16.mxu1 %v5819_v60 }
0x1819   :  { %5853 = vmatmul.mubr.bf16.vlgmr.msra.gmra.mxu0 %v10849_v53  ;;  %5894 = vmatmul.mubr.bf16.vlgmr.msra.gmra.mxu1 %v10849_v53 }
0x181a   :  { %5903 = vmatpush1.bf16.msra.mxu0 %v11934_v25  ;;  %5944 = vmatpush1.bf16.msra.mxu1 %v11935_v29 }
0x181b   :  { %5934 = vmatprep.mubr.bf16.mxu0 %v5819_v60  ;;  %5975 = vmatprep.mubr.bf16.mxu1 %v5819_v60  ;;  %v12256_v60 = vld [vmem:[#allocation169_spill] sm:$0xff] }
0x181c   :  { %5904 = vmatprep.subr.bf16.mxu0 %v11936_v0  ;;  %5945 = vmatprep.subr.bf16.mxu1 %v11937_v31 }
0x181e   :  { %5905 = vmatpush1.bf16.msra.mxu0 %v11938_v38  ;;  %5946 = vmatpush1.bf16.msra.mxu1 %v11939_v63 }
0x181f   :  { %5906 = vmatprep.subr.bf16.mxu0 %v11940_v24  ;;  %5947 = vmatprep.subr.bf16.mxu1 %v11941_v54 }
0x1822   :  { %5907 = vmatpush1.bf16.msra.mxu0 %v11942_v2  ;;  %5948 = vmatpush1.bf16.msra.mxu1 %v11943_v39 }
0x1823   :  { %5908 = vmatprep.subr.bf16.mxu0 %v11944_v9  ;;  %5949 = vmatprep.subr.bf16.mxu1 %v11945_v44 }
0x1826   :  { %5909 = vmatpush1.bf16.msra.mxu0 %v11946_v30  ;;  %5950 = vmatpush1.bf16.msra.mxu1 %v11947_v48 }
0x1827   :  { %5910 = vmatprep.subr.bf16.mxu0 %v11948_v19  ;;  %5951 = vmatprep.subr.bf16.mxu1 %v11949_v7 }
0x182a   :  { %5911 = vmatpush1.bf16.msra.mxu0 %v11950_v55  ;;  %5952 = vmatpush1.bf16.msra.mxu1 %v12037_v35 }
0x182b   :  { %5912 = vmatprep.subr.bf16.mxu0 %v12038_v41  ;;  %5953 = vmatprep.subr.bf16.mxu1 %v12039_v45 }
0x182e   :  { %5913 = vmatpush1.bf16.msra.mxu0 %v12040_v26  ;;  %5954 = vmatpush1.bf16.msra.mxu1 %v12041_v21 }
0x182f   :  { %5914 = vmatprep.subr.bf16.mxu0 %v12042_v47  ;;  %5955 = vmatprep.subr.bf16.mxu1 %v12043_v11 }
0x1832   :  { %5915 = vmatpush1.bf16.msra.mxu0 %v12044_v57  ;;  %5956 = vmatpush1.bf16.msra.mxu1 %v12136_v56 }
0x1833   :  { %5916 = vmatprep.subr.bf16.mxu0 %v12046_v62  ;;  %5957 = vmatprep.subr.bf16.mxu1 %v12047_v43 }
0x1836   :  { %5917 = vmatpush1.bf16.msra.mxu0 %v12048_v51  ;;  %5958 = vmatpush1.bf16.msra.mxu1 %v12137_v23 }
0x1837   :  { %5918 = vmatprep.subr.bf16.mxu0 %v12138_v20  ;;  %5959 = vmatprep.subr.bf16.mxu1 %v12051_v52 }
0x183a   :  { %5919 = vmatpush2.bf16.msra.mxu0 %v12052_v4  ;;  %5960 = vmatpush2.bf16.msra.mxu1 %v12053_v32 }
0x183b   :  { %5920 = vmatprep.subr.bf16.mxu0 %v12054_v40  ;;  %5961 = vmatprep.subr.bf16.mxu1 %v12055_v1 }
0x183e   :  { %5921 = vmatpush2.bf16.msra.mxu0 %v12056_v49  ;;  %5962 = vmatpush2.bf16.msra.mxu1 %v11971_v5 }
0x183f   :  { %5922 = vmatprep.subr.bf16.mxu0 %v11972_v18  ;;  %5963 = vmatprep.subr.bf16.mxu1 %v11973_v22 }
0x1842   :  { %5923 = vmatpush2.bf16.msra.mxu0 %v12236_v17  ;;  %5964 = vmatpush2.bf16.msra.mxu1 %v12237_v12 }
0x1843   :  { %5924 = vmatprep.subr.bf16.mxu0 %v12238_v50  ;;  %5965 = vmatprep.subr.bf16.mxu1 %v12239_v33 }
0x1846   :  { %5925 = vmatpush2.bf16.msra.mxu0 %v12240_v59  ;;  %5966 = vmatpush2.bf16.msra.mxu1 %v12241_v8 }
0x1847   :  { %5926 = vmatprep.subr.bf16.mxu0 %v12242_v28  ;;  %5967 = vmatprep.subr.bf16.mxu1 %v12243_v6 }
0x184a   :  { %5927 = vmatpush2.bf16.msra.mxu0 %v12244_v42  ;;  %5968 = vmatpush2.bf16.msra.mxu1 %v12245_v37  ;;  %v12325_v37 = vld [vmem:[#allocation184_spill] sm:$0xff] }
0x184b   :  { %5928 = vmatprep.subr.bf16.mxu0 %v12246_v27  ;;  %5969 = vmatprep.subr.bf16.mxu1 %v12247_v14  ;;  %v12257_v27 = vld [vmem:[#allocation170_spill] sm:$0xff]  ;;  %v12258_v14 = vld [vmem:[#allocation43_spill] sm:$0xff] }
0x184e   :  { %5929 = vmatpush2.bf16.msra.mxu0 %v12248_v3  ;;  %5970 = vmatpush2.bf16.msra.mxu1 %v12249_v34  ;;  %v12259_v3 = vld [vmem:[#allocation44_spill] sm:$0xff]  ;;  %v12324_v34 = vld [vmem:[#allocation183_spill] sm:$0xff] }
0x184f   :  { %5930 = vmatprep.subr.bf16.mxu0 %v12250_v61  ;;  %5971 = vmatprep.subr.bf16.mxu1 %v12251_v15  ;;  %v12260_v15 = vld [vmem:[#allocation45_spill] sm:$0xff]  ;;  %v12269_v61 = vld [vmem:[#allocation54_spill] sm:$0xff] }
0x1852   :  { %5931 = vmatpush2.bf16.msra.mxu0 %v12252_v16  ;;  %5972 = vmatpush2.bf16.msra.mxu1 %v12253_v58  ;;  %v12261_v16 = vld [vmem:[#allocation46_spill] sm:$0xff]  ;;  %v12262_v58 = vld [vmem:[#allocation47_spill] sm:$0xff] }
0x1853   :  { %5932 = vmatprep.subr.bf16.mxu0 %v12254_v10  ;;  %5973 = vmatprep.subr.bf16.mxu1 %v12255_v46  ;;  %v12263_v10 = vld [vmem:[#allocation48_spill] sm:$0xff]  ;;  %v12264_v46 = vld [vmem:[#allocation49_spill] sm:$0xff] }
0x1856   :  { %5933 = vmatpush2.bf16.msra.mxu0 %v12256_v60  ;;  %5974 = vmatpush2.bf16.msra.mxu1 %v12257_v27  ;;  %v12265_v60 = vld [vmem:[#allocation50_spill] sm:$0xff]  ;;  %v12266_v27 = vld [vmem:[#allocation51_spill] sm:$0xff] }
0x1857   :  { %6052 = vmatprep.subr.bf16.mxu0 %v12258_v14  ;;  %6093 = vmatprep.subr.bf16.mxu1 %v12259_v3  ;;  %v12267_v14 = vld [vmem:[#allocation52_spill] sm:$0xff]  ;;  %v12268_v3 = vld [vmem:[#allocation53_spill] sm:$0xff] }
0x1859   :  { %5935 = vmatmul.mubr.bf16.vlgmr.msra.gmra.mxu0 %v10849_v53  ;;  %5976 = vmatmul.mubr.bf16.vlgmr.msra.gmra.mxu1 %v10849_v53  ;;  %v12270_v53 = vld [vmem:[#allocation55_spill] sm:$0xff] }
0x185a   :  { %6053 = vmatpush1.bf16.msra.mxu0 %v12260_v15  ;;  %6094 = vmatpush1.bf16.msra.mxu1 %v12261_v16  ;;  %v12271_v15 = vld [vmem:[#allocation56_spill] sm:$0xff]  ;;  %v12272_v16 = vld [vmem:[#allocation57_spill] sm:$0xff] }
0x185b   :  { %6054 = vmatprep.subr.bf16.mxu0 %v12262_v58  ;;  %6095 = vmatprep.subr.bf16.mxu1 %v12263_v10  ;;  %v12273_v58 = vld [vmem:[#allocation58_spill] sm:$0xff]  ;;  %v12274_v10 = vld [vmem:[#allocation59_spill] sm:$0xff] }
0x185e   :  { %6055 = vmatpush1.bf16.msra.mxu0 %v12264_v46  ;;  %6096 = vmatpush1.bf16.msra.mxu1 %v12265_v60  ;;  %v12275_v46 = vld [vmem:[#allocation60_spill] sm:$0xff]  ;;  %v12276_v60 = vld [vmem:[#allocation61_spill] sm:$0xff] }
0x185f   :  { %6056 = vmatprep.subr.bf16.mxu0 %v12266_v27  ;;  %6097 = vmatprep.subr.bf16.mxu1 %v12267_v14  ;;  %v12277_v27 = vld [vmem:[#allocation62_spill] sm:$0xff]  ;;  %v12278_v14 = vld [vmem:[#allocation63_spill] sm:$0xff] }
0x1862   :  { %6057 = vmatpush1.bf16.msra.mxu0 %v12268_v3  ;;  %6098 = vmatpush1.bf16.msra.mxu1 %v12269_v61  ;;  %v12279_v3 = vld [vmem:[#allocation64_spill] sm:$0xff]  ;;  %v12280_v61 = vld [vmem:[#allocation65_spill] sm:$0xff] }
0x1863   :  { %6058 = vmatprep.subr.bf16.mxu0 %v12270_v53  ;;  %6099 = vmatprep.subr.bf16.mxu1 %v12271_v15  ;;  %v12281_v53 = vld [vmem:[#allocation66_spill] sm:$0xff]  ;;  %v12282_v15 = vld [vmem:[#allocation67_spill] sm:$0xff] }
0x1866   :  { %6059 = vmatpush1.bf16.msra.mxu0 %v12272_v16  ;;  %6100 = vmatpush1.bf16.msra.mxu1 %v12273_v58  ;;  %v12283_v16 = vld [vmem:[#allocation68_spill] sm:$0xff]  ;;  %v12284_v58 = vld [vmem:[#allocation69_spill] sm:$0xff] }
0x1867   :  { %6060 = vmatprep.subr.bf16.mxu0 %v12274_v10  ;;  %6101 = vmatprep.subr.bf16.mxu1 %v12275_v46  ;;  %v12285_v10 = vld [vmem:[#allocation70_spill] sm:$0xff]  ;;  %v12286_v46 = vld [vmem:[#allocation71_spill] sm:$0xff] }
0x186a   :  { %6061 = vmatpush1.bf16.msra.mxu0 %v12276_v60  ;;  %6102 = vmatpush1.bf16.msra.mxu1 %v12277_v27  ;;  %v12287_v60 = vld [vmem:[#allocation72_spill] sm:$0xff]  ;;  %v12288_v27 = vld [vmem:[#allocation73_spill] sm:$0xff] }
0x186b   :  { %6062 = vmatprep.subr.bf16.mxu0 %v12278_v14  ;;  %6103 = vmatprep.subr.bf16.mxu1 %v12279_v3  ;;  %v12289_v14 = vld [vmem:[#allocation74_spill] sm:$0xff]  ;;  %v12290_v3 = vld [vmem:[#allocation75_spill] sm:$0xff] }
0x186e   :  { %6063 = vmatpush1.bf16.msra.mxu0 %v12280_v61  ;;  %6104 = vmatpush1.bf16.msra.mxu1 %v12281_v53  ;;  %v12291_v61 = vld [vmem:[#allocation76_spill] sm:$0xff]  ;;  %v12292_v53 = vld [vmem:[#allocation77_spill] sm:$0xff] }
0x186f   :  { %6064 = vmatprep.subr.bf16.mxu0 %v12282_v15  ;;  %6105 = vmatprep.subr.bf16.mxu1 %v12283_v16  ;;  %v12293_v15 = vld [vmem:[#allocation78_spill] sm:$0xff]  ;;  %v12294_v16 = vld [vmem:[#allocation79_spill] sm:$0xff] }
0x1872   :  { %6065 = vmatpush1.bf16.msra.mxu0 %v12284_v58  ;;  %6106 = vmatpush1.bf16.msra.mxu1 %v12285_v10  ;;  %v12295_v58 = vld [vmem:[#allocation80_spill] sm:$0xff]  ;;  %v12296_v10 = vld [vmem:[#allocation81_spill] sm:$0xff] }
0x1873   :  { %6066 = vmatprep.subr.bf16.mxu0 %v12286_v46  ;;  %6107 = vmatprep.subr.bf16.mxu1 %v12287_v60  ;;  %v12297_v46 = vld [vmem:[#allocation82_spill] sm:$0xff]  ;;  %v12298_v60 = vld [vmem:[#allocation83_spill] sm:$0xff] }
0x1876   :  { %6067 = vmatpush1.bf16.msra.mxu0 %v12288_v27  ;;  %6108 = vmatpush1.bf16.msra.mxu1 %v12289_v14  ;;  %v12299_v27 = vld [vmem:[#allocation84_spill] sm:$0xff]  ;;  %v12300_v14 = vld [vmem:[#allocation85_spill] sm:$0xff] }
0x1877   :  { %6068 = vmatprep.subr.bf16.mxu0 %v12290_v3  ;;  %6109 = vmatprep.subr.bf16.mxu1 %v12291_v61  ;;  %v12301_v3 = vld [vmem:[#allocation86_spill] sm:$0xff]  ;;  %v12302_v61 = vld [vmem:[#allocation87_spill] sm:$0xff] }
0x187a   :  { %6069 = vmatpush2.bf16.msra.mxu0 %v12292_v53  ;;  %6110 = vmatpush2.bf16.msra.mxu1 %v12293_v15  ;;  %v12303_v53 = vld [vmem:[#allocation88_spill] sm:$0xff]  ;;  %v12304_v15 = vld [vmem:[#allocation89_spill] sm:$0xff] }
0x187b   :  { %6070 = vmatprep.subr.bf16.mxu0 %v12294_v16  ;;  %6111 = vmatprep.subr.bf16.mxu1 %v12295_v58  ;;  %v12305_v16 = vld [vmem:[#allocation90_spill] sm:$0xff]  ;;  %v12306_v58 = vld [vmem:[#allocation91_spill] sm:$0xff] }
0x187e   :  { %6071 = vmatpush2.bf16.msra.mxu0 %v12296_v10  ;;  %6112 = vmatpush2.bf16.msra.mxu1 %v12297_v46  ;;  %v12307_v10 = vld [vmem:[#allocation92_spill] sm:$0xff]  ;;  %v12308_v46 = vld [vmem:[#allocation93_spill] sm:$0xff] }
0x187f   :  { %6072 = vmatprep.subr.bf16.mxu0 %v12298_v60  ;;  %6113 = vmatprep.subr.bf16.mxu1 %v12299_v27  ;;  %v12309_v60 = vld [vmem:[#allocation94_spill] sm:$0xff]  ;;  %v12310_v27 = vld [vmem:[#allocation95_spill] sm:$0xff] }
0x1882   :  { %6073 = vmatpush2.bf16.msra.mxu0 %v12300_v14  ;;  %6114 = vmatpush2.bf16.msra.mxu1 %v12301_v3  ;;  %v12311_v14 = vld [vmem:[#allocation96_spill] sm:$0xff]  ;;  %v12312_v3 = vld [vmem:[#allocation97_spill] sm:$0xff] }
0x1883   :  { %6074 = vmatprep.subr.bf16.mxu0 %v12302_v61  ;;  %6115 = vmatprep.subr.bf16.mxu1 %v12303_v53  ;;  %v12313_v61 = vld [vmem:[#allocation98_spill] sm:$0xff]  ;;  %v12314_v53 = vld [vmem:[#allocation99_spill] sm:$0xff] }
0x1886   :  { %6075 = vmatpush2.bf16.msra.mxu0 %v12304_v15  ;;  %6116 = vmatpush2.bf16.msra.mxu1 %v12305_v16  ;;  %v12315_v15 = vld [vmem:[#allocation100_spill] sm:$0xff]  ;;  %v12316_v16 = vld [vmem:[#allocation101_spill] sm:$0xff] }
0x1887   :  { %6076 = vmatprep.subr.bf16.mxu0 %v12306_v58  ;;  %6117 = vmatprep.subr.bf16.mxu1 %v12307_v10  ;;  %v12317_v58 = vld [vmem:[#allocation102_spill] sm:$0xff]  ;;  %v12318_v10 = vld [vmem:[#allocation103_spill] sm:$0xff] }
0x188a   :  { %6077 = vmatpush2.bf16.msra.mxu0 %v12308_v46  ;;  %6118 = vmatpush2.bf16.msra.mxu1 %v12309_v60  ;;  %v12319_v46 = vld [vmem:[#allocation104_spill] sm:$0xff]  ;;  %v12320_v60 = vld [vmem:[#allocation105_spill] sm:$0xff] }
0x188b   :  { %6078 = vmatprep.subr.bf16.mxu0 %v12310_v27  ;;  %6119 = vmatprep.subr.bf16.mxu1 %v12311_v14  ;;  %v12321_v27 = vld [vmem:[#allocation106_spill] sm:$0xff]  ;;  %v12322_v14 = vld [vmem:[#allocation107_spill] sm:$0xff] }
0x188e   :  { %6079 = vmatpush2.bf16.msra.mxu0 %v12312_v3  ;;  %6120 = vmatpush2.bf16.msra.mxu1 %v12313_v61  ;;  %v12323_v3 = vld [vmem:[#allocation108_spill] sm:$0xff] }
0x188f   :  { %6080 = vmatprep.subr.bf16.mxu0 %v12314_v53  ;;  %6121 = vmatprep.subr.bf16.mxu1 %v12315_v15 }
0x1892   :  { %6081 = vmatpush2.bf16.msra.mxu0 %v12316_v16  ;;  %6122 = vmatpush2.bf16.msra.mxu1 %v12317_v58 }
0x1893   :  { %6082 = vmatprep.subr.bf16.mxu0 %v12318_v10  ;;  %6123 = vmatprep.subr.bf16.mxu1 %v12319_v46  ;;  %v12326_v10 = vld [vmem:[#allocation185_spill] sm:$0xff]  ;;  %v12327_v46 = vld [vmem:[#allocation186_spill] sm:$0xff] }
0x1896   :  { %6083 = vmatpush2.bf16.msra.mxu0 %v12320_v60  ;;  %6124 = vmatpush2.bf16.msra.mxu1 %v12321_v27 }
0x1897   :  { %6134 = vmatprep.subr.bf16.mxu0 %v12322_v14  ;;  %6175 = vmatprep.subr.bf16.mxu1 %v12323_v3 }
0x18d9   :  { %v5854_v61 = vpop.f32.mrf.mxu0  ;;  %v5895_v53 = vpop.f32.mrf.mxu1 }
0x18da   :  { %v5984_v15 = vadd.f32 %v5854_v61, %v12324_v34  ;;  %v5986_v16 = vadd.f32 %v5895_v53, %v12325_v37 }
0x18db   :  { %v5856_v42 = vpop.f32.mrf.mxu0  ;;  %v5897_v58 = vpop.f32.mrf.mxu1 }
0x18dc   :  { %v7452_v6 = vmul.f32 -1.442695, %v5984_v15  ;;  %v5985_v28 = vadd.f32 %v5856_v42, %v12326_v10  ;;  %v5987_v8 = vadd.f32 %v5897_v58, %v12327_v46  ;;  %v12332_v46 = vld [vmem:[#allocation211_spill] sm:$0xff] }
0x18dd   :  { %v5858_v60 = vpop.f32.mrf.mxu0  ;;  %v5899_v59 = vpop.f32.mrf.mxu1 }
0x18de   :  { %8342 = vpow2.f32 %v7452_v6  ;;  %v7453_v27 = vmul.f32 -1.442695, %v5985_v28  ;;  %v7454_v3 = vmul.f32 -1.442695, %v5987_v8  ;;  %v12328_v6 = vld [vmem:[#allocation110_spill] sm:$0xff] }
0x18df   :  { %v5859_v14 = vpop.f32.mrf.mxu0  ;;  %v5900_v33 = vpop.f32.mrf.mxu1 }
0x18e0   :  { %8344 = vpow2.f32 %v7453_v27  ;;  %v12330_v27 = vld [vmem:[#allocation111_spill] sm:$0xff] }
0x18e1   :  { %8346 = vtanh.f32 %v5986_v16 }
0x18e2   :  { %8348 = vpow2.f32 %v7454_v3 }
0x18eb   :  { %v8343_v50 = vpop.eup %8342 }
0x18ec   :  { %v5991_v12 = vadd.f32 1.0, %v8343_v50 }
0x18ed   :  { %v8345_v34 = vpop.eup %8344 }
0x18ee   :  { %8350 = vrcp.f32 %v5991_v12  ;;  %v5997_v37 = vadd.f32 1.0, %v8345_v34  ;;  %v8347_v61 = vpop.eup %8346 }
0x18ef   :  { %v8349_v42 = vpop.eup %8348 }
0x18f0   :  { %8352 = vrcp.f32 %v5997_v37  ;;  %v6004_v59 = vadd.f32 1.0, %v8349_v42 }
0x18f2   :  { %8354 = vrcp.f32 %v6004_v59 }
0x18fb   :  { %v8351_v15 = vpop.eup %8350 }
0x18fc   :  { %v6008_v58 = vmul.f32 %v8351_v15, %v8347_v61  ;;  %v12333_v61 = vld [vmem:[#allocation213_spill] sm:$0xff] }
0x18fd   :  { %v8353_v10 = vpop.eup %8352 }
0x18fe   :  { %v6007_v28 = vmul.f32 %v8353_v10, %v12328_v6 }
0x18ff   :  { %v8355_v50 = vpop.eup %8354 }
0x1900   :  { %v10988_v14 = vadd.f32 %v6008_v58, %v6007_v28  ;;  %v12334_v28 = vld [vmem:[#allocation214_spill] sm:$0xff] }
0x1902   :  { %12329 = vst [vmem:[#allocation112_spill] sm:$0xff] %v10988_v14  ;;  %8356 = vtanh.f32 %v10988_v14 }
0x190f   :  { %v8357_v33 = vpop.eup %8356 }
0x1910   :  { %v6011_v8 = vmul.f32 %v8357_v33, %v8355_v50  ;;  %v12335_v33 = vld [vmem:[#allocation212_spill] sm:$0xff] }
0x1912   :  { %v10992_v12 = vadd.f32 %v6011_v8, %v12330_v27 }
0x1914   :  { %12331 = vst [vmem:[#allocation113_spill] sm:$0xff] %v10992_v12 }
0x1919   :  { %v5936_v3 = vpop.f32.mrf.mxu0  ;;  %v5977_v16 = vpop.f32.mrf.mxu1 }
0x191a   :  { %v6012_v60 = vadd.f32 %v5936_v3, %v12332_v46  ;;  %v6014_v27 = vadd.f32 %v5977_v16, %v12335_v33  ;;  %v12342_v33 = vld [vmem:[#allocation155_spill] sm:$0xff] }
0x191b   :  { %v5938_v53 = vpop.f32.mrf.mxu0  ;;  %v5979_v34 = vpop.f32.mrf.mxu1 }
0x191c   :  { %v7455_v37 = vmul.f32 -1.442695, %v6012_v60  ;;  %v6013_v42 = vadd.f32 %v5938_v53, %v12333_v61  ;;  %v6015_v50 = vadd.f32 %v5979_v34, %v12334_v28  ;;  %v12340_v28 = vld [vmem:[#allocation153_spill] sm:$0xff] }
0x191d   :  { %v5940_v15 = vpop.f32.mrf.mxu0  ;;  %v5981_v58 = vpop.f32.mrf.mxu1 }
0x191e   :  { %8358 = vpow2.f32 %v7455_v37  ;;  %v7456_v10 = vmul.f32 -1.442695, %v6013_v42  ;;  %v7457_v12 = vmul.f32 -1.442695, %v6015_v50  ;;  %v12341_v50 = vld [vmem:[#allocation154_spill] sm:$0xff] }
0x191f   :  { %v5941_v59 = vpop.f32.mrf.mxu0  ;;  %v5982_v6 = vpop.f32.mrf.mxu1 }
0x1920   :  { %8360 = vpow2.f32 %v7456_v10  ;;  %v11005_v59 = vpack.c.bf16 %v6011_v8, %v6011_v8  ;;  %v12338_v8 = vld [vmem:[#allocation151_spill] sm:$0xff]  ;;  %v12339_v6 = vld [vmem:[#allocation152_spill] sm:$0xff] }
0x1921   :  { %8362 = vtanh.f32 %v6014_v27  ;;  %v12343_v27 = vld [vmem:[#allocation156_spill] sm:$0xff] }
0x1922   :  { %8364 = vpow2.f32 %v7457_v12 }
0x192b   :  { %v8359_v14 = vpop.eup %8358 }
0x192c   :  { %v6019_v17 = vadd.f32 1.0, %v8359_v14 }
0x192d   :  { %v8361_v3 = vpop.eup %8360 }
0x192e   :  { %8366 = vrcp.f32 %v6019_v17  ;;  %v6025_v46 = vadd.f32 1.0, %v8361_v3  ;;  %v8363_v60 = vpop.eup %8362  ;;  %v12344_v3 = vld [vmem:[#allocation157_spill] sm:$0xff] }
0x192f   :  { %v8365_v53 = vpop.eup %8364 }
0x1930   :  { %8368 = vrcp.f32 %v6025_v46  ;;  %v6032_v15 = vadd.f32 1.0, %v8365_v53  ;;  %v12345_v46 = vld [vmem:[#allocation158_spill] sm:$0xff]  ;;  %v12347_v53 = vld [vmem:[#allocation160_spill] sm:$0xff] }
0x1932   :  { %8370 = vrcp.f32 %v6032_v15  ;;  %v12351_v15 = vld [vmem:[#allocation164_spill] sm:$0xff] }
0x193b   :  { %v8367_v37 = vpop.eup %8366 }
0x193c   :  { %v6036_v61 = vmul.f32 %v8367_v37, %v8363_v60  ;;  %v12346_v60 = vld [vmem:[#allocation159_spill] sm:$0xff]  ;;  %v12348_v37 = vld [vmem:[#allocation161_spill] sm:$0xff] }
0x193d   :  { %v8369_v42 = vpop.eup %8368 }
0x193e   :  { %v6035_v58 = vmul.f32 %v8369_v42, %v10843_v13  ;;  %v12336_v13 = vld [vmem:[#allocation149_spill] sm:$0xff]  ;;  %v12350_v42 = vld [vmem:[#allocation163_spill] sm:$0xff] }
0x193f   :  { %v8371_v14 = vpop.eup %8370 }
0x1940   :  { %v10999_v34 = vadd.f32 %v6036_v61, %v6035_v58  ;;  %v12349_v61 = vld [vmem:[#allocation162_spill] sm:$0xff]  ;;  %v12352_v58 = vld [vmem:[#allocation165_spill] sm:$0xff] }
0x1942   :  { %8372 = vtanh.f32 %v10999_v34 }
0x194f   :  { %v8373_v16 = vpop.eup %8372 }
0x1950   :  { %v6039_v10 = vmul.f32 %v8373_v16, %v8371_v14  ;;  %v12353_v14 = vld [vmem:[#allocation166_spill] sm:$0xff]  ;;  %v12354_v16 = vld [vmem:[#allocation167_spill] sm:$0xff] }
0x1952   :  { %v6051_v12 = vpack.c.bf16 %v6039_v10, %v6039_v10  ;;  %v11003_v17 = vadd.f32 %v6039_v10, %v10847_v36  ;;  %v12337_v36 = vld [vmem:[#allocation150_spill] sm:$0xff]  ;;  %v12355_v10 = vld [vmem:[#allocation168_spill] sm:$0xff] }
0x1954   :  { %6084 = vmatprep.mubr.bf16.mxu0 %v6051_v12  ;;  %6125 = vmatprep.mubr.bf16.mxu1 %v6051_v12 }
0x1955   :  { %6085 = vmatmul.mubr.bf16.vlgmr.msra.gmra.mxu0 %v11005_v59  ;;  %6126 = vmatmul.mubr.bf16.vlgmr.msra.gmra.mxu1 %v11005_v59 }
0x1956   :  { %6135 = vmatpush1.bf16.msra.mxu0 %v11934_v25  ;;  %6176 = vmatpush1.bf16.msra.mxu1 %v11935_v29 }
0x1957   :  { %6166 = vmatprep.mubr.bf16.mxu0 %v6051_v12  ;;  %6207 = vmatprep.mubr.bf16.mxu1 %v6051_v12  ;;  %v12356_v12 = vld [vmem:[#allocation169_spill] sm:$0xff] }
0x1958   :  { %6136 = vmatprep.subr.bf16.mxu0 %v11936_v0  ;;  %6177 = vmatprep.subr.bf16.mxu1 %v11937_v31 }
0x195a   :  { %6137 = vmatpush1.bf16.msra.mxu0 %v11938_v38  ;;  %6178 = vmatpush1.bf16.msra.mxu1 %v11939_v63 }
0x195b   :  { %6138 = vmatprep.subr.bf16.mxu0 %v11940_v24  ;;  %6179 = vmatprep.subr.bf16.mxu1 %v11941_v54 }
0x195e   :  { %6139 = vmatpush1.bf16.msra.mxu0 %v11942_v2  ;;  %6180 = vmatpush1.bf16.msra.mxu1 %v11943_v39 }
0x195f   :  { %6140 = vmatprep.subr.bf16.mxu0 %v11944_v9  ;;  %6181 = vmatprep.subr.bf16.mxu1 %v11945_v44 }
0x1962   :  { %6141 = vmatpush1.bf16.msra.mxu0 %v11946_v30  ;;  %6182 = vmatpush1.bf16.msra.mxu1 %v11947_v48 }
0x1963   :  { %6142 = vmatprep.subr.bf16.mxu0 %v11948_v19  ;;  %6183 = vmatprep.subr.bf16.mxu1 %v11949_v7 }
0x1966   :  { %6143 = vmatpush1.bf16.msra.mxu0 %v11950_v55  ;;  %6184 = vmatpush1.bf16.msra.mxu1 %v12037_v35 }
0x1967   :  { %6144 = vmatprep.subr.bf16.mxu0 %v12038_v41  ;;  %6185 = vmatprep.subr.bf16.mxu1 %v12039_v45 }
0x196a   :  { %6145 = vmatpush1.bf16.msra.mxu0 %v12040_v26  ;;  %6186 = vmatpush1.bf16.msra.mxu1 %v12041_v21 }
0x196b   :  { %6146 = vmatprep.subr.bf16.mxu0 %v12042_v47  ;;  %6187 = vmatprep.subr.bf16.mxu1 %v12043_v11 }
0x196e   :  { %6147 = vmatpush1.bf16.msra.mxu0 %v12044_v57  ;;  %6188 = vmatpush1.bf16.msra.mxu1 %v12136_v56 }
0x196f   :  { %6148 = vmatprep.subr.bf16.mxu0 %v12046_v62  ;;  %6189 = vmatprep.subr.bf16.mxu1 %v12047_v43 }
0x1972   :  { %6149 = vmatpush1.bf16.msra.mxu0 %v12048_v51  ;;  %6190 = vmatpush1.bf16.msra.mxu1 %v12137_v23 }
0x1973   :  { %6150 = vmatprep.subr.bf16.mxu0 %v12138_v20  ;;  %6191 = vmatprep.subr.bf16.mxu1 %v12051_v52 }
0x1976   :  { %6151 = vmatpush2.bf16.msra.mxu0 %v12052_v4  ;;  %6192 = vmatpush2.bf16.msra.mxu1 %v12053_v32 }
0x1977   :  { %6152 = vmatprep.subr.bf16.mxu0 %v12054_v40  ;;  %6193 = vmatprep.subr.bf16.mxu1 %v12055_v1 }
0x197a   :  { %6153 = vmatpush2.bf16.msra.mxu0 %v12056_v49  ;;  %6194 = vmatpush2.bf16.msra.mxu1 %v11971_v5 }
0x197b   :  { %6154 = vmatprep.subr.bf16.mxu0 %v11972_v18  ;;  %6195 = vmatprep.subr.bf16.mxu1 %v11973_v22 }
0x197e   :  { %6155 = vmatpush2.bf16.msra.mxu0 %v12336_v13  ;;  %6196 = vmatpush2.bf16.msra.mxu1 %v12337_v36 }
0x197f   :  { %6156 = vmatprep.subr.bf16.mxu0 %v12338_v8  ;;  %6197 = vmatprep.subr.bf16.mxu1 %v12339_v6 }
0x1982   :  { %6157 = vmatpush2.bf16.msra.mxu0 %v12340_v28  ;;  %6198 = vmatpush2.bf16.msra.mxu1 %v12341_v50 }
0x1983   :  { %6158 = vmatprep.subr.bf16.mxu0 %v12342_v33  ;;  %6199 = vmatprep.subr.bf16.mxu1 %v12343_v27 }
0x1986   :  { %6159 = vmatpush2.bf16.msra.mxu0 %v12344_v3  ;;  %6200 = vmatpush2.bf16.msra.mxu1 %v12345_v46  ;;  %v12425_v46 = vld [vmem:[#allocation188_spill] sm:$0xff] }
0x1987   :  { %6160 = vmatprep.subr.bf16.mxu0 %v12346_v60  ;;  %6201 = vmatprep.subr.bf16.mxu1 %v12347_v53  ;;  %v12357_v60 = vld [vmem:[#allocation170_spill] sm:$0xff]  ;;  %v12358_v53 = vld [vmem:[#allocation43_spill] sm:$0xff] }
0x198a   :  { %6161 = vmatpush2.bf16.msra.mxu0 %v12348_v37  ;;  %6202 = vmatpush2.bf16.msra.mxu1 %v12349_v61  ;;  %v12359_v37 = vld [vmem:[#allocation44_spill] sm:$0xff]  ;;  %v12424_v61 = vld [vmem:[#allocation187_spill] sm:$0xff] }
0x198b   :  { %6162 = vmatprep.subr.bf16.mxu0 %v12350_v42  ;;  %6203 = vmatprep.subr.bf16.mxu1 %v12351_v15  ;;  %v12360_v15 = vld [vmem:[#allocation45_spill] sm:$0xff]  ;;  %v12369_v42 = vld [vmem:[#allocation54_spill] sm:$0xff] }
0x198e   :  { %6163 = vmatpush2.bf16.msra.mxu0 %v12352_v58  ;;  %6204 = vmatpush2.bf16.msra.mxu1 %v12353_v14  ;;  %v12361_v58 = vld [vmem:[#allocation46_spill] sm:$0xff]  ;;  %v12362_v14 = vld [vmem:[#allocation47_spill] sm:$0xff] }
0x198f   :  { %6164 = vmatprep.subr.bf16.mxu0 %v12354_v16  ;;  %6205 = vmatprep.subr.bf16.mxu1 %v12355_v10  ;;  %v12363_v16 = vld [vmem:[#allocation48_spill] sm:$0xff]  ;;  %v12364_v10 = vld [vmem:[#allocation49_spill] sm:$0xff] }
0x1992   :  { %6165 = vmatpush2.bf16.msra.mxu0 %v12356_v12  ;;  %6206 = vmatpush2.bf16.msra.mxu1 %v12357_v60  ;;  %v12365_v12 = vld [vmem:[#allocation50_spill] sm:$0xff]  ;;  %v12366_v60 = vld [vmem:[#allocation51_spill] sm:$0xff] }
0x1993   :  { %6284 = vmatprep.subr.bf16.mxu0 %v12358_v53  ;;  %6325 = vmatprep.subr.bf16.mxu1 %v12359_v37  ;;  %v12367_v53 = vld [vmem:[#allocation52_spill] sm:$0xff]  ;;  %v12368_v37 = vld [vmem:[#allocation53_spill] sm:$0xff] }
0x1995   :  { %6167 = vmatmul.mubr.bf16.vlgmr.msra.gmra.mxu0 %v11005_v59  ;;  %6208 = vmatmul.mubr.bf16.vlgmr.msra.gmra.mxu1 %v11005_v59  ;;  %v12370_v59 = vld [vmem:[#allocation55_spill] sm:$0xff] }
0x1996   :  { %6285 = vmatpush1.bf16.msra.mxu0 %v12360_v15  ;;  %6326 = vmatpush1.bf16.msra.mxu1 %v12361_v58  ;;  %v12371_v15 = vld [vmem:[#allocation56_spill] sm:$0xff]  ;;  %v12372_v58 = vld [vmem:[#allocation57_spill] sm:$0xff] }
0x1997   :  { %6286 = vmatprep.subr.bf16.mxu0 %v12362_v14  ;;  %6327 = vmatprep.subr.bf16.mxu1 %v12363_v16  ;;  %v12373_v14 = vld [vmem:[#allocation58_spill] sm:$0xff]  ;;  %v12374_v16 = vld [vmem:[#allocation59_spill] sm:$0xff] }
0x199a   :  { %6287 = vmatpush1.bf16.msra.mxu0 %v12364_v10  ;;  %6328 = vmatpush1.bf16.msra.mxu1 %v12365_v12  ;;  %v12375_v10 = vld [vmem:[#allocation60_spill] sm:$0xff]  ;;  %v12376_v12 = vld [vmem:[#allocation61_spill] sm:$0xff] }
0x199b   :  { %6288 = vmatprep.subr.bf16.mxu0 %v12366_v60  ;;  %6329 = vmatprep.subr.bf16.mxu1 %v12367_v53  ;;  %v12377_v60 = vld [vmem:[#allocation62_spill] sm:$0xff]  ;;  %v12378_v53 = vld [vmem:[#allocation63_spill] sm:$0xff] }
0x199e   :  { %6289 = vmatpush1.bf16.msra.mxu0 %v12368_v37  ;;  %6330 = vmatpush1.bf16.msra.mxu1 %v12369_v42  ;;  %v12379_v37 = vld [vmem:[#allocation64_spill] sm:$0xff]  ;;  %v12380_v42 = vld [vmem:[#allocation65_spill] sm:$0xff] }
0x199f   :  { %6290 = vmatprep.subr.bf16.mxu0 %v12370_v59  ;;  %6331 = vmatprep.subr.bf16.mxu1 %v12371_v15  ;;  %v12381_v59 = vld [vmem:[#allocation66_spill] sm:$0xff]  ;;  %v12382_v15 = vld [vmem:[#allocation67_spill] sm:$0xff] }
0x19a2   :  { %6291 = vmatpush1.bf16.msra.mxu0 %v12372_v58  ;;  %6332 = vmatpush1.bf16.msra.mxu1 %v12373_v14  ;;  %v12383_v58 = vld [vmem:[#allocation68_spill] sm:$0xff]  ;;  %v12384_v14 = vld [vmem:[#allocation69_spill] sm:$0xff] }
0x19a3   :  { %6292 = vmatprep.subr.bf16.mxu0 %v12374_v16  ;;  %6333 = vmatprep.subr.bf16.mxu1 %v12375_v10  ;;  %v12385_v16 = vld [vmem:[#allocation70_spill] sm:$0xff]  ;;  %v12386_v10 = vld [vmem:[#allocation71_spill] sm:$0xff] }
0x19a6   :  { %6293 = vmatpush1.bf16.msra.mxu0 %v12376_v12  ;;  %6334 = vmatpush1.bf16.msra.mxu1 %v12377_v60  ;;  %v12387_v12 = vld [vmem:[#allocation72_spill] sm:$0xff]  ;;  %v12388_v60 = vld [vmem:[#allocation73_spill] sm:$0xff] }
0x19a7   :  { %6294 = vmatprep.subr.bf16.mxu0 %v12378_v53  ;;  %6335 = vmatprep.subr.bf16.mxu1 %v12379_v37  ;;  %v12389_v53 = vld [vmem:[#allocation74_spill] sm:$0xff]  ;;  %v12390_v37 = vld [vmem:[#allocation75_spill] sm:$0xff] }
0x19aa   :  { %6295 = vmatpush1.bf16.msra.mxu0 %v12380_v42  ;;  %6336 = vmatpush1.bf16.msra.mxu1 %v12381_v59  ;;  %v12391_v42 = vld [vmem:[#allocation76_spill] sm:$0xff]  ;;  %v12392_v59 = vld [vmem:[#allocation77_spill] sm:$0xff] }
0x19ab   :  { %6296 = vmatprep.subr.bf16.mxu0 %v12382_v15  ;;  %6337 = vmatprep.subr.bf16.mxu1 %v12383_v58  ;;  %v12393_v15 = vld [vmem:[#allocation78_spill] sm:$0xff]  ;;  %v12394_v58 = vld [vmem:[#allocation79_spill] sm:$0xff] }
0x19ae   :  { %6297 = vmatpush1.bf16.msra.mxu0 %v12384_v14  ;;  %6338 = vmatpush1.bf16.msra.mxu1 %v12385_v16  ;;  %v12395_v14 = vld [vmem:[#allocation80_spill] sm:$0xff]  ;;  %v12396_v16 = vld [vmem:[#allocation81_spill] sm:$0xff] }
0x19af   :  { %6298 = vmatprep.subr.bf16.mxu0 %v12386_v10  ;;  %6339 = vmatprep.subr.bf16.mxu1 %v12387_v12  ;;  %v12397_v10 = vld [vmem:[#allocation82_spill] sm:$0xff]  ;;  %v12398_v12 = vld [vmem:[#allocation83_spill] sm:$0xff] }
0x19b2   :  { %6299 = vmatpush1.bf16.msra.mxu0 %v12388_v60  ;;  %6340 = vmatpush1.bf16.msra.mxu1 %v12389_v53  ;;  %v12399_v60 = vld [vmem:[#allocation84_spill] sm:$0xff]  ;;  %v12400_v53 = vld [vmem:[#allocation85_spill] sm:$0xff] }
0x19b3   :  { %6300 = vmatprep.subr.bf16.mxu0 %v12390_v37  ;;  %6341 = vmatprep.subr.bf16.mxu1 %v12391_v42  ;;  %v12401_v37 = vld [vmem:[#allocation86_spill] sm:$0xff]  ;;  %v12402_v42 = vld [vmem:[#allocation87_spill] sm:$0xff] }
0x19b6   :  { %6301 = vmatpush2.bf16.msra.mxu0 %v12392_v59  ;;  %6342 = vmatpush2.bf16.msra.mxu1 %v12393_v15  ;;  %v12403_v59 = vld [vmem:[#allocation88_spill] sm:$0xff]  ;;  %v12404_v15 = vld [vmem:[#allocation89_spill] sm:$0xff] }
0x19b7   :  { %6302 = vmatprep.subr.bf16.mxu0 %v12394_v58  ;;  %6343 = vmatprep.subr.bf16.mxu1 %v12395_v14  ;;  %v12405_v58 = vld [vmem:[#allocation90_spill] sm:$0xff]  ;;  %v12406_v14 = vld [vmem:[#allocation91_spill] sm:$0xff] }
0x19ba   :  { %6303 = vmatpush2.bf16.msra.mxu0 %v12396_v16  ;;  %6344 = vmatpush2.bf16.msra.mxu1 %v12397_v10  ;;  %v12407_v16 = vld [vmem:[#allocation92_spill] sm:$0xff]  ;;  %v12408_v10 = vld [vmem:[#allocation93_spill] sm:$0xff] }
0x19bb   :  { %6304 = vmatprep.subr.bf16.mxu0 %v12398_v12  ;;  %6345 = vmatprep.subr.bf16.mxu1 %v12399_v60  ;;  %v12409_v12 = vld [vmem:[#allocation94_spill] sm:$0xff]  ;;  %v12410_v60 = vld [vmem:[#allocation95_spill] sm:$0xff] }
0x19be   :  { %6305 = vmatpush2.bf16.msra.mxu0 %v12400_v53  ;;  %6346 = vmatpush2.bf16.msra.mxu1 %v12401_v37  ;;  %v12411_v53 = vld [vmem:[#allocation96_spill] sm:$0xff]  ;;  %v12412_v37 = vld [vmem:[#allocation97_spill] sm:$0xff] }
0x19bf   :  { %6306 = vmatprep.subr.bf16.mxu0 %v12402_v42  ;;  %6347 = vmatprep.subr.bf16.mxu1 %v12403_v59  ;;  %v12413_v42 = vld [vmem:[#allocation98_spill] sm:$0xff]  ;;  %v12414_v59 = vld [vmem:[#allocation99_spill] sm:$0xff] }
0x19c2   :  { %6307 = vmatpush2.bf16.msra.mxu0 %v12404_v15  ;;  %6348 = vmatpush2.bf16.msra.mxu1 %v12405_v58  ;;  %v12415_v15 = vld [vmem:[#allocation100_spill] sm:$0xff]  ;;  %v12416_v58 = vld [vmem:[#allocation101_spill] sm:$0xff] }
0x19c3   :  { %6308 = vmatprep.subr.bf16.mxu0 %v12406_v14  ;;  %6349 = vmatprep.subr.bf16.mxu1 %v12407_v16  ;;  %v12417_v14 = vld [vmem:[#allocation102_spill] sm:$0xff]  ;;  %v12418_v16 = vld [vmem:[#allocation103_spill] sm:$0xff] }
0x19c6   :  { %6309 = vmatpush2.bf16.msra.mxu0 %v12408_v10  ;;  %6350 = vmatpush2.bf16.msra.mxu1 %v12409_v12  ;;  %v12419_v10 = vld [vmem:[#allocation104_spill] sm:$0xff]  ;;  %v12420_v12 = vld [vmem:[#allocation105_spill] sm:$0xff] }
0x19c7   :  { %6310 = vmatprep.subr.bf16.mxu0 %v12410_v60  ;;  %6351 = vmatprep.subr.bf16.mxu1 %v12411_v53  ;;  %v12421_v60 = vld [vmem:[#allocation106_spill] sm:$0xff]  ;;  %v12422_v53 = vld [vmem:[#allocation107_spill] sm:$0xff] }
0x19ca   :  { %6311 = vmatpush2.bf16.msra.mxu0 %v12412_v37  ;;  %6352 = vmatpush2.bf16.msra.mxu1 %v12413_v42  ;;  %v12423_v37 = vld [vmem:[#allocation108_spill] sm:$0xff] }
0x19cb   :  { %6312 = vmatprep.subr.bf16.mxu0 %v12414_v59  ;;  %6353 = vmatprep.subr.bf16.mxu1 %v12415_v15 }
0x19ce   :  { %6313 = vmatpush2.bf16.msra.mxu0 %v12416_v58  ;;  %6354 = vmatpush2.bf16.msra.mxu1 %v12417_v14 }
0x19cf   :  { %6314 = vmatprep.subr.bf16.mxu0 %v12418_v16  ;;  %6355 = vmatprep.subr.bf16.mxu1 %v12419_v10  ;;  %v12426_v16 = vld [vmem:[#allocation189_spill] sm:$0xff]  ;;  %v12427_v10 = vld [vmem:[#allocation190_spill] sm:$0xff] }
0x19d2   :  { %6315 = vmatpush2.bf16.msra.mxu0 %v12420_v12  ;;  %6356 = vmatpush2.bf16.msra.mxu1 %v12421_v60 }
0x19d3   :  { %6366 = vmatprep.subr.bf16.mxu0 %v12422_v53  ;;  %6407 = vmatprep.subr.bf16.mxu1 %v12423_v37 }
0x1a15   :  { %v6086_v42 = vpop.f32.mrf.mxu0  ;;  %v6127_v59 = vpop.f32.mrf.mxu1 }
0x1a16   :  { %v6216_v15 = vadd.f32 %v6086_v42, %v12424_v61  ;;  %v6218_v58 = vadd.f32 %v6127_v59, %v12425_v46 }
0x1a17   :  { %v6088_v3 = vpop.f32.mrf.mxu0  ;;  %v6129_v14 = vpop.f32.mrf.mxu1 }
0x1a18   :  { %v7458_v27 = vmul.f32 -1.442695, %v6216_v15  ;;  %v6217_v33 = vadd.f32 %v6088_v3, %v12426_v16  ;;  %v6219_v50 = vadd.f32 %v6129_v14, %v12427_v10  ;;  %v12432_v10 = vld [vmem:[#allocation207_spill] sm:$0xff] }
0x1a19   :  { %v6090_v12 = vpop.f32.mrf.mxu0  ;;  %v6131_v28 = vpop.f32.mrf.mxu1 }
0x1a1a   :  { %8374 = vpow2.f32 %v7458_v27  ;;  %v7459_v60 = vmul.f32 -1.442695, %v6217_v33  ;;  %v7460_v37 = vmul.f32 -1.442695, %v6219_v50  ;;  %v12428_v27 = vld [vmem:[#allocation112_spill] sm:$0xff] }
0x1a1b   :  { %v6091_v53 = vpop.f32.mrf.mxu0  ;;  %v6132_v6 = vpop.f32.mrf.mxu1 }
0x1a1c   :  { %8376 = vpow2.f32 %v7459_v60  ;;  %v12430_v60 = vld [vmem:[#allocation113_spill] sm:$0xff] }
0x1a1d   :  { %8378 = vtanh.f32 %v6218_v58 }
0x1a1e   :  { %8380 = vpow2.f32 %v7460_v37 }
0x1a27   :  { %v8375_v8 = vpop.eup %8374 }
0x1a28   :  { %v6223_v36 = vadd.f32 1.0, %v8375_v8 }
0x1a29   :  { %v8377_v61 = vpop.eup %8376 }
0x1a2a   :  { %8382 = vrcp.f32 %v6223_v36  ;;  %v6229_v46 = vadd.f32 1.0, %v8377_v61  ;;  %v8379_v42 = vpop.eup %8378 }
0x1a2b   :  { %v8381_v3 = vpop.eup %8380 }
0x1a2c   :  { %8384 = vrcp.f32 %v6229_v46  ;;  %v6236_v28 = vadd.f32 1.0, %v8381_v3 }
0x1a2e   :  { %8386 = vrcp.f32 %v6236_v28 }
0x1a37   :  { %v8383_v15 = vpop.eup %8382 }
0x1a38   :  { %v6240_v14 = vmul.f32 %v8383_v15, %v8379_v42  ;;  %v12433_v42 = vld [vmem:[#allocation209_spill] sm:$0xff] }
0x1a39   :  { %v8385_v16 = vpop.eup %8384 }
0x1a3a   :  { %v6239_v33 = vmul.f32 %v8385_v16, %v12428_v27 }
0x1a3b   :  { %v8387_v8 = vpop.eup %8386 }
0x1a3c   :  { %v11144_v53 = vadd.f32 %v6240_v14, %v6239_v33  ;;  %v12434_v33 = vld [vmem:[#allocation210_spill] sm:$0xff] }
0x1a3e   :  { %12429 = vst [vmem:[#allocation114_spill] sm:$0xff] %v11144_v53  ;;  %8388 = vtanh.f32 %v11144_v53 }
0x1a4b   :  { %v8389_v6 = vpop.eup %8388 }
0x1a4c   :  { %v6243_v50 = vmul.f32 %v8389_v6, %v8387_v8  ;;  %v12435_v6 = vld [vmem:[#allocation208_spill] sm:$0xff] }
0x1a4e   :  { %v11148_v36 = vadd.f32 %v6243_v50, %v12430_v60 }
0x1a50   :  { %12431 = vst [vmem:[#allocation115_spill] sm:$0xff] %v11148_v36 }
0x1a55   :  { %v6168_v37 = vpop.f32.mrf.mxu0  ;;  %v6209_v58 = vpop.f32.mrf.mxu1 }
0x1a56   :  { %v6244_v12 = vadd.f32 %v6168_v37, %v12432_v10  ;;  %v6246_v60 = vadd.f32 %v6209_v58, %v12435_v6  ;;  %v12442_v6 = vld [vmem:[#allocation155_spill] sm:$0xff] }
0x1a57   :  { %v6170_v59 = vpop.f32.mrf.mxu0  ;;  %v6211_v61 = vpop.f32.mrf.mxu1 }
0x1a58   :  { %v7461_v46 = vmul.f32 -1.442695, %v6244_v12  ;;  %v6245_v3 = vadd.f32 %v6170_v59, %v12433_v42  ;;  %v6247_v8 = vadd.f32 %v6211_v61, %v12434_v33  ;;  %v12440_v33 = vld [vmem:[#allocation153_spill] sm:$0xff] }
0x1a59   :  { %v6172_v15 = vpop.f32.mrf.mxu0  ;;  %v6213_v14 = vpop.f32.mrf.mxu1 }
0x1a5a   :  { %8390 = vpow2.f32 %v7461_v46  ;;  %v7462_v16 = vmul.f32 -1.442695, %v6245_v3  ;;  %v7463_v36 = vmul.f32 -1.442695, %v6247_v8  ;;  %v12441_v8 = vld [vmem:[#allocation154_spill] sm:$0xff] }
0x1a5b   :  { %v6173_v28 = vpop.f32.mrf.mxu0  ;;  %v6214_v27 = vpop.f32.mrf.mxu1 }
0x1a5c   :  { %8392 = vpow2.f32 %v7462_v16  ;;  %v11161_v28 = vpack.c.bf16 %v6243_v50, %v6243_v50  ;;  %v12438_v50 = vld [vmem:[#allocation151_spill] sm:$0xff]  ;;  %v12439_v27 = vld [vmem:[#allocation152_spill] sm:$0xff] }
0x1a5d   :  { %8394 = vtanh.f32 %v6246_v60  ;;  %v12443_v60 = vld [vmem:[#allocation156_spill] sm:$0xff] }
0x1a5e   :  { %8396 = vpow2.f32 %v7463_v36 }
0x1a67   :  { %v8391_v53 = vpop.eup %8390 }
0x1a68   :  { %v6251_v13 = vadd.f32 1.0, %v8391_v53 }
0x1a69   :  { %v8393_v37 = vpop.eup %8392 }
0x1a6a   :  { %8398 = vrcp.f32 %v6251_v13  ;;  %v6257_v10 = vadd.f32 1.0, %v8393_v37  ;;  %v8395_v12 = vpop.eup %8394  ;;  %v12444_v37 = vld [vmem:[#allocation157_spill] sm:$0xff] }
0x1a6b   :  { %v8397_v59 = vpop.eup %8396 }
0x1a6c   :  { %8400 = vrcp.f32 %v6257_v10  ;;  %v6264_v15 = vadd.f32 1.0, %v8397_v59  ;;  %v12445_v10 = vld [vmem:[#allocation158_spill] sm:$0xff]  ;;  %v12447_v59 = vld [vmem:[#allocation160_spill] sm:$0xff] }
0x1a6e   :  { %8402 = vrcp.f32 %v6264_v15  ;;  %v12451_v15 = vld [vmem:[#allocation164_spill] sm:$0xff] }
0x1a77   :  { %v8399_v46 = vpop.eup %8398 }
0x1a78   :  { %v6268_v42 = vmul.f32 %v8399_v46, %v8395_v12  ;;  %v12446_v12 = vld [vmem:[#allocation159_spill] sm:$0xff]  ;;  %v12448_v46 = vld [vmem:[#allocation161_spill] sm:$0xff] }
0x1a79   :  { %v8401_v3 = vpop.eup %8400 }
0x1a7a   :  { %v6267_v14 = vmul.f32 %v8401_v3, %v10999_v34  ;;  %v12436_v34 = vld [vmem:[#allocation149_spill] sm:$0xff]  ;;  %v12450_v3 = vld [vmem:[#allocation163_spill] sm:$0xff] }
0x1a7b   :  { %v8403_v53 = vpop.eup %8402 }
0x1a7c   :  { %v11155_v61 = vadd.f32 %v6268_v42, %v6267_v14  ;;  %v12449_v42 = vld [vmem:[#allocation162_spill] sm:$0xff]  ;;  %v12452_v14 = vld [vmem:[#allocation165_spill] sm:$0xff] }
0x1a7e   :  { %8404 = vtanh.f32 %v11155_v61 }
0x1a8b   :  { %v8405_v58 = vpop.eup %8404 }
0x1a8c   :  { %v6271_v16 = vmul.f32 %v8405_v58, %v8403_v53  ;;  %v12453_v53 = vld [vmem:[#allocation166_spill] sm:$0xff]  ;;  %v12454_v58 = vld [vmem:[#allocation167_spill] sm:$0xff] }
0x1a8e   :  { %v6283_v36 = vpack.c.bf16 %v6271_v16, %v6271_v16  ;;  %v11159_v13 = vadd.f32 %v6271_v16, %v11003_v17  ;;  %v12437_v17 = vld [vmem:[#allocation150_spill] sm:$0xff]  ;;  %v12455_v16 = vld [vmem:[#allocation168_spill] sm:$0xff] }
0x1a90   :  { %6316 = vmatprep.mubr.bf16.mxu0 %v6283_v36  ;;  %6357 = vmatprep.mubr.bf16.mxu1 %v6283_v36 }
0x1a91   :  { %6317 = vmatmul.mubr.bf16.vlgmr.msra.gmra.mxu0 %v11161_v28  ;;  %6358 = vmatmul.mubr.bf16.vlgmr.msra.gmra.mxu1 %v11161_v28 }
0x1a92   :  { %6367 = vmatpush1.bf16.msra.mxu0 %v11934_v25  ;;  %6408 = vmatpush1.bf16.msra.mxu1 %v11935_v29 }
0x1a93   :  { %6398 = vmatprep.mubr.bf16.mxu0 %v6283_v36  ;;  %6439 = vmatprep.mubr.bf16.mxu1 %v6283_v36  ;;  %v12456_v36 = vld [vmem:[#allocation169_spill] sm:$0xff] }
0x1a94   :  { %6368 = vmatprep.subr.bf16.mxu0 %v11936_v0  ;;  %6409 = vmatprep.subr.bf16.mxu1 %v11937_v31 }
0x1a96   :  { %6369 = vmatpush1.bf16.msra.mxu0 %v11938_v38  ;;  %6410 = vmatpush1.bf16.msra.mxu1 %v11939_v63 }
0x1a97   :  { %6370 = vmatprep.subr.bf16.mxu0 %v11940_v24  ;;  %6411 = vmatprep.subr.bf16.mxu1 %v11941_v54 }
0x1a9a   :  { %6371 = vmatpush1.bf16.msra.mxu0 %v11942_v2  ;;  %6412 = vmatpush1.bf16.msra.mxu1 %v11943_v39 }
0x1a9b   :  { %6372 = vmatprep.subr.bf16.mxu0 %v11944_v9  ;;  %6413 = vmatprep.subr.bf16.mxu1 %v11945_v44 }
0x1a9e   :  { %6373 = vmatpush1.bf16.msra.mxu0 %v11946_v30  ;;  %6414 = vmatpush1.bf16.msra.mxu1 %v11947_v48 }
0x1a9f   :  { %6374 = vmatprep.subr.bf16.mxu0 %v11948_v19  ;;  %6415 = vmatprep.subr.bf16.mxu1 %v11949_v7 }
0x1aa2   :  { %6375 = vmatpush1.bf16.msra.mxu0 %v11950_v55  ;;  %6416 = vmatpush1.bf16.msra.mxu1 %v12037_v35 }
0x1aa3   :  { %6376 = vmatprep.subr.bf16.mxu0 %v12038_v41  ;;  %6417 = vmatprep.subr.bf16.mxu1 %v12039_v45 }
0x1aa6   :  { %6377 = vmatpush1.bf16.msra.mxu0 %v12040_v26  ;;  %6418 = vmatpush1.bf16.msra.mxu1 %v12041_v21 }
0x1aa7   :  { %6378 = vmatprep.subr.bf16.mxu0 %v12042_v47  ;;  %6419 = vmatprep.subr.bf16.mxu1 %v12043_v11 }
0x1aaa   :  { %6379 = vmatpush1.bf16.msra.mxu0 %v12044_v57  ;;  %6420 = vmatpush1.bf16.msra.mxu1 %v12136_v56 }
0x1aab   :  { %6380 = vmatprep.subr.bf16.mxu0 %v12046_v62  ;;  %6421 = vmatprep.subr.bf16.mxu1 %v12047_v43 }
0x1aae   :  { %6381 = vmatpush1.bf16.msra.mxu0 %v12048_v51  ;;  %6422 = vmatpush1.bf16.msra.mxu1 %v12137_v23 }
0x1aaf   :  { %6382 = vmatprep.subr.bf16.mxu0 %v12138_v20  ;;  %6423 = vmatprep.subr.bf16.mxu1 %v12051_v52 }
0x1ab2   :  { %6383 = vmatpush2.bf16.msra.mxu0 %v12052_v4  ;;  %6424 = vmatpush2.bf16.msra.mxu1 %v12053_v32 }
0x1ab3   :  { %6384 = vmatprep.subr.bf16.mxu0 %v12054_v40  ;;  %6425 = vmatprep.subr.bf16.mxu1 %v12055_v1 }
0x1ab6   :  { %6385 = vmatpush2.bf16.msra.mxu0 %v12056_v49  ;;  %6426 = vmatpush2.bf16.msra.mxu1 %v11971_v5 }
0x1ab7   :  { %6386 = vmatprep.subr.bf16.mxu0 %v11972_v18  ;;  %6427 = vmatprep.subr.bf16.mxu1 %v11973_v22 }
0x1aba   :  { %6387 = vmatpush2.bf16.msra.mxu0 %v12436_v34  ;;  %6428 = vmatpush2.bf16.msra.mxu1 %v12437_v17 }
0x1abb   :  { %6388 = vmatprep.subr.bf16.mxu0 %v12438_v50  ;;  %6429 = vmatprep.subr.bf16.mxu1 %v12439_v27 }
0x1abe   :  { %6389 = vmatpush2.bf16.msra.mxu0 %v12440_v33  ;;  %6430 = vmatpush2.bf16.msra.mxu1 %v12441_v8 }
0x1abf   :  { %6390 = vmatprep.subr.bf16.mxu0 %v12442_v6  ;;  %6431 = vmatprep.subr.bf16.mxu1 %v12443_v60 }
0x1ac2   :  { %6391 = vmatpush2.bf16.msra.mxu0 %v12444_v37  ;;  %6432 = vmatpush2.bf16.msra.mxu1 %v12445_v10  ;;  %v12525_v10 = vld [vmem:[#allocation192_spill] sm:$0xff] }
0x1ac3   :  { %6392 = vmatprep.subr.bf16.mxu0 %v12446_v12  ;;  %6433 = vmatprep.subr.bf16.mxu1 %v12447_v59  ;;  %v12457_v12 = vld [vmem:[#allocation170_spill] sm:$0xff]  ;;  %v12458_v59 = vld [vmem:[#allocation43_spill] sm:$0xff] }
0x1ac6   :  { %6393 = vmatpush2.bf16.msra.mxu0 %v12448_v46  ;;  %6434 = vmatpush2.bf16.msra.mxu1 %v12449_v42  ;;  %v12459_v46 = vld [vmem:[#allocation44_spill] sm:$0xff]  ;;  %v12524_v42 = vld [vmem:[#allocation191_spill] sm:$0xff] }
0x1ac7   :  { %6394 = vmatprep.subr.bf16.mxu0 %v12450_v3  ;;  %6435 = vmatprep.subr.bf16.mxu1 %v12451_v15  ;;  %v12460_v15 = vld [vmem:[#allocation45_spill] sm:$0xff]  ;;  %v12469_v3 = vld [vmem:[#allocation54_spill] sm:$0xff] }
0x1aca   :  { %6395 = vmatpush2.bf16.msra.mxu0 %v12452_v14  ;;  %6436 = vmatpush2.bf16.msra.mxu1 %v12453_v53  ;;  %v12461_v14 = vld [vmem:[#allocation46_spill] sm:$0xff]  ;;  %v12462_v53 = vld [vmem:[#allocation47_spill] sm:$0xff] }
0x1acb   :  { %6396 = vmatprep.subr.bf16.mxu0 %v12454_v58  ;;  %6437 = vmatprep.subr.bf16.mxu1 %v12455_v16  ;;  %v12463_v58 = vld [vmem:[#allocation48_spill] sm:$0xff]  ;;  %v12464_v16 = vld [vmem:[#allocation49_spill] sm:$0xff] }
0x1ace   :  { %6397 = vmatpush2.bf16.msra.mxu0 %v12456_v36  ;;  %6438 = vmatpush2.bf16.msra.mxu1 %v12457_v12  ;;  %v12465_v36 = vld [vmem:[#allocation50_spill] sm:$0xff]  ;;  %v12466_v12 = vld [vmem:[#allocation51_spill] sm:$0xff] }
0x1acf   :  { %6516 = vmatprep.subr.bf16.mxu0 %v12458_v59  ;;  %6557 = vmatprep.subr.bf16.mxu1 %v12459_v46  ;;  %v12467_v59 = vld [vmem:[#allocation52_spill] sm:$0xff]  ;;  %v12468_v46 = vld [vmem:[#allocation53_spill] sm:$0xff] }
0x1ad1   :  { %6399 = vmatmul.mubr.bf16.vlgmr.msra.gmra.mxu0 %v11161_v28  ;;  %6440 = vmatmul.mubr.bf16.vlgmr.msra.gmra.mxu1 %v11161_v28  ;;  %v12470_v28 = vld [vmem:[#allocation55_spill] sm:$0xff] }
0x1ad2   :  { %6517 = vmatpush1.bf16.msra.mxu0 %v12460_v15  ;;  %6558 = vmatpush1.bf16.msra.mxu1 %v12461_v14  ;;  %v12471_v15 = vld [vmem:[#allocation56_spill] sm:$0xff]  ;;  %v12472_v14 = vld [vmem:[#allocation57_spill] sm:$0xff] }
0x1ad3   :  { %6518 = vmatprep.subr.bf16.mxu0 %v12462_v53  ;;  %6559 = vmatprep.subr.bf16.mxu1 %v12463_v58  ;;  %v12473_v53 = vld [vmem:[#allocation58_spill] sm:$0xff]  ;;  %v12474_v58 = vld [vmem:[#allocation59_spill] sm:$0xff] }
0x1ad6   :  { %6519 = vmatpush1.bf16.msra.mxu0 %v12464_v16  ;;  %6560 = vmatpush1.bf16.msra.mxu1 %v12465_v36  ;;  %v12475_v16 = vld [vmem:[#allocation60_spill] sm:$0xff]  ;;  %v12476_v36 = vld [vmem:[#allocation61_spill] sm:$0xff] }
0x1ad7   :  { %6520 = vmatprep.subr.bf16.mxu0 %v12466_v12  ;;  %6561 = vmatprep.subr.bf16.mxu1 %v12467_v59  ;;  %v12477_v12 = vld [vmem:[#allocation62_spill] sm:$0xff]  ;;  %v12478_v59 = vld [vmem:[#allocation63_spill] sm:$0xff] }
0x1ada   :  { %6521 = vmatpush1.bf16.msra.mxu0 %v12468_v46  ;;  %6562 = vmatpush1.bf16.msra.mxu1 %v12469_v3  ;;  %v12479_v46 = vld [vmem:[#allocation64_spill] sm:$0xff]  ;;  %v12480_v3 = vld [vmem:[#allocation65_spill] sm:$0xff] }
0x1adb   :  { %6522 = vmatprep.subr.bf16.mxu0 %v12470_v28  ;;  %6563 = vmatprep.subr.bf16.mxu1 %v12471_v15  ;;  %v12481_v28 = vld [vmem:[#allocation66_spill] sm:$0xff]  ;;  %v12482_v15 = vld [vmem:[#allocation67_spill] sm:$0xff] }
0x1ade   :  { %6523 = vmatpush1.bf16.msra.mxu0 %v12472_v14  ;;  %6564 = vmatpush1.bf16.msra.mxu1 %v12473_v53  ;;  %v12483_v14 = vld [vmem:[#allocation68_spill] sm:$0xff]  ;;  %v12484_v53 = vld [vmem:[#allocation69_spill] sm:$0xff] }
0x1adf   :  { %6524 = vmatprep.subr.bf16.mxu0 %v12474_v58  ;;  %6565 = vmatprep.subr.bf16.mxu1 %v12475_v16  ;;  %v12485_v58 = vld [vmem:[#allocation70_spill] sm:$0xff]  ;;  %v12486_v16 = vld [vmem:[#allocation71_spill] sm:$0xff] }
0x1ae2   :  { %6525 = vmatpush1.bf16.msra.mxu0 %v12476_v36  ;;  %6566 = vmatpush1.bf16.msra.mxu1 %v12477_v12  ;;  %v12487_v36 = vld [vmem:[#allocation72_spill] sm:$0xff]  ;;  %v12488_v12 = vld [vmem:[#allocation73_spill] sm:$0xff] }
0x1ae3   :  { %6526 = vmatprep.subr.bf16.mxu0 %v12478_v59  ;;  %6567 = vmatprep.subr.bf16.mxu1 %v12479_v46  ;;  %v12489_v59 = vld [vmem:[#allocation74_spill] sm:$0xff]  ;;  %v12490_v46 = vld [vmem:[#allocation75_spill] sm:$0xff] }
0x1ae6   :  { %6527 = vmatpush1.bf16.msra.mxu0 %v12480_v3  ;;  %6568 = vmatpush1.bf16.msra.mxu1 %v12481_v28  ;;  %v12491_v3 = vld [vmem:[#allocation76_spill] sm:$0xff]  ;;  %v12492_v28 = vld [vmem:[#allocation77_spill] sm:$0xff] }
0x1ae7   :  { %6528 = vmatprep.subr.bf16.mxu0 %v12482_v15  ;;  %6569 = vmatprep.subr.bf16.mxu1 %v12483_v14  ;;  %v12493_v15 = vld [vmem:[#allocation78_spill] sm:$0xff]  ;;  %v12494_v14 = vld [vmem:[#allocation79_spill] sm:$0xff] }
0x1aea   :  { %6529 = vmatpush1.bf16.msra.mxu0 %v12484_v53  ;;  %6570 = vmatpush1.bf16.msra.mxu1 %v12485_v58  ;;  %v12495_v53 = vld [vmem:[#allocation80_spill] sm:$0xff]  ;;  %v12496_v58 = vld [vmem:[#allocation81_spill] sm:$0xff] }
0x1aeb   :  { %6530 = vmatprep.subr.bf16.mxu0 %v12486_v16  ;;  %6571 = vmatprep.subr.bf16.mxu1 %v12487_v36  ;;  %v12497_v16 = vld [vmem:[#allocation82_spill] sm:$0xff]  ;;  %v12498_v36 = vld [vmem:[#allocation83_spill] sm:$0xff] }
0x1aee   :  { %6531 = vmatpush1.bf16.msra.mxu0 %v12488_v12  ;;  %6572 = vmatpush1.bf16.msra.mxu1 %v12489_v59  ;;  %v12499_v12 = vld [vmem:[#allocation84_spill] sm:$0xff]  ;;  %v12500_v59 = vld [vmem:[#allocation85_spill] sm:$0xff] }
0x1aef   :  { %6532 = vmatprep.subr.bf16.mxu0 %v12490_v46  ;;  %6573 = vmatprep.subr.bf16.mxu1 %v12491_v3  ;;  %v12501_v46 = vld [vmem:[#allocation86_spill] sm:$0xff]  ;;  %v12502_v3 = vld [vmem:[#allocation87_spill] sm:$0xff] }
0x1af2   :  { %6533 = vmatpush2.bf16.msra.mxu0 %v12492_v28  ;;  %6574 = vmatpush2.bf16.msra.mxu1 %v12493_v15  ;;  %v12503_v28 = vld [vmem:[#allocation88_spill] sm:$0xff]  ;;  %v12504_v15 = vld [vmem:[#allocation89_spill] sm:$0xff] }
0x1af3   :  { %6534 = vmatprep.subr.bf16.mxu0 %v12494_v14  ;;  %6575 = vmatprep.subr.bf16.mxu1 %v12495_v53  ;;  %v12505_v14 = vld [vmem:[#allocation90_spill] sm:$0xff]  ;;  %v12506_v53 = vld [vmem:[#allocation91_spill] sm:$0xff] }
0x1af6   :  { %6535 = vmatpush2.bf16.msra.mxu0 %v12496_v58  ;;  %6576 = vmatpush2.bf16.msra.mxu1 %v12497_v16  ;;  %v12507_v58 = vld [vmem:[#allocation92_spill] sm:$0xff]  ;;  %v12508_v16 = vld [vmem:[#allocation93_spill] sm:$0xff] }
0x1af7   :  { %6536 = vmatprep.subr.bf16.mxu0 %v12498_v36  ;;  %6577 = vmatprep.subr.bf16.mxu1 %v12499_v12  ;;  %v12509_v36 = vld [vmem:[#allocation94_spill] sm:$0xff]  ;;  %v12510_v12 = vld [vmem:[#allocation95_spill] sm:$0xff] }
0x1afa   :  { %6537 = vmatpush2.bf16.msra.mxu0 %v12500_v59  ;;  %6578 = vmatpush2.bf16.msra.mxu1 %v12501_v46  ;;  %v12511_v59 = vld [vmem:[#allocation96_spill] sm:$0xff]  ;;  %v12512_v46 = vld [vmem:[#allocation97_spill] sm:$0xff] }
0x1afb   :  { %6538 = vmatprep.subr.bf16.mxu0 %v12502_v3  ;;  %6579 = vmatprep.subr.bf16.mxu1 %v12503_v28  ;;  %v12513_v3 = vld [vmem:[#allocation98_spill] sm:$0xff]  ;;  %v12514_v28 = vld [vmem:[#allocation99_spill] sm:$0xff] }
0x1afe   :  { %6539 = vmatpush2.bf16.msra.mxu0 %v12504_v15  ;;  %6580 = vmatpush2.bf16.msra.mxu1 %v12505_v14  ;;  %v12515_v15 = vld [vmem:[#allocation100_spill] sm:$0xff]  ;;  %v12516_v14 = vld [vmem:[#allocation101_spill] sm:$0xff] }
0x1aff   :  { %6540 = vmatprep.subr.bf16.mxu0 %v12506_v53  ;;  %6581 = vmatprep.subr.bf16.mxu1 %v12507_v58  ;;  %v12517_v53 = vld [vmem:[#allocation102_spill] sm:$0xff]  ;;  %v12518_v58 = vld [vmem:[#allocation103_spill] sm:$0xff] }
0x1b02   :  { %6541 = vmatpush2.bf16.msra.mxu0 %v12508_v16  ;;  %6582 = vmatpush2.bf16.msra.mxu1 %v12509_v36  ;;  %v12519_v16 = vld [vmem:[#allocation104_spill] sm:$0xff]  ;;  %v12520_v36 = vld [vmem:[#allocation105_spill] sm:$0xff] }
0x1b03   :  { %6542 = vmatprep.subr.bf16.mxu0 %v12510_v12  ;;  %6583 = vmatprep.subr.bf16.mxu1 %v12511_v59  ;;  %v12521_v12 = vld [vmem:[#allocation106_spill] sm:$0xff]  ;;  %v12522_v59 = vld [vmem:[#allocation107_spill] sm:$0xff] }
0x1b06   :  { %6543 = vmatpush2.bf16.msra.mxu0 %v12512_v46  ;;  %6584 = vmatpush2.bf16.msra.mxu1 %v12513_v3  ;;  %v12523_v46 = vld [vmem:[#allocation108_spill] sm:$0xff] }
0x1b07   :  { %6544 = vmatprep.subr.bf16.mxu0 %v12514_v28  ;;  %6585 = vmatprep.subr.bf16.mxu1 %v12515_v15 }
0x1b0a   :  { %6545 = vmatpush2.bf16.msra.mxu0 %v12516_v14  ;;  %6586 = vmatpush2.bf16.msra.mxu1 %v12517_v53 }
0x1b0b   :  { %6546 = vmatprep.subr.bf16.mxu0 %v12518_v58  ;;  %6587 = vmatprep.subr.bf16.mxu1 %v12519_v16  ;;  %v12526_v58 = vld [vmem:[#allocation193_spill] sm:$0xff]  ;;  %v12527_v16 = vld [vmem:[#allocation194_spill] sm:$0xff] }
0x1b0e   :  { %6547 = vmatpush2.bf16.msra.mxu0 %v12520_v36  ;;  %6588 = vmatpush2.bf16.msra.mxu1 %v12521_v12 }
0x1b0f   :  { %6598 = vmatprep.subr.bf16.mxu0 %v12522_v59  ;;  %6639 = vmatprep.subr.bf16.mxu1 %v12523_v46 }
0x1b51   :  { %v6318_v3 = vpop.f32.mrf.mxu0  ;;  %v6359_v28 = vpop.f32.mrf.mxu1 }
0x1b52   :  { %v6448_v15 = vadd.f32 %v6318_v3, %v12524_v42  ;;  %v6450_v14 = vadd.f32 %v6359_v28, %v12525_v10 }
0x1b53   :  { %v6320_v37 = vpop.f32.mrf.mxu0  ;;  %v6361_v53 = vpop.f32.mrf.mxu1 }
0x1b54   :  { %v7464_v60 = vmul.f32 -1.442695, %v6448_v15  ;;  %v6449_v6 = vadd.f32 %v6320_v37, %v12526_v58  ;;  %v6451_v8 = vadd.f32 %v6361_v53, %v12527_v16 }
0x1b55   :  { %v6322_v36 = vpop.f32.mrf.mxu0  ;;  %v6363_v33 = vpop.f32.mrf.mxu1 }
0x1b56   :  { %8406 = vpow2.f32 %v7464_v60  ;;  %v7465_v12 = vmul.f32 -1.442695, %v6449_v6  ;;  %v7466_v46 = vmul.f32 -1.442695, %v6451_v8  ;;  %v12528_v60 = vld [vmem:[#allocation114_spill] sm:$0xff] }
0x1b57   :  { %v6323_v59 = vpop.f32.mrf.mxu0  ;;  %v6364_v27 = vpop.f32.mrf.mxu1 }
0x1b58   :  { %8408 = vpow2.f32 %v7465_v12  ;;  %v12532_v12 = vld [vmem:[#allocation203_spill] sm:$0xff] }
0x1b59   :  { %8410 = vtanh.f32 %v6450_v14  ;;  %v12530_v14 = vld [vmem:[#allocation115_spill] sm:$0xff] }
0x1b5a   :  { %8412 = vpow2.f32 %v7466_v46 }
0x1b63   :  { %v8407_v50 = vpop.eup %8406 }
0x1b64   :  { %v6455_v17 = vadd.f32 1.0, %v8407_v50 }
0x1b65   :  { %v8409_v42 = vpop.eup %8408 }
0x1b66   :  { %8414 = vrcp.f32 %v6455_v17  ;;  %v6461_v10 = vadd.f32 1.0, %v8409_v42  ;;  %v8411_v3 = vpop.eup %8410 }
0x1b67   :  { %v8413_v37 = vpop.eup %8412 }
0x1b68   :  { %8416 = vrcp.f32 %v6461_v10  ;;  %v6468_v33 = vadd.f32 1.0, %v8413_v37 }
0x1b6a   :  { %8418 = vrcp.f32 %v6468_v33 }
0x1b73   :  { %v8415_v28 = vpop.eup %8414 }
0x1b74   :  { %v6472_v15 = vmul.f32 %v8415_v28, %v8411_v3  ;;  %v12533_v3 = vld [vmem:[#allocation205_spill] sm:$0xff] }
0x1b75   :  { %v8417_v53 = vpop.eup %8416 }
0x1b76   :  { %v6471_v6 = vmul.f32 %v8417_v53, %v12528_v60 }
0x1b77   :  { %v8419_v50 = vpop.eup %8418 }
0x1b78   :  { %v11300_v58 = vadd.f32 %v6472_v15, %v6471_v6  ;;  %v12534_v6 = vld [vmem:[#allocation206_spill] sm:$0xff] }
0x1b7a   :  { %12529 = vst [vmem:[#allocation116_spill] sm:$0xff] %v11300_v58  ;;  %8420 = vtanh.f32 %v11300_v58 }
0x1b87   :  { %v8421_v27 = vpop.eup %8420 }
0x1b88   :  { %v6475_v8 = vmul.f32 %v8421_v27, %v8419_v50  ;;  %v12535_v27 = vld [vmem:[#allocation204_spill] sm:$0xff] }
0x1b8a   :  { %v11304_v17 = vadd.f32 %v6475_v8, %v12530_v14 }
0x1b8c   :  { %12531 = vst [vmem:[#allocation117_spill] sm:$0xff] %v11304_v17 }
0x1b91   :  { %v6400_v16 = vpop.f32.mrf.mxu0  ;;  %v6441_v36 = vpop.f32.mrf.mxu1 }
0x1b92   :  { %v6476_v59 = vadd.f32 %v6400_v16, %v12532_v12  ;;  %v6478_v14 = vadd.f32 %v6441_v36, %v12535_v27 }
0x1b93   :  { %v6402_v46 = vpop.f32.mrf.mxu0  ;;  %v6443_v42 = vpop.f32.mrf.mxu1 }
0x1b94   :  { %v7467_v10 = vmul.f32 -1.442695, %v6476_v59  ;;  %v6477_v37 = vadd.f32 %v6402_v46, %v12533_v3  ;;  %v6479_v50 = vadd.f32 %v6443_v42, %v12534_v6  ;;  %v12560_v6 = vld [vmem:[#allocation196_spill] sm:$0xff] }
0x1b95   :  { %v6404_v28 = vpop.f32.mrf.mxu0  ;;  %v6445_v15 = vpop.f32.mrf.mxu1 }
0x1b96   :  { %8422 = vpow2.f32 %v7467_v10  ;;  %v7468_v53 = vmul.f32 -1.442695, %v6477_v37  ;;  %v7469_v17 = vmul.f32 -1.442695, %v6479_v50 }
0x1b97   :  { %v6405_v33 = vpop.f32.mrf.mxu0  ;;  %v6446_v60 = vpop.f32.mrf.mxu1 }
0x1b98   :  { %8424 = vpow2.f32 %v7468_v53  ;;  %v11317_v33 = vpack.c.bf16 %v6475_v8, %v6475_v8  ;;  %v12559_v8 = vld [vmem:[#allocation195_spill] sm:$0xff] }
0x1b99   :  { %8426 = vtanh.f32 %v6478_v14 }
0x1b9a   :  { %8428 = vpow2.f32 %v7469_v17 }
0x1ba3   :  { %v8423_v58 = vpop.eup %8422 }
0x1ba4   :  { %v6483_v34 = vadd.f32 1.0, %v8423_v58 }
0x1ba5   :  { %v8425_v16 = vpop.eup %8424 }
0x1ba6   :  { %8430 = vrcp.f32 %v6483_v34  ;;  %v6489_v12 = vadd.f32 1.0, %v8425_v16  ;;  %v8427_v59 = vpop.eup %8426  ;;  %v8103_v16 = vld [vmem:[#allocation22 + $0x30] sm:$0xff]  }
0x1ba7   :  { %v8429_v46 = vpop.eup %8428 }
0x1ba8   :  { %8432 = vrcp.f32 %v6489_v12  ;;  %v6496_v28 = vadd.f32 1.0, %v8429_v46 }
0x1baa   :  { %8434 = vrcp.f32 %v6496_v28 }
0x1bb3   :  { %v8431_v10 = vpop.eup %8430 }
0x1bb4   :  { %v6500_v3 = vmul.f32 %v8431_v10, %v8427_v59  ;;  %v12561_v59 = vld [vmem:[#allocation197_spill] sm:$0xff]  ;;  %v12562_v10 = vld [vmem:[#allocation198_spill] sm:$0xff] }
0x1bb5   :  { %v8433_v37 = vpop.eup %8432 }
0x1bb6   :  { %v6499_v15 = vmul.f32 %v8433_v37, %v11155_v61 }
0x1bb7   :  { %v8435_v58 = vpop.eup %8434 }
0x1bb8   :  { %v11311_v42 = vadd.f32 %v6500_v3, %v6499_v15 }
0x1bba   :  { %8436 = vtanh.f32 %v11311_v42 }
0x1bc7   :  { %v8437_v36 = vpop.eup %8436 }
0x1bc8   :  { %v6503_v53 = vmul.f32 %v8437_v36, %v8435_v58 }
0x1bca   :  { %v6515_v17 = vpack.c.bf16 %v6503_v53, %v6503_v53  ;;  %v11315_v34 = vadd.f32 %v6503_v53, %v11159_v13  ;;  %v8102_v13 = vld [vmem:[#allocation22 + $0x38] sm:$0xff]   ;;  %v8104_v53 = vld [vmem:[#allocation22 + $0x28] sm:$0xff]  }
0x1bcc   :  { %6548 = vmatprep.mubr.bf16.mxu0 %v6515_v17  ;;  %6589 = vmatprep.mubr.bf16.mxu1 %v6515_v17 }
0x1bcd   :  { %6549 = vmatmul.mubr.bf16.vlgmr.msra.gmra.mxu0 %v11317_v33  ;;  %6590 = vmatmul.mubr.bf16.vlgmr.msra.gmra.mxu1 %v11317_v33 }
0x1bce   :  { %6599 = vmatpush1.bf16.msra.mxu0 %v11934_v25  ;;  %6640 = vmatpush1.bf16.msra.mxu1 %v11935_v29  ;;  %v12536_v25 = vld [vmem:[#allocation149_spill] sm:$0xff]  ;;  %v12537_v29 = vld [vmem:[#allocation150_spill] sm:$0xff] }
0x1bcf   :  { %6630 = vmatprep.mubr.bf16.mxu0 %v6515_v17  ;;  %6671 = vmatprep.mubr.bf16.mxu1 %v6515_v17 }
0x1bd0   :  { %6600 = vmatprep.subr.bf16.mxu0 %v11936_v0  ;;  %6641 = vmatprep.subr.bf16.mxu1 %v11937_v31  ;;  %v12538_v0 = vld [vmem:[#allocation151_spill] sm:$0xff]  ;;  %v12539_v31 = vld [vmem:[#allocation152_spill] sm:$0xff] }
0x1bd2   :  { %6601 = vmatpush1.bf16.msra.mxu0 %v11938_v38  ;;  %6642 = vmatpush1.bf16.msra.mxu1 %v11939_v63  ;;  %v12540_v38 = vld [vmem:[#allocation153_spill] sm:$0xff]  ;;  %v12541_v63 = vld [vmem:[#allocation154_spill] sm:$0xff] }
0x1bd3   :  { %6602 = vmatprep.subr.bf16.mxu0 %v11940_v24  ;;  %6643 = vmatprep.subr.bf16.mxu1 %v11941_v54  ;;  %v12542_v24 = vld [vmem:[#allocation155_spill] sm:$0xff]  ;;  %v12543_v54 = vld [vmem:[#allocation156_spill] sm:$0xff] }
0x1bd6   :  { %6603 = vmatpush1.bf16.msra.mxu0 %v11942_v2  ;;  %6644 = vmatpush1.bf16.msra.mxu1 %v11943_v39  ;;  %v12546_v2 = vld [vmem:[#allocation159_spill] sm:$0xff]  ;;  %v12547_v39 = vld [vmem:[#allocation160_spill] sm:$0xff] }
0x1bd7   :  { %6604 = vmatprep.subr.bf16.mxu0 %v11944_v9  ;;  %6645 = vmatprep.subr.bf16.mxu1 %v11945_v44  ;;  %v12548_v9 = vld [vmem:[#allocation161_spill] sm:$0xff]  ;;  %v12549_v44 = vld [vmem:[#allocation162_spill] sm:$0xff] }
0x1bda   :  { %6605 = vmatpush1.bf16.msra.mxu0 %v11946_v30  ;;  %6646 = vmatpush1.bf16.msra.mxu1 %v11947_v48  ;;  %v12550_v30 = vld [vmem:[#allocation163_spill] sm:$0xff]  ;;  %v12551_v48 = vld [vmem:[#allocation164_spill] sm:$0xff] }
0x1bdb   :  { %6606 = vmatprep.subr.bf16.mxu0 %v11948_v19  ;;  %6647 = vmatprep.subr.bf16.mxu1 %v11949_v7  ;;  %v12552_v19 = vld [vmem:[#allocation165_spill] sm:$0xff]  ;;  %v12553_v7 = vld [vmem:[#allocation166_spill] sm:$0xff] }
0x1bde   :  { %6607 = vmatpush1.bf16.msra.mxu0 %v11950_v55  ;;  %6648 = vmatpush1.bf16.msra.mxu1 %v12037_v35  ;;  %v12554_v55 = vld [vmem:[#allocation167_spill] sm:$0xff]  ;;  %v12556_v35 = vld [vmem:[#allocation169_spill] sm:$0xff] }
0x1bdf   :  { %6608 = vmatprep.subr.bf16.mxu0 %v12038_v41  ;;  %6649 = vmatprep.subr.bf16.mxu1 %v12039_v45  ;;  %v12557_v41 = vld [vmem:[#allocation170_spill] sm:$0xff]  ;;  %v12558_v45 = vmov 0.0  }
0x1be2   :  { %6609 = vmatpush1.bf16.msra.mxu0 %v12040_v26  ;;  %6650 = vmatpush1.bf16.msra.mxu1 %v12041_v21  ;;  %v8086_v26 = vld [vmem:[#allocation14 + $0x78] sm:$0xff]  }
0x1be3   :  { %6610 = vmatprep.subr.bf16.mxu0 %v12042_v47  ;;  %6651 = vmatprep.subr.bf16.mxu1 %v12043_v11  ;;  %v8087_v21 = vld [vmem:[#allocation14 + $0x38] sm:$0xff]   ;;  %v8088_v47 = vld [vmem:[#allocation14 + $0x70] sm:$0xff]  }
0x1be4   :  { %v8089_v11 = vld [vmem:[#allocation14 + $0x30] sm:$0xff]  }
0x1be6   :  { %6611 = vmatpush1.bf16.msra.mxu0 %v12044_v57  ;;  %6652 = vmatpush1.bf16.msra.mxu1 %v12136_v56  ;;  %v8090_v57 = vld [vmem:[#allocation14 + $0x68] sm:$0xff]   ;;  %v8100_v56 = vld [vmem:[#allocation14 + $0x40] sm:$0xff]  }
0x1be7   :  { %6612 = vmatprep.subr.bf16.mxu0 %v12046_v62  ;;  %6653 = vmatprep.subr.bf16.mxu1 %v12047_v43  ;;  %v8092_v62 = vld [vmem:[#allocation14 + $0x60] sm:$0xff]  }
0x1be8   :  { %v8093_v43 = vld [vmem:[#allocation14 + $0x20] sm:$0xff]  }
0x1bea   :  { %6613 = vmatpush1.bf16.msra.mxu0 %v12048_v51  ;;  %6654 = vmatpush1.bf16.msra.mxu1 %v12137_v23  ;;  %v8094_v51 = vld [vmem:[#allocation14 + $0x58] sm:$0xff]   ;;  %v8101_v23 = vld [vmem:[#allocation14] sm:$0xff]  }
0x1beb   :  { %6614 = vmatprep.subr.bf16.mxu0 %v12138_v20  ;;  %6655 = vmatprep.subr.bf16.mxu1 %v12051_v52  ;;  %v8095_v52 = vld [vmem:[#allocation14 + $0x18] sm:$0xff]  }
0x1bee   :  { %6615 = vmatpush2.bf16.msra.mxu0 %v12052_v4  ;;  %6656 = vmatpush2.bf16.msra.mxu1 %v12053_v32  ;;  %v8096_v4 = vld [vmem:[#allocation14 + $0x50] sm:$0xff]  }
0x1bef   :  { %6616 = vmatprep.subr.bf16.mxu0 %v12054_v40  ;;  %6657 = vmatprep.subr.bf16.mxu1 %v12055_v1  ;;  %v8097_v32 = vld [vmem:[#allocation14 + $0x10] sm:$0xff]   ;;  %v8098_v40 = vld [vmem:[#allocation14 + $0x48] sm:$0xff]  }
0x1bf0   :  { %v8099_v1 = vld [vmem:[#allocation14 + $0x8] sm:$0xff]  }
0x1bf2   :  { %6617 = vmatpush2.bf16.msra.mxu0 %v12056_v49  ;;  %6658 = vmatpush2.bf16.msra.mxu1 %v11971_v5  ;;  %v12544_v5 = vld [vmem:[#allocation157_spill] sm:$0xff]  ;;  %v8091_v49 = vld [vmem:[#allocation14 + $0x28] sm:$0xff]  }
0x1bf3   :  { %6618 = vmatprep.subr.bf16.mxu0 %v11972_v18  ;;  %6659 = vmatprep.subr.bf16.mxu1 %v11973_v22  ;;  %v12545_v18 = vld [vmem:[#allocation158_spill] sm:$0xff]  ;;  %v12555_v22 = vld [vmem:[#allocation168_spill] sm:$0xff] }
0x1bf6   :  { %6619 = vmatpush2.bf16.msra.mxu0 %v12536_v25  ;;  %6660 = vmatpush2.bf16.msra.mxu1 %v12537_v29 }
0x1bf7   :  { %6620 = vmatprep.subr.bf16.mxu0 %v12538_v0  ;;  %6661 = vmatprep.subr.bf16.mxu1 %v12539_v31 }
0x1bfa   :  { %6621 = vmatpush2.bf16.msra.mxu0 %v12540_v38  ;;  %6662 = vmatpush2.bf16.msra.mxu1 %v12541_v63 }
0x1bfb   :  { %6622 = vmatprep.subr.bf16.mxu0 %v12542_v24  ;;  %6663 = vmatprep.subr.bf16.mxu1 %v12543_v54 }
0x1bfe   :  { %6623 = vmatpush2.bf16.msra.mxu0 %v12544_v5  ;;  %6664 = vmatpush2.bf16.msra.mxu1 %v12545_v18  ;;  %v12563_v18 = vld [vmem:[#allocation116_spill] sm:$0xff] }
0x1bff   :  { %6624 = vmatprep.subr.bf16.mxu0 %v12546_v2  ;;  %6665 = vmatprep.subr.bf16.mxu1 %v12547_v39 }
0x1c02   :  { %6625 = vmatpush2.bf16.msra.mxu0 %v12548_v9  ;;  %6666 = vmatpush2.bf16.msra.mxu1 %v12549_v44 }
0x1c03   :  { %6626 = vmatprep.subr.bf16.mxu0 %v12550_v30  ;;  %6667 = vmatprep.subr.bf16.mxu1 %v12551_v48  ;;  %v12564_v48 = vld [vmem:[#allocation117_spill] sm:$0xff] }
0x1c06   :  { %6627 = vmatpush2.bf16.msra.mxu0 %v12552_v19  ;;  %6668 = vmatpush2.bf16.msra.mxu1 %v12553_v7 }
0x1c07   :  { %6628 = vmatprep.subr.bf16.mxu0 %v12554_v55  ;;  %6669 = vmatprep.subr.bf16.mxu1 %v12555_v22  ;;  %v12565_v22 = vld [vmem:[#allocation199_spill] sm:$0xff] }
0x1c0a   :  { %6629 = vmatpush2.bf16.msra.mxu0 %v12556_v35  ;;  %6670 = vmatpush2.bf16.msra.mxu1 %v12557_v41 }
0x1c0b   :  { %7898 = vmatprep.subr.bf16.mxu1 %v12558_v45  ;;  %7623 = vmatprep.subr.bf16.mxu0 %v8086_v26 }
0x1c0d   :  { %6631 = vmatmul.mubr.bf16.vlgmr.msra.gmra.mxu0 %v11317_v33  ;;  %6672 = vmatmul.mubr.bf16.vlgmr.msra.gmra.mxu1 %v11317_v33 }
0x1c0e   :  { %7914 = vmatprep.mubr.msk.bf16.mxu1 %vm8800_vm0, %v12558_v45  ;;  %7624 = vmatpush3.bf16.msra.mxu0 %v8087_v21 }
0x1c0f   :  { %7625 = vmatprep.subr.bf16.mxu0 %v8088_v47  ;;  %7899 = vmatpush3.bf16.msra.mxu1 %v8102_v13  ;;  %v12566_v47 = vld [vmem:[#allocation201_spill] sm:$0xff] }
0x1c10   :  { %7900 = vmatprep.subr.bf16.mxu1 %v12558_v45 }
0x1c12   :  { %7626 = vmatpush3.bf16.msra.mxu0 %v8089_v11 }
0x1c13   :  { %7627 = vmatprep.subr.bf16.mxu0 %v8090_v57  ;;  %7901 = vmatpush3.bf16.msra.mxu1 %v8103_v16 }
0x1c14   :  { %7902 = vmatprep.subr.bf16.mxu1 %v12558_v45 }
0x1c16   :  { %7628 = vmatpush3.bf16.msra.mxu0 %v8091_v49 }
0x1c17   :  { %7629 = vmatprep.subr.bf16.mxu0 %v8092_v62  ;;  %7903 = vmatpush3.bf16.msra.mxu1 %v8104_v53  ;;  %v8109_v53 = vld [vmem:[#allocation22] sm:$0xff]  }
0x1c18   :  { %7904 = vmatprep.subr.bf16.mxu1 %v12558_v45 }
0x1c1a   :  { %7630 = vmatpush3.bf16.msra.mxu0 %v8093_v43 }
0x1c1b   :  { %7631 = vmatprep.subr.bf16.mxu0 %v8094_v51 }
0x1c1e   :  { %7632 = vmatpush3.bf16.msra.mxu0 %v8095_v52  ;;  %v12567_v52 = vld [vmem:[#allocation202_spill] sm:$0xff] }
0x1c1f   :  { %7633 = vmatprep.subr.bf16.mxu0 %v8096_v4 }
0x1c22   :  { %7634 = vmatpush3.bf16.msra.mxu0 %v8097_v32  ;;  %v12568_v32 = vld [vmem:[#allocation200_spill] sm:$0xff] }
0x1c23   :  { %7635 = vmatprep.subr.bf16.mxu0 %v8098_v40 }
0x1c26   :  { %7636 = vmatpush3.bf16.msra.mxu0 %v8099_v1 }
0x1c27   :  { %7637 = vmatprep.subr.bf16.mxu0 %v8100_v56 }
0x1c2a   :  { %7638 = vmatpush3.bf16.msra.mxu0 %v8101_v23 }
0x1c8d   :  { %v6550_v20 = vpop.f32.mrf.mxu0  ;;  %v6591_v61 = vpop.f32.mrf.mxu1 }
0x1c8e   :  { %v6680_v60 = vadd.f32 %v6550_v20, %v12559_v8  ;;  %v6682_v50 = vadd.f32 %v6591_v61, %v12560_v6 }
0x1c8f   :  { %v6552_v27 = vpop.f32.mrf.mxu0  ;;  %v6593_v14 = vpop.f32.mrf.mxu1 }
0x1c90   :  { %v7470_v12 = vmul.f32 -1.442695, %v6680_v60  ;;  %v6681_v46 = vadd.f32 %v6552_v27, %v12561_v59  ;;  %v6683_v3 = vadd.f32 %v6593_v14, %v12562_v10 }
0x1c91   :  { %v6554_v37 = vpop.f32.mrf.mxu0  ;;  %v6595_v28 = vpop.f32.mrf.mxu1 }
0x1c92   :  { %8438 = vpow2.f32 %v7470_v12  ;;  %v7471_v15 = vmul.f32 -1.442695, %v6681_v46  ;;  %v7472_v17 = vmul.f32 -1.442695, %v6683_v3 }
0x1c93   :  { %v6555_v58 = vpop.f32.mrf.mxu0  ;;  %v6596_v36 = vpop.f32.mrf.mxu1 }
0x1c94   :  { %8440 = vpow2.f32 %v7471_v15  ;;  %v8105_v58 = vld [vmem:[#allocation22 + $0x20] sm:$0xff]   ;;  %v8106_v36 = vld [vmem:[#allocation22 + $0x18] sm:$0xff]  }
0x1c95   :  { %8442 = vtanh.f32 %v6682_v50  ;;  %7905 = vmatpush3.bf16.msra.mxu1 %v8105_v58 }
0x1c96   :  { %8444 = vpow2.f32 %v7472_v17  ;;  %7906 = vmatprep.subr.bf16.mxu1 %v12558_v45  ;;  %v6925_v17 = vld [vmem:[#allocation20] sm:$0x1] }
0x1c99   :  { %7907 = vmatpush3.bf16.msra.mxu1 %v8106_v36 }
0x1c9a   :  { %7908 = vmatprep.subr.bf16.mxu1 %v12558_v45 }
0x1c9f   :  { %v8439_v33 = vpop.eup %8438 }
0x1ca0   :  { %v6687_v25 = vadd.f32 1.0, %v8439_v33  ;;  %v6926_v33 = vadd.f32 1e-05, %v6925_v17 }
0x1ca1   :  { %v8441_v29 = vpop.eup %8440 }
0x1ca2   :  { %8446 = vrcp.f32 %v6687_v25  ;;  %v6693_v0 = vadd.f32 1.0, %v8441_v29  ;;  %v8443_v31 = vpop.eup %8442 }
0x1ca3   :  { %v8445_v38 = vpop.eup %8444 }
0x1ca4   :  { %8448 = vrcp.f32 %v6693_v0  ;;  %v6700_v5 = vadd.f32 1.0, %v8445_v38  ;;  %v7476_v0 = vld [vmem:[%s12569_s15] ss:$0 sm:$0xff] }
0x1ca6   :  { %8450 = vrcp.f32 %v6700_v5  ;;  %v12570_v5 = vld [vmem:[#allocation42_spill] sm:$0xff] }
0x1caf   :  { %v8447_v63 = vpop.eup %8446 }
0x1cb0   :  { %v6704_v24 = vmul.f32 %v8447_v63, %v8443_v31  ;;  %v7493_v63 = vld [vmem:[#allocation19] ss:$0 sm:$0xff] }
0x1cb1   :  { %v8449_v54 = vpop.eup %8448 }
0x1cb2   :  { %v6703_v2 = vmul.f32 %v8449_v54, %v12563_v18 }
0x1cb3   :  { %v8451_v9 = vpop.eup %8450 }
0x1cb4   :  { %v6705_v39 = vadd.f32 %v6704_v24, %v6703_v2 }
0x1cb6   :  { %8452 = vtanh.f32 %v6705_v39 }
0x1cc3   :  { %v8453_v44 = vpop.eup %8452 }
0x1cc4   :  { %v6707_v30 = vmul.f32 %v8453_v44, %v8451_v9  ;;  %v7495_v44 = vld [vmem:[#allocation17] ss:$0 sm:$0xff] }
0x1cc6   :  { %v6736_v19 = vadd.f32 %v6707_v30, %v12564_v48 }
0x1cc8   :  { %v6738_v3 = vmul.f32 0.125, %v6736_v19 }
0x1cca   :  { %v6740_v15 = vpack.c.bf16 %v6738_v3, %v6738_v3 }
0x1ccd   :  { %v6632_v7 = vpop.f32.mrf.mxu0  ;;  %v6673_v55 = vpop.f32.mrf.mxu1 }
0x1cce   :  { %v6708_v35 = vadd.f32 %v6632_v7, %v12565_v22  ;;  %v6710_v40 = vadd.f32 %v6673_v55, %v12568_v32  ;;  %v12571_v55 = vlaneseq }
0x1ccf   :  { %v6634_v41 = vpop.f32.mrf.mxu0  ;;  %v6675_v26 = vpop.f32.mrf.mxu1 }
0x1cd0   :  { %v7473_v21 = vmul.f32 -1.442695, %v6708_v35  ;;  %v6709_v11 = vadd.f32 %v6634_v41, %v12566_v47  ;;  %v6711_v4 = vadd.f32 %v6675_v26, %v12567_v52  ;;  %v7066_v22 = vand.u32 127, %v12571_v55  ;;  %v7496_v35 = vld [vmem:[%s8947_s9] ss:$0 sm:$0xff] }
0x1cd1   :  { %v6636_v57 = vpop.f32.mrf.mxu0  ;;  %v6677_v49 = vpop.f32.mrf.mxu1 }
0x1cd2   :  { %8454 = vpow2.f32 %v7473_v21  ;;  %v7474_v62 = vmul.f32 -1.442695, %v6709_v11  ;;  %v7475_v1 = vmul.f32 -1.442695, %v6711_v4  ;;  %vm7067_vm6 = vcmp.lt.s32.totalorder %v7066_v22, 2 }
0x1cd3   :  { %v6637_v43 = vpop.f32.mrf.mxu0  ;;  %v6678_v51 = vpop.f32.mrf.mxu1 }
0x1cd4   :  { %8456 = vpow2.f32 %v7474_v62 }
0x1cd5   :  { %8458 = vtanh.f32 %v6710_v40 }
0x1cd6   :  { %8460 = vpow2.f32 %v7475_v1 }
0x1cdf   :  { %v8455_v56 = vpop.eup %8454 }
0x1ce0   :  { %v6715_v23 = vadd.f32 1.0, %v8455_v56 }
0x1ce1   :  { %v8457_v20 = vpop.eup %8456 }
0x1ce2   :  { %8462 = vrcp.f32 %v6715_v23  ;;  %v6721_v61 = vadd.f32 1.0, %v8457_v20  ;;  %v8459_v13 = vpop.eup %8458 }
0x1ce3   :  { %v8461_v8 = vpop.eup %8460 }
0x1ce4   :  { %8464 = vrcp.f32 %v6721_v61  ;;  %v6728_v27 = vadd.f32 1.0, %v8461_v8 }
0x1ce6   :  { %8466 = vrcp.f32 %v6728_v27 }
0x1cef   :  { %v8463_v60 = vpop.eup %8462 }
0x1cf0   :  { %v6732_v6 = vmul.f32 %v8463_v60, %v8459_v13 }
0x1cf1   :  { %v8465_v50 = vpop.eup %8464 }
0x1cf2   :  { %v6731_v14 = vmul.f32 %v8465_v50, %v11311_v42  ;;  %v8107_v42 = vld [vmem:[#allocation22 + $0x10] sm:$0xff]  }
0x1cf3   :  { %v8467_v12 = vpop.eup %8466  ;;  %7909 = vmatpush3.bf16.msra.mxu1 %v8107_v42 }
0x1cf4   :  { %v6733_v16 = vadd.f32 %v6732_v6, %v6731_v14  ;;  %7910 = vmatprep.subr.bf16.mxu1 %v12558_v45 }
0x1cf6   :  { %8468 = vtanh.f32 %v6733_v16 }
0x1cf7   :  { %8470 = vrsqrt.f32 %v6926_v33 }
0x1d03   :  { %v8469_v59 = vpop.eup %8468 }
0x1d04   :  { %v6735_v46 = vmul.f32 %v8469_v59, %v8467_v12  ;;  %v8471_v29 = vpop.eup %8470 }
0x1d05   :  { %v6932_v18 = vrot.slane %v8471_v29, %v12570_v5 }
0x1d06   :  { %v6737_v10 = vadd.f32 %v6735_v46, %v11315_v34  ;;  %v8108_v34 = vld [vmem:[#allocation22 + $0x8] sm:$0xff]  }
0x1d07   :  { %7911 = vmatpush3.bf16.msra.mxu1 %v8108_v34 }
0x1d08   :  { %v6739_v37 = vmul.f32 0.125, %v6737_v10  ;;  %7912 = vmatprep.subr.bf16.mxu1 %v12558_v45  ;;  %v7494_v45 = vld [vmem:[#allocation16] ss:$0 sm:$0xff] }
0x1d0a   :  { %v6741_v28 = vpack.c.bf16 %v6739_v37, %v6739_v37 }
0x1d0b   :  { %7913 = vmatpush3.bf16.msra.mxu1 %v8109_v53 }
0x1d0c   :  { %6909 = vmatprep.mubr.bf16.mxu0 %v6741_v28 }
0x1d0d   :  { %6910 = vmatmul.mubr.bf16.vlgmr.msra.gmra.mxu0 %v6740_v15 }
0x1dcd   :  { %v7639_v25 = vpop.f32.mrf.mxu0 }
0x1dcf   :  { %v7640_v31 = vpop.f32.mrf.mxu0 }
0x1dd0   :  { %v7641_v38 = vadd.f32 %v7640_v31, %v7639_v25 }
0x1dd1   :  { %v7642_v24 = vpop.f32.mrf.mxu0 }
0x1dd2   :  { %v6912_v54 = vadd.f32 %v7641_v38, %v7476_v0 }
0x1dd3   :  { %v7643_v2 = vpop.f32.mrf.mxu0 }
0x1dd4   :  { %v6924_v39 = vsub.f32 %v6912_v54, %v7493_v63 }
0x1dd6   :  { %v6934_v9 = vmul.f32 %v6932_v18, %v6924_v39 }
0x1dd8   :  { %v6942_v30 = vmul.f32 %v7494_v45, %v6934_v9 }
0x1dda   :  { %v6950_v48 = vadd.f32 %v7495_v44, %v6942_v30 }
0x1ddc   :  { %v6951_v19 = vmax.f32 %v6950_v48, 0.0 }
0x1dde   :  { %v6952_v7 = vpack.c.bf16 %v6951_v19, %v6951_v19 }
0x1de0   :  { %7915 = vmatmul.mubr.bf16.vlgmr.msra.gmra.mxu1 %v6952_v7 }
0x1ea0   :  { %v7058_v41 = vpop.f32.mrf.mxu1 }
0x1ea1   :  { %v7059_v26 = vadd.f32 %v7496_v35, %v7058_v41 }
0x1ea2   :  { %v7916_v21 = vpop.f32.mrf.mxu1 }
0x1ea3   :  { %7064 = vst [vmem:[%s8952_s25] sm:$0xff] %v7059_v26  ;;  %v7068_v47 = vsel %vm7067_vm6, %v7059_v26, -1e+30 }
0x1ea4   :  { %7069 = vmax.xlane.f32.xlu0 %v7068_v47  ;;  %v7061_v11 = vpop.f32.mrf.mxu1 }
0x1ea6   :  { %v7917_v57 = vpop.f32.mrf.mxu1 }
0x1f2d   :  { %v7070_v49 = vpop.xlane.xlu0 %7069 }
0x1f2e   :  { %v7071_v62 = vsub.f32 %v7068_v47, %v7070_v49 }
0x1f30   :  { %v7072_v43 = vmul.f32 1.442695, %v7071_v62 }
0x1f32   :  { %8472 = vpow2.f32 %v7072_v43 }
0x1f3f   :  { %v8473_v51 = vpop.eup %8472 }
0x1f40   :  { %7074 = vadd.xlane.f32.xlu1 %v8473_v51 }
0x1fc9   :  { %v7075_v52 = vpop.xlane.xlu1 %7074 }
0x1fca   :  { %8474 = vrcp.f32 %v7075_v52 }
0x1fd7   :  { %v8475_v4 = vpop.eup %8474 }
0x1fd8   :  { %v7077_v32 = vmul.f32 %v8475_v4, %v8473_v51 }
0x1fda   :  { %7078 = vst [vmem:[%s8957_s13] sm:$0xff] %v7077_v32 }
0x1fdb   :  { %7087 = vsyncpa [#allocation4], 1 }
0x1fdc   :  { %7088 = vsyncpa [#allocation6], 1 }
0x1fdd   :  { %7089 = vsyncpa [#allocation9], 1 }
0x1fde   :  { %7090 = vsyncpa [#allocation12], 1 }
0x1fdf   :  { %7091 = vsyncpa [#allocation15], 1 }
0x1fe0   :  { %7092 = vsyncpa [#allocation18], 1 }
0x1fe1   :  { %7093 = vsyncpa [#allocation21], 1 }

</bundles_post_ra>
